<compile_context>
chip_gen: v7x
topology: tpu7x:2x2x1
jax: 0.10.0
libtpu: 0.0.40
codegen_flags: <defaults>
</compile_context>

<pallas_src>
import functools

import jax
import jax.numpy as jnp
import numpy as np
from jax import lax
from jax.experimental import pallas as pl
from jax.experimental.pallas import tpu as pltpu

LN_EPS = 1e-5
_SQRT_2_OVER_PI = 0.7978845608028654


def _layer_norm(z, w, b):
    mu = jnp.mean(z, axis=-1, keepdims=True)
    var = jnp.mean(jnp.square(z - mu), axis=-1, keepdims=True)
    return (z - mu) * lax.rsqrt(var + LN_EPS) * w + b


def _gelu_tanh(x):
    # tanh-form GELU runs on the EUP (own bundle slot); |diff vs erf| <= ~2e-4.
    return 0.5 * x * (1.0 + jnp.tanh(_SQRT_2_OVER_PI * (x + 0.044715 * x * x * x)))


# ------------------------- fused transformer kernel -------------------------
def transformer_kernel(x_ref,
                       ln1w_ref, ln1b_ref, wqkv_ref, wo_ref, ob_ref,
                       ln2w_ref, ln2b_ref, w1_ref, b1_ref, w2_ref, b2_ref,
                       o_ref, act_ref, *, heads, dim_head, blk):
    f32, bf16 = jnp.float32, jnp.bfloat16
    layer = pl.program_id(1)
    _, n, dim = x_ref.shape
    m = blk * n
    inner = heads * dim_head

    # Layer 0: load the activation block into the VMEM-resident carry.
    @pl.when(layer == 0)
    def _():
        act_ref[...] = x_ref[...].reshape(m, dim)

    x = act_ref[...]                                      # (m, dim) f32

    # ---- PreNorm + multi-head attention + residual ----
    h1 = _layer_norm(x, ln1w_ref[0], ln1b_ref[0]).astype(bf16)
    # One lane-dense fused QKV matmul; 1/sqrt(dh) pre-folded into Q columns.
    qkv = jnp.dot(h1, wqkv_ref[0], preferred_element_type=f32).astype(bf16)

    attn_rows = []
    for b in range(blk):                                  # static, small
        r0 = b * n
        acc = jnp.zeros((n, dim), f32)                    # per-batch out-proj acc
        for h in range(heads):                            # static, small
            c0 = h * dim_head
            q_bh = qkv[r0:r0 + n, c0:c0 + dim_head]
            k_bh = qkv[r0:r0 + n, inner + c0:inner + c0 + dim_head]
            v_bh = qkv[r0:r0 + n, 2 * inner + c0:2 * inner + c0 + dim_head]
            # scores (n, n): lane-dense MXU output, contraction over dh.
            s = lax.dot_general(q_bh, k_bh, (((1,), (1,)), ((), ())),
                                preferred_element_type=f32)
            s = s - jnp.max(s, axis=-1, keepdims=True)
            e = jnp.exp(s)
            denom = jnp.sum(e, axis=-1, keepdims=True)
            # unnormalized PV, then normalize the (n, dh) context (not (n, n)).
            ctx = jnp.dot(e.astype(bf16), v_bh, preferred_element_type=f32)
            ctx = ctx * pl.reciprocal(denom, approx=True)
            # out-projection accumulated over heads on the MXU.
            acc = acc + jnp.dot(ctx.astype(bf16), wo_ref[0, h],
                                preferred_element_type=f32)
        attn_rows.append(acc)
    x = x + jnp.concatenate(attn_rows, axis=0) + ob_ref[0]

    # ---- PreNorm + FeedForward + residual ----
    h2 = _layer_norm(x, ln2w_ref[0], ln2b_ref[0]).astype(bf16)
    z = jnp.dot(h2, w1_ref[0], preferred_element_type=f32) + b1_ref[0]
    z = _gelu_tanh(z).astype(bf16)
    z = jnp.dot(z, w2_ref[0], preferred_element_type=f32) + b2_ref[0]
    x = x + z

    act_ref[...] = x                                      # carry to next layer

    @pl.when(layer == pl.num_programs(1) - 1)
    def _():
        o_ref[...] = x.reshape(blk, n, dim).astype(o_ref.dtype)


_KERNEL_WEIGHT_NAMES = ("ln1_w", "ln1_b", "wqkv", "wo", "out_b",
                        "ln2_w", "ln2_b", "ff1_w", "ff1_b", "ff2_w", "ff2_b")


def _layer_spec(arr):
    """Full-array block along all but the leading (depth) axis; indexed by layer."""
    nd = arr.ndim
    return pl.BlockSpec((1,) + arr.shape[1:],
                        lambda bi, l: (l,) + (0,) * (nd - 1))


def transformer_forward_pallas(x, stacked, *, heads, dim_head):
    b, n, dim = x.shape
    depth = stacked["wqkv"].shape[0]
    nb = 2 if (b % 2 == 0 and b >= 2) else 1   # keep grid even for megacore
    blk = b // nb

    weights = [stacked[name] for name in _KERNEL_WEIGHT_NAMES]
    in_specs = [pl.BlockSpec((blk, n, dim), lambda bi, l: (bi, 0, 0))]
    in_specs += [_layer_spec(w) for w in weights]

    kernel = functools.partial(transformer_kernel, heads=heads,
                               dim_head=dim_head, blk=blk)
    return pl.pallas_call(
        kernel,
        out_shape=jax.ShapeDtypeStruct((b, n, dim), x.dtype),
        grid_spec=pltpu.PrefetchScalarGridSpec(
            num_scalar_prefetch=0,
            grid=(nb, depth),                   # batch outer, layers inner
            in_specs=in_specs,
            out_specs=pl.BlockSpec((blk, n, dim), lambda bi, l: (bi, 0, 0)),
            scratch_shapes=[pltpu.VMEM((blk * n, dim), jnp.float32)],
        ),
        compiler_params=pltpu.CompilerParams(
            dimension_semantics=("parallel", "arbitrary"),
            # Plenty at this size; raise toward 64-96 MiB on v5e/v6e (<=48 on
            # v7x) for real ViT shapes.
            vmem_limit_bytes=32 * 1024 * 1024),
    )(x, *weights)


@functools.partial(jax.jit, static_argnames=("heads", "dim_head"))
def transformer_forward(x, stacked, *, heads, dim_head):
    return transformer_forward_pallas(x, stacked, heads=heads, dim_head=dim_head)


# --------------------- parameters (PyTorch layout, f32) ---------------------
def init_params(key, depth, dim, heads, dim_head, mlp_dim):
    inner = heads * dim_head
    project_out = not (heads == 1 and dim_head == dim)
    params = []
    for _ in range(depth):
        keys = jax.random.split(key, 8)
        key = keys[-1]

        def lin(k, fan_in, fan_out):
            return (jax.random.normal(k, (fan_in, fan_out), jnp.float32)
                    / np.sqrt(fan_in))

        if project_out:
            out_w = lin(keys[1], inner, dim)
            out_b = jax.random.normal(keys[2], (1, dim), jnp.float32) * 0.02
        else:                                    # nn.Identity()
            out_w = jnp.eye(inner, dim, dtype=jnp.float32)
            out_b = jnp.zeros((1, dim), jnp.float32)

        params.append(dict(
            ln1_w=jnp.ones((1, dim), jnp.float32),
            ln1_b=jnp.zeros((1, dim), jnp.float32),
            qkv_w=lin(keys[0], dim, inner * 3),          # Linear, bias=False
            out_w=out_w, out_b=out_b,
            ln2_w=jnp.ones((1, dim), jnp.float32),
            ln2_b=jnp.zeros((1, dim), jnp.float32),
            ff1_w=lin(keys[3], dim, mlp_dim),
            ff1_b=jax.random.normal(keys[4], (1, mlp_dim), jnp.float32) * 0.02,
            ff2_w=lin(keys[5], mlp_dim, dim),
            ff2_b=jax.random.normal(keys[6], (1, dim), jnp.float32) * 0.02,
        ))
    return params


def prep_kernel_params(params, *, heads, dim_head):
    """PyTorch-layout f32 params -> depth-stacked kernel layout: fused bf16
    Wqkv (scale folded into the Q columns), head-major bf16 out-proj weight,
    bf16 FF weights, f32 LayerNorm params / biases."""
    bf16 = jnp.bfloat16
    scale = dim_head ** -0.5
    inner = heads * dim_head
    per_layer = []
    for p in params:
        dim = p["ln1_w"].shape[-1]
        qkv = p["qkv_w"]                                   # (dim, 3*inner)
        wqkv = jnp.concatenate([qkv[:, :inner] * scale, qkv[:, inner:]],
                               axis=1).astype(bf16)
        per_layer.append(dict(
            ln1_w=p["ln1_w"], ln1_b=p["ln1_b"],
            wqkv=wqkv,
            wo=p["out_w"].reshape(heads, dim_head, dim).astype(bf16),
            out_b=p["out_b"],
            ln2_w=p["ln2_w"], ln2_b=p["ln2_b"],
            ff1_w=p["ff1_w"].astype(bf16), ff1_b=p["ff1_b"],
            ff2_w=p["ff2_w"].astype(bf16), ff2_b=p["ff2_b"],
        ))
    return {k: jnp.stack([layer[k] for layer in per_layer], axis=0)
            for k in per_layer[0]}


# ------------------ pure-JAX f32 reference (PyTorch forward) ----------------
def reference_forward(x, params, *, heads, dim_head):
    scale = dim_head ** -0.5
    inner = heads * dim_head
    for p in params:
        h1 = _layer_norm(x, p["ln1_w"][0], p["ln1_b"][0])
        qkv = h1 @ p["qkv_w"]
        q, k, v = jnp.split(qkv, 3, axis=-1)

        def to_heads(t):
            b, n, _ = t.shape
            return t.reshape(b, n, heads, dim_head).transpose(0, 2, 1, 3)

        q, k, v = map(to_heads, (q, k, v))
        dots = jnp.einsum("bhid,bhjd->bhij", q, k) * scale
        attn = jax.nn.softmax(dots, axis=-1)
        out = jnp.einsum("bhij,bhjd->bhid", attn, v)
        b, _, n, _ = out.shape
        out = out.transpose(0, 2, 1, 3).reshape(b, n, inner)
        x = out @ p["out_w"] + p["out_b"][0] + x

        h2 = _layer_norm(x, p["ln2_w"][0], p["ln2_b"][0])
        z = jax.nn.gelu(h2 @ p["ff1_w"] + p["ff1_b"][0], approximate=False)
        x = z @ p["ff2_w"] + p["ff2_b"][0] + x
    return x


if __name__ == "__main__":
    # Small but TPU-tile-aligned config: seq=128, dim=128 keep every block's
    # last two dims (8,128)-aligned and all matmul outputs lane-dense.
    B, N, DIM = 4, 128, 128
    DEPTH, HEADS, DIM_HEAD, MLP_DIM = 2, 4, 32, 256

    key = jax.random.PRNGKey(0)
    kx, kp = jax.random.split(key)
    x = jax.random.normal(kx, (B, N, DIM), jnp.float32)
    params = init_params(kp, DEPTH, DIM, HEADS, DIM_HEAD, MLP_DIM)
    kparams = prep_kernel_params(params, heads=HEADS, dim_head=DIM_HEAD)

    out = transformer_forward(x, kparams, heads=HEADS, dim_head=DIM_HEAD)
    out = jax.block_until_ready(out)

    ref = reference_forward(x, params, heads=HEADS, dim_head=DIM_HEAD)
    # Tolerance covers bf16 MXU inputs (f32 accumulation), the approx
    # reciprocal in softmax, and the tanh-form GELU vs. the exact-erf f32 ref.
    np.testing.assert_allclose(np.asarray(out), np.asarray(ref),
                               rtol=5e-2, atol=5e-2)
    print("KERNEL_OK")
</pallas_src>

<mosaic_0001>
module attributes {stable_mosaic.version = 11 : i64} {
  func.func @transformer_kernel(%arg0: i32, %arg1: i32, %arg2: memref<2x128x128xf32, #tpu.memory_space<vmem>>, %arg3: memref<1x1x128xf32, #tpu.memory_space<vmem>>, %arg4: memref<1x1x128xf32, #tpu.memory_space<vmem>>, %arg5: memref<1x128x384xbf16, #tpu.memory_space<vmem>>, %arg6: memref<1x4x32x128xbf16, #tpu.memory_space<vmem>>, %arg7: memref<1x1x128xf32, #tpu.memory_space<vmem>>, %arg8: memref<1x1x128xf32, #tpu.memory_space<vmem>>, %arg9: memref<1x1x128xf32, #tpu.memory_space<vmem>>, %arg10: memref<1x128x256xbf16, #tpu.memory_space<vmem>>, %arg11: memref<1x1x256xf32, #tpu.memory_space<vmem>>, %arg12: memref<1x256x128xbf16, #tpu.memory_space<vmem>>, %arg13: memref<1x1x128xf32, #tpu.memory_space<vmem>>, %arg14: memref<2x128x128xf32, #tpu.memory_space<vmem>>, %arg15: memref<256x128xf32, #tpu.memory_space<vmem>>) attributes {dimension_semantics = [#tpu.dimension_semantics<parallel>, #tpu.dimension_semantics<arbitrary>], iteration_bounds = array<i64: 2, 2>, scalar_prefetch = 0 : i64, scratch_operands = 1 : i64, tpu.core_type = #tpu.core_type<tc>, window_params = [{transform_indices = @transform_0, window_bounds = array<i64: 2, 128, 128>}, {transform_indices = @transform_1, window_bounds = array<i64: 1, 1, 128>}, {transform_indices = @transform_2, window_bounds = array<i64: 1, 1, 128>}, {transform_indices = @transform_3, window_bounds = array<i64: 1, 128, 384>}, {transform_indices = @transform_4, window_bounds = array<i64: 1, 4, 32, 128>}, {transform_indices = @transform_5, window_bounds = array<i64: 1, 1, 128>}, {transform_indices = @transform_6, window_bounds = array<i64: 1, 1, 128>}, {transform_indices = @transform_7, window_bounds = array<i64: 1, 1, 128>}, {transform_indices = @transform_8, window_bounds = array<i64: 1, 128, 256>}, {transform_indices = @transform_9, window_bounds = array<i64: 1, 1, 256>}, {transform_indices = @transform_10, window_bounds = array<i64: 1, 256, 128>}, {transform_indices = @transform_11, window_bounds = array<i64: 1, 1, 128>}, {transform_indices = @transform_12, window_bounds = array<i64: 2, 128, 128>}]} {
    %c0_i32 = arith.constant 0 : i32
    %0 = arith.cmpi eq, %arg1, %c0_i32 : i32
    %1 = arith.extui %0 : i1 to i32
    %c0_i32_0 = arith.constant 0 : i32
    %2 = arith.cmpi ne, %1, %c0_i32_0 : i32
    scf.if %2 {
      %c0_122 = arith.constant 0 : index
      %c0_123 = arith.constant 0 : index
      %c0_124 = arith.constant 0 : index
      %271 = vector.load %arg2[%c0_122, %c0_123, %c0_124] : memref<2x128x128xf32, #tpu.memory_space<vmem>>, vector<2x128x128xf32>
      %272 = vector.shape_cast %271 : vector<2x128x128xf32> to vector<256x128xf32>
      %c0_125 = arith.constant 0 : index
      %c0_126 = arith.constant 0 : index
      %273 = vector.load %arg15[%c0_125, %c0_126] : memref<256x128xf32, #tpu.memory_space<vmem>>, vector<256x128xf32>
      tpu.vector_store %arg15[%c0_125, %c0_126], %272 {strides = array<i32>} : memref<256x128xf32, #tpu.memory_space<vmem>>, vector<256x128xf32>,
    } else {
    }
    %c0 = arith.constant 0 : index
    %c0_1 = arith.constant 0 : index
    %3 = vector.load %arg15[%c0, %c0_1] : memref<256x128xf32, #tpu.memory_space<vmem>>, vector<256x128xf32>
    %c0_2 = arith.constant 0 : index
    %c0_3 = arith.constant 0 : index
    %c0_4 = arith.constant 0 : index
    %4 = vector.load %arg3[%c0_2, %c0_3, %c0_4] : memref<1x1x128xf32, #tpu.memory_space<vmem>>, vector<1x1x128xf32>
    %5 = vector.shape_cast %4 : vector<1x1x128xf32> to vector<1x128xf32>
    %c0_5 = arith.constant 0 : index
    %c0_6 = arith.constant 0 : index
    %c0_7 = arith.constant 0 : index
    %6 = vector.load %arg4[%c0_5, %c0_6, %c0_7] : memref<1x1x128xf32, #tpu.memory_space<vmem>>, vector<1x1x128xf32>
    %7 = vector.shape_cast %6 : vector<1x1x128xf32> to vector<1x128xf32>
    %cst = arith.constant dense<0.000000e+00> : vector<256xf32>
    %8 = vector.multi_reduction <add>, %3, %cst [1] : vector<256x128xf32> to vector<256xf32>
    %9 = vector.shape_cast %8 : vector<256xf32> to vector<256x1xf32>
    %cst_8 = arith.constant 1.280000e+02 : f32
    %10 = vector.broadcast %cst_8 : f32 to vector<256x1xf32>
    %11 = arith.divf %9, %10 : vector<256x1xf32>
    %12 = vector.broadcast %11 : vector<256x1xf32> to vector<256x128xf32>
    %13 = arith.subf %3, %12 : vector<256x128xf32>
    %14 = arith.mulf %13, %13 : vector<256x128xf32>
    %cst_9 = arith.constant dense<0.000000e+00> : vector<256xf32>
    %15 = vector.multi_reduction <add>, %14, %cst_9 [1] : vector<256x128xf32> to vector<256xf32>
    %16 = vector.shape_cast %15 : vector<256xf32> to vector<256x1xf32>
    %cst_10 = arith.constant 1.280000e+02 : f32
    %17 = vector.broadcast %cst_10 : f32 to vector<256x1xf32>
    %18 = arith.divf %16, %17 : vector<256x1xf32>
    %19 = vector.broadcast %11 : vector<256x1xf32> to vector<256x128xf32>
    %20 = arith.subf %3, %19 : vector<256x128xf32>
    %cst_11 = arith.constant 9.99999974E-6 : f32
    %21 = vector.broadcast %cst_11 : f32 to vector<256x1xf32>
    %22 = arith.addf %18, %21 : vector<256x1xf32>
    %23 = math.rsqrt %22 : vector<256x1xf32>
    %24 = vector.broadcast %23 : vector<256x1xf32> to vector<256x128xf32>
    %25 = arith.mulf %20, %24 : vector<256x128xf32>
    %26 = vector.broadcast %5 : vector<1x128xf32> to vector<256x128xf32>
    %27 = arith.mulf %25, %26 : vector<256x128xf32>
    %28 = vector.broadcast %7 : vector<1x128xf32> to vector<256x128xf32>
    %29 = arith.addf %27, %28 : vector<256x128xf32>
    %30 = arith.truncf %29 : vector<256x128xf32> to vector<256x128xbf16>
    %c0_12 = arith.constant 0 : index
    %c0_13 = arith.constant 0 : index
    %c0_14 = arith.constant 0 : index
    %31 = vector.load %arg5[%c0_12, %c0_13, %c0_14] : memref<1x128x384xbf16, #tpu.memory_space<vmem>>, vector<1x128x384xbf16>
    %32 = vector.shape_cast %31 : vector<1x128x384xbf16> to vector<128x384xbf16>
    %cst_15 = arith.constant dense<0.000000e+00> : vector<256x384xf32>
    %33 = tpu.matmul %30, %32, %cst_15 {dimension_numbers = #tpu.dot_dimension_numbers<[1], [0], [0], [1], [0, 0, 1, 1], [], []>} : vector<256x128xbf16>, vector<128x384xbf16>, vector<256x384xf32> -> vector<256x384xf32>
    %34 = arith.truncf %33 : vector<256x384xf32> to vector<256x384xbf16>
    %cst_16 = arith.constant 0.000000e+00 : f32
    %35 = vector.broadcast %cst_16 : f32 to vector<128x128xf32>
    %36 = vector.extract_strided_slice %34 {offsets = [0, 0], sizes = [128, 32], strides = [1, 1]} : vector<256x384xbf16> to vector<128x32xbf16>
    %37 = vector.extract_strided_slice %34 {offsets = [0, 128], sizes = [128, 32], strides = [1, 1]} : vector<256x384xbf16> to vector<128x32xbf16>
    %38 = vector.extract_strided_slice %34 {offsets = [0, 256], sizes = [128, 32], strides = [1, 1]} : vector<256x384xbf16> to vector<128x32xbf16>
    %cst_17 = arith.constant dense<0.000000e+00> : vector<128x128xf32>
    %39 = tpu.matmul %36, %37, %cst_17 {dimension_numbers = #tpu.dot_dimension_numbers<[1], [1], [0], [0], [0, 0, 1, 0], [], []>} : vector<128x32xbf16>, vector<128x32xbf16>, vector<128x128xf32> -> vector<128x128xf32>
    %cst_18 = arith.constant dense<0xFF800000> : vector<128xf32>
    %40 = vector.multi_reduction <maximumf>, %39, %cst_18 [1] : vector<128x128xf32> to vector<128xf32>
    %41 = vector.shape_cast %40 : vector<128xf32> to vector<128x1xf32>
    %42 = vector.broadcast %41 : vector<128x1xf32> to vector<128x128xf32>
    %43 = arith.subf %39, %42 : vector<128x128xf32>
    %44 = math.exp %43 : vector<128x128xf32>
    %cst_19 = arith.constant dense<0.000000e+00> : vector<128xf32>
    %45 = vector.multi_reduction <add>, %44, %cst_19 [1] : vector<128x128xf32> to vector<128xf32>
    %46 = vector.shape_cast %45 : vector<128xf32> to vector<128x1xf32>
    %47 = arith.truncf %44 : vector<128x128xf32> to vector<128x128xbf16>
    %cst_20 = arith.constant dense<0.000000e+00> : vector<128x32xf32>
    %48 = tpu.matmul %47, %38, %cst_20 {dimension_numbers = #tpu.dot_dimension_numbers<[1], [0], [0], [1], [0, 0, 1, 1], [], []>} : vector<128x128xbf16>, vector<128x32xbf16>, vector<128x32xf32> -> vector<128x32xf32>
    %49 = tpu.reciprocal %46 {approx = true} : vector<128x1xf32> -> vector<128x1xf32>
    %50 = vector.broadcast %49 : vector<128x1xf32> to vector<128x32xf32>
    %51 = arith.mulf %48, %50 : vector<128x32xf32>
    %52 = arith.truncf %51 : vector<128x32xf32> to vector<128x32xbf16>
    %c0_21 = arith.constant 0 : index
    %c0_22 = arith.constant 0 : index
    %c0_23 = arith.constant 0 : index
    %c0_24 = arith.constant 0 : index
    %53 = vector.load %arg6[%c0_21, %c0_22, %c0_23, %c0_24] : memref<1x4x32x128xbf16, #tpu.memory_space<vmem>>, vector<1x1x32x128xbf16>
    %54 = vector.shape_cast %53 : vector<1x1x32x128xbf16> to vector<32x128xbf16>
    %cst_25 = arith.constant dense<0.000000e+00> : vector<128x128xf32>
    %55 = tpu.matmul %52, %54, %cst_25 {dimension_numbers = #tpu.dot_dimension_numbers<[1], [0], [0], [1], [0, 0, 1, 1], [], []>} : vector<128x32xbf16>, vector<32x128xbf16>, vector<128x128xf32> -> vector<128x128xf32>
    %56 = arith.addf %35, %55 : vector<128x128xf32>
    %57 = vector.extract_strided_slice %34 {offsets = [0, 32], sizes = [128, 32], strides = [1, 1]} : vector<256x384xbf16> to vector<128x32xbf16>
    %58 = vector.extract_strided_slice %34 {offsets = [0, 160], sizes = [128, 32], strides = [1, 1]} : vector<256x384xbf16> to vector<128x32xbf16>
    %59 = vector.extract_strided_slice %34 {offsets = [0, 288], sizes = [128, 32], strides = [1, 1]} : vector<256x384xbf16> to vector<128x32xbf16>
    %cst_26 = arith.constant dense<0.000000e+00> : vector<128x128xf32>
    %60 = tpu.matmul %57, %58, %cst_26 {dimension_numbers = #tpu.dot_dimension_numbers<[1], [1], [0], [0], [0, 0, 1, 0], [], []>} : vector<128x32xbf16>, vector<128x32xbf16>, vector<128x128xf32> -> vector<128x128xf32>
    %cst_27 = arith.constant dense<0xFF800000> : vector<128xf32>
    %61 = vector.multi_reduction <maximumf>, %60, %cst_27 [1] : vector<128x128xf32> to vector<128xf32>
    %62 = vector.shape_cast %61 : vector<128xf32> to vector<128x1xf32>
    %63 = vector.broadcast %62 : vector<128x1xf32> to vector<128x128xf32>
    %64 = arith.subf %60, %63 : vector<128x128xf32>
    %65 = math.exp %64 : vector<128x128xf32>
    %cst_28 = arith.constant dense<0.000000e+00> : vector<128xf32>
    %66 = vector.multi_reduction <add>, %65, %cst_28 [1] : vector<128x128xf32> to vector<128xf32>
    %67 = vector.shape_cast %66 : vector<128xf32> to vector<128x1xf32>
    %68 = arith.truncf %65 : vector<128x128xf32> to vector<128x128xbf16>
    %cst_29 = arith.constant dense<0.000000e+00> : vector<128x32xf32>
    %69 = tpu.matmul %68, %59, %cst_29 {dimension_numbers = #tpu.dot_dimension_numbers<[1], [0], [0], [1], [0, 0, 1, 1], [], []>} : vector<128x128xbf16>, vector<128x32xbf16>, vector<128x32xf32> -> vector<128x32xf32>
    %70 = tpu.reciprocal %67 {approx = true} : vector<128x1xf32> -> vector<128x1xf32>
    %71 = vector.broadcast %70 : vector<128x1xf32> to vector<128x32xf32>
    %72 = arith.mulf %69, %71 : vector<128x32xf32>
    %73 = arith.truncf %72 : vector<128x32xf32> to vector<128x32xbf16>
    %c0_30 = arith.constant 0 : index
    %c1 = arith.constant 1 : index
    %c0_31 = arith.constant 0 : index
    %c0_32 = arith.constant 0 : index
    %74 = vector.load %arg6[%c0_30, %c1, %c0_31, %c0_32] : memref<1x4x32x128xbf16, #tpu.memory_space<vmem>>, vector<1x1x32x128xbf16>
    %75 = vector.shape_cast %74 : vector<1x1x32x128xbf16> to vector<32x128xbf16>
    %cst_33 = arith.constant dense<0.000000e+00> : vector<128x128xf32>
    %76 = tpu.matmul %73, %75, %cst_33 {dimension_numbers = #tpu.dot_dimension_numbers<[1], [0], [0], [1], [0, 0, 1, 1], [], []>} : vector<128x32xbf16>, vector<32x128xbf16>, vector<128x128xf32> -> vector<128x128xf32>
    %77 = arith.addf %56, %76 : vector<128x128xf32>
    %78 = vector.extract_strided_slice %34 {offsets = [0, 64], sizes = [128, 32], strides = [1, 1]} : vector<256x384xbf16> to vector<128x32xbf16>
    %79 = vector.extract_strided_slice %34 {offsets = [0, 192], sizes = [128, 32], strides = [1, 1]} : vector<256x384xbf16> to vector<128x32xbf16>
    %80 = vector.extract_strided_slice %34 {offsets = [0, 320], sizes = [128, 32], strides = [1, 1]} : vector<256x384xbf16> to vector<128x32xbf16>
    %cst_34 = arith.constant dense<0.000000e+00> : vector<128x128xf32>
    %81 = tpu.matmul %78, %79, %cst_34 {dimension_numbers = #tpu.dot_dimension_numbers<[1], [1], [0], [0], [0, 0, 1, 0], [], []>} : vector<128x32xbf16>, vector<128x32xbf16>, vector<128x128xf32> -> vector<128x128xf32>
    %cst_35 = arith.constant dense<0xFF800000> : vector<128xf32>
    %82 = vector.multi_reduction <maximumf>, %81, %cst_35 [1] : vector<128x128xf32> to vector<128xf32>
    %83 = vector.shape_cast %82 : vector<128xf32> to vector<128x1xf32>
    %84 = vector.broadcast %83 : vector<128x1xf32> to vector<128x128xf32>
    %85 = arith.subf %81, %84 : vector<128x128xf32>
    %86 = math.exp %85 : vector<128x128xf32>
    %cst_36 = arith.constant dense<0.000000e+00> : vector<128xf32>
    %87 = vector.multi_reduction <add>, %86, %cst_36 [1] : vector<128x128xf32> to vector<128xf32>
    %88 = vector.shape_cast %87 : vector<128xf32> to vector<128x1xf32>
    %89 = arith.truncf %86 : vector<128x128xf32> to vector<128x128xbf16>
    %cst_37 = arith.constant dense<0.000000e+00> : vector<128x32xf32>
    %90 = tpu.matmul %89, %80, %cst_37 {dimension_numbers = #tpu.dot_dimension_numbers<[1], [0], [0], [1], [0, 0, 1, 1], [], []>} : vector<128x128xbf16>, vector<128x32xbf16>, vector<128x32xf32> -> vector<128x32xf32>
    %91 = tpu.reciprocal %88 {approx = true} : vector<128x1xf32> -> vector<128x1xf32>
    %92 = vector.broadcast %91 : vector<128x1xf32> to vector<128x32xf32>
    %93 = arith.mulf %90, %92 : vector<128x32xf32>
    %94 = arith.truncf %93 : vector<128x32xf32> to vector<128x32xbf16>
    %c0_38 = arith.constant 0 : index
    %c2 = arith.constant 2 : index
    %c0_39 = arith.constant 0 : index
    %c0_40 = arith.constant 0 : index
    %95 = vector.load %arg6[%c0_38, %c2, %c0_39, %c0_40] : memref<1x4x32x128xbf16, #tpu.memory_space<vmem>>, vector<1x1x32x128xbf16>
    %96 = vector.shape_cast %95 : vector<1x1x32x128xbf16> to vector<32x128xbf16>
    %cst_41 = arith.constant dense<0.000000e+00> : vector<128x128xf32>
    %97 = tpu.matmul %94, %96, %cst_41 {dimension_numbers = #tpu.dot_dimension_numbers<[1], [0], [0], [1], [0, 0, 1, 1], [], []>} : vector<128x32xbf16>, vector<32x128xbf16>, vector<128x128xf32> -> vector<128x128xf32>
    %98 = arith.addf %77, %97 : vector<128x128xf32>
    %99 = vector.extract_strided_slice %34 {offsets = [0, 96], sizes = [128, 32], strides = [1, 1]} : vector<256x384xbf16> to vector<128x32xbf16>
    %100 = vector.extract_strided_slice %34 {offsets = [0, 224], sizes = [128, 32], strides = [1, 1]} : vector<256x384xbf16> to vector<128x32xbf16>
    %101 = vector.extract_strided_slice %34 {offsets = [0, 352], sizes = [128, 32], strides = [1, 1]} : vector<256x384xbf16> to vector<128x32xbf16>
    %cst_42 = arith.constant dense<0.000000e+00> : vector<128x128xf32>
    %102 = tpu.matmul %99, %100, %cst_42 {dimension_numbers = #tpu.dot_dimension_numbers<[1], [1], [0], [0], [0, 0, 1, 0], [], []>} : vector<128x32xbf16>, vector<128x32xbf16>, vector<128x128xf32> -> vector<128x128xf32>
    %cst_43 = arith.constant dense<0xFF800000> : vector<128xf32>
    %103 = vector.multi_reduction <maximumf>, %102, %cst_43 [1] : vector<128x128xf32> to vector<128xf32>
    %104 = vector.shape_cast %103 : vector<128xf32> to vector<128x1xf32>
    %105 = vector.broadcast %104 : vector<128x1xf32> to vector<128x128xf32>
    %106 = arith.subf %102, %105 : vector<128x128xf32>
    %107 = math.exp %106 : vector<128x128xf32>
    %cst_44 = arith.constant dense<0.000000e+00> : vector<128xf32>
    %108 = vector.multi_reduction <add>, %107, %cst_44 [1] : vector<128x128xf32> to vector<128xf32>
    %109 = vector.shape_cast %108 : vector<128xf32> to vector<128x1xf32>
    %110 = arith.truncf %107 : vector<128x128xf32> to vector<128x128xbf16>
    %cst_45 = arith.constant dense<0.000000e+00> : vector<128x32xf32>
    %111 = tpu.matmul %110, %101, %cst_45 {dimension_numbers = #tpu.dot_dimension_numbers<[1], [0], [0], [1], [0, 0, 1, 1], [], []>} : vector<128x128xbf16>, vector<128x32xbf16>, vector<128x32xf32> -> vector<128x32xf32>
    %112 = tpu.reciprocal %109 {approx = true} : vector<128x1xf32> -> vector<128x1xf32>
    %113 = vector.broadcast %112 : vector<128x1xf32> to vector<128x32xf32>
    %114 = arith.mulf %111, %113 : vector<128x32xf32>
    %115 = arith.truncf %114 : vector<128x32xf32> to vector<128x32xbf16>
    %c0_46 = arith.constant 0 : index
    %c3 = arith.constant 3 : index
    %c0_47 = arith.constant 0 : index
    %c0_48 = arith.constant 0 : index
    %116 = vector.load %arg6[%c0_46, %c3, %c0_47, %c0_48] : memref<1x4x32x128xbf16, #tpu.memory_space<vmem>>, vector<1x1x32x128xbf16>
    %117 = vector.shape_cast %116 : vector<1x1x32x128xbf16> to vector<32x128xbf16>
    %cst_49 = arith.constant dense<0.000000e+00> : vector<128x128xf32>
    %118 = tpu.matmul %115, %117, %cst_49 {dimension_numbers = #tpu.dot_dimension_numbers<[1], [0], [0], [1], [0, 0, 1, 1], [], []>} : vector<128x32xbf16>, vector<32x128xbf16>, vector<128x128xf32> -> vector<128x128xf32>
    %119 = arith.addf %98, %118 : vector<128x128xf32>
    %cst_50 = arith.constant 0.000000e+00 : f32
    %120 = vector.broadcast %cst_50 : f32 to vector<128x128xf32>
    %121 = vector.extract_strided_slice %34 {offsets = [128, 0], sizes = [128, 32], strides = [1, 1]} : vector<256x384xbf16> to vector<128x32xbf16>
    %122 = vector.extract_strided_slice %34 {offsets = [128, 128], sizes = [128, 32], strides = [1, 1]} : vector<256x384xbf16> to vector<128x32xbf16>
    %123 = vector.extract_strided_slice %34 {offsets = [128, 256], sizes = [128, 32], strides = [1, 1]} : vector<256x384xbf16> to vector<128x32xbf16>
    %cst_51 = arith.constant dense<0.000000e+00> : vector<128x128xf32>
    %124 = tpu.matmul %121, %122, %cst_51 {dimension_numbers = #tpu.dot_dimension_numbers<[1], [1], [0], [0], [0, 0, 1, 0], [], []>} : vector<128x32xbf16>, vector<128x32xbf16>, vector<128x128xf32> -> vector<128x128xf32>
    %cst_52 = arith.constant dense<0xFF800000> : vector<128xf32>
    %125 = vector.multi_reduction <maximumf>, %124, %cst_52 [1] : vector<128x128xf32> to vector<128xf32>
    %126 = vector.shape_cast %125 : vector<128xf32> to vector<128x1xf32>
    %127 = vector.broadcast %126 : vector<128x1xf32> to vector<128x128xf32>
    %128 = arith.subf %124, %127 : vector<128x128xf32>
    %129 = math.exp %128 : vector<128x128xf32>
    %cst_53 = arith.constant dense<0.000000e+00> : vector<128xf32>
    %130 = vector.multi_reduction <add>, %129, %cst_53 [1] : vector<128x128xf32> to vector<128xf32>
    %131 = vector.shape_cast %130 : vector<128xf32> to vector<128x1xf32>
    %132 = arith.truncf %129 : vector<128x128xf32> to vector<128x128xbf16>
    %cst_54 = arith.constant dense<0.000000e+00> : vector<128x32xf32>
    %133 = tpu.matmul %132, %123, %cst_54 {dimension_numbers = #tpu.dot_dimension_numbers<[1], [0], [0], [1], [0, 0, 1, 1], [], []>} : vector<128x128xbf16>, vector<128x32xbf16>, vector<128x32xf32> -> vector<128x32xf32>
    %134 = tpu.reciprocal %131 {approx = true} : vector<128x1xf32> -> vector<128x1xf32>
    %135 = vector.broadcast %134 : vector<128x1xf32> to vector<128x32xf32>
    %136 = arith.mulf %133, %135 : vector<128x32xf32>
    %137 = arith.truncf %136 : vector<128x32xf32> to vector<128x32xbf16>
    %c0_55 = arith.constant 0 : index
    %c0_56 = arith.constant 0 : index
    %c0_57 = arith.constant 0 : index
    %c0_58 = arith.constant 0 : index
    %138 = vector.load %arg6[%c0_55, %c0_56, %c0_57, %c0_58] : memref<1x4x32x128xbf16, #tpu.memory_space<vmem>>, vector<1x1x32x128xbf16>
    %139 = vector.shape_cast %138 : vector<1x1x32x128xbf16> to vector<32x128xbf16>
    %cst_59 = arith.constant dense<0.000000e+00> : vector<128x128xf32>
    %140 = tpu.matmul %137, %139, %cst_59 {dimension_numbers = #tpu.dot_dimension_numbers<[1], [0], [0], [1], [0, 0, 1, 1], [], []>} : vector<128x32xbf16>, vector<32x128xbf16>, vector<128x128xf32> -> vector<128x128xf32>
    %141 = arith.addf %120, %140 : vector<128x128xf32>
    %142 = vector.extract_strided_slice %34 {offsets = [128, 32], sizes = [128, 32], strides = [1, 1]} : vector<256x384xbf16> to vector<128x32xbf16>
    %143 = vector.extract_strided_slice %34 {offsets = [128, 160], sizes = [128, 32], strides = [1, 1]} : vector<256x384xbf16> to vector<128x32xbf16>
    %144 = vector.extract_strided_slice %34 {offsets = [128, 288], sizes = [128, 32], strides = [1, 1]} : vector<256x384xbf16> to vector<128x32xbf16>
    %cst_60 = arith.constant dense<0.000000e+00> : vector<128x128xf32>
    %145 = tpu.matmul %142, %143, %cst_60 {dimension_numbers = #tpu.dot_dimension_numbers<[1], [1], [0], [0], [0, 0, 1, 0], [], []>} : vector<128x32xbf16>, vector<128x32xbf16>, vector<128x128xf32> -> vector<128x128xf32>
    %cst_61 = arith.constant dense<0xFF800000> : vector<128xf32>
    %146 = vector.multi_reduction <maximumf>, %145, %cst_61 [1] : vector<128x128xf32> to vector<128xf32>
    %147 = vector.shape_cast %146 : vector<128xf32> to vector<128x1xf32>
    %148 = vector.broadcast %147 : vector<128x1xf32> to vector<128x128xf32>
    %149 = arith.subf %145, %148 : vector<128x128xf32>
    %150 = math.exp %149 : vector<128x128xf32>
    %cst_62 = arith.constant dense<0.000000e+00> : vector<128xf32>
    %151 = vector.multi_reduction <add>, %150, %cst_62 [1] : vector<128x128xf32> to vector<128xf32>
    %152 = vector.shape_cast %151 : vector<128xf32> to vector<128x1xf32>
    %153 = arith.truncf %150 : vector<128x128xf32> to vector<128x128xbf16>
    %cst_63 = arith.constant dense<0.000000e+00> : vector<128x32xf32>
    %154 = tpu.matmul %153, %144, %cst_63 {dimension_numbers = #tpu.dot_dimension_numbers<[1], [0], [0], [1], [0, 0, 1, 1], [], []>} : vector<128x128xbf16>, vector<128x32xbf16>, vector<128x32xf32> -> vector<128x32xf32>
    %155 = tpu.reciprocal %152 {approx = true} : vector<128x1xf32> -> vector<128x1xf32>
    %156 = vector.broadcast %155 : vector<128x1xf32> to vector<128x32xf32>
    %157 = arith.mulf %154, %156 : vector<128x32xf32>
    %158 = arith.truncf %157 : vector<128x32xf32> to vector<128x32xbf16>
    %c0_64 = arith.constant 0 : index
    %c1_65 = arith.constant 1 : index
    %c0_66 = arith.constant 0 : index
    %c0_67 = arith.constant 0 : index
    %159 = vector.load %arg6[%c0_64, %c1_65, %c0_66, %c0_67] : memref<1x4x32x128xbf16, #tpu.memory_space<vmem>>, vector<1x1x32x128xbf16>
    %160 = vector.shape_cast %159 : vector<1x1x32x128xbf16> to vector<32x128xbf16>
    %cst_68 = arith.constant dense<0.000000e+00> : vector<128x128xf32>
    %161 = tpu.matmul %158, %160, %cst_68 {dimension_numbers = #tpu.dot_dimension_numbers<[1], [0], [0], [1], [0, 0, 1, 1], [], []>} : vector<128x32xbf16>, vector<32x128xbf16>, vector<128x128xf32> -> vector<128x128xf32>
    %162 = arith.addf %141, %161 : vector<128x128xf32>
    %163 = vector.extract_strided_slice %34 {offsets = [128, 64], sizes = [128, 32], strides = [1, 1]} : vector<256x384xbf16> to vector<128x32xbf16>
    %164 = vector.extract_strided_slice %34 {offsets = [128, 192], sizes = [128, 32], strides = [1, 1]} : vector<256x384xbf16> to vector<128x32xbf16>
    %165 = vector.extract_strided_slice %34 {offsets = [128, 320], sizes = [128, 32], strides = [1, 1]} : vector<256x384xbf16> to vector<128x32xbf16>
    %cst_69 = arith.constant dense<0.000000e+00> : vector<128x128xf32>
    %166 = tpu.matmul %163, %164, %cst_69 {dimension_numbers = #tpu.dot_dimension_numbers<[1], [1], [0], [0], [0, 0, 1, 0], [], []>} : vector<128x32xbf16>, vector<128x32xbf16>, vector<128x128xf32> -> vector<128x128xf32>
    %cst_70 = arith.constant dense<0xFF800000> : vector<128xf32>
    %167 = vector.multi_reduction <maximumf>, %166, %cst_70 [1] : vector<128x128xf32> to vector<128xf32>
    %168 = vector.shape_cast %167 : vector<128xf32> to vector<128x1xf32>
    %169 = vector.broadcast %168 : vector<128x1xf32> to vector<128x128xf32>
    %170 = arith.subf %166, %169 : vector<128x128xf32>
    %171 = math.exp %170 : vector<128x128xf32>
    %cst_71 = arith.constant dense<0.000000e+00> : vector<128xf32>
    %172 = vector.multi_reduction <add>, %171, %cst_71 [1] : vector<128x128xf32> to vector<128xf32>
    %173 = vector.shape_cast %172 : vector<128xf32> to vector<128x1xf32>
    %174 = arith.truncf %171 : vector<128x128xf32> to vector<128x128xbf16>
    %cst_72 = arith.constant dense<0.000000e+00> : vector<128x32xf32>
    %175 = tpu.matmul %174, %165, %cst_72 {dimension_numbers = #tpu.dot_dimension_numbers<[1], [0], [0], [1], [0, 0, 1, 1], [], []>} : vector<128x128xbf16>, vector<128x32xbf16>, vector<128x32xf32> -> vector<128x32xf32>
    %176 = tpu.reciprocal %173 {approx = true} : vector<128x1xf32> -> vector<128x1xf32>
    %177 = vector.broadcast %176 : vector<128x1xf32> to vector<128x32xf32>
    %178 = arith.mulf %175, %177 : vector<128x32xf32>
    %179 = arith.truncf %178 : vector<128x32xf32> to vector<128x32xbf16>
    %c0_73 = arith.constant 0 : index
    %c2_74 = arith.constant 2 : index
    %c0_75 = arith.constant 0 : index
    %c0_76 = arith.constant 0 : index
    %180 = vector.load %arg6[%c0_73, %c2_74, %c0_75, %c0_76] : memref<1x4x32x128xbf16, #tpu.memory_space<vmem>>, vector<1x1x32x128xbf16>
    %181 = vector.shape_cast %180 : vector<1x1x32x128xbf16> to vector<32x128xbf16>
    %cst_77 = arith.constant dense<0.000000e+00> : vector<128x128xf32>
    %182 = tpu.matmul %179, %181, %cst_77 {dimension_numbers = #tpu.dot_dimension_numbers<[1], [0], [0], [1], [0, 0, 1, 1], [], []>} : vector<128x32xbf16>, vector<32x128xbf16>, vector<128x128xf32> -> vector<128x128xf32>
    %183 = arith.addf %162, %182 : vector<128x128xf32>
    %184 = vector.extract_strided_slice %34 {offsets = [128, 96], sizes = [128, 32], strides = [1, 1]} : vector<256x384xbf16> to vector<128x32xbf16>
    %185 = vector.extract_strided_slice %34 {offsets = [128, 224], sizes = [128, 32], strides = [1, 1]} : vector<256x384xbf16> to vector<128x32xbf16>
    %186 = vector.extract_strided_slice %34 {offsets = [128, 352], sizes = [128, 32], strides = [1, 1]} : vector<256x384xbf16> to vector<128x32xbf16>
    %cst_78 = arith.constant dense<0.000000e+00> : vector<128x128xf32>
    %187 = tpu.matmul %184, %185, %cst_78 {dimension_numbers = #tpu.dot_dimension_numbers<[1], [1], [0], [0], [0, 0, 1, 0], [], []>} : vector<128x32xbf16>, vector<128x32xbf16>, vector<128x128xf32> -> vector<128x128xf32>
    %cst_79 = arith.constant dense<0xFF800000> : vector<128xf32>
    %188 = vector.multi_reduction <maximumf>, %187, %cst_79 [1] : vector<128x128xf32> to vector<128xf32>
    %189 = vector.shape_cast %188 : vector<128xf32> to vector<128x1xf32>
    %190 = vector.broadcast %189 : vector<128x1xf32> to vector<128x128xf32>
    %191 = arith.subf %187, %190 : vector<128x128xf32>
    %192 = math.exp %191 : vector<128x128xf32>
    %cst_80 = arith.constant dense<0.000000e+00> : vector<128xf32>
    %193 = vector.multi_reduction <add>, %192, %cst_80 [1] : vector<128x128xf32> to vector<128xf32>
    %194 = vector.shape_cast %193 : vector<128xf32> to vector<128x1xf32>
    %195 = arith.truncf %192 : vector<128x128xf32> to vector<128x128xbf16>
    %cst_81 = arith.constant dense<0.000000e+00> : vector<128x32xf32>
    %196 = tpu.matmul %195, %186, %cst_81 {dimension_numbers = #tpu.dot_dimension_numbers<[1], [0], [0], [1], [0, 0, 1, 1], [], []>} : vector<128x128xbf16>, vector<128x32xbf16>, vector<128x32xf32> -> vector<128x32xf32>
    %197 = tpu.reciprocal %194 {approx = true} : vector<128x1xf32> -> vector<128x1xf32>
    %198 = vector.broadcast %197 : vector<128x1xf32> to vector<128x32xf32>
    %199 = arith.mulf %196, %198 : vector<128x32xf32>
    %200 = arith.truncf %199 : vector<128x32xf32> to vector<128x32xbf16>
    %c0_82 = arith.constant 0 : index
    %c3_83 = arith.constant 3 : index
    %c0_84 = arith.constant 0 : index
    %c0_85 = arith.constant 0 : index
    %201 = vector.load %arg6[%c0_82, %c3_83, %c0_84, %c0_85] : memref<1x4x32x128xbf16, #tpu.memory_space<vmem>>, vector<1x1x32x128xbf16>
    %202 = vector.shape_cast %201 : vector<1x1x32x128xbf16> to vector<32x128xbf16>
    %cst_86 = arith.constant dense<0.000000e+00> : vector<128x128xf32>
    %203 = tpu.matmul %200, %202, %cst_86 {dimension_numbers = #tpu.dot_dimension_numbers<[1], [0], [0], [1], [0, 0, 1, 1], [], []>} : vector<128x32xbf16>, vector<32x128xbf16>, vector<128x128xf32> -> vector<128x128xf32>
    %204 = arith.addf %183, %203 : vector<128x128xf32>
    %205 = tpu.concatenate %119, %204 in 0 : vector<128x128xf32>, vector<128x128xf32> -> vector<256x128xf32>
    %206 = arith.addf %3, %205 : vector<256x128xf32>
    %c0_87 = arith.constant 0 : index
    %c0_88 = arith.constant 0 : index
    %c0_89 = arith.constant 0 : index
    %207 = vector.load %arg7[%c0_87, %c0_88, %c0_89] : memref<1x1x128xf32, #tpu.memory_space<vmem>>, vector<1x1x128xf32>
    %208 = vector.shape_cast %207 : vector<1x1x128xf32> to vector<1x128xf32>
    %209 = vector.broadcast %208 : vector<1x128xf32> to vector<256x128xf32>
    %210 = arith.addf %206, %209 : vector<256x128xf32>
    %c0_90 = arith.constant 0 : index
    %c0_91 = arith.constant 0 : index
    %c0_92 = arith.constant 0 : index
    %211 = vector.load %arg8[%c0_90, %c0_91, %c0_92] : memref<1x1x128xf32, #tpu.memory_space<vmem>>, vector<1x1x128xf32>
    %212 = vector.shape_cast %211 : vector<1x1x128xf32> to vector<1x128xf32>
    %c0_93 = arith.constant 0 : index
    %c0_94 = arith.constant 0 : index
    %c0_95 = arith.constant 0 : index
    %213 = vector.load %arg9[%c0_93, %c0_94, %c0_95] : memref<1x1x128xf32, #tpu.memory_space<vmem>>, vector<1x1x128xf32>
    %214 = vector.shape_cast %213 : vector<1x1x128xf32> to vector<1x128xf32>
    %cst_96 = arith.constant dense<0.000000e+00> : vector<256xf32>
    %215 = vector.multi_reduction <add>, %210, %cst_96 [1] : vector<256x128xf32> to vector<256xf32>
    %216 = vector.shape_cast %215 : vector<256xf32> to vector<256x1xf32>
    %cst_97 = arith.constant 1.280000e+02 : f32
    %217 = vector.broadcast %cst_97 : f32 to vector<256x1xf32>
    %218 = arith.divf %216, %217 : vector<256x1xf32>
    %219 = vector.broadcast %218 : vector<256x1xf32> to vector<256x128xf32>
    %220 = arith.subf %210, %219 : vector<256x128xf32>
    %221 = arith.mulf %220, %220 : vector<256x128xf32>
    %cst_98 = arith.constant dense<0.000000e+00> : vector<256xf32>
    %222 = vector.multi_reduction <add>, %221, %cst_98 [1] : vector<256x128xf32> to vector<256xf32>
    %223 = vector.shape_cast %222 : vector<256xf32> to vector<256x1xf32>
    %cst_99 = arith.constant 1.280000e+02 : f32
    %224 = vector.broadcast %cst_99 : f32 to vector<256x1xf32>
    %225 = arith.divf %223, %224 : vector<256x1xf32>
    %226 = vector.broadcast %218 : vector<256x1xf32> to vector<256x128xf32>
    %227 = arith.subf %210, %226 : vector<256x128xf32>
    %cst_100 = arith.constant 9.99999974E-6 : f32
    %228 = vector.broadcast %cst_100 : f32 to vector<256x1xf32>
    %229 = arith.addf %225, %228 : vector<256x1xf32>
    %230 = math.rsqrt %229 : vector<256x1xf32>
    %231 = vector.broadcast %230 : vector<256x1xf32> to vector<256x128xf32>
    %232 = arith.mulf %227, %231 : vector<256x128xf32>
    %233 = vector.broadcast %212 : vector<1x128xf32> to vector<256x128xf32>
    %234 = arith.mulf %232, %233 : vector<256x128xf32>
    %235 = vector.broadcast %214 : vector<1x128xf32> to vector<256x128xf32>
    %236 = arith.addf %234, %235 : vector<256x128xf32>
    %237 = arith.truncf %236 : vector<256x128xf32> to vector<256x128xbf16>
    %c0_101 = arith.constant 0 : index
    %c0_102 = arith.constant 0 : index
    %c0_103 = arith.constant 0 : index
    %238 = vector.load %arg10[%c0_101, %c0_102, %c0_103] : memref<1x128x256xbf16, #tpu.memory_space<vmem>>, vector<1x128x256xbf16>
    %239 = vector.shape_cast %238 : vector<1x128x256xbf16> to vector<128x256xbf16>
    %cst_104 = arith.constant dense<0.000000e+00> : vector<256x256xf32>
    %240 = tpu.matmul %237, %239, %cst_104 {dimension_numbers = #tpu.dot_dimension_numbers<[1], [0], [0], [1], [0, 0, 1, 1], [], []>} : vector<256x128xbf16>, vector<128x256xbf16>, vector<256x256xf32> -> vector<256x256xf32>
    %c0_105 = arith.constant 0 : index
    %c0_106 = arith.constant 0 : index
    %c0_107 = arith.constant 0 : index
    %241 = vector.load %arg11[%c0_105, %c0_106, %c0_107] : memref<1x1x256xf32, #tpu.memory_space<vmem>>, vector<1x1x256xf32>
    %242 = vector.shape_cast %241 : vector<1x1x256xf32> to vector<1x256xf32>
    %243 = vector.broadcast %242 : vector<1x256xf32> to vector<256x256xf32>
    %244 = arith.addf %240, %243 : vector<256x256xf32>
    %cst_108 = arith.constant 5.000000e-01 : f32
    %245 = vector.broadcast %cst_108 : f32 to vector<256x256xf32>
    %246 = arith.mulf %245, %244 : vector<256x256xf32>
    %cst_109 = arith.constant 4.471500e-02 : f32
    %247 = vector.broadcast %cst_109 : f32 to vector<256x256xf32>
    %248 = arith.mulf %247, %244 : vector<256x256xf32>
    %249 = arith.mulf %248, %244 : vector<256x256xf32>
    %250 = arith.mulf %249, %244 : vector<256x256xf32>
    %251 = arith.addf %244, %250 : vector<256x256xf32>
    %cst_110 = arith.constant 0.797884583 : f32
    %252 = vector.broadcast %cst_110 : f32 to vector<256x256xf32>
    %253 = arith.mulf %252, %251 : vector<256x256xf32>
    %254 = math.tanh %253 : vector<256x256xf32>
    %cst_111 = arith.constant 1.000000e+00 : f32
    %255 = vector.broadcast %cst_111 : f32 to vector<256x256xf32>
    %256 = arith.addf %255, %254 : vector<256x256xf32>
    %257 = arith.mulf %246, %256 : vector<256x256xf32>
    %258 = arith.truncf %257 : vector<256x256xf32> to vector<256x256xbf16>
    %c0_112 = arith.constant 0 : index
    %c0_113 = arith.constant 0 : index
    %c0_114 = arith.constant 0 : index
    %259 = vector.load %arg12[%c0_112, %c0_113, %c0_114] : memref<1x256x128xbf16, #tpu.memory_space<vmem>>, vector<1x256x128xbf16>
    %260 = vector.shape_cast %259 : vector<1x256x128xbf16> to vector<256x128xbf16>
    %cst_115 = arith.constant dense<0.000000e+00> : vector<256x128xf32>
    %261 = tpu.matmul %258, %260, %cst_115 {dimension_numbers = #tpu.dot_dimension_numbers<[1], [0], [0], [1], [0, 0, 1, 1], [], []>} : vector<256x256xbf16>, vector<256x128xbf16>, vector<256x128xf32> -> vector<256x128xf32>
    %c0_116 = arith.constant 0 : index
    %c0_117 = arith.constant 0 : index
    %c0_118 = arith.constant 0 : index
    %262 = vector.load %arg13[%c0_116, %c0_117, %c0_118] : memref<1x1x128xf32, #tpu.memory_space<vmem>>, vector<1x1x128xf32>
    %263 = vector.shape_cast %262 : vector<1x1x128xf32> to vector<1x128xf32>
    %264 = vector.broadcast %263 : vector<1x128xf32> to vector<256x128xf32>
    %265 = arith.addf %261, %264 : vector<256x128xf32>
    %266 = arith.addf %210, %265 : vector<256x128xf32>
    %c0_119 = arith.constant 0 : index
    %c0_120 = arith.constant 0 : index
    %267 = vector.load %arg15[%c0_119, %c0_120] : memref<256x128xf32, #tpu.memory_space<vmem>>, vector<256x128xf32>
    tpu.vector_store %arg15[%c0_119, %c0_120], %266 {strides = array<i32>} : memref<256x128xf32, #tpu.memory_space<vmem>>, vector<256x128xf32>,
    %c1_i32 = arith.constant 1 : i32
    %268 = arith.cmpi eq, %arg1, %c1_i32 : i32
    %269 = arith.extui %268 : i1 to i32
    %c0_i32_121 = arith.constant 0 : i32
    %270 = arith.cmpi ne, %269, %c0_i32_121 : i32
    scf.if %270 {
      %271 = vector.shape_cast %266 : vector<256x128xf32> to vector<2x128x128xf32>
      %c0_122 = arith.constant 0 : index
      %c0_123 = arith.constant 0 : index
      %c0_124 = arith.constant 0 : index
      %272 = vector.load %arg14[%c0_122, %c0_123, %c0_124] : memref<2x128x128xf32, #tpu.memory_space<vmem>>, vector<2x128x128xf32>
      tpu.vector_store %arg14[%c0_122, %c0_123, %c0_124], %271 {strides = array<i32>} : memref<2x128x128xf32, #tpu.memory_space<vmem>>, vector<2x128x128xf32>,
    } else {
    }
    return
  }
  func.func @transform_0(%arg0: i32, %arg1: i32) -> (i32, i32, i32) {
    %c0_i32 = arith.constant 0 : i32
    %c0_i32_0 = arith.constant 0 : i32
    %c0_i32_1 = arith.constant 0 : i32
    return %arg0, %c0_i32, %c0_i32_0 : i32, i32, i32
  }
  func.func @transform_1(%arg0: i32, %arg1: i32) -> (i32, i32, i32) {
    %c0_i32 = arith.constant 0 : i32
    %c0_i32_0 = arith.constant 0 : i32
    %c0_i32_1 = arith.constant 0 : i32
    return %arg1, %c0_i32, %c0_i32_0 : i32, i32, i32
  }
  func.func @transform_2(%arg0: i32, %arg1: i32) -> (i32, i32, i32) {
    %c0_i32 = arith.constant 0 : i32
    %c0_i32_0 = arith.constant 0 : i32
    %c0_i32_1 = arith.constant 0 : i32
    return %arg1, %c0_i32, %c0_i32_0 : i32, i32, i32
  }
  func.func @transform_3(%arg0: i32, %arg1: i32) -> (i32, i32, i32) {
    %c0_i32 = arith.constant 0 : i32
    %c0_i32_0 = arith.constant 0 : i32
    %c0_i32_1 = arith.constant 0 : i32
    return %arg1, %c0_i32, %c0_i32_0 : i32, i32, i32
  }
  func.func @transform_4(%arg0: i32, %arg1: i32) -> (i32, i32, i32, i32) {
    %c0_i32 = arith.constant 0 : i32
    %c0_i32_0 = arith.constant 0 : i32
    %c0_i32_1 = arith.constant 0 : i32
    %c0_i32_2 = arith.constant 0 : i32
    return %arg1, %c0_i32, %c0_i32_0, %c0_i32_1 : i32, i32, i32, i32
  }
  func.func @transform_5(%arg0: i32, %arg1: i32) -> (i32, i32, i32) {
    %c0_i32 = arith.constant 0 : i32
    %c0_i32_0 = arith.constant 0 : i32
    %c0_i32_1 = arith.constant 0 : i32
    return %arg1, %c0_i32, %c0_i32_0 : i32, i32, i32
  }
  func.func @transform_6(%arg0: i32, %arg1: i32) -> (i32, i32, i32) {
    %c0_i32 = arith.constant 0 : i32
    %c0_i32_0 = arith.constant 0 : i32
    %c0_i32_1 = arith.constant 0 : i32
    return %arg1, %c0_i32, %c0_i32_0 : i32, i32, i32
  }
  func.func @transform_7(%arg0: i32, %arg1: i32) -> (i32, i32, i32) {
    %c0_i32 = arith.constant 0 : i32
    %c0_i32_0 = arith.constant 0 : i32
    %c0_i32_1 = arith.constant 0 : i32
    return %arg1, %c0_i32, %c0_i32_0 : i32, i32, i32
  }
  func.func @transform_8(%arg0: i32, %arg1: i32) -> (i32, i32, i32) {
    %c0_i32 = arith.constant 0 : i32
    %c0_i32_0 = arith.constant 0 : i32
    %c0_i32_1 = arith.constant 0 : i32
    return %arg1, %c0_i32, %c0_i32_0 : i32, i32, i32
  }
  func.func @transform_9(%arg0: i32, %arg1: i32) -> (i32, i32, i32) {
    %c0_i32 = arith.constant 0 : i32
    %c0_i32_0 = arith.constant 0 : i32
    %c0_i32_1 = arith.constant 0 : i32
    return %arg1, %c0_i32, %c0_i32_0 : i32, i32, i32
  }
  func.func @transform_10(%arg0: i32, %arg1: i32) -> (i32, i32, i32) {
    %c0_i32 = arith.constant 0 : i32
    %c0_i32_0 = arith.constant 0 : i32
    %c0_i32_1 = arith.constant 0 : i32
    return %arg1, %c0_i32, %c0_i32_0 : i32, i32, i32
  }
  func.func @transform_11(%arg0: i32, %arg1: i32) -> (i32, i32, i32) {
    %c0_i32 = arith.constant 0 : i32
    %c0_i32_0 = arith.constant 0 : i32
    %c0_i32_1 = arith.constant 0 : i32
    return %arg1, %c0_i32, %c0_i32_0 : i32, i32, i32
  }
  func.func @transform_12(%arg0: i32, %arg1: i32) -> (i32, i32, i32) {
    %c0_i32 = arith.constant 0 : i32
    %c0_i32_0 = arith.constant 0 : i32
    %c0_i32_1 = arith.constant 0 : i32
    return %arg0, %c0_i32, %c0_i32_0 : i32, i32, i32
  }
}

</mosaic_0001>

<bundles_post_ra>
// kernel: transformer_forward.1
= control target key start
LH: loop header
LB: loop body
LE: loop exit
PB: predicated region body
PF: predicated region fallthrough
CT: control target
= control target key end

     0   :  { %s16092_s0 = inlined_call_operand.hbm [shape: f32[4,128,128], index: 0, kind: input, shape index: {}]   ;;  %s16093_s1 = inlined_call_operand.vmem [shape: f32[2,1,128], index: 1, kind: input, shape index: {}]   ;;  %s16094_s2 = inlined_call_operand.vmem [shape: f32[2,1,128], index: 2, kind: input, shape index: {}]   ;;  %s16095_s3 = inlined_call_operand.hbm [shape: bf16[2,128,384], index: 3, kind: input, shape index: {}]   ;;  %s16096_s4 = inlined_call_operand.hbm [shape: bf16[2,4,32,128], index: 4, kind: input, shape index: {}]   ;;  %s16097_s5 = inlined_call_operand.vmem [shape: f32[2,1,128], index: 5, kind: input, shape index: {}]   ;;  %s16098_s6 = inlined_call_operand.vmem [shape: f32[2,1,128], index: 6, kind: input, shape index: {}]   ;;  %s16099_s7 = inlined_call_operand.vmem [shape: f32[2,1,128], index: 7, kind: input, shape index: {}]   ;;  %s16100_s8 = inlined_call_operand.hbm [shape: bf16[2,128,256], index: 8, kind: input, shape index: {}]   ;;  %s16101_s9 = inlined_call_operand.hbm [shape: f32[2,1,256], index: 9, kind: input, shape index: {}]   ;;  %s16102_s10 = inlined_call_operand.hbm [shape: bf16[2,256,128], index: 10, kind: input, shape index: {}]   ;;  %s16103_s11 = inlined_call_operand.hbm [shape: f32[2,1,128], index: 11, kind: input, shape index: {}]   ;;  %s16104_s12 = inlined_call_operand.hbm [shape: f32[4,128,128], index: 12, kind: output, shape index: {}]  }
   0x1   :  { %16251 = sst [smem:[#allocation112_spill]] %s16092_s0 }
   0x2   :  { %16252 = sst [smem:[#allocation113_spill]] %s16093_s1 }
   0x3   :  { %16253 = sst [smem:[#allocation114_spill]] %s16094_s2 }
   0x4   :  { %16254 = sst [smem:[#allocation115_spill]] %s16095_s3 }
   0x5   :  { %16255 = sst [smem:[#allocation116_spill]] %s16096_s4 }
   0x6   :  { %16256 = sst [smem:[#allocation117_spill]] %s16097_s5 }
   0x7   :  { %16257 = sst [smem:[#allocation118_spill]] %s16098_s6 }
   0x8   :  { %16258 = sst [smem:[#allocation119_spill]] %s16099_s7 }
   0x9   :  { %16259 = sst [smem:[#allocation120_spill]] %s16100_s8 }
   0xa   :  { %16260 = sst [smem:[#allocation121_spill]] %s16101_s9 }
   0xb   :  { %16261 = sst [smem:[#allocation122_spill]] %s16102_s10 }
   0xc   :  { %16262 = sst [smem:[#allocation123_spill]] %s16103_s11 }
   0xd   :  { %16263 = sst [smem:[#allocation124_spill]] %s16104_s12 }
   0xe   :  { %17 = vsyncpa [#allocation4], 0 }
   0xf   :  { %19 = vsyncpa [#allocation4 + $0x1], 0 }
  0x10   :  { %20 = vsyncpa [#allocation7], 0 }
  0x11   :  { %22 = vsyncpa [#allocation7 + $0x1], 0 }
  0x12   :  { %23 = vsyncpa [#allocation10], 0 }
  0x13   :  { %25 = vsyncpa [#allocation10 + $0x1], 0 }
  0x14   :  { %26 = vsyncpa [#allocation13], 0 }
  0x15   :  { %28 = vsyncpa [#allocation13 + $0x1], 0 }
  0x16   :  { %29 = vsyncpa [#allocation5], 0 }
  0x17   :  { %31 = vsyncpa [#allocation5 + $0x1], 0  ;;  %s11733_s21 = smov 0   ;;  %s11735_s22 = smov 0  }
  0x18   :  { %s11737_s23 = smov 0   ;;  %s11739_s24 = smov 0  }
  0x19   :  { %s11741_s25 = smov 0   ;;  %s11743_s26 = smov 0  }
  0x1a   :  { %s11745_s27 = smov 0   ;;  %s11747_s28 = smov 0  }
  0x1b   :  { %s11749_s29 = smov 0   ;;  %s11751_s30 = smov 0  }
  0x1c   :  { %s11753_s13 = smov 0  }
  0x1d LB: > { %16264 = sst [smem:[#allocation21_spill]] %s11610_s22  ;;  %p16107_p0 = scmp.eq.s32.totalorder %s11646_s13, 0  ;;  %s11646_s13 = sphi %s11753_s13, %s37_s13   ;;  %s11642_s30 = sphi %s11751_s30, %s16643_s30   ;;  %s11638_s29 = sphi %s11749_s29, %s16642_s29   ;;  %s11634_s28 = sphi %s11747_s28, %s16641_s28   ;;  %s11630_s27 = sphi %s11745_s27, %s16640_s27   ;;  %s11626_s26 = sphi %s11743_s26, %s16639_s26   ;;  %s11622_s25 = sphi %s11741_s25, %s16638_s25   ;;  %s11618_s24 = sphi %s11739_s24, %s16637_s24   ;;  %s11614_s23 = sphi %s11737_s23, %s16636_s23   ;;  %s11610_s22 = sphi %s11735_s22, %s16635_s22   ;;  %s11606_s21 = sphi %s11733_s21, %s16634_s21  }
  0x1e   : > { %16265 = sst [smem:[#allocation22_spill]] %s11614_s23  ;;  %p141_p1 = scmp.ne.s32.totalorder %s11614_s23, %s11610_s22 }
  0x1f   : > { %16266 = sst [smem:[#allocation23_spill]] %s11622_s25  ;;  %p16106_p3 = scmp.lt.s32.totalorder %s11646_s13, 4 }
  0x20   : > { %16267 = sst [smem:[#allocation24_spill]] %s11626_s26  ;;  %p143_p4 = por %p141_p1, %p16107_p0 }
  0x21   : > { %16268 = sst [smem:[#allocation25_spill]] %s11630_s27  ;;  %s11798_s15 = sand.u32 1, %s11646_s13  }
  0x22   : > { %16269 = sst [smem:[#allocation26_spill]] %s11634_s28  ;;  %s11801_s16 = sand.u32 1, %s11614_s23  }
  0x23   : > { %16270 = sst [smem:[#allocation27_spill]] %s11638_s29  ;;  %s10265_s17 = smul.u32 192, %s11801_s16 }
  0x24   : > { %16271 = sst [smem:[#allocation28_spill]] %s11642_s30  ;;  %p11806_p5 = pnand %p16106_p3, %p143_p4 }
  0x25   : > { %s10266_s19 = smul.u32 3072, %s11638_s29  ;;  %s16273_s3 = sld [smem:[#allocation115_spill]] }
  0x26   : > { %s16272_s18 = scalar_select %p11806_p5, 1, 0 }
  0x27   : > { %s443_s28 = scalar_lea.vmem [#allocation6], %s10265_s17  ;;  %p11823_p7 = pneg %p11806_p5 }
  0x28   : > { %s450_s7 = sshll.u32 %s443_s28, 4  ;;  %s11816_s7 = int_to_ptr.vmem [resolvable:$true] %s450_s7 }
  0x2b   : > { %s11814_s12 = scalar_lea.hbm %s16273_s3, %s10266_s19  ;;  %s11307_s20 = scalar_lea.hbm %s16273_s3, 6144 }
  0x2c   : > { %s11302_s5 = scalar_lea.hbm %s11814_s12, 3072  ;;  %p11308_p10 = scmp.lt.u32.totalorder %s11814_s12, %s16273_s3 }
  0x2d   : > { %p11303_p6 = scmp.ne.s32.totalorder %s11814_s12, %s11302_s5  ;;  %p11309_p11 = scmp.lt.u32.totalorder %s11307_s20, %s11302_s5 }
  0x2e   : > { %p11311_p13 = scmp.lt.u32.totalorder %s11302_s5, %s11814_s12 }
  0x2f   : > { %p11305_p8 = pnand %p11823_p7, %p11303_p6  ;;  %p11310_p12 = por %p11309_p11, %p11308_p10 }
  0x31   : > { %p11306_p9 = pneg %p11305_p8  ;;  %p11312_p1 = por %p11311_p13, %p11310_p12 }
  0x33   : > { %p11313_p4 = pnand %p11312_p1, %p11306_p9 }
  0x35   : > { %11316 = shalt.err (!%p11313_p4)
}
  0x36   : > { %s11317_s6 = scalar_lea.vmem %s11816_s7, 3072  ;;  %s11648_s14 = smov [#allocation6]  }
  0x37   : > { %p11318_p6 = scmp.ne.s32.totalorder %s11816_s7, %s11317_s6  ;;  %s11322_s19 = sshll.u32 %s11648_s14, 4  ;;  %s11323_s19 = int_to_ptr.vmem [resolvable:$false] %s11322_s19 }
  0x38   : > { %s11324_s17 = scalar_lea.vmem %s11323_s19, 6144  ;;  %p11325_p2 = scmp.lt.s32.totalorder %s11816_s7, %s11323_s19 }
  0x39   : > { %p11320_p8 = pnand %p11318_p6, %p11823_p7  ;;  %p11326_p0 = scmp.lt.s32.totalorder %s11324_s17, %s11317_s6 }
  0x3b   : > { %p11321_p3 = pneg %p11320_p8  ;;  %p11327_p10 = por %p11326_p0, %p11325_p2 }
  0x3d   : > { %p11328_p11 = pnand %p11327_p10, %p11321_p3 }
  0x3f   : > { %11331 = shalt.err (!%p11328_p11)
}
  0x40   : > { %s11649_s5 = smov 192   ;;  %s11650_s20 = smov 12  }
  0x41   : > { %s16275_s28 = scalar_lea.sflag [#allocation7], %s11798_s15  ;;  %p8664_p0 = scmp.ge.s32.totalorder %s11646_s13, 1 }
  0x42   : > { %10290 = dma.hbm_to_vmem [thread:$0]  (!%p11806_p5), %s11814_s12, 3072, %s11816_s7, %s16275_s28, %s11649_s5, %s11649_s5, %s11650_s20  }
  0x43   : > { %p575_p2 = scmp.lt.s32.totalorder %s11646_s13, 5  ;;  %s8654_s14 = sshll.u32 %s11801_s16, 7 }
  0x44   : > { %s16109_s19 = sshll.u32 %s11638_s29, 11  ;;  %s16278_s8 = sld [smem:[#allocation120_spill]] }
  0x45   : > { %p11850_p3 = pnand %p8664_p0, %p575_p2  ;;  %s503_s7 = scalar_lea.vmem [#allocation9], %s8654_s14 }
  0x46   : > { %s510_s12 = sshll.u32 %s503_s7, 4  ;;  %s16113_s5 = scalar_lea.sflag [#allocation10], %s11798_s15  ;;  %s11865_s12 = int_to_ptr.vmem [resolvable:$true] %s510_s12 }
  0x47   : > { %s16276_s6 = scalar_select %p11850_p3, 1, 0 }
  0x49   : > { %16277 = sst [smem:[#allocation29_spill]] %s16276_s6 }
  0x4a   : > { %s11861_s1 = scalar_lea.hbm %s16278_s8, %s16109_s19  ;;  %s11337_s3 = scalar_lea.hbm %s16278_s8, 4096 }
  0x4b   : > { %s11332_s20 = scalar_lea.hbm %s11861_s1, 2048  ;;  %p11338_p1 = scmp.lt.u32.totalorder %s11861_s1, %s16278_s8 }
  0x4c   : > { %p11333_p9 = scmp.ne.s32.totalorder %s11861_s1, %s11332_s20  ;;  %p11339_p4 = scmp.lt.u32.totalorder %s11337_s3, %s11332_s20 }
  0x4d   : > { %p11341_p8 = scmp.lt.u32.totalorder %s11332_s20, %s11861_s1 }
  0x4e   : > { %p11335_p12 = pnand %p11333_p9, %p11823_p7  ;;  %p11340_p6 = por %p11339_p4, %p11338_p1 }
  0x50   : > { %p11336_p13 = pneg %p11335_p12  ;;  %p11342_p10 = por %p11341_p8, %p11340_p6 }
  0x52   : > { %p11343_p11 = pnand %p11342_p10, %p11336_p13 }
  0x54   : > { %11346 = shalt.err (!%p11343_p11)
}
  0x55   : > { %s11347_s7 = scalar_lea.vmem %s11865_s12, 2048  ;;  %s11651_s27 = smov [#allocation9]  }
  0x56   : > { %p11348_p0 = scmp.ne.s32.totalorder %s11865_s12, %s11347_s7  ;;  %s11352_s28 = sshll.u32 %s11651_s27, 4  ;;  %s11353_s28 = int_to_ptr.vmem [resolvable:$false] %s11352_s28 }
  0x57   : > { %s11354_s19 = scalar_lea.vmem %s11353_s28, 4096  ;;  %p11355_p12 = scmp.lt.s32.totalorder %s11865_s12, %s11353_s28 }
  0x58   : > { %p11350_p2 = pnand %p11348_p0, %p11823_p7  ;;  %p11356_p3 = scmp.lt.s32.totalorder %s11354_s19, %s11347_s7 }
  0x5a   : > { %p11351_p9 = pneg %p11350_p2  ;;  %p11357_p1 = por %p11356_p3, %p11355_p12 }
  0x5c   : > { %p11358_p4 = pnand %p11357_p1, %p11351_p9 }
  0x5e   : > { %11361 = shalt.err (!%p11358_p4)
}
  0x5f   : > { %s16116_s20 = smov 128   ;;  %s16117_s3 = smov 8  }
  0x60   : > { %10296 = dma.hbm_to_vmem [thread:$0]  (!%p11806_p5), %s11861_s1, 2048, %s11865_s12, %s16113_s5, %s16116_s20, %s16116_s20, %s16117_s3  }
  0x61   : > { %s16279_s17 = sshll.u32 %s11638_s29, 11  ;;  %s16280_s10 = sld [smem:[#allocation122_spill]] }
  0x62   : > { %s543_s19 = scalar_lea.vmem [#allocation12], %s8654_s14  ;;  %s16112_s6 = scalar_lea.sflag [#allocation13], %s11798_s15 }
  0x63   : > { %s550_s8 = sshll.u32 %s543_s19, 4  ;;  %s11903_s8 = int_to_ptr.vmem [resolvable:$true] %s550_s8 }
  0x67   : > { %s11899_s28 = scalar_lea.hbm %s16280_s10, %s16279_s17  ;;  %s11367_s17 = scalar_lea.hbm %s16280_s10, 4096 }
  0x68   : > { %s11362_s11 = scalar_lea.hbm %s11899_s28, 2048  ;;  %p11368_p8 = scmp.lt.u32.totalorder %s11899_s28, %s16280_s10 }
  0x69   : > { %p11363_p3 = scmp.ne.s32.totalorder %s11899_s28, %s11362_s11  ;;  %p11369_p10 = scmp.lt.u32.totalorder %s11367_s17, %s11362_s11 }
  0x6a   : > { %p11371_p0 = scmp.lt.u32.totalorder %s11362_s11, %s11899_s28 }
  0x6b   : > { %p11365_p13 = pnand %p11363_p3, %p11823_p7  ;;  %p11370_p11 = por %p11369_p10, %p11368_p8 }
  0x6d   : > { %p11366_p6 = pneg %p11365_p13  ;;  %p11372_p2 = por %p11371_p0, %p11370_p11 }
  0x6f   : > { %p11373_p9 = pnand %p11372_p2, %p11366_p6 }
  0x71   : > { %11376 = shalt.err (!%p11373_p9)
}
  0x72   : > { %s11377_s14 = scalar_lea.vmem %s11903_s8, 2048  ;;  %s11654_s19 = smov [#allocation12]  }
  0x73   : > { %p11378_p12 = scmp.ne.s32.totalorder %s11903_s8, %s11377_s14  ;;  %s11382_s1 = sshll.u32 %s11654_s19, 4  ;;  %s11383_s1 = int_to_ptr.vmem [resolvable:$false] %s11382_s1 }
  0x74   : > { %s11384_s12 = scalar_lea.vmem %s11383_s1, 4096  ;;  %p11385_p3 = scmp.lt.s32.totalorder %s11903_s8, %s11383_s1 }
  0x75   : > { %p11380_p1 = pnand %p11378_p12, %p11823_p7  ;;  %p11386_p13 = scmp.lt.s32.totalorder %s11384_s12, %s11377_s14 }
  0x77   : > { %p11381_p4 = pneg %p11380_p1  ;;  %p11387_p8 = por %p11386_p13, %p11385_p3 }
  0x79   : > { %p11388_p10 = pnand %p11387_p8, %p11381_p4 }
  0x7b   : > { %11391 = shalt.err (!%p11388_p10)
}
  0x7c   : > { %s16114_s11 = smov 64   ;;  %s16115_s17 = smov 4  }
  0x7d   : > { %10302 = dma.hbm_to_vmem [thread:$0]  (!%p11806_p5), %s11899_s28, 2048, %s11903_s8, %s16112_s6, %s16114_s11, %s16114_s11, %s16115_s17  }
  0x7e   : > { %s11933_s7 = sadd.s32 4294967295, %s11646_s13   ;;  %s8643_s27 = sadd.s32 4294967294, %s11646_s13  }
  0x7f   : > { %s46_s14 = sadd.s32 1, %s11638_s29  ;;  %s49_s19 = sadd.s32 1, %s11642_s30 }
  0x80   : > { %p47_p6 = scmp.ge.s32.totalorder %s46_s14, 2  ;;  %s56_s1 = sadd.s32 1, %s11626_s26 }
  0x81   : > { %p63_p11 = scmp.ne.s32.totalorder %s11626_s26, %s11622_s25  ;;  %p16282_p0 = scmp.eq.s32.totalorder %s11646_s13, 0 }
  0x82   : > { %s16645_s14 = smov (%p47_p6, %s46_s14), 0  ;;  %s16647_s19 = smov (!%p47_p6, %s49_s19), %s11642_s30 }
  0x83   : > { %16281 = sst [smem:[#allocation30_spill]] %s16645_s14  ;;  %p11949_p2 = por %p16282_p0, %p63_p11 }
  0x84   : > { %p69_p9 = scmp.ne.s32.totalorder %s11622_s25, %s11618_s24  ;;  %p51_p12 = scmp.ge.s32.totalorder %s16647_s19, 2 }
  0x85   : > { %p70_p1 = scmp.eq.s32.totalorder %s11933_s7, 0  ;;  %s131_s28 = ssub.s32 %s11638_s29, %s16645_s14 }
  0x86   : > { %p379_p4 = scmp.eq.s32.totalorder %s11933_s7, 3  ;;  %s16649_s19 = smov (%p51_p12, %s16647_s19), 0 }
  0x87   : > { %16284 = sst [smem:[#allocation31_spill]] %s16649_s19  ;;  %p11964_p3 = por %p70_p1, %p69_p9 }
  0x88   : > { %p132_p13 = scmp.eq.s32.totalorder %s131_s28, 0  ;;  %s53_s6 = ssub.s32 %s11642_s30, %s16649_s19 }
  0x89   : > { %s16285_s12 = scalar_select %p11964_p3, 1, 0 }
  0x8a   : > { %p16286_p8 = scmp.ne.s32.totalorder %s11610_s22, %s11606_s21  ;;  %p54_p6 = scmp.eq.s32.totalorder %s53_s6, 0 }
  0x8b   : > { %p11980_p0 = por %p379_p4, %p63_p11  ;;  %s16291_s17 = sadd.s32 1, %s11614_s23 }
  0x8c   : > { %p11973_p10 = por %p16286_p8, %p70_p1  ;;  %p385_p12 = scmp.eq.s32.totalorder %s8643_s27, 3 }
  0x8d   : > { %s16289_s11 = scalar_select %p11980_p0, 1, 0 }
  0x8e   : > { %s16287_s5 = scalar_select %p11973_p10, 1, 0 }
  0x8f   : > { %16290 = sst [smem:[#allocation33_spill]] %s16289_s11  ;;  %s405_s3 = sand.u32 1, %s11626_s26  }
  0x90   : > { %16288 = sst [smem:[#allocation32_spill]] %s16287_s5  ;;  %s8646_s21 = sshll.u32 %s405_s3, 8 }
  0x91   : > { %s11987_s20 = scalar_select %p132_p13, %s11614_s23, %s16291_s17  }
  0x92   : > { %s11990_s28 = scalar_select %p54_p6, %s11626_s26, %s56_s1  }
  0x93   : > { %16292 = sst [smem:[#allocation34_spill]] %s11987_s20  ;;  %p11996_p1 = por %p385_p12, %p69_p9 }
  0x94   : > { %16293 = sst [smem:[#allocation35_spill]] %s11990_s28  ;;  %s8890_s19 = sshll.u32 %s11642_s30, 12 }
  0x95   : > { %s16294_s10 = scalar_select %p11996_p1, 1, 0 }
  0x96   : > { %s409_s6 = scalar_lea.vmem [#allocation3], %s8646_s21  ;;  %s16296_s0 = sld [smem:[#allocation112_spill]] }
  0x97   : > { %16295 = sst [smem:[#allocation36_spill]] %s16294_s10  ;;  %s417_s14 = sshll.u32 %s409_s6, 4  ;;  %s12006_s14 = int_to_ptr.vmem [resolvable:$true] %s417_s14 }
  0x98   : > { %p16297_p11 = scmp.lt.s32.totalorder %s11646_s13, 4  ;;  %s8891_s1 = sshll.u32 %s11638_s29, 10 }
  0x99   : > { %s16299_s4 = sld [smem:[#allocation116_spill]] }
  0x9a   : > { %p12012_p9 = pnand %p16297_p11, %p11949_p2 }
  0x9c   : > { %s12004_s11 = scalar_lea.hbm %s16296_s0, %s8890_s19  ;;  %s12023_s19 = scalar_lea.sflag [#allocation4], %s405_s3 }
  0x9d   : > { %s11392_s6 = scalar_lea.hbm %s12004_s11, 4096  ;;  %p11394_p13 = pneg %p12012_p9 }
  0x9e   : > { %p11393_p4 = scmp.ne.s32.totalorder %s12004_s11, %s11392_s6  ;;  %s11397_s27 = scalar_lea.hbm %s16296_s0, 8192 }
  0x9f   : > { %s12021_s5 = scalar_lea.hbm %s16299_s4, %s8891_s1  ;;  %p11398_p6 = scmp.lt.u32.totalorder %s12004_s11, %s16296_s0 }
  0xa0   : > { %p11395_p2 = pnand %p11394_p13, %p11393_p4  ;;  %p11399_p12 = scmp.lt.u32.totalorder %s11397_s27, %s11392_s6 }
  0xa1   : > { %p11401_p1 = scmp.lt.u32.totalorder %s11392_s6, %s12004_s11 }
  0xa2   : > { %p11396_p8 = pneg %p11395_p2  ;;  %p11400_p11 = por %p11399_p12, %p11398_p6 }
  0xa4   : > { %p11402_p0 = por %p11401_p1, %p11400_p11 }
  0xa6   : > { %p11403_p10 = pnand %p11402_p0, %p11396_p8 }
  0xa8   : > { %11406 = shalt.err (!%p11403_p10)
}
  0xa9   : > { %s11407_s3 = scalar_lea.vmem %s12006_s14, 4096  ;;  %s11657_s30 = smov [#allocation3]  }
  0xaa   : > { %p11408_p4 = scmp.ne.s32.totalorder %s12006_s14, %s11407_s3  ;;  %s11412_s1 = sshll.u32 %s11657_s30, 4  ;;  %s11413_s1 = int_to_ptr.vmem [resolvable:$false] %s11412_s1 }
  0xab   : > { %s11414_s26 = scalar_lea.vmem %s11413_s1, 8192  ;;  %p11415_p5 = scmp.lt.s32.totalorder %s12006_s14, %s11413_s1 }
  0xac   : > { %p11410_p2 = pnand %p11408_p4, %p11394_p13  ;;  %p11416_p6 = scmp.lt.s32.totalorder %s11414_s26, %s11407_s3 }
  0xae   : > { %p11411_p3 = pneg %p11410_p2  ;;  %p11417_p12 = por %p11416_p6, %p11415_p5 }
  0xb0   : > { %p11418_p1 = pnand %p11417_p12, %p11411_p3 }
  0xb2   : > { %11421 = shalt.err (!%p11418_p1)
}
  0xb3   : > { %s16300_s28 = smov 8   ;;  %s16301_s27 = smov 128  }
  0xb4   : > { %10287 = dma.hbm_to_vmem [thread:$0]  (!%p12012_p9), %s12004_s11, 4096, %s12006_s14, %s12023_s19, %s16301_s27, %s16301_s27, %s16300_s28  }
  0xb5   : > { %s16302_s21 = sshll.u32 %s11801_s16, 6  ;;  %s8657_s8 = sshll.u32 %s11801_s16, 1 }
  0xb6   : > { %s464_s22 = scalar_lea.vmem [#allocation8], %s16302_s21  ;;  %s11422_s17 = scalar_lea.hbm %s12021_s5, 1024 }
  0xb7   : > { %s471_s6 = sshll.u32 %s464_s22, 4  ;;  %p11423_p5 = scmp.ne.s32.totalorder %s12021_s5, %s11422_s17  ;;  %s12057_s6 = int_to_ptr.vmem [resolvable:$true] %s471_s6 }
  0xb8   : > { %s11427_s1 = scalar_lea.hbm %s16299_s4, 2048  ;;  %p11428_p0 = scmp.lt.u32.totalorder %s12021_s5, %s16299_s4 }
  0xb9   : > { %p11425_p3 = pnand %p11423_p5, %p11823_p7  ;;  %p11429_p9 = scmp.lt.u32.totalorder %s11427_s1, %s11422_s17 }
  0xba   : > { %p11431_p8 = scmp.lt.u32.totalorder %s11422_s17, %s12021_s5 }
  0xbb   : > { %p11426_p10 = pneg %p11425_p3  ;;  %p11430_p13 = por %p11429_p9, %p11428_p0 }
  0xbd   : > { %p11432_p11 = por %p11431_p8, %p11430_p13 }
  0xbf   : > { %p11433_p4 = pnand %p11432_p11, %p11426_p10 }
  0xc1   : > { %11436 = shalt.err (!%p11433_p4)
}
  0xc2   : > { %s11437_s11 = scalar_lea.vmem %s12057_s6, 1024  ;;  %s11658_s14 = smov [#allocation8]  }
  0xc3   : > { %p11438_p2 = scmp.ne.s32.totalorder %s12057_s6, %s11437_s11  ;;  %s11442_s19 = sshll.u32 %s11658_s14, 4  ;;  %s11443_s19 = int_to_ptr.vmem [resolvable:$false] %s11442_s19 }
  0xc4   : > { %s11444_s0 = scalar_lea.vmem %s11443_s19, 2048  ;;  %p11445_p1 = scmp.lt.s32.totalorder %s12057_s6, %s11443_s19 }
  0xc5   : > { %p11440_p6 = pnand %p11438_p2, %p11823_p7  ;;  %p11446_p5 = scmp.lt.s32.totalorder %s11444_s0, %s11437_s11 }
  0xc7   : > { %p11441_p12 = pneg %p11440_p6  ;;  %p11447_p3 = por %p11446_p5, %p11445_p1 }
  0xc9   : > { %p11448_p0 = pnand %p11447_p3, %p11441_p12 }
  0xcb   : > { %11451 = shalt.err (!%p11448_p0)
}
  0xcc   : > { %p16303_p10 = scmp.ne.s32.totalorder %s16272_s18, 0  ;;  %s16304_s28 = smov 4  }
  0xcd   : > { %s16305_s27 = smov 64   ;;  %s16306_s21 = scalar_lea.sflag [#allocation7], %s11798_s15 }
  0xce   : > { %10293 = dma.hbm_to_vmem [thread:$0]  (!%p16303_p10), %s12021_s5, 1024, %s12057_s6, %s16306_s21, %s16305_s27, %s16305_s27, %s16304_s28  }
  0xcf   : > { %s8893_s22 = sshll.u32 %s11638_s29, 5  ;;  %s524_s17 = scalar_lea.vmem [#allocation11], %s8657_s8 }
  0xd0   : > { %s532_s3 = sshll.u32 %s524_s17, 4  ;;  %s16307_s9 = sld [smem:[#allocation121_spill]]  ;;  %s533_s3 = int_to_ptr.vmem [resolvable:$true] %s532_s3 }
  0xd6   : > { %s530_s26 = scalar_lea.hbm %s16307_s9, %s8893_s22  ;;  %s11457_s0 = scalar_lea.hbm %s16307_s9, 64 }
  0xd7   : > { %s11452_s11 = scalar_lea.hbm %s530_s26, 32  ;;  %p11458_p11 = scmp.lt.u32.totalorder %s530_s26, %s16307_s9 }
  0xd8   : > { %p11453_p9 = scmp.ne.s32.totalorder %s530_s26, %s11452_s11  ;;  %p11459_p4 = scmp.lt.u32.totalorder %s11457_s0, %s11452_s11 }
  0xd9   : > { %p11461_p6 = scmp.lt.u32.totalorder %s11452_s11, %s530_s26 }
  0xda   : > { %p11455_p13 = pnand %p11453_p9, %p11823_p7  ;;  %p11460_p2 = por %p11459_p4, %p11458_p11 }
  0xdc   : > { %p11456_p8 = pneg %p11455_p13  ;;  %p11462_p12 = por %p11461_p6, %p11460_p2 }
  0xde   : > { %p11463_p1 = pnand %p11462_p12, %p11456_p8 }
  0xe0   : > { %11466 = shalt.err (!%p11463_p1)
}
  0xe1   : > { %s11467_s6 = scalar_lea.vmem %s533_s3, 32  ;;  %s11659_s8 = smov [#allocation11]  }
  0xe2   : > { %p11468_p5 = scmp.ne.s32.totalorder %s533_s3, %s11467_s6  ;;  %s11472_s28 = sshll.u32 %s11659_s8, 4  ;;  %s11473_s28 = int_to_ptr.vmem [resolvable:$false] %s11472_s28 }
  0xe3   : > { %s11474_s27 = scalar_lea.vmem %s11473_s28, 64  ;;  %p11475_p9 = scmp.lt.s32.totalorder %s533_s3, %s11473_s28 }
  0xe4   : > { %p11470_p3 = pnand %p11468_p5, %p11823_p7  ;;  %p11476_p13 = scmp.lt.s32.totalorder %s11474_s27, %s11467_s6 }
  0xe6   : > { %p11471_p0 = pneg %p11470_p3  ;;  %p11477_p10 = por %p11476_p13, %p11475_p9 }
  0xe8   : > { %p11478_p4 = pnand %p11477_p10, %p11471_p0 }
  0xea   : > { %11481 = shalt.err (!%p11478_p4)
}
  0xeb   : > { %p16308_p11 = scmp.ne.s32.totalorder %s16272_s18, 0  ;;  %s16309_s4 = scalar_lea.sflag [#allocation10], %s11798_s15 }
  0xec   : > { %s8663_s21 = sshll.u32 %s11638_s29, 4  ;;  %s16310_s30 = sld [smem:[#allocation123_spill]] }
  0xed   : > { %10299 = dma.hbm_to_vmem [thread:$0]  (!%p16308_p11), %s530_s26, 32, %s533_s3, %s16309_s4  }
  0xee   : > { %s563_s14 = scalar_lea.vmem [#allocation14], %s11801_s16 }
  0xef   : > { %s570_s19 = sshll.u32 %s563_s14, 4  ;;  %s571_s19 = int_to_ptr.vmem [resolvable:$true] %s570_s19 }
  0xf2   : > { %s16311_s1 = smov %s16310_s30  ;;  %s12109_s11 = scalar_lea.hbm %s16310_s30, %s8663_s21 }
  0xf3   : > { %s11482_s0 = scalar_lea.hbm %s12109_s11, 16  ;;  %s11487_s26 = scalar_lea.hbm %s16311_s1, 32 }
  0xf4   : > { %p11483_p10 = scmp.ne.s32.totalorder %s12109_s11, %s11482_s0  ;;  %p11488_p6 = scmp.lt.u32.totalorder %s12109_s11, %s16311_s1 }
  0xf5   : > { %p11489_p12 = scmp.lt.u32.totalorder %s11487_s26, %s11482_s0  ;;  %p11491_p5 = scmp.lt.u32.totalorder %s11482_s0, %s12109_s11 }
  0xf6   : > { %p11485_p8 = pnand %p11483_p10, %p11823_p7 }
  0xf7   : > { %p11490_p1 = por %p11489_p12, %p11488_p6 }
  0xf8   : > { %p11486_p2 = pneg %p11485_p8 }
  0xf9   : > { %p11492_p3 = por %p11491_p5, %p11490_p1 }
  0xfb   : > { %p11493_p0 = pnand %p11492_p3, %p11486_p2 }
  0xfd   : > { %11496 = shalt.err (!%p11493_p0)
}
  0xfe   : > { %s11497_s16 = scalar_lea.vmem %s571_s19, 16  ;;  %s11660_s28 = smov [#allocation14]  }
  0xff   : > { %p11498_p9 = scmp.ne.s32.totalorder %s571_s19, %s11497_s16  ;;  %s11502_s27 = sshll.u32 %s11660_s28, 4  ;;  %s11503_s27 = int_to_ptr.vmem [resolvable:$false] %s11502_s27 }
 0x100   : > { %s11504_s4 = scalar_lea.vmem %s11503_s27, 32  ;;  %p11505_p10 = scmp.lt.s32.totalorder %s571_s19, %s11503_s27 }
 0x101   : > { %p11500_p13 = pnand %p11498_p9, %p11823_p7  ;;  %p11506_p8 = scmp.lt.s32.totalorder %s11504_s4, %s11497_s16 }
 0x103   : > { %p11501_p4 = pneg %p11500_p13  ;;  %p11507_p11 = por %p11506_p8, %p11505_p10 }
 0x105   : > { %p11508_p6 = pnand %p11507_p11, %p11501_p4 }
 0x107   : > { %11511 = shalt.err (!%p11508_p6)
}
 0x108   : > { %p16312_p12 = scmp.ne.s32.totalorder %s16272_s18, 0  ;;  %s16313_s21 = scalar_lea.sflag [#allocation13], %s11798_s15 }
 0x109   : > { %s16314_s22 = sld [smem:[#allocation29_spill]] }
 0x10a   : > { %10305 = dma.hbm_to_vmem [thread:$0]  (!%p16312_p12), %s12109_s11, 16, %s571_s19, %s16313_s21  }
 0x10f   : > { %p16315_p2 = scmp.ne.s32.totalorder %s16314_s22, 0 }
 0x111   : > { %579 = sbr.rel (%p16315_p2) target bundleno = 4666 (0x123a), region = 68 }
 0x118   : > { %s12134_s2 = sand.u32 1, %s11622_s25   ;;  %p16316_p7 = scmp.ne.s32.totalorder %s16285_s12, 0 }
 0x119   : > { %s16132_s17 = sshll.u32 %s12134_s2, 8  ;;  %s582_s30 = scalar_lea.sflag [#allocation4], %s12134_s2 }
 0x11a   : > { %s12140_s14 = scalar_lea.vmem [#allocation3], %s16132_s17 }
 0x11b   : > { %11585 = dma.done.wait (%p16316_p7), %s582_s30, 4096  }
 0x11c   : > { %11587 = vsyncadd (%p16316_p7), %s582_s30, 4294963200  ;;  %s16317_s15 = sld [smem:[#allocation21_spill]]  ;;  %s16318_s18 = sld [smem:[#allocation32_spill]] }
 0x11d   : > { %s590_s11 = sand.u32 1, %s11933_s7  }
 0x11e   : > { %s591_s5 = scalar_lea.sflag [#allocation7], %s590_s11 }
 0x122   : > { %s12148_s19 = sand.u32 1, %s16317_s15   ;;  %p16319_p11 = scmp.ne.s32.totalorder %s16318_s18, 0 }
 0x123   : > { %s10267_s0 = smul.u32 192, %s12148_s19 }
 0x125   : > { %s12151_s3 = scalar_lea.vmem [#allocation6], %s10267_s0 }
 0x126   : > { %11589 = dma.done.wait (%p16319_p11), %s591_s5, 4096  }
 0x127   : > { %11591 = vsyncadd (%p16319_p11), %s591_s5, 4294963200  ;;  %s8666_s12 = sshll.u32 %s12148_s19, 6  ;;  %s8667_s26 = sshll.u32 %s12148_s19, 7 }
 0x128   : > { %s12159_s6 = scalar_lea.vmem [#allocation8], %s8666_s12  ;;  %s609_s7 = scalar_lea.sflag [#allocation10], %s590_s11 }
 0x129   : > { %s12161_s8 = scalar_lea.vmem [#allocation9], %s8667_s26 }
 0x12a   : > { %11593 = dma.done.wait (%p16319_p11), %s609_s7, 2080  }
 0x12b   : > { %11595 = vsyncadd (%p16319_p11), %s609_s7, 4294965216  ;;  %s8668_s16 = sshll.u32 %s12148_s19, 1  ;;  %s627_s27 = scalar_lea.sflag [#allocation13], %s590_s11 }
 0x12c   : > { %s12168_s28 = scalar_lea.vmem [#allocation11], %s8668_s16  ;;  %s12170_s4 = scalar_lea.vmem [#allocation12], %s8667_s26 }
 0x12d   : > { %11597 = dma.done.wait (%p16319_p11), %s627_s27, 2064  }
 0x12e   : > { %11599 = vsyncadd (%p16319_p11), %s627_s27, 4294965232  ;;  %s16320_s21 = sld [smem:[#allocation25_spill]]  ;;  %s16322_s18 = sld [smem:[#allocation114_spill]] }
 0x12f   : > { %s16323_s27 = sld [smem:[#allocation117_spill]]  ;;  %s16324_s29 = sld [smem:[#allocation118_spill]] }
 0x130   : > { %s16325_s15 = sld [smem:[#allocation119_spill]]  ;;  %s638_s10 = scalar_lea.vmem [#allocation14], %s12148_s19 }
 0x131   : > { %s16326_s0 = sshll.u32 %s12134_s2, 8 }
 0x132   : > { %s12207_s11 = scalar_lea.vmem [#allocation15], %s16326_s0 }
 0x134   : > { %p724_p1 = scmp.lt.s32.totalorder %s16320_s21, 1  ;;  %p8671_p5 = scmp.ne.s32.totalorder %s16320_s21, 0 }
 0x135   : > { %v745_v0 = vld [vmem:[%s12140_s14] sm:$0xff] (!%p8671_p5)  ;;  %v746_v1 = vld [vmem:[%s12140_s14 + $0x8] sm:$0xff] (!%p8671_p5)  ;;  %v747_v2 = vld [vmem:[%s12140_s14 + $0x10] sm:$0xff] (!%p8671_p5) }
 0x136   : > { %s12178_s22 = scalar_select %p724_p1, %s16320_s21, 1 }
 0x137   : > { %744 = sbr.rel (%p8671_p5) target bundleno = 327 (0x147), region = 100  ;;  %777 = vst [vmem:[#allocation2] sm:$0xff] (!%p8671_p5), %v745_v0  ;;  %778 = vst [vmem:[#allocation2 + $0x8] sm:$0xff] (!%p8671_p5), %v746_v1  ;;  %v748_v3 = vld [vmem:[%s12140_s14 + $0x18] sm:$0xff] (!%p8671_p5)  ;;  %v749_v4 = vld [vmem:[%s12140_s14 + $0x20] sm:$0xff] (!%p8671_p5) }
 0x138   : > { %s729_s26 = scalar_lea.vmem %s16322_s18, %s12178_s22  ;;  %s732_s17 = scalar_lea.vmem %s16323_s27, %s12178_s22  ;;  %779 = vst [vmem:[#allocation2 + $0x10] sm:$0xff] (!%p8671_p5), %v747_v2  ;;  %v750_v5 = vld [vmem:[%s12140_s14 + $0x28] sm:$0xff] (!%p8671_p5)  ;;  %780 = vst [vmem:[#allocation2 + $0x18] sm:$0xff] (!%p8671_p5), %v748_v3  ;;  %v751_v6 = vld [vmem:[%s12140_s14 + $0x30] sm:$0xff] (!%p8671_p5) }
 0x139   : > { %s12196_s25 = scalar_lea.vmem %s16324_s29, %s12178_s22  ;;  %s12202_s23 = scalar_lea.vmem %s16325_s15, %s12178_s22  ;;  %781 = vst [vmem:[#allocation2 + $0x20] sm:$0xff] (!%p8671_p5), %v749_v4  ;;  %782 = vst [vmem:[#allocation2 + $0x28] sm:$0xff] (!%p8671_p5), %v750_v5  ;;  %v752_v7 = vld [vmem:[%s12140_s14 + $0x38] sm:$0xff] (!%p8671_p5)  ;;  %v753_v8 = vld [vmem:[%s12140_s14 + $0x40] sm:$0xff] (!%p8671_p5) }
 0x13a   : > { %783 = vst [vmem:[#allocation2 + $0x30] sm:$0xff] (!%p8671_p5), %v751_v6  ;;  %784 = vst [vmem:[#allocation2 + $0x38] sm:$0xff] (!%p8671_p5), %v752_v7  ;;  %v754_v9 = vld [vmem:[%s12140_s14 + $0x48] sm:$0xff] (!%p8671_p5)  ;;  %v755_v10 = vld [vmem:[%s12140_s14 + $0x50] sm:$0xff] (!%p8671_p5) }
 0x13b   : > { %785 = vst [vmem:[#allocation2 + $0x40] sm:$0xff] (!%p8671_p5), %v753_v8  ;;  %v756_v11 = vld [vmem:[%s12140_s14 + $0x58] sm:$0xff] (!%p8671_p5)  ;;  %786 = vst [vmem:[#allocation2 + $0x48] sm:$0xff] (!%p8671_p5), %v754_v9  ;;  %v757_v12 = vld [vmem:[%s12140_s14 + $0x60] sm:$0xff] (!%p8671_p5) }
 0x13c   : > { %787 = vst [vmem:[#allocation2 + $0x50] sm:$0xff] (!%p8671_p5), %v755_v10  ;;  %788 = vst [vmem:[#allocation2 + $0x58] sm:$0xff] (!%p8671_p5), %v756_v11  ;;  %v758_v13 = vld [vmem:[%s12140_s14 + $0x68] sm:$0xff] (!%p8671_p5)  ;;  %v759_v14 = vld [vmem:[%s12140_s14 + $0x70] sm:$0xff] (!%p8671_p5) }
 0x13d   : > { %789 = vst [vmem:[#allocation2 + $0x60] sm:$0xff] (!%p8671_p5), %v757_v12  ;;  %790 = vst [vmem:[#allocation2 + $0x68] sm:$0xff] (!%p8671_p5), %v758_v13  ;;  %v760_v15 = vld [vmem:[%s12140_s14 + $0x78] sm:$0xff] (!%p8671_p5)  ;;  %v761_v16 = vld [vmem:[%s12140_s14 + $0x80] sm:$0xff] (!%p8671_p5) }
 0x13e   : > { %791 = vst [vmem:[#allocation2 + $0x70] sm:$0xff] %v759_v14  ;;  %v762_v17 = vld [vmem:[%s12140_s14 + $0x88] sm:$0xff]  ;;  %792 = vst [vmem:[#allocation2 + $0x78] sm:$0xff] %v760_v15  ;;  %v763_v18 = vld [vmem:[%s12140_s14 + $0x90] sm:$0xff] }
 0x13f   : > { %793 = vst [vmem:[#allocation2 + $0x80] sm:$0xff] %v761_v16  ;;  %794 = vst [vmem:[#allocation2 + $0x88] sm:$0xff] %v762_v17  ;;  %v764_v19 = vld [vmem:[%s12140_s14 + $0x98] sm:$0xff]  ;;  %v765_v20 = vld [vmem:[%s12140_s14 + $0xa0] sm:$0xff] }
 0x140   : > { %795 = vst [vmem:[#allocation2 + $0x90] sm:$0xff] %v763_v18  ;;  %796 = vst [vmem:[#allocation2 + $0x98] sm:$0xff] %v764_v19  ;;  %v766_v21 = vld [vmem:[%s12140_s14 + $0xa8] sm:$0xff]  ;;  %v767_v22 = vld [vmem:[%s12140_s14 + $0xb0] sm:$0xff] }
 0x141   : > { %797 = vst [vmem:[#allocation2 + $0xa0] sm:$0xff] %v765_v20  ;;  %v768_v23 = vld [vmem:[%s12140_s14 + $0xb8] sm:$0xff]  ;;  %798 = vst [vmem:[#allocation2 + $0xa8] sm:$0xff] %v766_v21  ;;  %v769_v24 = vld [vmem:[%s12140_s14 + $0xc0] sm:$0xff] }
 0x142   : > { %799 = vst [vmem:[#allocation2 + $0xb0] sm:$0xff] %v767_v22  ;;  %800 = vst [vmem:[#allocation2 + $0xb8] sm:$0xff] %v768_v23  ;;  %v770_v25 = vld [vmem:[%s12140_s14 + $0xc8] sm:$0xff]  ;;  %v771_v26 = vld [vmem:[%s12140_s14 + $0xd0] sm:$0xff] }
 0x143   : > { %801 = vst [vmem:[#allocation2 + $0xc0] sm:$0xff] %v769_v24  ;;  %802 = vst [vmem:[#allocation2 + $0xc8] sm:$0xff] %v770_v25  ;;  %v772_v27 = vld [vmem:[%s12140_s14 + $0xd8] sm:$0xff]  ;;  %v773_v28 = vld [vmem:[%s12140_s14 + $0xe0] sm:$0xff] }
 0x144   : > { %803 = vst [vmem:[#allocation2 + $0xd0] sm:$0xff] %v771_v26  ;;  %v774_v29 = vld [vmem:[%s12140_s14 + $0xe8] sm:$0xff]  ;;  %804 = vst [vmem:[#allocation2 + $0xd8] sm:$0xff] %v772_v27  ;;  %v775_v30 = vld [vmem:[%s12140_s14 + $0xf0] sm:$0xff] }
 0x145   : > { %805 = vst [vmem:[#allocation2 + $0xe0] sm:$0xff] %v773_v28  ;;  %806 = vst [vmem:[#allocation2 + $0xe8] sm:$0xff] %v774_v29  ;;  %v776_v31 = vld [vmem:[%s12140_s14 + $0xf8] sm:$0xff] }
 0x146   : > { %807 = vst [vmem:[#allocation2 + $0xf0] sm:$0xff] %v775_v30  ;;  %808 = vst [vmem:[#allocation2 + $0xf8] sm:$0xff] %v776_v31 }
 0x147 PF: > { %v809_v32 = vld [vmem:[#allocation2] sm:$0xff]  ;;  %v810_v34 = vld [vmem:[#allocation2 + $0x8] sm:$0xff]  ;;  %s16327_s20 = sld [smem:[#allocation113_spill]]  ;;  %vm1850_vm0 = vcmask 261120   ;;  %s11663_s12 = smov 64  }
 0x148   : > { %v811_v33 = vld [vmem:[#allocation2 + $0x10] sm:$0xff]  ;;  %843 = vadd.xlane.f32.xlu0 %v809_v32  ;;  %v812_v35 = vld [vmem:[#allocation2 + $0x18] sm:$0xff]  ;;  %v10414_v49 = vld [vmem:[%s12151_s3] ss:$12 sps:$4 sm:$0xff]   ;;  %s11664_s18 = smov 32  }
 0x149   : > { %847 = vadd.xlane.f32.xlu1 %v811_v33  ;;  %v813_v36 = vld [vmem:[#allocation2 + $0x20] sm:$0xff]  ;;  %v814_v37 = vld [vmem:[#allocation2 + $0x28] sm:$0xff] }
 0x14a   : > { %v12242_v38 = vld [vmem:[#allocation2 + $0x30] sm:$0xff]  ;;  %v12244_v39 = vld [vmem:[#allocation2 + $0x38] sm:$0xff] }
 0x14b   : > { %v12246_v40 = vld [vmem:[#allocation2 + $0x40] sm:$0xff]  ;;  %v12248_v41 = vld [vmem:[#allocation2 + $0x48] sm:$0xff] }
 0x14c   : > { %845 = vadd.xlane.f32.xlu0 %v810_v34  ;;  %v12252_v42 = vld [vmem:[#allocation2 + $0x50] sm:$0xff]  ;;  %v12254_v43 = vld [vmem:[#allocation2 + $0x58] sm:$0xff] }
 0x14d   : > { %849 = vadd.xlane.f32.xlu1 %v812_v35  ;;  %v12258_v44 = vld [vmem:[#allocation2 + $0x60] sm:$0xff]  ;;  %v12260_v45 = vld [vmem:[#allocation2 + $0x68] sm:$0xff]  ;;  %s16328_s1 = scalar_lea.vmem %s16327_s20, %s12178_s22 }
 0x14e   : > { %v12264_v46 = vld [vmem:[#allocation2 + $0x70] sm:$0xff]  ;;  %v12266_v47 = vld [vmem:[#allocation2 + $0x78] sm:$0xff] }
 0x14f   : > { %v10412_v48 = vld [vmem:[%s12151_s3 + $0x4] ss:$12 sps:$4 sm:$0xff]   ;;  %v10415_v50 = vld [vmem:[%s12151_s3 + $0x1c] ss:$12 sps:$4 sm:$0xff]   ;;  %v10418_v31 = vld [vmem:[%s12151_s3 + $0x34] ss:$12 sps:$4 sm:$0xff]  }
 0x150   : > { %851 = vadd.xlane.f32.xlu0 %v813_v36  ;;  %1448 = vmatprep.subr.bf16.mxu0 %v10412_v48  ;;  %v10417_v25 = vld [vmem:[%s12151_s3 + $0x18] ss:$12 sps:$4 sm:$0xff]  }
 0x151   : > { %853 = vadd.xlane.f32.xlu1 %v814_v37  ;;  %10089 = vmatprep.subr.bf16.mxu1 %v10412_v48  ;;  %v10421_v48 = vld [vmem:[%s12151_s3 + $0x4c] ss:$12 sps:$4 sm:$0xff]  }
 0x152   : > { %1449 = vmatpush1.bf16.msra.mxu0 %v10414_v49  ;;  %10097 = vmatpush1.bf16.msra.mxu1 %v10414_v49 }
 0x153   : > { %1450 = vmatprep.subr.bf16.mxu0 %v10415_v50  ;;  %10090 = vmatprep.subr.bf16.mxu1 %v10415_v50 }
 0x154   : > { %855 = vadd.xlane.f32.xlu0 %v12242_v38 }
 0x155   : > { %857 = vadd.xlane.f32.xlu1 %v12244_v39 }
 0x156   : > { %1451 = vmatpush1.bf16.msra.mxu0 %v10417_v25  ;;  %10098 = vmatpush1.bf16.msra.mxu1 %v10417_v25  ;;  %v12405_v25 = vld [vmem:[#allocation2 + $0xb0] sm:$0xff] }
 0x157   : > { %1452 = vmatprep.subr.bf16.mxu0 %v10418_v31  ;;  %10091 = vmatprep.subr.bf16.mxu1 %v10418_v31 }
 0x158   : > { %859 = vadd.xlane.f32.xlu0 %v12246_v40 }
 0x159   : > { %861 = vadd.xlane.f32.xlu1 %v12248_v41 }
 0x15c   : > { %863 = vadd.xlane.f32.xlu0 %v12252_v42 }
 0x15d   : > { %865 = vadd.xlane.f32.xlu1 %v12254_v43 }
 0x160   : > { %867 = vadd.xlane.f32.xlu0 %v12258_v44 }
 0x161   : > { %869 = vadd.xlane.f32.xlu1 %v12260_v45 }
 0x164   : > { %871 = vadd.xlane.f32.xlu0 %v12264_v46 }
 0x165   : > { %873 = vadd.xlane.f32.xlu1 %v12266_v47 }
 0x1d5   : > { %v844_v51 = vpop.xlane.xlu0 %843 }
 0x1d6   : > { %v848_v52 = vpop.xlane.xlu1 %847  ;;  %v908_v53 = vmul.f32 0.0078125, %v844_v51  ;;  %v10423_v51 = vld [vmem:[%s12151_s3 + $0x48] ss:$12 sps:$4 sm:$0xff]  }
 0x1d7   : > { %v910_v54 = vmul.f32 0.0078125, %v848_v52 }
 0x1d8   : > { %v12275_v55 = vsub.f32 %v809_v32, %v908_v53 }
 0x1d9   : > { %v12277_v56 = vsub.f32 %v811_v33, %v910_v54  ;;  %v846_v57 = vpop.xlane.xlu0 %845 }
 0x1da   : > { %v850_v58 = vpop.xlane.xlu1 %849  ;;  %v909_v59 = vmul.f32 0.0078125, %v846_v57  ;;  %v972_v60 = vmul.f32 %v12275_v55, %v12275_v55 }
 0x1db   : > { %v911_v61 = vmul.f32 0.0078125, %v850_v58  ;;  %v974_v62 = vmul.f32 %v12277_v56, %v12277_v56  ;;  %v10424_v58 = vld [vmem:[%s12151_s3 + $0x64] ss:$12 sps:$4 sm:$0xff]  }
 0x1dc   : > { %1004 = vadd.xlane.f32.xlu0 %v972_v60  ;;  %v12283_v63 = vsub.f32 %v810_v34, %v909_v59  ;;  %v10426_v59 = vld [vmem:[%s12151_s3 + $0x60] ss:$12 sps:$4 sm:$0xff]  }
 0x1dd   : > { %v12285_v0 = vsub.f32 %v812_v35, %v911_v61  ;;  %v852_v1 = vpop.xlane.xlu0 %851  ;;  %v10427_v61 = vld [vmem:[%s12151_s3 + $0x7c] ss:$12 sps:$4 sm:$0xff]  }
 0x1de   : > { %v854_v2 = vpop.xlane.xlu1 %853  ;;  %v912_v3 = vmul.f32 0.0078125, %v852_v1  ;;  %v973_v4 = vmul.f32 %v12283_v63, %v12283_v63  ;;  %v10430_v1 = vld [vmem:[%s12151_s3 + $0x94] ss:$12 sps:$4 sm:$0xff]  }
 0x1df   : > { %v913_v5 = vmul.f32 0.0078125, %v854_v2  ;;  %v975_v6 = vmul.f32 %v12285_v0, %v12285_v0  ;;  %v12362_v2 = vld [vmem:[#allocation2 + $0xc8] sm:$0xff] }
 0x1e0   : > { %1008 = vadd.xlane.f32.xlu0 %v974_v62  ;;  %1006 = vadd.xlane.f32.xlu1 %v973_v4  ;;  %v12291_v7 = vsub.f32 %v813_v36, %v912_v3  ;;  %v12357_v62 = vld [vmem:[#allocation2 + $0xc0] sm:$0xff]  ;;  %v12364_v3 = vld [vmem:[#allocation2 + $0xd0] sm:$0xff] }
 0x1e1   : > { %v12293_v8 = vsub.f32 %v814_v37, %v913_v5  ;;  %v856_v9 = vpop.xlane.xlu0 %855  ;;  %v10420_v37 = vld [vmem:[%s12151_s3 + $0x30] ss:$12 sps:$4 sm:$0xff]   ;;  %v10433_v5 = vld [vmem:[%s12151_s3 + $0xac] ss:$12 sps:$4 sm:$0xff]  }
 0x1e2   : > { %v858_v10 = vpop.xlane.xlu1 %857  ;;  %v914_v11 = vmul.f32 0.0078125, %v856_v9  ;;  %v976_v12 = vmul.f32 %v12291_v7, %v12291_v7  ;;  %1453 = vmatpush1.bf16.msra.mxu0 %v10420_v37  ;;  %10099 = vmatpush1.bf16.msra.mxu1 %v10420_v37  ;;  %v10432_v4 = vld [vmem:[%s12151_s3 + $0x90] ss:$12 sps:$4 sm:$0xff]   ;;  %v12372_v9 = vld [vmem:[#allocation2 + $0xe0] sm:$0xff] }
 0x1e3   : > { %v915_v13 = vmul.f32 0.0078125, %v858_v10  ;;  %v977_v14 = vmul.f32 %v12293_v8, %v12293_v8  ;;  %1454 = vmatprep.subr.bf16.mxu0 %v10421_v48  ;;  %10092 = vmatprep.subr.bf16.mxu1 %v10421_v48  ;;  %v10435_v10 = vld [vmem:[%s12151_s3 + $0xa8] ss:$12 sps:$4 sm:$0xff]  }
 0x1e4   : > { %1010 = vadd.xlane.f32.xlu1 %v975_v6  ;;  %1012 = vadd.xlane.f32.xlu0 %v976_v12  ;;  %v12300_v15 = vsub.f32 %v12242_v38, %v914_v11  ;;  %v12370_v6 = vld [vmem:[#allocation2 + $0xd8] sm:$0xff]  ;;  %v12377_v11 = vld [vmem:[#allocation2 + $0xe8] sm:$0xff]  ;;  %v12379_v12 = vld [vmem:[#allocation2 + $0xf0] sm:$0xff] }
 0x1e5   : > { %v12303_v16 = vsub.f32 %v12244_v39, %v915_v13  ;;  %v860_v17 = vpop.xlane.xlu0 %859  ;;  %v16138_v13 = vmov 0  }
 0x1e6   : > { %v862_v18 = vpop.xlane.xlu1 %861  ;;  %v916_v19 = vmul.f32 0.0078125, %v860_v17  ;;  %v978_v20 = vmul.f32 %v12300_v15, %v12300_v15  ;;  %1455 = vmatpush1.bf16.msra.mxu0 %v10423_v51  ;;  %10100 = vmatpush1.bf16.msra.mxu1 %v10423_v51  ;;  %v12387_v17 = vld [vmem:[#allocation2 + $0x80] sm:$0xff] }
 0x1e7   : > { %v917_v21 = vmul.f32 0.0078125, %v862_v18  ;;  %v979_v22 = vmul.f32 %v12303_v16, %v12303_v16  ;;  %1456 = vmatprep.subr.bf16.mxu0 %v10424_v58  ;;  %10093 = vmatprep.subr.bf16.mxu1 %v10424_v58  ;;  %v12391_v18 = vld [vmem:[#allocation2 + $0x88] sm:$0xff] }
 0x1e8   : > { %1014 = vadd.xlane.f32.xlu1 %v977_v14  ;;  %1016 = vadd.xlane.f32.xlu0 %v978_v20  ;;  %v12310_v23 = vsub.f32 %v12246_v40, %v916_v19  ;;  %v12385_v14 = vld [vmem:[#allocation2 + $0xf8] sm:$0xff]  ;;  %v12393_v19 = vld [vmem:[#allocation2 + $0x90] sm:$0xff] }
 0x1e9   : > { %v12313_v24 = vsub.f32 %v12248_v41, %v917_v21  ;;  %v864_v26 = vpop.xlane.xlu0 %863  ;;  %1480 = vmatprep.mubr.bf16.mxu0 %v16138_v13  ;;  %1600 = vmatprep.mubr.bf16.mxu1 %v16138_v13  ;;  %v12397_v20 = vld [vmem:[#allocation2 + $0x98] sm:$0xff]  ;;  %v12399_v21 = vld [vmem:[#allocation2 + $0xa0] sm:$0xff] }
 0x1ea   : > { %v866_v27 = vpop.xlane.xlu1 %865  ;;  %v918_v28 = vmul.f32 0.0078125, %v864_v26  ;;  %v980_v29 = vmul.f32 %v12310_v23, %v12310_v23  ;;  %1457 = vmatpush1.bf16.msra.mxu0 %v10426_v59  ;;  %10101 = vmatpush1.bf16.msra.mxu1 %v10426_v59  ;;  %v12409_v26 = vld [vmem:[#allocation2 + $0xb8] sm:$0xff] }
 0x1eb   : > { %v919_v30 = vmul.f32 0.0078125, %v866_v27  ;;  %v981_v32 = vmul.f32 %v12313_v24, %v12313_v24  ;;  %1458 = vmatprep.subr.bf16.mxu0 %v10427_v61  ;;  %10094 = vmatprep.subr.bf16.mxu1 %v10427_v61 }
 0x1ec   : > { %1018 = vadd.xlane.f32.xlu1 %v979_v22  ;;  %1020 = vadd.xlane.f32.xlu0 %v980_v29  ;;  %v12322_v33 = vsub.f32 %v12252_v42, %v918_v28  ;;  %v12403_v22 = vld [vmem:[#allocation2 + $0xa8] sm:$0xff] }
 0x1ed   : > { %v12325_v34 = vsub.f32 %v12254_v43, %v919_v30  ;;  %v868_v35 = vpop.xlane.xlu0 %867 }
 0x1ee   : > { %v870_v36 = vpop.xlane.xlu1 %869  ;;  %v920_v38 = vmul.f32 0.0078125, %v868_v35  ;;  %v982_v39 = vmul.f32 %v12322_v33, %v12322_v33 }
 0x1ef   : > { %v921_v40 = vmul.f32 0.0078125, %v870_v36  ;;  %v983_v41 = vmul.f32 %v12325_v34, %v12325_v34 }
 0x1f0   : > { %1022 = vadd.xlane.f32.xlu1 %v981_v32  ;;  %1024 = vadd.xlane.f32.xlu0 %v982_v39  ;;  %v12333_v42 = vsub.f32 %v12258_v44, %v920_v38 }
 0x1f1   : > { %v12336_v43 = vsub.f32 %v12260_v45, %v921_v40  ;;  %v872_v49 = vpop.xlane.xlu0 %871 }
 0x1f2   : > { %v874_v50 = vpop.xlane.xlu1 %873  ;;  %v922_v52 = vmul.f32 0.0078125, %v872_v49  ;;  %v984_v53 = vmul.f32 %v12333_v42, %v12333_v42 }
 0x1f3   : > { %v923_v54 = vmul.f32 0.0078125, %v874_v50  ;;  %v985_v44 = vmul.f32 %v12336_v43, %v12336_v43 }
 0x1f4   : > { %1026 = vadd.xlane.f32.xlu1 %v983_v41  ;;  %1028 = vadd.xlane.f32.xlu0 %v984_v53  ;;  %v12345_v45 = vsub.f32 %v12264_v46, %v922_v52 }
 0x1f5   : > { %v12348_v57 = vsub.f32 %v12266_v47, %v923_v54  ;;  %v10429_v47 = vld [vmem:[%s12151_s3 + $0x78] ss:$12 sps:$4 sm:$0xff]  }
 0x1f6   : > { %v986_v60 = vmul.f32 %v12345_v45, %v12345_v45  ;;  %1459 = vmatpush1.bf16.msra.mxu0 %v10429_v47  ;;  %10102 = vmatpush1.bf16.msra.mxu1 %v10429_v47 }
 0x1f7   : > { %v987_v46 = vmul.f32 %v12348_v57, %v12348_v57  ;;  %1460 = vmatprep.subr.bf16.mxu0 %v10430_v1  ;;  %10095 = vmatprep.subr.bf16.mxu1 %v10430_v1 }
 0x1f8   : > { %1030 = vadd.xlane.f32.xlu1 %v985_v44  ;;  %1032 = vadd.xlane.f32.xlu0 %v986_v60 }
 0x1fa   : > { %1461 = vmatpush1.bf16.msra.mxu0 %v10432_v4  ;;  %10103 = vmatpush1.bf16.msra.mxu1 %v10432_v4 }
 0x1fb   : > { %1462 = vmatprep.subr.bf16.mxu0 %v10433_v5  ;;  %10096 = vmatprep.subr.bf16.mxu1 %v10433_v5 }
 0x1fc   : > { %1034 = vadd.xlane.f32.xlu1 %v987_v46  ;;  %891 = vadd.xlane.f32.xlu0 %v12357_v62  ;;  %v12418_v46 = vld [vmem:[%s16328_s1] ss:$0 sm:$0xff] }
 0x1fe   : > { %1463 = vmatpush1.bf16.msra.mxu0 %v10435_v10  ;;  %10104 = vmatpush1.bf16.msra.mxu1 %v10435_v10 }
 0x200   : > { %893 = vadd.xlane.f32.xlu1 %v12362_v2  ;;  %895 = vadd.xlane.f32.xlu0 %v12364_v3 }
 0x204   : > { %897 = vadd.xlane.f32.xlu1 %v12370_v6  ;;  %899 = vadd.xlane.f32.xlu0 %v12372_v9 }
 0x208   : > { %901 = vadd.xlane.f32.xlu1 %v12377_v11  ;;  %903 = vadd.xlane.f32.xlu0 %v12379_v12 }
 0x20c   : > { %905 = vadd.xlane.f32.xlu1 %v12385_v14  ;;  %875 = vadd.xlane.f32.xlu0 %v12387_v17 }
 0x210   : > { %877 = vadd.xlane.f32.xlu1 %v12391_v18  ;;  %879 = vadd.xlane.f32.xlu0 %v12393_v19 }
 0x214   : > { %881 = vadd.xlane.f32.xlu1 %v12397_v20  ;;  %883 = vadd.xlane.f32.xlu0 %v12399_v21 }
 0x218   : > { %885 = vadd.xlane.f32.xlu1 %v12403_v22  ;;  %887 = vadd.xlane.f32.xlu0 %v12405_v25 }
 0x21c   : > { %889 = vadd.xlane.f32.xlu1 %v12409_v26 }
 0x269   : > { %v1005_v27 = vpop.xlane.xlu0 %1004 }
 0x26a   : > { %v1068_v28 = vmul.f32 0.0078125, %v1005_v27 }
 0x26c   : > { %v1100_v29 = vadd.f32 1e-05, %v1068_v28 }
 0x26d   : > { %v1007_v30 = vpop.xlane.xlu1 %1006  ;;  %v1009_v31 = vpop.xlane.xlu0 %1008 }
 0x26e   : > { %10492 = vrsqrt.f32 %v1100_v29  ;;  %v1069_v32 = vmul.f32 0.0078125, %v1007_v30  ;;  %v1070_v35 = vmul.f32 0.0078125, %v1009_v31 }
 0x270   : > { %v1101_v36 = vadd.f32 1e-05, %v1069_v32  ;;  %v1102_v37 = vadd.f32 1e-05, %v1070_v35 }
 0x271   : > { %v1011_v38 = vpop.xlane.xlu1 %1010  ;;  %v1013_v39 = vpop.xlane.xlu0 %1012 }
 0x272   : > { %10494 = vrsqrt.f32 %v1101_v36  ;;  %v1071_v40 = vmul.f32 0.0078125, %v1011_v38  ;;  %v1072_v48 = vmul.f32 0.0078125, %v1013_v39 }
 0x273   : > { %10496 = vrsqrt.f32 %v1102_v37 }
 0x274   : > { %v1103_v41 = vadd.f32 1e-05, %v1071_v40  ;;  %v1104_v53 = vadd.f32 1e-05, %v1072_v48 }
 0x275   : > { %v1015_v49 = vpop.xlane.xlu1 %1014  ;;  %v1017_v50 = vpop.xlane.xlu0 %1016 }
 0x276   : > { %10498 = vrsqrt.f32 %v1103_v41  ;;  %v1073_v51 = vmul.f32 0.0078125, %v1015_v49  ;;  %v1074_v47 = vmul.f32 0.0078125, %v1017_v50 }
 0x278   : > { %v10493_v52 = vpop.eup %10492  ;;  %v1105_v54 = vadd.f32 1e-05, %v1073_v51  ;;  %v1106_v31 = vadd.f32 1e-05, %v1074_v47 }
 0x279   : > { %v1019_v44 = vpop.xlane.xlu1 %1018  ;;  %v1021_v58 = vpop.xlane.xlu0 %1020  ;;  %v1164_v59 = vmul.f32 %v10493_v52, %v12275_v55  ;;  %v12427_v55 = vld [vmem:[%s729_s26] ss:$0 sm:$0xff] }
 0x27a   : > { %10500 = vrsqrt.f32 %v1105_v54  ;;  %v1075_v60 = vmul.f32 0.0078125, %v1019_v44  ;;  %v1076_v49 = vmul.f32 0.0078125, %v1021_v58 }
 0x27b   : > { %10502 = vrsqrt.f32 %v1104_v53  ;;  %v1202_v10 = vmul.f32 %v12418_v46, %v1164_v59 }
 0x27c   : > { %v10495_v61 = vpop.eup %10494  ;;  %v1107_v28 = vadd.f32 1e-05, %v1075_v60  ;;  %v1108_v44 = vadd.f32 1e-05, %v1076_v49 }
 0x27d   : > { %v1023_v1 = vpop.xlane.xlu1 %1022  ;;  %v1025_v4 = vpop.xlane.xlu0 %1024  ;;  %v1165_v5 = vmul.f32 %v10495_v61, %v12283_v63  ;;  %v1240_v36 = vadd.f32 %v12427_v55, %v1202_v10 }
 0x27e   : > { %v10497_v27 = vpop.eup %10496  ;;  %10504 = vrsqrt.f32 %v1107_v28  ;;  %v1077_v39 = vmul.f32 0.0078125, %v1023_v1  ;;  %v1078_v28 = vmul.f32 0.0078125, %v1025_v4 }
 0x27f   : > { %v1203_v29 = vmul.f32 %v12418_v46, %v1165_v5  ;;  %v1166_v37 = vmul.f32 %v10497_v27, %v12277_v56  ;;  %10506 = vrsqrt.f32 %v1106_v31 }
 0x280   : > { %v10499_v30 = vpop.eup %10498  ;;  %v1109_v56 = vadd.f32 1e-05, %v1077_v39 }
 0x281   : > { %v1027_v32 = vpop.xlane.xlu1 %1026  ;;  %v12430_v35 = vpop.xlane.xlu0 %1028  ;;  %v1241_v63 = vadd.f32 %v12427_v55, %v1203_v29  ;;  %v1167_v38 = vmul.f32 %v10499_v30, %v12285_v0  ;;  %v1204_v52 = vmul.f32 %v12418_v46, %v1166_v37 }
 0x282   : > { %v1079_v59 = vmul.f32 0.0078125, %v1027_v32  ;;  %10508 = vrsqrt.f32 %v1109_v56 }
 0x283   : > { %v12436_v40 = vpack.c.bf16 %v1241_v63, %v1240_v36  ;;  %v1205_v41 = vmul.f32 %v12418_v46, %v1167_v38  ;;  %v1242_v61 = vadd.f32 %v12427_v55, %v1204_v52  ;;  %10510 = vrsqrt.f32 %v1108_v44 }
 0x284   : > { %v10501_v48 = vpop.eup %10500  ;;  %v1111_v29 = vadd.f32 1e-05, %v1079_v59  ;;  %v1110_v38 = vadd.f32 1e-05, %v1078_v28 }
 0x285   : > { %v1031_v50 = vpop.xlane.xlu1 %1030  ;;  %1481 = vmatmul.mubr.bf16.vlgmr.msra.gmra.mrb[0].mxu0 %v12436_v40  ;;  %v12440_v51 = vpop.xlane.xlu0 %1032  ;;  %v1243_v0 = vadd.f32 %v12427_v55, %v1205_v41  ;;  %v1169_v54 = vmul.f32 %v10501_v48, %v12293_v8 }
 0x286   : > { %v10503_v53 = vpop.eup %10502  ;;  %1490 = vmatprep.mubr.bf16.mxu0 %v16138_v13  ;;  %10512 = vrsqrt.f32 %v1111_v29  ;;  %v1081_v48 = vmul.f32 0.0078125, %v1031_v50  ;;  %v1080_v50 = vmul.f32 0.0078125, %v12430_v35 }
 0x287   : > { %v1168_v47 = vmul.f32 %v10503_v53, %v12291_v7  ;;  %v12450_v5 = vpack.c.bf16 %v1243_v0, %v1242_v61  ;;  %v1207_v10 = vmul.f32 %v12418_v46, %v1169_v54  ;;  %10514 = vrsqrt.f32 %v1110_v38 }
 0x288   : > { %v10505_v27 = vpop.eup %10504  ;;  %v1113_v61 = vadd.f32 1e-05, %v1081_v48 }
 0x289   : > { %v12446_v60 = vpop.xlane.xlu1 %1034  ;;  %v892_v58 = vpop.xlane.xlu0 %891  ;;  %v1206_v32 = vmul.f32 %v12418_v46, %v1168_v47  ;;  %v1245_v4 = vadd.f32 %v12427_v55, %v1207_v10 }
 0x28a   : > { %v932_v1 = vmul.f32 0.0078125, %v892_v58  ;;  %v10507_v7 = vpop.eup %10506  ;;  %10516 = vrsqrt.f32 %v1113_v61 }
 0x28b   : > { %v1244_v53 = vadd.f32 %v12427_v55, %v1206_v32  ;;  %v1170_v56 = vmul.f32 %v10507_v7, %v12300_v15 }
 0x28c   : > { %v12454_v8 = vsub.f32 %v12357_v62, %v932_v1  ;;  %v1171_v62 = vmul.f32 %v10505_v27, %v12303_v16  ;;  %v10509_v59 = vpop.eup %10508 }
 0x28d   : > { %v894_v30 = vpop.xlane.xlu1 %893  ;;  %1491 = vmatmul.mubr.bf16.gmra.mrb[4].mxu0 %v12450_v5  ;;  %v896_v31 = vpop.xlane.xlu0 %895  ;;  %v12475_v44 = vpack.c.bf16 %v1245_v4, %v1244_v53  ;;  %v1208_v10 = vmul.f32 %v12418_v46, %v1170_v56 }
 0x28e   : > { %v933_v36 = vmul.f32 0.0078125, %v894_v30  ;;  %v934_v63 = vmul.f32 0.0078125, %v896_v31  ;;  %v996_v37 = vmul.f32 %v12454_v8, %v12454_v8  ;;  %1500 = vmatprep.mubr.bf16.mxu0 %v16138_v13  ;;  %v10511_v27 = vpop.eup %10510  ;;  %v1173_v30 = vmul.f32 %v10509_v59, %v12313_v24 }
 0x28f   : > { %v1112_v31 = vadd.f32 1e-05, %v1080_v50  ;;  %v1246_v4 = vadd.f32 %v12427_v55, %v1208_v10 }
 0x290   : > { %1052 = vadd.xlane.f32.xlu0 %v996_v37  ;;  %v12464_v39 = vsub.f32 %v12362_v2, %v933_v36  ;;  %v12467_v41 = vsub.f32 %v12364_v3, %v934_v63  ;;  %v1209_v3 = vmul.f32 %v12418_v46, %v1171_v62  ;;  %v1083_v36 = vmul.f32 0.0078125, %v12446_v60 }
 0x291   : > { %v898_v49 = vpop.xlane.xlu1 %897  ;;  %v900_v52 = vpop.xlane.xlu0 %899  ;;  %v1172_v62 = vmul.f32 %v10511_v27, %v12310_v23  ;;  %10518 = vrsqrt.f32 %v1112_v31  ;;  %v1082_v60 = vmul.f32 0.0078125, %v12440_v51 }
 0x292   : > { %v935_v0 = vmul.f32 0.0078125, %v898_v49  ;;  %v936_v54 = vmul.f32 0.0078125, %v900_v52  ;;  %v997_v16 = vmul.f32 %v12464_v39, %v12464_v39  ;;  %v998_v2 = vmul.f32 %v12467_v41, %v12467_v41  ;;  %v10513_v49 = vpop.eup %10512 }
 0x293   : > { %v1211_v52 = vmul.f32 %v12418_v46, %v1173_v30  ;;  %v1115_v56 = vadd.f32 1e-05, %v1083_v36  ;;  %v1175_v50 = vmul.f32 %v10513_v49, %v12325_v34  ;;  %v1114_v61 = vadd.f32 1e-05, %v1082_v60 }
 0x294   : > { %1054 = vadd.xlane.f32.xlu1 %v997_v16  ;;  %1056 = vadd.xlane.f32.xlu0 %v998_v2  ;;  %v12480_v15 = vsub.f32 %v12370_v6, %v935_v0  ;;  %v12483_v58 = vsub.f32 %v12372_v9, %v936_v54  ;;  %v1247_v9 = vadd.f32 %v12427_v55, %v1209_v3  ;;  %v10515_v2 = vpop.eup %10514 }
 0x295   : > { %v902_v47 = vpop.xlane.xlu1 %901  ;;  %1501 = vmatmul.mubr.bf16.gmra.mrb[8].mxu0 %v12475_v44  ;;  %v904_v1 = vpop.xlane.xlu0 %903  ;;  %v1210_v16 = vmul.f32 %v12418_v46, %v1172_v62  ;;  %10520 = vrsqrt.f32 %v1115_v56 }
 0x296   : > { %v937_v28 = vmul.f32 0.0078125, %v902_v47  ;;  %v938_v29 = vmul.f32 0.0078125, %v904_v1  ;;  %v999_v35 = vmul.f32 %v12480_v15, %v12480_v15  ;;  %v1000_v6 = vmul.f32 %v12483_v58, %v12483_v58  ;;  %1510 = vmatprep.mubr.bf16.mxu0 %v16138_v13 }
 0x297   : > { %10522 = vrsqrt.f32 %v1114_v61 }
 0x298   : > { %1058 = vadd.xlane.f32.xlu1 %v999_v35  ;;  %1060 = vadd.xlane.f32.xlu0 %v1000_v6  ;;  %v12495_v32 = vsub.f32 %v12377_v11, %v937_v28  ;;  %v12498_v7 = vsub.f32 %v12379_v12, %v938_v29  ;;  %v12507_v12 = vpack.c.bf16 %v1247_v9, %v1246_v4 }
 0x299   : > { %v906_v63 = vpop.xlane.xlu1 %905  ;;  %v876_v37 = vpop.xlane.xlu0 %875  ;;  %v1248_v28 = vadd.f32 %v12427_v55, %v1210_v16  ;;  %v1174_v29 = vmul.f32 %v10515_v2, %v12322_v33 }
 0x29a   : > { %v939_v38 = vmul.f32 0.0078125, %v906_v63  ;;  %v924_v24 = vmul.f32 0.0078125, %v876_v37  ;;  %v1001_v48 = vmul.f32 %v12495_v32, %v12495_v32  ;;  %v1002_v11 = vmul.f32 %v12498_v7, %v12498_v7 }
 0x29b   : > { %v1212_v37 = vmul.f32 %v12418_v46, %v1174_v29 }
 0x29c   : > { %1062 = vadd.xlane.f32.xlu1 %v1001_v48  ;;  %1064 = vadd.xlane.f32.xlu0 %v1002_v11  ;;  %v12512_v23 = vsub.f32 %v12385_v14, %v939_v38  ;;  %v12515_v53 = vsub.f32 %v12387_v17, %v924_v24  ;;  %v1249_v17 = vadd.f32 %v12427_v55, %v1211_v52 }
 0x29d   : > { %v878_v0 = vpop.xlane.xlu1 %877  ;;  %1511 = vmatmul.mubr.bf16.gmra.mrb[12].mxu0 %v12507_v12  ;;  %v880_v54 = vpop.xlane.xlu0 %879  ;;  %v1250_v60 = vadd.f32 %v12427_v55, %v1212_v37 }
 0x29e   : > { %v925_v3 = vmul.f32 0.0078125, %v878_v0  ;;  %v926_v59 = vmul.f32 0.0078125, %v880_v54  ;;  %v1003_v51 = vmul.f32 %v12512_v23, %v12512_v23  ;;  %v988_v14 = vmul.f32 %v12515_v53, %v12515_v53  ;;  %1520 = vmatprep.mubr.bf16.mxu0 %v16138_v13 }
 0x29f   : > { %v12538_v30 = vpack.c.bf16 %v1249_v17, %v1248_v28 }
 0x2a0   : > { %1066 = vadd.xlane.f32.xlu1 %v1003_v51  ;;  %1036 = vadd.xlane.f32.xlu0 %v988_v14  ;;  %v12527_v47 = vsub.f32 %v12391_v18, %v925_v3  ;;  %v12530_v1 = vsub.f32 %v12393_v19, %v926_v59  ;;  %v10517_v18 = vpop.eup %10516  ;;  %v1213_v19 = vmul.f32 %v12418_v46, %v1175_v50 }
 0x2a1   : > { %v882_v10 = vpop.xlane.xlu1 %881  ;;  %v884_v27 = vpop.xlane.xlu0 %883 }
 0x2a2   : > { %v927_v35 = vmul.f32 0.0078125, %v882_v10  ;;  %v928_v6 = vmul.f32 0.0078125, %v884_v27  ;;  %v989_v34 = vmul.f32 %v12527_v47, %v12527_v47  ;;  %v990_v9 = vmul.f32 %v12530_v1, %v12530_v1  ;;  %v10519_v4 = vpop.eup %10518 }
 0x2a3   : > { %v1176_v56 = vmul.f32 %v10519_v4, %v12333_v42  ;;  %v10521_v16 = vpop.eup %10520 }
 0x2a4   : > { %1038 = vadd.xlane.f32.xlu1 %v989_v34  ;;  %1040 = vadd.xlane.f32.xlu0 %v990_v9  ;;  %v12542_v31 = vsub.f32 %v12397_v20, %v927_v35  ;;  %v12545_v33 = vsub.f32 %v12399_v21, %v928_v6  ;;  %v1251_v20 = vadd.f32 %v12427_v55, %v1213_v19  ;;  %v10523_v3 = vpop.eup %10522 }
 0x2a5   : > { %v886_v36 = vpop.xlane.xlu1 %885  ;;  %1521 = vmatmul.mubr.bf16.gmra.mrb[16].mxu0 %v12538_v30  ;;  %v888_v63 = vpop.xlane.xlu0 %887  ;;  %v1177_v21 = vmul.f32 %v10517_v18, %v12336_v43  ;;  %v1214_v42 = vmul.f32 %v12418_v46, %v1176_v56  ;;  %v1179_v14 = vmul.f32 %v10521_v16, %v12348_v57  ;;  %v12592_v57 = vld [vmem:[%s12151_s3 + $0x8] ss:$12 sps:$4 sm:$0xff]  }
 0x2a6   : > { %v929_v62 = vmul.f32 0.0078125, %v886_v36  ;;  %v930_v38 = vmul.f32 0.0078125, %v888_v63  ;;  %v991_v24 = vmul.f32 %v12542_v31, %v12542_v31  ;;  %v992_v48 = vmul.f32 %v12545_v33, %v12545_v33  ;;  %1530 = vmatprep.mubr.bf16.mxu0 %v16138_v13  ;;  %9369 = vmatprep.subr.bf16.mxu1 %v12592_v57 }
 0x2a7   : > { %v12568_v2 = vpack.c.bf16 %v1251_v20, %v1250_v60  ;;  %v1252_v17 = vadd.f32 %v12427_v55, %v1214_v42  ;;  %v1217_v61 = vmul.f32 %v12418_v46, %v1179_v14 }
 0x2a8   : > { %1042 = vadd.xlane.f32.xlu1 %v991_v24  ;;  %1044 = vadd.xlane.f32.xlu0 %v992_v48  ;;  %v12557_v11 = vsub.f32 %v12403_v22, %v929_v62  ;;  %v12560_v49 = vsub.f32 %v12405_v25, %v930_v38  ;;  %v1215_v22 = vmul.f32 %v12418_v46, %v1177_v21 }
 0x2a9   : > { %v890_v52 = vpop.xlane.xlu1 %889  ;;  %v1255_v27 = vadd.f32 %v12427_v55, %v1217_v61 }
 0x2aa   : > { %v931_v0 = vmul.f32 0.0078125, %v890_v52  ;;  %v993_v54 = vmul.f32 %v12557_v11, %v12557_v11  ;;  %v994_v43 = vmul.f32 %v12560_v49, %v12560_v49  ;;  %v1253_v51 = vadd.f32 %v12427_v55, %v1215_v22 }
 0x2ac   : > { %1046 = vadd.xlane.f32.xlu1 %v993_v54  ;;  %1048 = vadd.xlane.f32.xlu0 %v994_v43  ;;  %v12572_v25 = vsub.f32 %v12409_v26, %v931_v0  ;;  %v1178_v26 = vmul.f32 %v10523_v3, %v12345_v45  ;;  %v12583_v50 = vpack.c.bf16 %v1253_v51, %v1252_v17 }
 0x2ad   : > { %1531 = vmatmul.mubr.bf16.gmra.mrb[20].mxu0 %v12568_v2 }
 0x2ae   : > { %v995_v59 = vmul.f32 %v12572_v25, %v12572_v25  ;;  %1540 = vmatprep.mubr.bf16.mxu0 %v16138_v13  ;;  %v1216_v10 = vmul.f32 %v12418_v46, %v1178_v26 }
 0x2b0   : > { %1050 = vadd.xlane.f32.xlu1 %v995_v59  ;;  %v1254_v28 = vadd.f32 %v12427_v55, %v1216_v10 }
 0x2b2   : > { %v12594_v29 = vpack.c.bf16 %v1255_v27, %v1254_v28 }
 0x2b5   : > { %1541 = vmatmul.mubr.bf16.gmra.mrb[24].mxu0 %v12583_v50 }
 0x2b6   : > { %1550 = vmatprep.mubr.bf16.mxu0 %v16138_v13 }
 0x2bd   : > { %1551 = vmatmul.mubr.bf16.gmra.mrb[28].mxu0 %v12594_v29 }
 0x2be   : > { %1560 = vmatprep.mubr.bf16.mxu0 %v16138_v13 }
 0x31d   : > { %v1053_v45 = vpop.xlane.xlu0 %1052 }
 0x31e   : > { %v1092_v35 = vmul.f32 0.0078125, %v1053_v45 }
 0x320   : > { %v1124_v6 = vadd.f32 1e-05, %v1092_v35 }
 0x321   : > { %v1055_v34 = vpop.xlane.xlu1 %1054  ;;  %v1057_v9 = vpop.xlane.xlu0 %1056 }
 0x322   : > { %10524 = vrsqrt.f32 %v1124_v6  ;;  %v1093_v18 = vmul.f32 0.0078125, %v1055_v34  ;;  %v1094_v19 = vmul.f32 0.0078125, %v1057_v9 }
 0x324   : > { %v1125_v36 = vadd.f32 1e-05, %v1093_v18  ;;  %v1126_v63 = vadd.f32 1e-05, %v1094_v19 }
 0x325   : > { %v1059_v37 = vpop.xlane.xlu1 %1058  ;;  %v1061_v4 = vpop.xlane.xlu0 %1060 }
 0x326   : > { %10526 = vrsqrt.f32 %v1125_v36  ;;  %v1095_v62 = vmul.f32 0.0078125, %v1059_v37  ;;  %v1096_v38 = vmul.f32 0.0078125, %v1061_v4 }
 0x327   : > { %10528 = vrsqrt.f32 %v1126_v63 }
 0x328   : > { %v1127_v24 = vadd.f32 1e-05, %v1095_v62  ;;  %v1128_v52 = vadd.f32 1e-05, %v1096_v38  ;;  %v10437_v62 = vld [vmem:[%s12151_s3 + $0x20] ss:$12 sps:$4 sm:$0xff]  }
 0x329   : > { %v1063_v48 = vpop.xlane.xlu1 %1062  ;;  %v1065_v20 = vpop.xlane.xlu0 %1064 }
 0x32a   : > { %10530 = vrsqrt.f32 %v1127_v24  ;;  %v1097_v21 = vmul.f32 0.0078125, %v1063_v48  ;;  %v1098_v42 = vmul.f32 0.0078125, %v1065_v20 }
 0x32c   : > { %v10525_v60 = vpop.eup %10524  ;;  %v1129_v56 = vadd.f32 1e-05, %v1097_v21  ;;  %v1130_v45 = vadd.f32 1e-05, %v1098_v42 }
 0x32d   : > { %v1067_v0 = vpop.xlane.xlu1 %1066  ;;  %v1037_v54 = vpop.xlane.xlu0 %1036  ;;  %v1188_v43 = vmul.f32 %v10525_v60, %v12454_v8 }
 0x32e   : > { %10532 = vrsqrt.f32 %v1129_v56  ;;  %v1099_v16 = vmul.f32 0.0078125, %v1067_v0  ;;  %v1084_v22 = vmul.f32 0.0078125, %v1037_v54  ;;  %v10438_v56 = vld [vmem:[%s12151_s3 + $0x38] ss:$12 sps:$4 sm:$0xff]  }
 0x32f   : > { %10534 = vrsqrt.f32 %v1128_v52  ;;  %v1226_v51 = vmul.f32 %v12418_v46, %v1188_v43 }
 0x330   : > { %v10527_v3 = vpop.eup %10526  ;;  %v1116_v59 = vadd.f32 1e-05, %v1084_v22  ;;  %v1131_v14 = vadd.f32 1e-05, %v1099_v16 }
 0x331   : > { %v1039_v17 = vpop.xlane.xlu1 %1038  ;;  %v1041_v26 = vpop.xlane.xlu0 %1040  ;;  %v1189_v61 = vmul.f32 %v10527_v3, %v12464_v39  ;;  %v1264_v9 = vadd.f32 %v12427_v55, %v1226_v51 }
 0x332   : > { %v10529_v10 = vpop.eup %10528  ;;  %v1085_v27 = vmul.f32 0.0078125, %v1039_v17  ;;  %v1086_v28 = vmul.f32 0.0078125, %v1041_v26  ;;  %10536 = vrsqrt.f32 %v1116_v59  ;;  %v10439_v26 = vld [vmem:[%s12151_s3 + $0x50] ss:$12 sps:$4 sm:$0xff]  }
 0x333   : > { %v1227_v8 = vmul.f32 %v12418_v46, %v1189_v61  ;;  %10538 = vrsqrt.f32 %v1131_v14  ;;  %v1190_v39 = vmul.f32 %v10529_v10, %v12467_v41 }
 0x334   : > { %v10531_v35 = vpop.eup %10530  ;;  %v1117_v6 = vadd.f32 1e-05, %v1085_v27  ;;  %v1118_v34 = vadd.f32 1e-05, %v1086_v28 }
 0x335   : > { %v1043_v18 = vpop.xlane.xlu1 %1042  ;;  %v1045_v19 = vpop.xlane.xlu0 %1044  ;;  %v1265_v36 = vadd.f32 %v12427_v55, %v1227_v8  ;;  %v1191_v63 = vmul.f32 %v10531_v35, %v12480_v15  ;;  %v1228_v41 = vmul.f32 %v12418_v46, %v1190_v39 }
 0x336   : > { %10540 = vrsqrt.f32 %v1117_v6  ;;  %v1087_v37 = vmul.f32 0.0078125, %v1043_v18  ;;  %v1088_v20 = vmul.f32 0.0078125, %v1045_v19 }
 0x337   : > { %10542 = vrsqrt.f32 %v1130_v45  ;;  %v12607_v4 = vpack.c.bf16 %v1265_v36, %v1264_v9  ;;  %v1229_v38 = vmul.f32 %v12418_v46, %v1191_v63  ;;  %v1266_v59 = vadd.f32 %v12427_v55, %v1228_v41 }
 0x338   : > { %v10533_v24 = vpop.eup %10532  ;;  %10544 = vrsqrt.f32 %v1118_v34  ;;  %v1119_v48 = vadd.f32 1e-05, %v1087_v37  ;;  %v1120_v54 = vadd.f32 1e-05, %v1088_v20  ;;  %v10440_v34 = vld [vmem:[%s12151_s3 + $0x68] ss:$12 sps:$4 sm:$0xff]  }
 0x339   : > { %v10535_v21 = vpop.eup %10534  ;;  %v1047_v52 = vpop.xlane.xlu1 %1046  ;;  %1601 = vmatmul.mubr.bf16.vlgmr.msra.gmra.mrb[0].mxu1 %v12607_v4  ;;  %v1267_v60 = vadd.f32 %v12427_v55, %v1229_v38  ;;  %v1193_v0 = vmul.f32 %v10533_v24, %v12495_v32 }
 0x33a   : > { %10546 = vrsqrt.f32 %v1119_v48  ;;  %v1089_v15 = vmul.f32 0.0078125, %v1047_v52  ;;  %9370 = vmatpush3.bf16.msra.mxu1 %v12592_v57  ;;  %1610 = vmatprep.mubr.bf16.mxu1 %v16138_v13  ;;  %v1192_v16 = vmul.f32 %v10535_v21, %v12483_v58  ;;  %v1049_v42 = vpop.xlane.xlu0 %1048 }
 0x33b   : > { %9371 = vmatprep.subr.bf16.mxu1 %v10437_v62  ;;  %v12621_v17 = vpack.c.bf16 %v1267_v60, %v1266_v59  ;;  %v1231_v32 = vmul.f32 %v12418_v46, %v1193_v0  ;;  %v1090_v58 = vmul.f32 0.0078125, %v1049_v42 }
 0x33c   : > { %v1121_v43 = vadd.f32 1e-05, %v1089_v15  ;;  %v10537_v22 = vpop.eup %10536  ;;  %v1230_v10 = vmul.f32 %v12418_v46, %v1192_v16  ;;  %v10442_v15 = vld [vmem:[%s12151_s3 + $0x98] ss:$12 sps:$4 sm:$0xff]  }
 0x33d   : > { %v1051_v3 = vpop.xlane.xlu1 %1050  ;;  %v1180_v51 = vmul.f32 %v10537_v22, %v12515_v53  ;;  %v10539_v14 = vpop.eup %10538  ;;  %v1269_v6 = vadd.f32 %v12427_v55, %v1231_v32  ;;  %v1122_v19 = vadd.f32 1e-05, %v1090_v58  ;;  %v10443_v22 = vld [vmem:[%s12151_s3 + $0xb0] ss:$12 sps:$4 sm:$0xff]  }
 0x33e   : > { %10548 = vrsqrt.f32 %v1121_v43  ;;  %v1091_v57 = vmul.f32 0.0078125, %v1051_v3  ;;  %9372 = vmatpush3.bf16.msra.mxu1 %v10437_v62  ;;  %v1195_v9 = vmul.f32 %v10539_v14, %v12512_v23  ;;  %v10441_v23 = vld [vmem:[%s12151_s3 + $0x80] ss:$12 sps:$4 sm:$0xff]   ;;  %s11662_s3 = smov 96  }
 0x33f   : > { %9373 = vmatprep.subr.bf16.mxu1 %v10438_v56  ;;  %10550 = vrsqrt.f32 %v1120_v54  ;;  %v1218_v53 = vmul.f32 %v12418_v46, %v1180_v51 }
 0x340   : > { %v10541_v61 = vpop.eup %10540  ;;  %v1123_v8 = vadd.f32 1e-05, %v1091_v57 }
 0x341   : > { %v10543_v27 = vpop.eup %10542  ;;  %1611 = vmatmul.mubr.bf16.gmra.mrb[4].mxu1 %v12621_v17  ;;  %v1181_v28 = vmul.f32 %v10541_v61, %v12527_v47  ;;  %v1268_v47 = vadd.f32 %v12427_v55, %v1230_v10  ;;  %v1256_v39 = vadd.f32 %v12427_v55, %v1218_v53 }
 0x342   : > { %v10545_v45 = vpop.eup %10544  ;;  %9374 = vmatpush3.bf16.msra.mxu1 %v10438_v56  ;;  %1620 = vmatprep.mubr.bf16.mxu1 %v16138_v13  ;;  %v1194_v36 = vmul.f32 %v10543_v27, %v12498_v7  ;;  %10552 = vrsqrt.f32 %v1123_v8  ;;  %v1233_v7 = vmul.f32 %v12418_v46, %v1195_v9 }
 0x343   : > { %9375 = vmatprep.subr.bf16.mxu1 %v10439_v26  ;;  %v1219_v35 = vmul.f32 %v12418_v46, %v1181_v28  ;;  %v1182_v37 = vmul.f32 %v10545_v45, %v12530_v1  ;;  %v12642_v24 = vpack.c.bf16 %v1269_v6, %v1268_v47  ;;  %10554 = vrsqrt.f32 %v1122_v19 }
 0x344   : > { %v10547_v18 = vpop.eup %10546  ;;  %v1271_v41 = vadd.f32 %v12427_v55, %v1233_v7 }
 0x345   : > { %v1257_v63 = vadd.f32 %v12427_v55, %v1219_v35  ;;  %v1183_v62 = vmul.f32 %v10547_v18, %v12542_v31  ;;  %v1220_v1 = vmul.f32 %v12418_v46, %v1182_v37  ;;  %v1232_v31 = vmul.f32 %v12418_v46, %v1194_v36 }
 0x346   : > { %9376 = vmatpush3.bf16.msra.mxu1 %v10439_v26 }
 0x347   : > { %v12640_v38 = vpack.c.bf16 %v1257_v63, %v1256_v39  ;;  %9377 = vmatprep.subr.bf16.mxu1 %v10440_v34  ;;  %v1221_v48 = vmul.f32 %v12418_v46, %v1183_v62  ;;  %v1258_v56 = vadd.f32 %v12427_v55, %v1220_v1  ;;  %v1270_v0 = vadd.f32 %v12427_v55, %v1232_v31 }
 0x348   : > { %v10549_v20 = vpop.eup %10548 }
 0x349   : > { %1561 = vmatmul.mubr.bf16.gmra.mrb[32].mxu0 %v12640_v38  ;;  %1621 = vmatmul.mubr.bf16.gmra.mrb[8].mxu1 %v12642_v24  ;;  %v10551_v21 = vpop.eup %10550  ;;  %v1259_v52 = vadd.f32 %v12427_v55, %v1221_v48  ;;  %v1185_v60 = vmul.f32 %v10549_v20, %v12557_v11  ;;  %v12662_v16 = vpack.c.bf16 %v1271_v41, %v1270_v0 }
 0x34a   : > { %9378 = vmatpush3.bf16.msra.mxu1 %v10440_v34  ;;  %1570 = vmatprep.mubr.bf16.mxu0 %v16138_v13  ;;  %v1184_v54 = vmul.f32 %v10551_v21, %v12545_v33 }
 0x34b   : > { %9379 = vmatprep.subr.bf16.mxu1 %v10441_v23  ;;  %1630 = vmatprep.mubr.bf16.mxu1 %v16138_v13  ;;  %v12660_v43 = vpack.c.bf16 %v1259_v52, %v1258_v56  ;;  %v1223_v42 = vmul.f32 %v12418_v46, %v1185_v60 }
 0x34c   : > { %v10553_v3 = vpop.eup %10552  ;;  %v1222_v11 = vmul.f32 %v12418_v46, %v1184_v54 }
 0x34d   : > { %v10555_v59 = vpop.eup %10554  ;;  %v1261_v33 = vadd.f32 %v12427_v55, %v1223_v42  ;;  %v1187_v57 = vmul.f32 %v10553_v3, %v12572_v25 }
 0x34e   : > { %9380 = vmatpush3.bf16.msra.mxu1 %v10441_v23  ;;  %v1260_v51 = vadd.f32 %v12427_v55, %v1222_v11  ;;  %v1186_v14 = vmul.f32 %v10555_v59, %v12560_v49 }
 0x34f   : > { %9381 = vmatprep.subr.bf16.mxu1 %v10442_v15  ;;  %v1225_v32 = vmul.f32 %v12418_v46, %v1187_v57 }
 0x350   : > { %v1282_v26 = vpack.c.bf16 %v1261_v33, %v1260_v51 }
 0x351   : > { %1571 = vmatmul.mubr.bf16.gmra.mrb[36].mxu0 %v12660_v43  ;;  %1631 = vmatmul.mubr.bf16.gmra.mrb[12].mxu1 %v12662_v16  ;;  %v1263_v49 = vadd.f32 %v12427_v55, %v1225_v32 }
 0x352   : > { %9382 = vmatpush3.bf16.msra.mxu1 %v10442_v15  ;;  %9385 = vmatprep.mubr.bf16.mxu1 %v12436_v40  ;;  %v1224_v40 = vmul.f32 %v12418_v46, %v1186_v14 }
 0x353   : > { %9383 = vmatprep.subr.bf16.mxu1 %v10443_v22  ;;  %1580 = vmatprep.mubr.bf16.mxu0 %v16138_v13 }
 0x354   : > { %v1262_v53 = vadd.f32 %v12427_v55, %v1224_v40 }
 0x356   : > { %9384 = vmatpush3.bf16.msra.mxu1 %v10443_v22 }
 0x358   : > { %v1482_v61 = vpop.f32.mrb[0].mxu0 }
 0x359   : > { %v1484_v58 = vpop.f32.mrb[1].mxu0  ;;  %1581 = vmatmul.mubr.bf16.gmra.mrb[40].mxu0 %v1282_v26  ;;  %9386 = vmatmul.mubr.bf16.vlgmr.msra.gmra.mrb[16].mxu1 %v12450_v5  ;;  %v1283_v5 = vpack.c.bf16 %v1263_v49, %v1262_v53 }
 0x35a   : > { %v1486_v10 = vpop.f32.mrb[2].mxu0  ;;  %9389 = vmatprep.mubr.bf16.mxu1 %v12475_v44  ;;  %1590 = vmatprep.mubr.bf16.mxu0 %v16138_v13 }
 0x35b   : > { %v12680_v25 = vpack.c.bf16 %v1486_v10, %v1482_v61  ;;  %v1488_v27 = vpop.f32.mrb[3].mxu0 }
 0x35c   : > { %v12683_v28 = vpack.c.bf16 %v1488_v27, %v1484_v58 }
 0x35e   : > { %2289 = vrot.lane.b32.xlu0 %v12683_v28, %s11662_s3  ;;  %10201 = vmatprep.subr.msk.bf16.mxu1 %vm1850_vm0, %v12683_v28  ;;  %v1876_v46 = vsel %vm1850_vm0, %v12683_v28, 0 }
 0x35f   : > { %9418 = vmatpush3.bf16.xpose.msra.mxu1 %v1876_v46 }
 0x360   : > { %v1492_v44 = vpop.f32.mrb[4].mxu0 }
 0x361   : > { %v1494_v45 = vpop.f32.mrb[5].mxu0  ;;  %1591 = vmatmul.mubr.bf16.gmra.mrb[44].mxu0 %v1283_v5  ;;  %9390 = vmatmul.mubr.bf16.gmra.mrb[20].mxu1 %v12507_v12 }
 0x362   : > { %v1496_v8 = vpop.f32.mrb[6].mxu0  ;;  %9393 = vmatprep.mubr.bf16.mxu1 %v12538_v30 }
 0x363   : > { %v12694_v55 = vpack.c.bf16 %v1496_v8, %v1492_v44  ;;  %v1498_v35 = vpop.f32.mrb[7].mxu0 }
 0x364   : > { %v12696_v6 = vpack.c.bf16 %v1498_v35, %v1494_v45 }
 0x366   : > { %2291 = vrot.lane.b32.xlu1 %v12696_v6, %s11662_s3  ;;  %10202 = vmatprep.subr.msk.bf16.mxu1 %vm1850_vm0, %v12696_v6  ;;  %v1879_v34 = vsel %vm1850_vm0, %v12696_v6, 0 }
 0x367   : > { %9420 = vmatpush3.bf16.xpose.msra.mxu1 %v1879_v34 }
 0x368   : > { %v1502_v9 = vpop.f32.mrb[8].mxu0 }
 0x369   : > { %v1504_v12 = vpop.f32.mrb[9].mxu0  ;;  %9394 = vmatmul.mubr.bf16.gmra.mrb[24].mxu1 %v12568_v2 }
 0x36a   : > { %v1506_v30 = vpop.f32.mrb[10].mxu0  ;;  %9397 = vmatprep.mubr.bf16.mxu1 %v12583_v50 }
 0x36b   : > { %v12706_v18 = vpack.c.bf16 %v1506_v30, %v1502_v9  ;;  %v1508_v19 = vpop.f32.mrb[11].mxu0 }
 0x36c   : > { %v12708_v47 = vpack.c.bf16 %v1508_v19, %v1504_v12 }
 0x36e   : > { %2293 = vrot.lane.b32.xlu1 %v12708_v47, %s11662_s3  ;;  %10203 = vmatprep.subr.msk.bf16.mxu1 %vm1850_vm0, %v12708_v47  ;;  %v1882_v36 = vsel %vm1850_vm0, %v12708_v47, 0 }
 0x36f   : > { %9422 = vmatpush3.bf16.xpose.msra.mxu1 %v1882_v36 }
 0x370   : > { %v1512_v39 = vpop.f32.mrb[12].mxu0 }
 0x371   : > { %v1514_v2 = vpop.f32.mrb[13].mxu0  ;;  %9398 = vmatmul.mubr.bf16.gmra.mrb[28].mxu1 %v12594_v29 }
 0x372   : > { %v1516_v50 = vpop.f32.mrb[14].mxu0  ;;  %9401 = vmatprep.mubr.bf16.mxu1 %v12640_v38 }
 0x373   : > { %v12718_v63 = vpack.c.bf16 %v1516_v50, %v1512_v39  ;;  %v1518_v37 = vpop.f32.mrb[15].mxu0 }
 0x374   : > { %v12720_v62 = vpack.c.bf16 %v1518_v37, %v1514_v2 }
 0x376   : > { %2295 = vrot.lane.b32.xlu1 %v12720_v62, %s11662_s3  ;;  %10204 = vmatprep.subr.msk.bf16.mxu1 %vm1850_vm0, %v12720_v62  ;;  %v1885_v23 = vsel %vm1850_vm0, %v12720_v62, 0 }
 0x377   : > { %9424 = vmatpush3.bf16.xpose.msra.mxu1 %v1885_v23 }
 0x378   : > { %v1522_v48 = vpop.f32.mrb[16].mxu0 }
 0x379   : > { %v1524_v29 = vpop.f32.mrb[17].mxu0  ;;  %9402 = vmatmul.mubr.bf16.gmra.mrb[32].mxu1 %v12660_v43 }
 0x37a   : > { %v1526_v38 = vpop.f32.mrb[18].mxu0  ;;  %9405 = vmatprep.mubr.bf16.mxu1 %v1282_v26 }
 0x37b   : > { %v12729_v7 = vpack.c.bf16 %v1526_v38, %v1522_v48  ;;  %v1528_v20 = vpop.f32.mrb[19].mxu0 }
 0x37c   : > { %v12731_v1 = vpack.c.bf16 %v1528_v20, %v1524_v29 }
 0x37e   : > { %2297 = vrot.lane.b32.xlu0 %v12731_v1, %s11662_s3  ;;  %10205 = vmatprep.subr.msk.bf16.mxu1 %vm1850_vm0, %v12731_v1  ;;  %v1888_v31 = vsel %vm1850_vm0, %v12731_v1, 0 }
 0x37f   : > { %9426 = vmatpush3.bf16.xpose.msra.mxu1 %v1888_v31 }
 0x380   : > { %v1532_v21 = vpop.f32.mrb[20].mxu0 }
 0x381   : > { %v1534_v52 = vpop.f32.mrb[21].mxu0  ;;  %9406 = vmatmul.mubr.bf16.gmra.mrb[36].mxu1 %v1283_v5 }
 0x382   : > { %v1536_v41 = vpop.f32.mrb[22].mxu0  ;;  %9409 = vmatprep.mubr.bf16.mxu1 %v12607_v4 }
 0x383   : > { %v12740_v15 = vpack.c.bf16 %v1536_v41, %v1532_v21  ;;  %v1538_v60 = vpop.f32.mrb[23].mxu0 }
 0x384   : > { %v12742_v56 = vpack.c.bf16 %v1538_v60, %v1534_v52 }
 0x386   : > { %2299 = vrot.lane.b32.xlu1 %v12742_v56, %s11662_s3  ;;  %10206 = vmatprep.subr.msk.bf16.mxu1 %vm1850_vm0, %v12742_v56  ;;  %v1891_v0 = vsel %vm1850_vm0, %v12742_v56, 0 }
 0x387   : > { %9428 = vmatpush3.bf16.xpose.msra.mxu1 %v1891_v0 }
 0x388   : > { %v1542_v54 = vpop.f32.mrb[24].mxu0 }
 0x389   : > { %v1544_v43 = vpop.f32.mrb[25].mxu0  ;;  %9410 = vmatmul.mubr.bf16.gmra.mrb[40].mxu1 %v12621_v17 }
 0x38a   : > { %v1546_v4 = vpop.f32.mrb[26].mxu0  ;;  %9413 = vmatprep.mubr.bf16.mxu1 %v12642_v24 }
 0x38b   : > { %v12752_v22 = vpack.c.bf16 %v1546_v4, %v1542_v54  ;;  %v1548_v42 = vpop.f32.mrb[27].mxu0 }
 0x38c   : > { %v12754_v3 = vpack.c.bf16 %v1548_v42, %v1544_v43 }
 0x38e   : > { %2301 = vrot.lane.b32.xlu0 %v12754_v3, %s11662_s3  ;;  %10207 = vmatprep.subr.msk.bf16.mxu1 %vm1850_vm0, %v12754_v3  ;;  %v1894_v11 = vsel %vm1850_vm0, %v12754_v3, 0 }
 0x38f   : > { %9430 = vmatpush3.bf16.xpose.msra.mxu1 %v1894_v11 }
 0x390   : > { %v1552_v59 = vpop.f32.mrb[28].mxu0 }
 0x391   : > { %v1554_v17 = vpop.f32.mrb[29].mxu0  ;;  %9414 = vmatmul.mubr.bf16.gmra.mrb[44].mxu1 %v12662_v16 }
 0x392   : > { %v1556_v24 = vpop.f32.mrb[30].mxu0  ;;  %2265 = vrot.lane.b32.xlu0 %v12680_v25, %s11662_s3  ;;  %9433 = vmatprep.mubr.msk.bf16.mxu1 %vm1850_vm0, %v12680_v25 }
 0x393   : > { %v12767_v33 = vpack.c.bf16 %v1556_v24, %v1552_v59  ;;  %v1558_v57 = vpop.f32.mrb[31].mxu0 }
 0x394   : > { %v12769_v51 = vpack.c.bf16 %v1558_v57, %v1554_v17 }
 0x396   : > { %2303 = vrot.lane.b32.xlu1 %v12769_v51, %s11662_s3  ;;  %2269 = vrot.lane.b32.xlu0 %v12706_v18, %s11662_s3  ;;  %v1897_v16 = vsel %vm1850_vm0, %v12769_v51, 0 }
 0x397   : > { %10208 = vmatprep.subr.msk.bf16.mxu1 %vm1850_vm0, %v12769_v51 }
 0x398   : > { %9432 = vmatpush3.bf16.xpose.msra.mxu1 %v1897_v16 }
 0x39a   : > { %2267 = vrot.lane.b32.xlu1 %v12694_v55, %s11662_s3  ;;  %2273 = vrot.lane.b32.xlu0 %v12729_v7, %s11662_s3 }
 0x39e   : > { %2271 = vrot.lane.b32.xlu1 %v12718_v63, %s11662_s3  ;;  %2277 = vrot.lane.b32.xlu0 %v12752_v22, %s11662_s3 }
 0x39f   : > { %9434 = vmatmul.mubr.msk.bf16.vlgmr.msra.gmra.mrb[48].mxu1 %vm1850_vm0, %v12694_v55 }
 0x3a0   : > { %9437 = vmatprep.mubr.msk.bf16.mxu1 %vm1850_vm0, %v12706_v18 }
 0x3a2   : > { %2275 = vrot.lane.b32.xlu1 %v12740_v15, %s11662_s3 }
 0x3a6   : > { %2279 = vrot.lane.b32.xlu1 %v12767_v33, %s11662_s3 }
 0x3a7   : > { %9438 = vmatmul.mubr.msk.bf16.gmra.mrb[52].mxu1 %vm1850_vm0, %v12718_v63 }
 0x3a8   : > { %9441 = vmatprep.mubr.msk.bf16.mxu1 %vm1850_vm0, %v12729_v7 }
 0x3af   : > { %9442 = vmatmul.mubr.msk.bf16.gmra.mrb[56].mxu1 %vm1850_vm0, %v12740_v15 }
 0x3b0   : > { %9445 = vmatprep.mubr.msk.bf16.mxu1 %vm1850_vm0, %v12752_v22 }
 0x3b7   : > { %9446 = vmatmul.mubr.msk.bf16.gmra.mrb[60].mxu1 %vm1850_vm0, %v12767_v33 }
 0x3d0   : > { %v2290_v14 = vpop.permute.xlu0 %2289 }
 0x3d1   : > { %10209 = vmatprep.subr.msk.bf16.mxu0 %vm1850_vm0, %v2290_v14  ;;  %v2330_v26 = vsel %vm1850_vm0, %v2290_v14, 0 }
 0x3d2   : > { %9482 = vmatpush3.bf16.xpose.msra.mxu0 %v2330_v26 }
 0x3d8   : > { %v2292_v32 = vpop.permute.xlu1 %2291 }
 0x3d9   : > { %10210 = vmatprep.subr.msk.bf16.mxu0 %vm1850_vm0, %v2292_v32  ;;  %v2333_v61 = vsel %vm1850_vm0, %v2292_v32, 0 }
 0x3da   : > { %9484 = vmatpush3.bf16.xpose.msra.mxu0 %v2333_v61 }
 0x3e0   : > { %v2294_v58 = vpop.permute.xlu1 %2293 }
 0x3e1   : > { %10211 = vmatprep.subr.msk.bf16.mxu0 %vm1850_vm0, %v2294_v58  ;;  %v2336_v40 = vsel %vm1850_vm0, %v2294_v58, 0 }
 0x3e2   : > { %9486 = vmatpush3.bf16.xpose.msra.mxu0 %v2336_v40 }
 0x3e8   : > { %v2296_v10 = vpop.permute.xlu1 %2295 }
 0x3e9   : > { %10212 = vmatprep.subr.msk.bf16.mxu0 %vm1850_vm0, %v2296_v10  ;;  %v2339_v27 = vsel %vm1850_vm0, %v2296_v10, 0 }
 0x3ea   : > { %9488 = vmatpush3.bf16.xpose.msra.mxu0 %v2339_v27 }
 0x3f0   : > { %v2298_v49 = vpop.permute.xlu0 %2297 }
 0x3f1   : > { %10213 = vmatprep.subr.msk.bf16.mxu0 %vm1850_vm0, %v2298_v49  ;;  %v2342_v53 = vsel %vm1850_vm0, %v2298_v49, 0 }
 0x3f2   : > { %9490 = vmatpush3.bf16.xpose.msra.mxu0 %v2342_v53 }
 0x3f8   : > { %v2300_v46 = vpop.permute.xlu1 %2299 }
 0x3f9   : > { %10214 = vmatprep.subr.msk.bf16.mxu0 %vm1850_vm0, %v2300_v46  ;;  %v2345_v5 = vsel %vm1850_vm0, %v2300_v46, 0 }
 0x3fa   : > { %9492 = vmatpush3.bf16.xpose.msra.mxu0 %v2345_v5 }
 0x400   : > { %v2302_v44 = vpop.permute.xlu0 %2301 }
 0x401   : > { %10215 = vmatprep.subr.msk.bf16.mxu0 %vm1850_vm0, %v2302_v44  ;;  %v2348_v45 = vsel %vm1850_vm0, %v2302_v44, 0 }
 0x402   : > { %9494 = vmatpush3.bf16.xpose.msra.mxu0 %v2348_v45 }
 0x404   : > { %v2266_v8 = vpop.permute.xlu0 %2265 }
 0x405   : > { %9497 = vmatprep.mubr.msk.bf16.mxu0 %vm1850_vm0, %v2266_v8 }
 0x408   : > { %v2304_v35 = vpop.permute.xlu1 %2303  ;;  %v2270_v50 = vpop.permute.xlu0 %2269 }
 0x409   : > { %10216 = vmatprep.subr.msk.bf16.mxu0 %vm1850_vm0, %v2304_v35  ;;  %v2351_v34 = vsel %vm1850_vm0, %v2304_v35, 0 }
 0x40a   : > { %9496 = vmatpush3.bf16.xpose.msra.mxu0 %v2351_v34 }
 0x40c   : > { %v1602_v9 = vpop.f32.mrb[0].mxu1  ;;  %v2268_v39 = vpop.permute.xlu1 %2267 }
 0x40d   : > { %v1604_v12 = vpop.f32.mrb[1].mxu1  ;;  %v2274_v21 = vpop.permute.xlu0 %2273 }
 0x40e   : > { %v1606_v30 = vpop.f32.mrb[2].mxu1 }
 0x40f   : > { %v12822_v19 = vpack.c.bf16 %v1606_v30, %v1602_v9  ;;  %v1608_v36 = vpop.f32.mrb[3].mxu1 }
 0x410   : > { %v12824_v2 = vpack.c.bf16 %v1608_v36, %v1604_v12  ;;  %v2272_v20 = vpop.permute.xlu1 %2271 }
 0x411   : > { %16330 = vst [vmem:[#allocation37_spill] sm:$0xff] %v12822_v19  ;;  %9498 = vmatmul.mubr.msk.bf16.vlgmr.msra.gmra.mrb[48].mxu0 %vm1850_vm0, %v2268_v39  ;;  %v2278_v16 = vpop.permute.xlu0 %2277 }
 0x412   : > { %16331 = vst [vmem:[#allocation38_spill] sm:$0xff] %v12824_v2  ;;  %9501 = vmatprep.mubr.msk.bf16.mxu0 %vm1850_vm0, %v2270_v50 }
 0x414   : > { %v1612_v37 = vpop.f32.mrb[4].mxu1  ;;  %v2276_v17 = vpop.permute.xlu1 %2275 }
 0x415   : > { %v1614_v23 = vpop.f32.mrb[5].mxu1 }
 0x416   : > { %v1616_v48 = vpop.f32.mrb[6].mxu1 }
 0x417   : > { %v12828_v29 = vpack.c.bf16 %v1616_v48, %v1612_v37  ;;  %v1618_v38 = vpop.f32.mrb[7].mxu1 }
 0x418   : > { %v12830_v31 = vpack.c.bf16 %v1618_v38, %v1614_v23  ;;  %v2280_v46 = vpop.permute.xlu1 %2279 }
 0x419   : > { %16332 = vst [vmem:[#allocation39_spill] sm:$0xff] %v12828_v29  ;;  %9502 = vmatmul.mubr.msk.bf16.gmra.mrb[52].mxu0 %vm1850_vm0, %v2272_v20 }
 0x41a   : > { %16333 = vst [vmem:[#allocation40_spill] sm:$0xff] %v12830_v31  ;;  %9505 = vmatprep.mubr.msk.bf16.mxu0 %vm1850_vm0, %v2274_v21 }
 0x41c   : > { %v1562_v52 = vpop.f32.mrb[32].mxu0  ;;  %v1622_v41 = vpop.f32.mrb[8].mxu1 }
 0x41d   : > { %v1564_v60 = vpop.f32.mrb[33].mxu0  ;;  %v1624_v0 = vpop.f32.mrb[9].mxu1 }
 0x41e   : > { %v1566_v54 = vpop.f32.mrb[34].mxu0  ;;  %v1626_v43 = vpop.f32.mrb[10].mxu1 }
 0x41f   : > { %v12834_v4 = vpack.c.bf16 %v1566_v54, %v1562_v52  ;;  %v12836_v42 = vpack.c.bf16 %v1626_v43, %v1622_v41  ;;  %v1568_v11 = vpop.f32.mrb[35].mxu0  ;;  %v1628_v59 = vpop.f32.mrb[11].mxu1 }
 0x420   : > { %v12838_v24 = vpack.c.bf16 %v1568_v11, %v1564_v60  ;;  %v12840_v57 = vpack.c.bf16 %v1628_v59, %v1624_v0 }
 0x421   : > { %16334 = vst [vmem:[#allocation41_spill] sm:$0xff] %v12834_v4  ;;  %16335 = vst [vmem:[#allocation42_spill] sm:$0xff] %v12836_v42  ;;  %9506 = vmatmul.mubr.msk.bf16.gmra.mrb[56].mxu0 %vm1850_vm0, %v2276_v17 }
 0x422   : > { %16336 = vst [vmem:[#allocation43_spill] sm:$0xff] %v12838_v24  ;;  %16337 = vst [vmem:[#allocation44_spill] sm:$0xff] %v12840_v57  ;;  %9509 = vmatprep.mubr.msk.bf16.mxu0 %vm1850_vm0, %v2278_v16 }
 0x424   : > { %v1572_v14 = vpop.f32.mrb[36].mxu0  ;;  %v1632_v26 = vpop.f32.mrb[12].mxu1 }
 0x425   : > { %v1574_v32 = vpop.f32.mrb[37].mxu0  ;;  %v1634_v61 = vpop.f32.mrb[13].mxu1 }
 0x426   : > { %v1576_v58 = vpop.f32.mrb[38].mxu0  ;;  %v1636_v40 = vpop.f32.mrb[14].mxu1 }
 0x427   : > { %v12844_v10 = vpack.c.bf16 %v1576_v58, %v1572_v14  ;;  %v12846_v27 = vpack.c.bf16 %v1636_v40, %v1632_v26  ;;  %v1578_v49 = vpop.f32.mrb[39].mxu0  ;;  %v1638_v53 = vpop.f32.mrb[15].mxu1 }
 0x428   : > { %v12848_v5 = vpack.c.bf16 %v1578_v49, %v1574_v32  ;;  %v12850_v44 = vpack.c.bf16 %v1638_v53, %v1634_v61 }
 0x429   : > { %16338 = vst [vmem:[#allocation45_spill] sm:$0xff] %v12844_v10  ;;  %16339 = vst [vmem:[#allocation46_spill] sm:$0xff] %v12846_v27  ;;  %9510 = vmatmul.mubr.msk.bf16.gmra.mrb[60].mxu0 %vm1850_vm0, %v2280_v46 }
 0x42a   : > { %16340 = vst [vmem:[#allocation47_spill] sm:$0xff] %v12848_v5  ;;  %16341 = vst [vmem:[#allocation48_spill] sm:$0xff] %v12850_v44 }
 0x42c   : > { %v1582_v45 = vpop.f32.mrb[40].mxu0  ;;  %v9387_v8 = vpop.f32.mrb[16].mxu1 }
 0x42d   : > { %v1584_v35 = vpop.f32.mrb[41].mxu0  ;;  %v1675_v34 = vpop.f32.mrb[17].mxu1 }
 0x42e   : > { %v1586_v9 = vpop.f32.mrb[42].mxu0  ;;  %v9388_v12 = vpop.f32.mrb[18].mxu1 }
 0x42f   : > { %v12853_v30 = vpack.c.bf16 %v1586_v9, %v1582_v45  ;;  %v12855_v36 = vpack.c.bf16 %v9388_v12, %v9387_v8  ;;  %v1588_v39 = vpop.f32.mrb[43].mxu0  ;;  %v1678_v50 = vpop.f32.mrb[19].mxu1 }
 0x430   : > { %v12857_v37 = vpack.c.bf16 %v1588_v39, %v1584_v35  ;;  %v12859_v23 = vpack.c.bf16 %v1678_v50, %v1675_v34 }
 0x431   : > { %16342 = vst [vmem:[#allocation49_spill] sm:$0xff] %v12853_v30  ;;  %2580 = vrot.lane.b32.xlu1 %v12855_v36, %s11662_s3 }
 0x432   : > { %16343 = vst [vmem:[#allocation50_spill] sm:$0xff] %v12857_v37  ;;  %2578 = vrot.lane.b32.xlu0 %v12859_v23, %s11662_s3  ;;  %9449 = vmatprep.subr.bf16.mxu1 %v12859_v23 }
 0x433   : > { %9450 = vmatpush3.bf16.msra.mxu1 %v12859_v23 }
 0x434   : > { %v1592_v48 = vpop.f32.mrb[44].mxu0  ;;  %v9391_v38 = vpop.f32.mrb[20].mxu1  ;;  %9451 = vmatprep.subr.bf16.mxu1 %v12855_v36 }
 0x435   : > { %v1594_v20 = vpop.f32.mrb[45].mxu0  ;;  %v1691_v21 = vpop.f32.mrb[21].mxu1 }
 0x436   : > { %v1596_v52 = vpop.f32.mrb[46].mxu0  ;;  %v9392_v41 = vpop.f32.mrb[22].mxu1 }
 0x437   : > { %v12868_v60 = vpack.c.bf16 %v1596_v52, %v1592_v48  ;;  %v12870_v0 = vpack.c.bf16 %v9392_v41, %v9391_v38  ;;  %v1598_v54 = vpop.f32.mrb[47].mxu0  ;;  %v1694_v43 = vpop.f32.mrb[23].mxu1  ;;  %9452 = vmatpush3.bf16.msra.mxu1 %v12855_v36 }
 0x438   : > { %v12873_v11 = vpack.c.bf16 %v1598_v54, %v1594_v20  ;;  %v12875_v59 = vpack.c.bf16 %v1694_v43, %v1691_v21 }
 0x439   : > { %16344 = vst [vmem:[#allocation51_spill] sm:$0xff] %v12868_v60  ;;  %2584 = vrot.lane.b32.xlu1 %v12870_v0, %s11662_s3 }
 0x43a   : > { %16345 = vst [vmem:[#allocation52_spill] sm:$0xff] %v12873_v11  ;;  %2582 = vrot.lane.b32.xlu0 %v12875_v59, %s11662_s3  ;;  %9453 = vmatprep.subr.bf16.mxu1 %v12875_v59 }
 0x43b   : > { %9454 = vmatpush3.bf16.msra.mxu1 %v12875_v59 }
 0x43c   : > { %v9395_v17 = vpop.f32.mrb[24].mxu1  ;;  %9455 = vmatprep.subr.bf16.mxu1 %v12870_v0 }
 0x43d   : > { %v1707_v16 = vpop.f32.mrb[25].mxu1 }
 0x43e   : > { %3026 = vrot.lane.b32.xlu0 %v12683_v28, %s11663_s12  ;;  %v9396_v14 = vpop.f32.mrb[26].mxu1 }
 0x43f   : > { %v12886_v26 = vpack.c.bf16 %v9396_v14, %v9395_v17  ;;  %v1710_v32 = vpop.f32.mrb[27].mxu1  ;;  %9456 = vmatpush3.bf16.msra.mxu1 %v12870_v0 }
 0x440   : > { %v12889_v61 = vpack.c.bf16 %v1710_v32, %v1707_v16 }
 0x442   : > { %3028 = vrot.lane.b32.xlu0 %v12696_v6, %s11663_s12  ;;  %2586 = vrot.lane.b32.xlu1 %v12889_v61, %s11662_s3 }
 0x443   : > { %9457 = vmatprep.subr.bf16.mxu1 %v12889_v61 }
 0x444   : > { %9458 = vmatpush3.bf16.msra.mxu1 %v12889_v61  ;;  %v9399_v58 = vpop.f32.mrb[28].mxu1 }
 0x445   : > { %9459 = vmatprep.subr.bf16.mxu1 %v12886_v26  ;;  %v1723_v40 = vpop.f32.mrb[29].mxu1 }
 0x446   : > { %3032 = vrot.lane.b32.xlu0 %v12720_v62, %s11663_s12  ;;  %2588 = vrot.lane.b32.xlu1 %v12886_v26, %s11662_s3  ;;  %v9400_v49 = vpop.f32.mrb[30].mxu1 }
 0x447   : > { %v12902_v53 = vpack.c.bf16 %v9400_v49, %v9399_v58  ;;  %v1726_v46 = vpop.f32.mrb[31].mxu1 }
 0x448   : > { %v12904_v45 = vpack.c.bf16 %v1726_v46, %v1723_v40  ;;  %9460 = vmatpush3.bf16.msra.mxu1 %v12886_v26 }
 0x44a   : > { %3036 = vrot.lane.b32.xlu0 %v12742_v56, %s11663_s12  ;;  %2592 = vrot.lane.b32.xlu1 %v12902_v53, %s11662_s3 }
 0x44b   : > { %9461 = vmatprep.subr.bf16.mxu1 %v12904_v45 }
 0x44c   : > { %9462 = vmatpush3.bf16.msra.mxu1 %v12904_v45  ;;  %v9403_v8 = vpop.f32.mrb[32].mxu1 }
 0x44d   : > { %9463 = vmatprep.subr.bf16.mxu1 %v12902_v53  ;;  %v1739_v35 = vpop.f32.mrb[33].mxu1 }
 0x44e   : > { %3038 = vrot.lane.b32.xlu0 %v12754_v3, %s11663_s12  ;;  %3030 = vrot.lane.b32.xlu1 %v12708_v47, %s11663_s12  ;;  %v9404_v34 = vpop.f32.mrb[34].mxu1 }
 0x44f   : > { %v12918_v9 = vpack.c.bf16 %v9404_v34, %v9403_v8  ;;  %v1742_v12 = vpop.f32.mrb[35].mxu1 }
 0x450   : > { %v12920_v39 = vpack.c.bf16 %v1742_v12, %v1739_v35  ;;  %9464 = vmatpush3.bf16.msra.mxu1 %v12902_v53 }
 0x451   : > { %16346 = vst [vmem:[#allocation53_spill] sm:$0xff] %v12918_v9 }
 0x452   : > { %16347 = vst [vmem:[#allocation54_spill] sm:$0xff] %v12920_v39  ;;  %3010 = vrot.lane.b32.xlu0 %v12680_v25, %s11663_s12  ;;  %3034 = vrot.lane.b32.xlu1 %v12731_v1, %s11663_s12 }
 0x454   : > { %v9407_v50 = vpop.f32.mrb[36].mxu1 }
 0x455   : > { %v1755_v48 = vpop.f32.mrb[37].mxu1 }
 0x456   : > { %3014 = vrot.lane.b32.xlu0 %v12706_v18, %s11663_s12  ;;  %3012 = vrot.lane.b32.xlu1 %v12694_v55, %s11663_s12  ;;  %v9408_v38 = vpop.f32.mrb[38].mxu1 }
 0x457   : > { %v12931_v20 = vpack.c.bf16 %v9408_v38, %v9407_v50  ;;  %v1758_v21 = vpop.f32.mrb[39].mxu1 }
 0x458   : > { %v12933_v52 = vpack.c.bf16 %v1758_v21, %v1755_v48 }
 0x459   : > { %16348 = vst [vmem:[#allocation55_spill] sm:$0xff] %v12931_v20 }
 0x45a   : > { %16349 = vst [vmem:[#allocation56_spill] sm:$0xff] %v12933_v52  ;;  %3018 = vrot.lane.b32.xlu0 %v12729_v7, %s11663_s12  ;;  %3016 = vrot.lane.b32.xlu1 %v12718_v63, %s11663_s12 }
 0x45c   : > { %v9411_v41 = vpop.f32.mrb[40].mxu1 }
 0x45d   : > { %v1771_v54 = vpop.f32.mrb[41].mxu1 }
 0x45e   : > { %3022 = vrot.lane.b32.xlu0 %v12752_v22, %s11663_s12  ;;  %3020 = vrot.lane.b32.xlu1 %v12740_v15, %s11663_s12  ;;  %v9412_v43 = vpop.f32.mrb[42].mxu1 }
 0x45f   : > { %v12943_v17 = vpack.c.bf16 %v9412_v43, %v9411_v41  ;;  %v1774_v16 = vpop.f32.mrb[43].mxu1 }
 0x460   : > { %v12945_v14 = vpack.c.bf16 %v1774_v16, %v1771_v54 }
 0x461   : > { %16350 = vst [vmem:[#allocation57_spill] sm:$0xff] %v12943_v17 }
 0x462   : > { %16351 = vst [vmem:[#allocation58_spill] sm:$0xff] %v12945_v14  ;;  %3638 = vrot.lane.b32.xlu0 %v12683_v28, %s11664_s18  ;;  %3024 = vrot.lane.b32.xlu1 %v12767_v33, %s11663_s12 }
 0x464   : > { %v9415_v32 = vpop.f32.mrb[44].mxu1 }
 0x465   : > { %v1787_v58 = vpop.f32.mrb[45].mxu1 }
 0x466   : > { %3642 = vrot.lane.b32.xlu0 %v12708_v47, %s11664_s18  ;;  %3640 = vrot.lane.b32.xlu1 %v12696_v6, %s11664_s18  ;;  %v9416_v40 = vpop.f32.mrb[46].mxu1 }
 0x467   : > { %v12955_v49 = vpack.c.bf16 %v9416_v40, %v9415_v32  ;;  %v1790_v46 = vpop.f32.mrb[47].mxu1 }
 0x468   : > { %v12957_v8 = vpack.c.bf16 %v1790_v46, %v1787_v58 }
 0x469   : > { %16352 = vst [vmem:[#allocation59_spill] sm:$0xff] %v12955_v49 }
 0x46a   : > { %16353 = vst [vmem:[#allocation60_spill] sm:$0xff] %v12957_v8  ;;  %3648 = vrot.lane.b32.xlu0 %v12742_v56, %s11664_s18  ;;  %3644 = vrot.lane.b32.xlu1 %v12720_v62, %s11664_s18 }
 0x46e   : > { %3624 = vrot.lane.b32.xlu0 %v12694_v55, %s11664_s18  ;;  %3646 = vrot.lane.b32.xlu1 %v12731_v1, %s11664_s18 }
 0x472   : > { %v12967_v28 = vpop.f32.mrb[48].mxu1  ;;  %3628 = vrot.lane.b32.xlu0 %v12718_v63, %s11664_s18  ;;  %3650 = vrot.lane.b32.xlu1 %v12754_v3, %s11664_s18 }
 0x473   : > { %v12973_v6 = vpop.f32.mrb[49].mxu1 }
 0x474   : > { %v12975_v47 = vpop.f32.mrb[50].mxu1 }
 0x475   : > { %v12977_v56 = vpop.f32.mrb[51].mxu1 }
 0x476   : > { %3632 = vrot.lane.b32.xlu0 %v12740_v15, %s11664_s18  ;;  %3622 = vrot.lane.b32.xlu1 %v12680_v25, %s11664_s18 }
 0x47a   : > { %v12983_v55 = vpop.f32.mrb[52].mxu1  ;;  %3634 = vrot.lane.b32.xlu0 %v12752_v22, %s11664_s18  ;;  %3626 = vrot.lane.b32.xlu1 %v12706_v18, %s11664_s18 }
 0x47b   : > { %v12989_v63 = vpop.f32.mrb[53].mxu1 }
 0x47c   : > { %v12991_v62 = vpop.f32.mrb[54].mxu1 }
 0x47d   : > { %v12993_v1 = vpop.f32.mrb[55].mxu1 }
 0x47e   : > { %3636 = vrot.lane.b32.xlu0 %v12767_v33, %s11664_s18  ;;  %3630 = vrot.lane.b32.xlu1 %v12729_v7, %s11664_s18 }
 0x482   : > { %v12999_v25 = vpop.f32.mrb[56].mxu1  ;;  %3311 = vrot.lane.b32.xlu0 %v12875_v59, %s11663_s12  ;;  %3307 = vrot.lane.b32.xlu1 %v12859_v23, %s11663_s12 }
 0x483   : > { %v13005_v18 = vpop.f32.mrb[57].mxu1 }
 0x484   : > { %v13007_v15 = vpop.f32.mrb[58].mxu1 }
 0x485   : > { %v13009_v22 = vpop.f32.mrb[59].mxu1 }
 0x486   : > { %3315 = vrot.lane.b32.xlu0 %v12889_v61, %s11663_s12  ;;  %3309 = vrot.lane.b32.xlu1 %v12855_v36, %s11663_s12 }
 0x48a   : > { %v13015_v7 = vpop.f32.mrb[60].mxu1  ;;  %4678 = vrot.lane.b32.xlu0 %v12830_v31, %s11662_s3  ;;  %3313 = vrot.lane.b32.xlu1 %v12870_v0, %s11663_s12 }
 0x48b   : > { %v13021_v3 = vpop.f32.mrb[61].mxu1 }
 0x48c   : > { %v13023_v33 = vpop.f32.mrb[62].mxu1 }
 0x48d   : > { %v13025_v35 = vpop.f32.mrb[63].mxu1 }
 0x48e   : > { %3919 = vrot.lane.b32.xlu0 %v12859_v23, %s11664_s18  ;;  %3317 = vrot.lane.b32.xlu1 %v12886_v26, %s11663_s12 }
 0x492   : > { %3921 = vrot.lane.b32.xlu0 %v12855_v36, %s11664_s18  ;;  %3321 = vrot.lane.b32.xlu1 %v12902_v53, %s11663_s12 }
 0x496   : > { %4676 = vrot.lane.b32.xlu1 %v12824_v2, %s11662_s3  ;;  %2590 = vrot.lane.b32.xlu0 %v12904_v45, %s11662_s3 }
 0x49a   : > { %4680 = vrot.lane.b32.xlu1 %v12840_v57, %s11662_s3  ;;  %3040 = vrot.lane.b32.xlu0 %v12769_v51, %s11663_s12 }
 0x49e   : > { %4682 = vrot.lane.b32.xlu1 %v12850_v44, %s11662_s3  ;;  %3652 = vrot.lane.b32.xlu0 %v12769_v51, %s11664_s18 }
 0x4a2   : > { %3923 = vrot.lane.b32.xlu1 %v12875_v59, %s11664_s18  ;;  %3319 = vrot.lane.b32.xlu0 %v12904_v45, %s11663_s12 }
 0x4a3   : > { %v13064_v23 = vpop.permute.xlu1 %2580 }
 0x4a4   : > { %v13051_v36 = vpop.permute.xlu0 %2578 }
 0x4a5   : > { %9513 = vmatprep.subr.bf16.mxu1 %v13051_v36 }
 0x4a6   : > { %4644 = vrot.lane.b32.xlu0 %v12834_v4, %s11662_s3  ;;  %4668 = vrot.lane.b32.xlu1 %v12838_v24, %s11662_s3 }
 0x4aa   : > { %4646 = vrot.lane.b32.xlu0 %v12844_v10, %s11662_s3  ;;  %4670 = vrot.lane.b32.xlu1 %v12848_v5, %s11662_s3 }
 0x4ab   : > { %v13072_v34 = vpop.permute.xlu1 %2584 }
 0x4ac   : > { %v13062_v51 = vpop.permute.xlu0 %2582 }
 0x4ae   : > { %4672 = vrot.lane.b32.xlu1 %v12857_v37, %s11662_s3  ;;  %4674 = vrot.lane.b32.xlu0 %v12873_v11, %s11662_s3 }
 0x4b0   : > { %v13070_v59 = vpop.permute.xlu0 %3026 }
 0x4b2   : > { %3927 = vrot.lane.b32.xlu1 %v12889_v61, %s11664_s18  ;;  %3925 = vrot.lane.b32.xlu0 %v12870_v0, %s11664_s18 }
 0x4b4   : > { %v13078_v12 = vpop.permute.xlu0 %3028  ;;  %v13080_v50 = vpop.permute.xlu1 %2586 }
 0x4b6   : > { %3929 = vrot.lane.b32.xlu1 %v12886_v26, %s11664_s18  ;;  %4648 = vrot.lane.b32.xlu0 %v12853_v30, %s11662_s3 }
 0x4b8   : > { %v13086_v48 = vpop.permute.xlu0 %3032  ;;  %v13090_v38 = vpop.permute.xlu1 %2588 }
 0x4ba   : > { %4650 = vrot.lane.b32.xlu0 %v12868_v60, %s11662_s3 }
 0x4bc   : > { %v13092_v61 = vpop.permute.xlu0 %3036  ;;  %v13096_v21 = vpop.permute.xlu1 %2592 }
 0x4c0   : > { %v13094_v0 = vpop.permute.xlu0 %3038  ;;  %v13100_v54 = vpop.permute.xlu1 %3030 }
 0x4c4   : > { %v13098_v41 = vpop.permute.xlu0 %3010  ;;  %v13104_v43 = vpop.permute.xlu1 %3034 }
 0x4c5   : > { %16354 = vst [vmem:[#allocation61_spill] sm:$0xff] %v13098_v41 }
 0x4c8   : > { %v13102_v26 = vpop.permute.xlu0 %3014  ;;  %v13108_v32 = vpop.permute.xlu1 %3012 }
 0x4c9   : > { %16355 = vst [vmem:[#allocation62_spill] sm:$0xff] %v13102_v26  ;;  %16357 = vst [vmem:[#allocation64_spill] sm:$0xff] %v13108_v32 }
 0x4cc   : > { %v13106_v16 = vpop.permute.xlu0 %3018  ;;  %v13112_v40 = vpop.permute.xlu1 %3016 }
 0x4cd   : > { %16356 = vst [vmem:[#allocation63_spill] sm:$0xff] %v13106_v16  ;;  %16359 = vst [vmem:[#allocation66_spill] sm:$0xff] %v13112_v40 }
 0x4d0   : > { %v13110_v58 = vpop.permute.xlu0 %3022  ;;  %v13120_v13 = vpop.permute.xlu1 %3020 }
 0x4d1   : > { %16358 = vst [vmem:[#allocation65_spill] sm:$0xff] %v13110_v58  ;;  %16360 = vst [vmem:[#allocation67_spill] sm:$0xff] %v13120_v13 }
 0x4d4   : > { %v13117_v46 = vpop.permute.xlu0 %3638  ;;  %v13128_v17 = vpop.permute.xlu1 %3024 }
 0x4d5   : > { %16362 = vst [vmem:[#allocation69_spill] sm:$0xff] %v13128_v17 }
 0x4d8   : > { %v13124_v49 = vpop.permute.xlu0 %3642  ;;  %v13142_v39 = vpop.permute.xlu1 %3640 }
 0x4d9   : > { %2000 = vmax.xlane.f32.xlu0 %v12967_v28  ;;  %16361 = vst [vmem:[#allocation68_spill] sm:$0xff] %v13124_v49  ;;  %16364 = vst [vmem:[#allocation71_spill] sm:$0xff] %v13142_v39 }
 0x4da   : > { %1998 = vmax.xlane.f32.xlu1 %v12977_v56 }
 0x4dc   : > { %v13139_v9 = vpop.permute.xlu0 %3648  ;;  %v13156_v31 = vpop.permute.xlu1 %3644 }
 0x4dd   : > { %1996 = vmax.xlane.f32.xlu0 %v12973_v6  ;;  %16363 = vst [vmem:[#allocation70_spill] sm:$0xff] %v13139_v9  ;;  %16366 = vst [vmem:[#allocation73_spill] sm:$0xff] %v13156_v31 }
 0x4de   : > { %2010 = vmax.xlane.f32.xlu1 %v12991_v62 }
 0x4e0   : > { %v13154_v57 = vpop.permute.xlu0 %3624  ;;  %v13170_v9 = vpop.permute.xlu1 %3646 }
 0x4e1   : > { %2002 = vmax.xlane.f32.xlu0 %v12975_v47  ;;  %16365 = vst [vmem:[#allocation72_spill] sm:$0xff] %v13154_v57  ;;  %16368 = vst [vmem:[#allocation75_spill] sm:$0xff] %v13170_v9 }
 0x4e2   : > { %2006 = vmax.xlane.f32.xlu1 %v12993_v1 }
 0x4e4   : > { %v13126_v8 = vpop.f32.mrb[48].mxu0  ;;  %v13165_v11 = vpop.permute.xlu0 %3628 }
 0x4e5   : > { %2008 = vmax.xlane.f32.xlu0 %v12983_v55  ;;  %v13131_v14 = vpop.f32.mrb[49].mxu0  ;;  %16367 = vst [vmem:[#allocation74_spill] sm:$0xff] %v13165_v11  ;;  %v13180_v58 = vpop.permute.xlu1 %3650 }
 0x4e6   : > { %2018 = vmax.xlane.f32.xlu1 %v13007_v15  ;;  %v13134_v20 = vpop.f32.mrb[50].mxu0  ;;  %16370 = vst [vmem:[#allocation77_spill] sm:$0xff] %v13180_v58 }
 0x4e7   : > { %v13136_v52 = vpop.f32.mrb[51].mxu0 }
 0x4e8   : > { %v13176_v17 = vpop.permute.xlu0 %3632 }
 0x4e9   : > { %2004 = vmax.xlane.f32.xlu0 %v12989_v63  ;;  %16369 = vst [vmem:[#allocation76_spill] sm:$0xff] %v13176_v17  ;;  %v13192_v16 = vpop.permute.xlu1 %3622 }
 0x4ea   : > { %2014 = vmax.xlane.f32.xlu1 %v13009_v22  ;;  %16373 = vst [vmem:[#allocation80_spill] sm:$0xff] %v13192_v16 }
 0x4ec   : > { %v13144_v60 = vpop.f32.mrb[52].mxu0  ;;  %v13190_v9 = vpop.permute.xlu0 %3634 }
 0x4ed   : > { %2016 = vmax.xlane.f32.xlu0 %v12999_v25  ;;  %v13147_v30 = vpop.f32.mrb[53].mxu0  ;;  %16372 = vst [vmem:[#allocation79_spill] sm:$0xff] %v13190_v9  ;;  %v13196_v17 = vpop.permute.xlu1 %3626 }
 0x4ee   : > { %2026 = vmax.xlane.f32.xlu1 %v13023_v33  ;;  %v13150_v10 = vpop.f32.mrb[54].mxu0  ;;  %16375 = vst [vmem:[#allocation82_spill] sm:$0xff] %v13196_v17 }
 0x4ef   : > { %v13152_v44 = vpop.f32.mrb[55].mxu0 }
 0x4f0   : > { %v13194_v40 = vpop.permute.xlu0 %3636 }
 0x4f1   : > { %2012 = vmax.xlane.f32.xlu0 %v13005_v18  ;;  %16374 = vst [vmem:[#allocation81_spill] sm:$0xff] %v13194_v40  ;;  %v13202_v39 = vpop.permute.xlu1 %3630 }
 0x4f2   : > { %2022 = vmax.xlane.f32.xlu1 %v13025_v35  ;;  %16377 = vst [vmem:[#allocation84_spill] sm:$0xff] %v13202_v39 }
 0x4f4   : > { %v13160_v2 = vpop.f32.mrb[56].mxu0  ;;  %v13200_v58 = vpop.permute.xlu0 %3311 }
 0x4f5   : > { %2024 = vmax.xlane.f32.xlu0 %v13015_v7  ;;  %v13163_v4 = vpop.f32.mrb[57].mxu0  ;;  %16376 = vst [vmem:[#allocation83_spill] sm:$0xff] %v13200_v58  ;;  %v13210_v16 = vpop.permute.xlu1 %3307 }
 0x4f6   : > { %2450 = vmax.xlane.f32.xlu1 %v13131_v14  ;;  %v13168_v37 = vpop.f32.mrb[58].mxu0  ;;  %16379 = vst [vmem:[#allocation86_spill] sm:$0xff] %v13210_v16 }
 0x4f7   : > { %v13172_v57 = vpop.f32.mrb[59].mxu0 }
 0x4f8   : > { %v13208_v9 = vpop.permute.xlu0 %3315 }
 0x4f9   : > { %2020 = vmax.xlane.f32.xlu0 %v13021_v3  ;;  %16378 = vst [vmem:[#allocation85_spill] sm:$0xff] %v13208_v9 }
 0x4fa   : > { %2456 = vmax.xlane.f32.xlu1 %v13134_v20 }
 0x4fc   : > { %v13178_v31 = vpop.f32.mrb[60].mxu0  ;;  %v13214_v40 = vpop.permute.xlu0 %4678 }
 0x4fd   : > { %2454 = vmax.xlane.f32.xlu0 %v13126_v8  ;;  %v13183_v11 = vpop.f32.mrb[61].mxu0  ;;  %16380 = vst [vmem:[#allocation87_spill] sm:$0xff] %v13214_v40 }
 0x4fe   : > { %v13185_v13 = vpop.f32.mrb[62].mxu0 }
 0x4ff   : > { %16371 = vst [vmem:[#allocation78_spill] sm:$0xff] %v13185_v13  ;;  %v13187_v49 = vpop.f32.mrb[63].mxu0 }
 0x500   : > { %v13218_v58 = vpop.permute.xlu0 %3919 }
 0x501   : > { %2452 = vmax.xlane.f32.xlu0 %v13136_v52  ;;  %16382 = vst [vmem:[#allocation89_spill] sm:$0xff] %v13218_v58 }
 0x504   : > { %v13222_v17 = vpop.permute.xlu0 %3921 }
 0x505   : > { %16384 = vst [vmem:[#allocation91_spill] sm:$0xff] %v13222_v17 }
 0x50b   : > { %4652 = vrot.lane.b32.xlu1 %v12822_v19, %s11662_s3  ;;  %v13216_v19 = vpop.permute.xlu1 %3309 }
 0x50c   : > { %16381 = vst [vmem:[#allocation88_spill] sm:$0xff] %v13216_v19 }
 0x50f   : > { %4654 = vrot.lane.b32.xlu1 %v12828_v29, %s11662_s3  ;;  %v13220_v39 = vpop.permute.xlu1 %3313 }
 0x510   : > { %16383 = vst [vmem:[#allocation90_spill] sm:$0xff] %v13220_v39 }
 0x513   : > { %3933 = vrot.lane.b32.xlu1 %v12902_v53, %s11664_s18  ;;  %v13224_v29 = vpop.permute.xlu1 %3317  ;;  %v13226_v53 = vpop.permute.xlu0 %2590 }
 0x514   : > { %16385 = vst [vmem:[#allocation92_spill] sm:$0xff] %v13224_v29 }
 0x517   : > { %3931 = vrot.lane.b32.xlu0 %v12904_v45, %s11664_s18  ;;  %v13228_v9 = vpop.permute.xlu1 %3321  ;;  %v13230_v16 = vpop.permute.xlu0 %3040 }
 0x518   : > { %16386 = vst [vmem:[#allocation93_spill] sm:$0xff] %v13228_v9 }
 0x51b   : > { %v13232_v26 = vpop.permute.xlu1 %4676  ;;  %v13236_v45 = vpop.permute.xlu0 %3652 }
 0x51c   : > { %16387 = vst [vmem:[#allocation94_spill] sm:$0xff] %v13232_v26  ;;  %16388 = vst [vmem:[#allocation95_spill] sm:$0xff] %v13236_v45 }
 0x51f   : > { %v13238_v58 = vpop.permute.xlu1 %4680  ;;  %v13242_v17 = vpop.permute.xlu0 %3319 }
 0x520   : > { %16389 = vst [vmem:[#allocation96_spill] sm:$0xff] %v13238_v58  ;;  %16390 = vst [vmem:[#allocation97_spill] sm:$0xff] %v13242_v17 }
 0x523   : > { %v13245_v9 = vpop.permute.xlu1 %4682  ;;  %v13250_v29 = vpop.permute.xlu0 %4644 }
 0x524   : > { %16391 = vst [vmem:[#allocation98_spill] sm:$0xff] %v13245_v9  ;;  %16392 = vst [vmem:[#allocation99_spill] sm:$0xff] %v13250_v29 }
 0x527   : > { %v13252_v39 = vpop.permute.xlu1 %3923  ;;  %v13255_v19 = vpop.permute.xlu0 %4646 }
 0x528   : > { %16393 = vst [vmem:[#allocation100_spill] sm:$0xff] %v13252_v39  ;;  %16394 = vst [vmem:[#allocation101_spill] sm:$0xff] %v13255_v19 }
 0x52b   : > { %v13257_v58 = vpop.permute.xlu1 %4668  ;;  %v13261_v17 = vpop.permute.xlu0 %4674 }
 0x52c   : > { %16395 = vst [vmem:[#allocation102_spill] sm:$0xff] %v13257_v58  ;;  %16396 = vst [vmem:[#allocation103_spill] sm:$0xff] %v13261_v17 }
 0x52f   : > { %v13263_v9 = vpop.permute.xlu1 %4670  ;;  %v13266_v40 = vpop.permute.xlu0 %3925 }
 0x530   : > { %16397 = vst [vmem:[#allocation104_spill] sm:$0xff] %v13263_v9  ;;  %16398 = vst [vmem:[#allocation105_spill] sm:$0xff] %v13266_v40 }
 0x533   : > { %v13268_v26 = vpop.permute.xlu1 %4672  ;;  %v13272_v39 = vpop.permute.xlu0 %4648 }
 0x534   : > { %16399 = vst [vmem:[#allocation106_spill] sm:$0xff] %v13268_v26  ;;  %16400 = vst [vmem:[#allocation107_spill] sm:$0xff] %v13272_v39 }
 0x536   : > { %2460 = vmax.xlane.f32.xlu0 %v13152_v44 }
 0x537   : > { %2462 = vmax.xlane.f32.xlu1 %v13144_v60  ;;  %v13274_v19 = vpop.permute.xlu1 %3927  ;;  %v13276_v29 = vpop.permute.xlu0 %4650 }
 0x538   : > { %16401 = vst [vmem:[#allocation108_spill] sm:$0xff] %v13274_v19  ;;  %16402 = vst [vmem:[#allocation109_spill] sm:$0xff] %v13276_v29 }
 0x53a   : > { %2470 = vmax.xlane.f32.xlu0 %v13160_v2 }
 0x53b   : > { %2458 = vmax.xlane.f32.xlu1 %v13147_v30  ;;  %v13278_v58 = vpop.permute.xlu1 %3929 }
 0x53c   : > { %16403 = vst [vmem:[#allocation110_spill] sm:$0xff] %v13278_v58 }
 0x53e   : > { %2474 = vmax.xlane.f32.xlu0 %v13183_v11 }
 0x53f   : > { %2464 = vmax.xlane.f32.xlu1 %v13150_v10 }
 0x542   : > { %2476 = vmax.xlane.f32.xlu0 %v13187_v49 }
 0x543   : > { %2466 = vmax.xlane.f32.xlu1 %v13163_v4 }
 0x547   : > { %2472 = vmax.xlane.f32.xlu1 %v13168_v37 }
 0x54b   : > { %2468 = vmax.xlane.f32.xlu1 %v13172_v57 }
 0x54f   : > { %2478 = vmax.xlane.f32.xlu1 %v13178_v31 }
 0x553   : > { %2480 = vmax.xlane.f32.xlu1 %v13185_v13 }
 0x558   : > { %4658 = vrot.lane.b32.xlu0 %v12846_v27, %s11662_s3 }
 0x564   : > { %4656 = vrot.lane.b32.xlu1 %v12836_v42, %s11662_s3 }
 0x566   : > { %v2001_v17 = vpop.xlane.xlu0 %2000 }
 0x567   : > { %v2030_v9 = vsub.f32 %v12967_v28, %v2001_v17  ;;  %v1999_v40 = vpop.xlane.xlu1 %1998 }
 0x568   : > { %v2029_v26 = vsub.f32 %v12977_v56, %v1999_v40 }
 0x569   : > { %v2048_v45 = vmul.f32 1.442695, %v2030_v9 }
 0x56a   : > { %v2046_v32 = vmul.f32 1.442695, %v2029_v26  ;;  %v1997_v27 = vpop.xlane.xlu0 %1996 }
 0x56b   : > { %10556 = vpow2.f32 %v2048_v45  ;;  %v2028_v39 = vsub.f32 %v12973_v6, %v1997_v27  ;;  %v2011_v19 = vpop.xlane.xlu1 %2010 }
 0x56c   : > { %10558 = vpow2.f32 %v2046_v32  ;;  %v2035_v58 = vsub.f32 %v12991_v62, %v2011_v19 }
 0x56d   : > { %v2044_v41 = vmul.f32 1.442695, %v2028_v39 }
 0x56e   : > { %v2003_v29 = vpop.xlane.xlu0 %2002  ;;  %v2058_v28 = vmul.f32 1.442695, %v2035_v58 }
 0x56f   : > { %10560 = vpow2.f32 %v2044_v41  ;;  %v2031_v42 = vsub.f32 %v12975_v47, %v2003_v29  ;;  %v2007_v13 = vpop.xlane.xlu1 %2006 }
 0x570   : > { %v2033_v56 = vsub.f32 %v12993_v1, %v2007_v13 }
 0x571   : > { %v2050_v17 = vmul.f32 1.442695, %v2031_v42 }
 0x572   : > { %v2009_v9 = vpop.xlane.xlu0 %2008  ;;  %v2054_v39 = vmul.f32 1.442695, %v2033_v56 }
 0x573   : > { %10562 = vpow2.f32 %v2050_v17  ;;  %v2034_v26 = vsub.f32 %v12983_v55, %v2009_v9  ;;  %v2019_v40 = vpop.xlane.xlu1 %2018 }
 0x574   : > { %10564 = vpow2.f32 %v2058_v28  ;;  %v2039_v19 = vsub.f32 %v13007_v15, %v2019_v40 }
 0x575   : > { %v10557_v27 = vpop.eup %10556  ;;  %v2056_v6 = vmul.f32 1.442695, %v2034_v26 }
 0x576   : > { %v2005_v62 = vpop.xlane.xlu0 %2004  ;;  %v10559_v42 = vpop.eup %10558  ;;  %v2066_v1 = vmul.f32 1.442695, %v2039_v19 }
 0x577   : > { %10566 = vpow2.f32 %v2056_v6  ;;  %v2032_v29 = vsub.f32 %v12989_v63, %v2005_v62  ;;  %v2015_v47 = vpop.xlane.xlu1 %2014  ;;  %2080 = vadd.xlane.f32.xlu0 %v10557_v27 }
 0x578   : > { %10568 = vpow2.f32 %v2054_v39  ;;  %v2037_v55 = vsub.f32 %v13009_v22, %v2015_v47 }
 0x579   : > { %v10561_v41 = vpop.eup %10560  ;;  %v2052_v13 = vmul.f32 1.442695, %v2032_v29 }
 0x57a   : > { %v2017_v32 = vpop.xlane.xlu0 %2016  ;;  %v2108_v58 = vpack.c.bf16 %v10559_v42, %v10561_v41  ;;  %v2062_v63 = vmul.f32 1.442695, %v2037_v55 }
 0x57b   : > { %10570 = vpow2.f32 %v2052_v13  ;;  %v2038_v45 = vsub.f32 %v12999_v25, %v2017_v32  ;;  %v2027_v17 = vpop.xlane.xlu1 %2026  ;;  %2076 = vadd.xlane.f32.xlu0 %v10561_v41 }
 0x57c   : > { %9465 = vmatprep.mubr.bf16.mxu1 %v2108_v58  ;;  %10572 = vpow2.f32 %v2066_v1  ;;  %v2043_v56 = vsub.f32 %v13023_v33, %v2027_v17 }
 0x57d   : > { %v10563_v15 = vpop.eup %10562  ;;  %v2064_v28 = vmul.f32 1.442695, %v2038_v45 }
 0x57e   : > { %v2013_v9 = vpop.xlane.xlu0 %2012  ;;  %v2109_v26 = vpack.c.bf16 %v10563_v15, %v10557_v27  ;;  %v10565_v6 = vpop.eup %10564  ;;  %v2074_v19 = vmul.f32 1.442695, %v2043_v56 }
 0x57f   : > { %10574 = vpow2.f32 %v2064_v28  ;;  %v2036_v40 = vsub.f32 %v13005_v18, %v2013_v9  ;;  %v2023_v22 = vpop.xlane.xlu1 %2022  ;;  %2082 = vadd.xlane.f32.xlu0 %v10563_v15 }
 0x580   : > { %9466 = vmatmul.mubr.bf16.vlgmr.msra.gmra.mrb[64].mxu1 %v2109_v26  ;;  %10576 = vpow2.f32 %v2062_v63  ;;  %v2041_v62 = vsub.f32 %v13025_v35, %v2023_v22 }
 0x581   : > { %v10567_v39 = vpop.eup %10566  ;;  %v2060_v25 = vmul.f32 1.442695, %v2036_v40  ;;  %9514 = vmatpush3.bf16.msra.mxu1 %v13051_v36 }
 0x582   : > { %9515 = vmatprep.subr.bf16.mxu1 %v13064_v23  ;;  %v2025_v33 = vpop.xlane.xlu0 %2024  ;;  %v2111_v29 = vpack.c.bf16 %v10565_v6, %v10567_v39  ;;  %v10569_v47 = vpop.eup %10568  ;;  %v2070_v1 = vmul.f32 1.442695, %v2041_v62 }
 0x583   : > { %10578 = vpow2.f32 %v2060_v25  ;;  %v2042_v27 = vsub.f32 %v13015_v7, %v2025_v33  ;;  %v2451_v18 = vpop.xlane.xlu1 %2450 }
 0x584   : > { %10580 = vpow2.f32 %v2074_v19 }
 0x585   : > { %v10571_v41 = vpop.eup %10570  ;;  %v2072_v13 = vmul.f32 1.442695, %v2042_v27  ;;  %9516 = vmatpush3.bf16.msra.mxu1 %v13064_v23  ;;  %v2482_v23 = vsub.f32 %v13131_v14, %v2451_v18 }
 0x586   : > { %9517 = vmatprep.subr.bf16.mxu1 %v13062_v51  ;;  %2084 = vadd.xlane.f32.xlu0 %v10571_v41  ;;  %v2021_v36 = vpop.xlane.xlu0 %2020  ;;  %v2110_v35 = vpack.c.bf16 %v10569_v47, %v10571_v41  ;;  %v10573_v58 = vpop.eup %10572 }
 0x587   : > { %10582 = vpow2.f32 %v2072_v13  ;;  %v2040_v55 = vsub.f32 %v13021_v3, %v2021_v36  ;;  %v2457_v32 = vpop.xlane.xlu1 %2456 }
 0x588   : > { %v2485_v7 = vsub.f32 %v13134_v20, %v2457_v32  ;;  %2078 = vadd.xlane.f32.xlu1 %v10559_v42  ;;  %9469 = vmatprep.mubr.bf16.mxu1 %v2110_v35  ;;  %10584 = vpow2.f32 %v2070_v1  ;;  %v3079_v1 = vsel %vm1850_vm0, %v13104_v43, 0 }
 0x589   : > { %v10575_v45 = vpop.eup %10574  ;;  %v2068_v17 = vmul.f32 1.442695, %v2040_v55  ;;  %9518 = vmatpush3.bf16.msra.mxu1 %v13062_v51  ;;  %v2498_v51 = vmul.f32 1.442695, %v2482_v23  ;;  %v3082_v23 = vsel %vm1850_vm0, %v13092_v61, 0 }
 0x58a   : > { %v2504_v15 = vmul.f32 1.442695, %v2485_v7  ;;  %9470 = vmatmul.mubr.bf16.gmra.mrb[68].mxu1 %v2111_v29  ;;  %9519 = vmatprep.subr.bf16.mxu1 %v13072_v34  ;;  %v2455_v28 = vpop.xlane.xlu0 %2454  ;;  %v2113_v63 = vpack.c.bf16 %v10573_v58, %v10575_v45  ;;  %v10577_v20 = vpop.eup %10576 }
 0x58b   : > { %10586 = vpow2.f32 %v2068_v17  ;;  %2090 = vadd.xlane.f32.xlu0 %v10565_v6  ;;  %v2484_v3 = vsub.f32 %v13126_v8, %v2455_v28  ;;  %v13343_v29 = vpop.permute.xlu1 %4652 }
 0x58c   : > { %2088 = vadd.xlane.f32.xlu1 %v10567_v39  ;;  %10588 = vpow2.f32 %v2504_v15 }
 0x58d   : > { %v10579_v42 = vpop.eup %10578  ;;  %v2502_v56 = vmul.f32 1.442695, %v2484_v3  ;;  %9520 = vmatpush3.bf16.msra.mxu1 %v13072_v34 }
 0x58e   : > { %9521 = vmatprep.subr.bf16.mxu1 %v13080_v50  ;;  %v2453_v14 = vpop.xlane.xlu0 %2452  ;;  %v2112_v9 = vpack.c.bf16 %v10577_v20, %v10579_v42  ;;  %v10581_v40 = vpop.eup %10580 }
 0x58f   : > { %10590 = vpow2.f32 %v2502_v56  ;;  %2092 = vadd.xlane.f32.xlu0 %v10579_v42  ;;  %v2483_v26 = vsub.f32 %v13136_v52, %v2453_v14  ;;  %v13349_v27 = vpop.permute.xlu1 %4654 }
 0x590   : > { %2086 = vadd.xlane.f32.xlu1 %v10569_v47  ;;  %9473 = vmatprep.mubr.bf16.mxu1 %v2112_v9  ;;  %10592 = vpow2.f32 %v2498_v51 }
 0x591   : > { %v10583_v8 = vpop.eup %10582  ;;  %v2500_v22 = vmul.f32 1.442695, %v2483_v26  ;;  %9522 = vmatpush3.bf16.msra.mxu1 %v13080_v50 }
 0x592   : > { %9474 = vmatmul.mubr.bf16.gmra.mrb[72].mxu1 %v2113_v63  ;;  %9523 = vmatprep.subr.bf16.mxu1 %v13090_v38  ;;  %v2115_v34 = vpack.c.bf16 %v10581_v40, %v10583_v8  ;;  %v13312_v6 = vpop.eup %10584  ;;  %v13353_v18 = vpop.permute.xlu0 %3931 }
 0x593   : > { %10594 = vpow2.f32 %v2500_v22  ;;  %2098 = vadd.xlane.f32.xlu0 %v10573_v58  ;;  %v13357_v47 = vpop.permute.xlu1 %3933 }
 0x594   : > { %2096 = vadd.xlane.f32.xlu1 %v10575_v45  ;;  %16404 = vst [vmem:[#allocation111_spill] sm:$0xff] %v13357_v47 }
 0x595   : > { %v10587_v39 = vpop.eup %10586  ;;  %9524 = vmatpush3.bf16.msra.mxu1 %v13090_v38 }
 0x596   : > { %9525 = vmatprep.subr.bf16.mxu1 %v13226_v53  ;;  %v2114_v52 = vpack.c.bf16 %v13312_v6, %v10587_v39  ;;  %v13317_v25 = vpop.eup %10588 }
 0x597   : > { %2100 = vadd.xlane.f32.xlu0 %v10587_v39  ;;  %v3088_v39 = vsel %vm1850_vm0, %v13230_v16, 0 }
 0x598   : > { %2094 = vadd.xlane.f32.xlu1 %v10577_v20  ;;  %9477 = vmatprep.mubr.bf16.mxu1 %v2114_v52 }
 0x599   : > { %v10591_v50 = vpop.eup %10590  ;;  %9526 = vmatpush3.bf16.msra.mxu1 %v13226_v53  ;;  %v3067_v53 = vsel %vm1850_vm0, %v13070_v59, 0 }
 0x59a   : > { %9478 = vmatmul.mubr.bf16.gmra.mrb[76].mxu1 %v2115_v34  ;;  %9527 = vmatprep.subr.bf16.mxu1 %v13096_v21  ;;  %v2563_v19 = vpack.c.bf16 %v13317_v25, %v10591_v50  ;;  %v13322_v62 = vpop.eup %10592 }
 0x59b   : > { %2106 = vadd.xlane.f32.xlu0 %v10581_v40 }
 0x59c   : > { %2104 = vadd.xlane.f32.xlu1 %v10583_v8 }
 0x59d   : > { %v13324_v38 = vpop.eup %10594  ;;  %9528 = vmatpush3.bf16.msra.mxu1 %v13096_v21  ;;  %v3070_v21 = vsel %vm1850_vm0, %v13078_v12, 0 }
 0x59e   : > { %10217 = vmatprep.subr.msk.bf16.mxu1 %vm1850_vm0, %v13070_v59  ;;  %v2562_v33 = vpack.c.bf16 %v13324_v38, %v13322_v62  ;;  %v3073_v59 = vsel %vm1850_vm0, %v13100_v54, 0 }
 0x5a0   : > { %9529 = vmatprep.mubr.bf16.mxu1 %v2562_v33 }
 0x5a2   : > { %9530 = vmatmul.mubr.bf16.vlgmr.msra.gmra.mrb[80].mxu1 %v2563_v19  ;;  %v16405_v19 = vld [vmem:[#allocation78_spill] sm:$0xff] }
 0x5a6   : > { %9586 = vmatpush3.bf16.xpose.msra.mxu1 %v3067_v53 }
 0x5a7   : > { %10218 = vmatprep.subr.msk.bf16.mxu1 %vm1850_vm0, %v13078_v12  ;;  %v3076_v12 = vsel %vm1850_vm0, %v13086_v48, 0 }
 0x5ad   : > { %5378 = vrot.lane.b32.xlu1 %v12848_v5, %s11663_s12 }
 0x5ae   : > { %9588 = vmatpush3.bf16.xpose.msra.mxu1 %v3070_v21 }
 0x5af   : > { %10219 = vmatprep.subr.msk.bf16.mxu1 %vm1850_vm0, %v13100_v54 }
 0x5b1   : > { %5376 = vrot.lane.b32.xlu0 %v12838_v24, %s11663_s12 }
 0x5b6   : > { %9590 = vmatpush3.bf16.xpose.msra.mxu1 %v3073_v59 }
 0x5b7   : > { %10220 = vmatprep.subr.msk.bf16.mxu1 %vm1850_vm0, %v13086_v48 }
 0x5be   : > { %9592 = vmatpush3.bf16.xpose.msra.mxu1 %v3076_v12 }
 0x5bf   : > { %10221 = vmatprep.subr.msk.bf16.mxu1 %vm1850_vm0, %v13104_v43 }
 0x5c3   : > { %v2461_v41 = vpop.xlane.xlu0 %2460 }
 0x5c4   : > { %v2487_v54 = vsub.f32 %v13152_v44, %v2461_v41  ;;  %v2463_v13 = vpop.xlane.xlu1 %2462 }
 0x5c5   : > { %v2488_v35 = vsub.f32 %v13144_v60, %v2463_v13  ;;  %v10444_v13 = vld [vmem:[%s12159_s6 + $0x10] sm:$0xff]  }
 0x5c6   : > { %9594 = vmatpush3.bf16.xpose.msra.mxu1 %v3079_v1  ;;  %v2508_v36 = vmul.f32 1.442695, %v2487_v54  ;;  %v16406_v1 = vld [vmem:[#allocation61_spill] sm:$0xff]  ;;  %9545 = vmatprep.subr.bf16.mxu0 %v10444_v13 }
 0x5c7   : > { %10222 = vmatprep.subr.msk.bf16.mxu1 %vm1850_vm0, %v13092_v61  ;;  %v2471_v48 = vpop.xlane.xlu0 %2470  ;;  %v2510_v45 = vmul.f32 1.442695, %v2488_v35  ;;  %9546 = vmatpush3.bf16.msra.mxu0 %v10444_v13  ;;  %v3679_v35 = vsel %vm1850_vm0, %v13117_v46, 0  ;;  %v16431_v13 = vld [vmem:[#allocation41_spill] sm:$0xff] }
 0x5c8   : > { %v2459_v55 = vpop.xlane.xlu1 %2458  ;;  %10596 = vpow2.f32 %v2508_v36  ;;  %v2492_v60 = vsub.f32 %v13160_v2, %v2471_v48  ;;  %v3085_v2 = vsel %vm1850_vm0, %v13094_v0, 0  ;;  %v10445_v48 = vld [vmem:[%s12159_s6 + $0x18] sm:$0xff]  }
 0x5c9   : > { %v2486_v32 = vsub.f32 %v13147_v30, %v2459_v55  ;;  %9547 = vmatprep.subr.bf16.mxu0 %v10445_v48  ;;  %v16407_v36 = vld [vmem:[#allocation64_spill] sm:$0xff]  ;;  %v16408_v55 = vld [vmem:[#allocation62_spill] sm:$0xff] }
 0x5ca   : > { %v2518_v61 = vmul.f32 1.442695, %v2492_v60  ;;  %v16417_v60 = vld [vmem:[#allocation80_spill] sm:$0xff] }
 0x5cb   : > { %v2506_v58 = vmul.f32 1.442695, %v2486_v32  ;;  %v2475_v7 = vpop.xlane.xlu0 %2474  ;;  %9548 = vmatpush3.bf16.msra.mxu0 %v10445_v48  ;;  %v13402_v32 = vld [vmem:[%s12159_s6] sm:$0xff]  }
 0x5cc   : > { %v2494_v44 = vsub.f32 %v13183_v11, %v2475_v7  ;;  %v2465_v17 = vpop.xlane.xlu1 %2464  ;;  %9565 = vmatprep.subr.bf16.mxu0 %v13402_v32  ;;  %v16410_v7 = vld [vmem:[#allocation66_spill] sm:$0xff] }
 0x5cd   : > { %10598 = vpow2.f32 %v2506_v58  ;;  %v2489_v43 = vsub.f32 %v13150_v10, %v2465_v17  ;;  %v16409_v58 = vld [vmem:[#allocation71_spill] sm:$0xff] }
 0x5ce   : > { %9596 = vmatpush3.bf16.xpose.msra.mxu1 %v3082_v23  ;;  %v2522_v15 = vmul.f32 1.442695, %v2494_v44  ;;  %10600 = vpow2.f32 %v2510_v45  ;;  %v3682_v45 = vsel %vm1850_vm0, %v16409_v58, 0  ;;  %v16412_v44 = vld [vmem:[#allocation68_spill] sm:$0xff]  ;;  %v16413_v17 = vld [vmem:[#allocation67_spill] sm:$0xff]  ;;  %v16414_v23 = vld [vmem:[#allocation65_spill] sm:$0xff] }
 0x5cf   : > { %v2512_v28 = vmul.f32 1.442695, %v2489_v43  ;;  %10223 = vmatprep.subr.msk.bf16.mxu1 %vm1850_vm0, %v13094_v0  ;;  %v2477_v30 = vpop.xlane.xlu0 %2476  ;;  %v3685_v43 = vsel %vm1850_vm0, %v16412_v44, 0 }
 0x5d0   : > { %2534 = vadd.xlane.f32.xlu0 %v10591_v50  ;;  %v2495_v11 = vsub.f32 %v13187_v49, %v2477_v30  ;;  %v2467_v63 = vpop.xlane.xlu1 %2466 }
 0x5d1   : > { %10602 = vpow2.f32 %v2512_v28  ;;  %2102 = vadd.xlane.f32.xlu1 %v13312_v6  ;;  %v2490_v3 = vsub.f32 %v13163_v4, %v2467_v63  ;;  %v16416_v28 = vld [vmem:[#allocation69_spill] sm:$0xff] }
 0x5d2   : > { %v2524_v10 = vmul.f32 1.442695, %v2495_v11  ;;  %10604 = vpow2.f32 %v2522_v15  ;;  %v10597_v49 = vpop.eup %10596  ;;  %v16415_v15 = vld [vmem:[#allocation73_spill] sm:$0xff]  ;;  %v16418_v11 = vld [vmem:[#allocation75_spill] sm:$0xff] }
 0x5d3   : > { %v2514_v14 = vmul.f32 1.442695, %v2490_v3  ;;  %v3688_v30 = vsel %vm1850_vm0, %v16415_v15, 0  ;;  %v3691_v63 = vsel %vm1850_vm0, %v16418_v11, 0 }
 0x5d4   : > { %10606 = vpow2.f32 %v2524_v10  ;;  %2536 = vadd.xlane.f32.xlu0 %v13317_v25  ;;  %v2473_v20 = vpop.xlane.xlu1 %2472  ;;  %v16419_v10 = vld [vmem:[#allocation70_spill] sm:$0xff] }
 0x5d5   : > { %v2493_v42 = vsub.f32 %v13168_v37, %v2473_v20  ;;  %2530 = vadd.xlane.f32.xlu1 %v13322_v62  ;;  %10608 = vpow2.f32 %v2518_v61  ;;  %v13435_v61 = vpop.permute.xlu0 %4658  ;;  %v3694_v3 = vsel %vm1850_vm0, %v16419_v10, 0  ;;  %v16420_v20 = vld [vmem:[#allocation77_spill] sm:$0xff] }
 0x5d6   : > { %9598 = vmatpush3.bf16.xpose.msra.mxu1 %v3085_v2  ;;  %v3697_v2 = vsel %vm1850_vm0, %v16420_v20, 0 }
 0x5d7   : > { %v10599_v56 = vpop.eup %10598  ;;  %v2520_v51 = vmul.f32 1.442695, %v2493_v42  ;;  %10224 = vmatprep.subr.msk.bf16.mxu1 %vm1850_vm0, %v13230_v16 }
 0x5d8   : > { %2532 = vadd.xlane.f32.xlu0 %v13324_v38  ;;  %v2469_v4 = vpop.xlane.xlu1 %2468  ;;  %v2564_v9 = vpack.c.bf16 %v10597_v49, %v10599_v56  ;;  %v10601_v26 = vpop.eup %10600 }
 0x5d9   : > { %10610 = vpow2.f32 %v2520_v51  ;;  %v2491_v37 = vsub.f32 %v13172_v57, %v2469_v4 }
 0x5da   : > { %9533 = vmatprep.mubr.bf16.mxu1 %v2564_v9  ;;  %10612 = vpow2.f32 %v2514_v14 }
 0x5db   : > { %v10603_v40 = vpop.eup %10602  ;;  %v2516_v0 = vmul.f32 1.442695, %v2491_v37 }
 0x5dc   : > { %2542 = vadd.xlane.f32.xlu0 %v10601_v26  ;;  %v2479_v8 = vpop.xlane.xlu1 %2478  ;;  %v2565_v22 = vpack.c.bf16 %v10603_v40, %v10601_v26  ;;  %v10605_v34 = vpop.eup %10604  ;;  %v16422_v26 = vld [vmem:[#allocation72_spill] sm:$0xff] }
 0x5dd   : > { %10614 = vpow2.f32 %v2516_v0  ;;  %v2496_v6 = vsub.f32 %v13178_v31, %v2479_v8  ;;  %v16423_v0 = vld [vmem:[#allocation82_spill] sm:$0xff] }
 0x5de   : > { %v10607_v52 = vpop.eup %10606  ;;  %9600 = vmatpush3.bf16.xpose.msra.mxu1 %v3088_v39  ;;  %v4262_v39 = vsel %vm1850_vm0, %v12848_v5, 0 }
 0x5df   : > { %v2526_v25 = vmul.f32 1.442695, %v2496_v6  ;;  %9534 = vmatmul.mubr.bf16.gmra.mrb[84].mxu1 %v2565_v22  ;;  %10225 = vmatprep.subr.msk.bf16.mxu1 %vm1850_vm0, %v13117_v46  ;;  %v2568_v57 = vpack.c.bf16 %v10607_v52, %v10605_v34  ;;  %v10609_v38 = vpop.eup %10608  ;;  %v16411_v46 = vld [vmem:[#allocation63_spill] sm:$0xff]  ;;  %v16424_v6 = vld [vmem:[#allocation74_spill] sm:$0xff] }
 0x5e0   : > { %2538 = vadd.xlane.f32.xlu0 %v10599_v56  ;;  %v2481_v50 = vpop.xlane.xlu1 %2480  ;;  %v16421_v56 = vld [vmem:[#allocation95_spill] sm:$0xff] }
 0x5e1   : > { %10616 = vpow2.f32 %v2526_v25  ;;  %v2497_v62 = vsub.f32 %v16405_v19, %v2481_v50  ;;  %v3700_v14 = vsel %vm1850_vm0, %v16421_v56, 0  ;;  %v16426_v25 = vld [vmem:[#allocation50_spill] sm:$0xff]  ;;  %v16427_v19 = vld [vmem:[#allocation76_spill] sm:$0xff] }
 0x5e3   : > { %v10611_v33 = vpop.eup %10610  ;;  %v2528_v53 = vmul.f32 1.442695, %v2497_v62  ;;  %v4265_v62 = vsel %vm1850_vm0, %v16426_v25, 0 }
 0x5e4   : > { %2544 = vadd.xlane.f32.xlu0 %v10603_v40  ;;  %v2567_v31 = vpack.c.bf16 %v10611_v33, %v10609_v38  ;;  %v10613_v16 = vpop.eup %10612  ;;  %v13449_v4 = vpop.permute.xlu1 %4656  ;;  %v4259_v40 = vsel %vm1850_vm0, %v12838_v24, 0 }
 0x5e5   : > { %10618 = vpow2.f32 %v2528_v53  ;;  %v16429_v53 = vld [vmem:[#allocation52_spill] sm:$0xff] }
 0x5e7   : > { %v10615_v21 = vpop.eup %10614 }
 0x5e8   : > { %2540 = vadd.xlane.f32.xlu0 %v10597_v49  ;;  %2548 = vadd.xlane.f32.xlu1 %v10615_v21  ;;  %v2566_v59 = vpack.c.bf16 %v10615_v21, %v10613_v16 }
 0x5ea   : > { %9537 = vmatprep.mubr.bf16.mxu1 %v2566_v59  ;;  %v16430_v59 = vld [vmem:[#allocation81_spill] sm:$0xff] }
 0x5eb   : > { %v10617_v12 = vpop.eup %10616  ;;  %9538 = vmatmul.mubr.bf16.gmra.mrb[88].mxu1 %v2567_v31 }
 0x5ec   : > { %2550 = vadd.xlane.f32.xlu0 %v10609_v38  ;;  %2558 = vadd.xlane.f32.xlu1 %v10617_v12 }
 0x5ed   : > { %9541 = vmatprep.mubr.bf16.mxu1 %v2568_v57 }
 0x5ef   : > { %v10619_v41 = vpop.eup %10618 }
 0x5f0   : > { %2546 = vadd.xlane.f32.xlu0 %v10613_v16  ;;  %2560 = vadd.xlane.f32.xlu1 %v10619_v41  ;;  %v2569_v54 = vpack.c.bf16 %v10619_v41, %v10617_v12  ;;  %v4268_v41 = vsel %vm1850_vm0, %v16429_v53, 0 }
 0x5f3   : > { %9542 = vmatmul.mubr.bf16.gmra.mrb[92].mxu1 %v2569_v54 }
 0x5f4   : > { %2552 = vadd.xlane.f32.xlu0 %v10611_v33  ;;  %2556 = vadd.xlane.f32.xlu1 %v10607_v52  ;;  %v16425_v52 = vld [vmem:[#allocation84_spill] sm:$0xff]  ;;  %v16428_v33 = vld [vmem:[#allocation79_spill] sm:$0xff] }
 0x5f5   : > { %9601 = vmatprep.mubr.msk.bf16.mxu1 %vm1850_vm0, %v16406_v1 }
 0x5f8   : > { %2554 = vadd.xlane.f32.xlu0 %v10605_v34 }
 0x5fb   : > { %9602 = vmatmul.mubr.msk.bf16.vlgmr.msra.gmra.mrb[96].mxu1 %vm1850_vm0, %v16407_v36 }
 0x5fc   : > { %9670 = vmatpush3.bf16.xpose.msra.mxu1 %v3679_v35  ;;  %9605 = vmatprep.mubr.msk.bf16.mxu1 %vm1850_vm0, %v16408_v55  ;;  %v16432_v35 = vld [vmem:[#allocation38_spill] sm:$0xff] }
 0x5fd   : > { %10226 = vmatprep.subr.msk.bf16.mxu1 %vm1850_vm0, %v16409_v58 }
 0x603   : > { %9606 = vmatmul.mubr.msk.bf16.gmra.mrb[100].mxu1 %vm1850_vm0, %v16410_v7 }
 0x604   : > { %9672 = vmatpush3.bf16.xpose.msra.mxu1 %v3682_v45  ;;  %9609 = vmatprep.mubr.msk.bf16.mxu1 %vm1850_vm0, %v16411_v46  ;;  %v2081_v42 = vpop.xlane.xlu0 %2080 }
 0x605   : > { %10227 = vmatprep.subr.msk.bf16.mxu1 %vm1850_vm0, %v16412_v44  ;;  %10620 = vrcp.f32 %v2081_v42 }
 0x608   : > { %v2077_v49 = vpop.xlane.xlu0 %2076 }
 0x609   : > { %10622 = vrcp.f32 %v2077_v49 }
 0x60b   : > { %9610 = vmatmul.mubr.msk.bf16.gmra.mrb[104].mxu1 %vm1850_vm0, %v16413_v17 }
 0x60c   : > { %9674 = vmatpush3.bf16.xpose.msra.mxu1 %v3685_v43  ;;  %9613 = vmatprep.mubr.msk.bf16.mxu1 %vm1850_vm0, %v16414_v23  ;;  %v2083_v51 = vpop.xlane.xlu0 %2082 }
 0x60d   : > { %10228 = vmatprep.subr.msk.bf16.mxu1 %vm1850_vm0, %v16415_v15  ;;  %10624 = vrcp.f32 %v2083_v51 }
 0x60f   : > { %v10621_v21 = vpop.eup %10620 }
 0x613   : > { %9614 = vmatmul.mubr.msk.bf16.gmra.mrb[108].mxu1 %vm1850_vm0, %v16416_v28  ;;  %v2085_v9 = vpop.xlane.xlu0 %2084  ;;  %v10623_v54 = vpop.eup %10622 }
 0x614   : > { %9676 = vmatpush3.bf16.xpose.msra.mxu1 %v3688_v30  ;;  %9685 = vmatprep.mubr.msk.bf16.mxu1 %vm1850_vm0, %v16417_v60  ;;  %v4271_v30 = vsel %vm1850_vm0, %v16432_v35, 0 }
 0x615   : > { %10229 = vmatprep.subr.msk.bf16.mxu1 %vm1850_vm0, %v16418_v11  ;;  %v2079_v37 = vpop.xlane.xlu1 %2078 }
 0x616   : > { %10626 = vrcp.f32 %v2079_v37 }
 0x617   : > { %10628 = vrcp.f32 %v2085_v9  ;;  %v10625_v48 = vpop.eup %10624 }
 0x618   : > { %v2091_v8 = vpop.xlane.xlu0 %2090 }
 0x619   : > { %v2089_v22 = vpop.xlane.xlu1 %2088  ;;  %10630 = vrcp.f32 %v2091_v8 }
 0x61a   : > { %10632 = vrcp.f32 %v2089_v22 }
 0x61c   : > { %9678 = vmatpush3.bf16.xpose.msra.mxu1 %v3691_v63  ;;  %v2093_v34 = vpop.xlane.xlu0 %2092  ;;  %v16433_v63 = vld [vmem:[#allocation40_spill] sm:$0xff] }
 0x61d   : > { %10230 = vmatprep.subr.msk.bf16.mxu1 %vm1850_vm0, %v16419_v10  ;;  %v2087_v57 = vpop.xlane.xlu1 %2086  ;;  %v4274_v22 = vsel %vm1850_vm0, %v16433_v63, 0 }
 0x61e   : > { %10634 = vrcp.f32 %v2087_v57 }
 0x61f   : > { %10636 = vrcp.f32 %v2093_v34 }
 0x620   : > { %v2099_v50 = vpop.xlane.xlu0 %2098  ;;  %v10627_v58 = vpop.eup %10626 }
 0x621   : > { %v2097_v38 = vpop.xlane.xlu1 %2096  ;;  %10638 = vrcp.f32 %v2099_v50  ;;  %v10629_v60 = vpop.eup %10628 }
 0x622   : > { %10640 = vrcp.f32 %v2097_v38 }
 0x623   : > { %v10631_v10 = vpop.eup %10630 }
 0x624   : > { %9680 = vmatpush3.bf16.xpose.msra.mxu1 %v3694_v3  ;;  %v2101_v31 = vpop.xlane.xlu0 %2100  ;;  %v10633_v42 = vpop.eup %10632 }
 0x625   : > { %10231 = vmatprep.subr.msk.bf16.mxu1 %vm1850_vm0, %v16420_v20  ;;  %v2095_v16 = vpop.xlane.xlu1 %2094 }
 0x626   : > { %10642 = vrcp.f32 %v2095_v16 }
 0x627   : > { %10644 = vrcp.f32 %v2101_v31 }
 0x628   : > { %v2107_v36 = vpop.xlane.xlu0 %2106 }
 0x629   : > { %v2105_v43 = vpop.xlane.xlu1 %2104  ;;  %10646 = vrcp.f32 %v2107_v36 }
 0x62a   : > { %10648 = vrcp.f32 %v2105_v43 }
 0x62c   : > { %9682 = vmatpush3.bf16.xpose.msra.mxu1 %v3697_v2  ;;  %v13495_v28 = vpop.permute.xlu0 %5376 }
 0x62d   : > { %10232 = vmatprep.subr.msk.bf16.mxu1 %vm1850_vm0, %v16421_v56  ;;  %v13501_v3 = vpop.permute.xlu1 %5378  ;;  %v10635_v56 = vpop.eup %10634 }
 0x62e   : > { %v10637_v34 = vpop.eup %10636 }
 0x62f   : > { %v10639_v57 = vpop.eup %10638 }
 0x634   : > { %9684 = vmatpush3.bf16.xpose.msra.mxu1 %v3700_v14 }
 0x635   : > { %10233 = vmatprep.subr.msk.bf16.mxu1 %vm1850_vm0, %v12838_v24 }
 0x63b   : > { %9686 = vmatmul.mubr.msk.bf16.vlgmr.msra.gmra.mrb[112].mxu1 %vm1850_vm0, %v16422_v26 }
 0x63c   : > { %9689 = vmatprep.mubr.msk.bf16.mxu1 %vm1850_vm0, %v16423_v0  ;;  %9754 = vmatpush3.bf16.xpose.msra.mxu1 %v4259_v40 }
 0x63d   : > { %10234 = vmatprep.subr.msk.bf16.mxu1 %vm1850_vm0, %v12848_v5 }
 0x643   : > { %9690 = vmatmul.mubr.msk.bf16.gmra.mrb[116].mxu1 %vm1850_vm0, %v16424_v6 }
 0x644   : > { %9693 = vmatprep.mubr.msk.bf16.mxu1 %vm1850_vm0, %v16425_v52  ;;  %9756 = vmatpush3.bf16.xpose.msra.mxu1 %v4262_v39  ;;  %v16434_v52 = vld [vmem:[#allocation44_spill] sm:$0xff] }
 0x645   : > { %10235 = vmatprep.subr.msk.bf16.mxu1 %vm1850_vm0, %v16426_v25 }
 0x64b   : > { %9694 = vmatmul.mubr.msk.bf16.gmra.mrb[120].mxu1 %vm1850_vm0, %v16427_v19  ;;  %v10641_v19 = vpop.eup %10640 }
 0x64c   : > { %9697 = vmatprep.mubr.msk.bf16.mxu1 %vm1850_vm0, %v16428_v33  ;;  %9758 = vmatpush3.bf16.xpose.msra.mxu1 %v4265_v62  ;;  %v10643_v38 = vpop.eup %10642 }
 0x64d   : > { %10236 = vmatprep.subr.msk.bf16.mxu1 %vm1850_vm0, %v16429_v53  ;;  %v10645_v36 = vpop.eup %10644 }
 0x653   : > { %9698 = vmatmul.mubr.msk.bf16.gmra.mrb[124].mxu1 %vm1850_vm0, %v16430_v59  ;;  %v9467_v12 = vpop.f32.mrb[64].mxu1 }
 0x654   : > { %9760 = vmatpush3.bf16.xpose.msra.mxu1 %v4268_v41  ;;  %9769 = vmatprep.mubr.msk.bf16.mxu1 %vm1850_vm0, %v16431_v13  ;;  %v2150_v1 = vpop.f32.mrb[65].mxu1  ;;  %v13483_v7 = vmul.f32 %v10621_v21, %v9467_v12 }
 0x655   : > { %10237 = vmatprep.subr.msk.bf16.mxu1 %vm1850_vm0, %v16432_v35  ;;  %v9468_v55 = vpop.f32.mrb[66].mxu1  ;;  %v13487_v44 = vmul.f32 %v10623_v54, %v2150_v1 }
 0x656   : > { %v13485_v45 = vmul.f32 %v10625_v48, %v9468_v55  ;;  %v2153_v46 = vpop.f32.mrb[67].mxu1  ;;  %v4277_v48 = vsel %vm1850_vm0, %v16434_v52, 0 }
 0x657   : > { %v13489_v17 = vmul.f32 %v10627_v58, %v2153_v46  ;;  %v16435_v58 = vld [vmem:[#allocation48_spill] sm:$0xff]  ;;  %v10647_v46 = vpop.eup %10646 }
 0x659   : > { %v2245_v15 = vpack.c.bf16 %v13489_v17, %v13487_v44  ;;  %v16456_v44 = vpack.c.bf16 %v13485_v45, %v13483_v7  ;;  %v16459_v7 = vld [vmem:[#allocation83_spill] sm:$0xff] }
 0x65c   : > { %9762 = vmatpush3.bf16.xpose.msra.mxu1 %v4271_v30  ;;  %v10649_v30 = vpop.eup %10648 }
 0x65d   : > { %v9471_v11 = vpop.f32.mrb[68].mxu1  ;;  %10238 = vmatprep.subr.msk.bf16.mxu1 %vm1850_vm0, %v16433_v63  ;;  %v2535_v2 = vpop.xlane.xlu0 %2534 }
 0x65e   : > { %v2166_v20 = vpop.f32.mrb[69].mxu1  ;;  %v13503_v51 = vmul.f32 %v10633_v42, %v9471_v11  ;;  %v2103_v0 = vpop.xlane.xlu1 %2102 }
 0x65f   : > { %v9472_v49 = vpop.f32.mrb[70].mxu1  ;;  %v13507_v37 = vmul.f32 %v10629_v60, %v2166_v20  ;;  %10650 = vrcp.f32 %v2103_v0  ;;  %v4280_v0 = vsel %vm1850_vm0, %v16435_v58, 0 }
 0x660   : > { %v13505_v14 = vmul.f32 %v10631_v10, %v9472_v49  ;;  %v2169_v9 = vpop.f32.mrb[71].mxu1  ;;  %10652 = vrcp.f32 %v2535_v2 }
 0x661   : > { %v13509_v26 = vmul.f32 %v10635_v56, %v2169_v9  ;;  %v2537_v6 = vpop.xlane.xlu0 %2536 }
 0x662   : > { %v2531_v12 = vpop.xlane.xlu1 %2530  ;;  %10654 = vrcp.f32 %v2537_v6  ;;  %v16436_v6 = vld [vmem:[#allocation102_spill] sm:$0xff] }
 0x663   : > { %10656 = vrcp.f32 %v2531_v12 }
 0x664   : > { %9764 = vmatpush3.bf16.xpose.msra.mxu1 %v4274_v22 }
 0x665   : > { %v9475_v39 = vpop.f32.mrb[72].mxu1  ;;  %10239 = vmatprep.subr.msk.bf16.mxu1 %vm1850_vm0, %v16434_v52  ;;  %v2533_v54 = vpop.xlane.xlu0 %2532 }
 0x666   : > { %v2182_v50 = vpop.f32.mrb[73].mxu1  ;;  %v13519_v33 = vmul.f32 %v10641_v19, %v9475_v39  ;;  %10658 = vrcp.f32 %v2533_v54 }
 0x667   : > { %v9476_v62 = vpop.f32.mrb[74].mxu1  ;;  %v13523_v21 = vmul.f32 %v10637_v34, %v2182_v50 }
 0x668   : > { %v13521_v31 = vmul.f32 %v10639_v57, %v9476_v62  ;;  %v2185_v16 = vpop.f32.mrb[75].mxu1 }
 0x669   : > { %v13525_v59 = vmul.f32 %v10643_v38, %v2185_v16  ;;  %v10651_v11 = vpop.eup %10650 }
 0x66a   : > { %v10653_v22 = vpop.eup %10652 }
 0x66c   : > { %9766 = vmatpush3.bf16.xpose.msra.mxu1 %v4277_v48  ;;  %v10655_v39 = vpop.eup %10654 }
 0x66d   : > { %v9479_v55 = vpop.f32.mrb[76].mxu1  ;;  %10240 = vmatprep.subr.msk.bf16.mxu1 %vm1850_vm0, %v16435_v58  ;;  %v10657_v50 = vpop.eup %10656 }
 0x66e   : > { %v2198_v43 = vpop.f32.mrb[77].mxu1  ;;  %v13535_v10 = vmul.f32 %v10649_v30, %v9479_v55  ;;  %v16438_v30 = vld [vmem:[#allocation49_spill] sm:$0xff] }
 0x66f   : > { %v9480_v60 = vpop.f32.mrb[78].mxu1  ;;  %v13539_v2 = vmul.f32 %v10645_v36, %v2198_v43  ;;  %v4709_v43 = vsel %vm1850_vm0, %v16436_v6, 0 }
 0x670   : > { %v13537_v20 = vmul.f32 %v10647_v46, %v9480_v60  ;;  %v2201_v42 = vpop.f32.mrb[79].mxu1  ;;  %v10659_v62 = vpop.eup %10658  ;;  %v16437_v46 = vld [vmem:[#allocation45_spill] sm:$0xff] }
 0x671   : > { %v13541_v49 = vmul.f32 %v10651_v11, %v2201_v42  ;;  %v10447_v60 = vld [vmem:[%s12159_s6 + $0x8] sm:$0xff]   ;;  %v16439_v11 = vld [vmem:[#allocation104_spill] sm:$0xff]  ;;  %v16440_v42 = vld [vmem:[#allocation51_spill] sm:$0xff] }
 0x674   : > { %9768 = vmatpush3.bf16.xpose.msra.mxu1 %v4280_v0  ;;  %v16441_v0 = vld [vmem:[#allocation86_spill] sm:$0xff] }
 0x675   : > { %v9531_v34 = vpop.f32.mrb[80].mxu1  ;;  %10241 = vmatprep.subr.msk.bf16.mxu1 %vm1850_vm0, %v16436_v6  ;;  %v16443_v6 = vld [vmem:[#allocation106_spill] sm:$0xff] }
 0x676   : > { %v2636_v57 = vpop.f32.mrb[81].mxu1  ;;  %v2717_v38 = vmul.f32 %v10653_v22, %v9531_v34  ;;  %v16442_v22 = vld [vmem:[#allocation37_spill] sm:$0xff]  ;;  %v4712_v34 = vsel %vm1850_vm0, %v16439_v11, 0 }
 0x677   : > { %v9532_v19 = vpop.f32.mrb[82].mxu1  ;;  %v2715_v54 = vmul.f32 %v10657_v50, %v2636_v57  ;;  %v4715_v57 = vsel %vm1850_vm0, %v16443_v6, 0  ;;  %v16446_v50 = vld [vmem:[#allocation103_spill] sm:$0xff] }
 0x678   : > { %v2718_v16 = vmul.f32 %v10655_v39, %v9532_v19  ;;  %v2639_v12 = vpop.f32.mrb[83].mxu1  ;;  %v16444_v39 = vld [vmem:[#allocation39_spill] sm:$0xff]  ;;  %v2543_v19 = vpop.xlane.xlu0 %2542 }
 0x679   : > { %v2716_v48 = vmul.f32 %v10659_v62, %v2639_v12  ;;  %v16447_v62 = vld [vmem:[#allocation46_spill] sm:$0xff]  ;;  %10660 = vrcp.f32 %v2543_v19 }
 0x67a   : > { %v2732_v36 = vpack.c.bf16 %v2718_v16, %v2717_v38  ;;  %v4718_v38 = vsel %vm1850_vm0, %v16446_v50, 0  ;;  %v16448_v16 = vld [vmem:[#allocation99_spill] sm:$0xff] }
 0x67b   : > { %v2731_v55 = vpack.c.bf16 %v2716_v48, %v2715_v54  ;;  %9770 = vmatmul.mubr.msk.bf16.vlgmr.msra.gmra.mrb[128].mxu1 %vm1850_vm0, %v16437_v46  ;;  %v16449_v54 = vld [vmem:[#allocation94_spill] sm:$0xff] }
 0x67c   : > { %9773 = vmatprep.mubr.msk.bf16.mxu1 %vm1850_vm0, %v16438_v30  ;;  %9818 = vmatpush3.bf16.xpose.msra.mxu1 %v4709_v43  ;;  %v2539_v12 = vpop.xlane.xlu0 %2538 }
 0x67d   : > { %9549 = vmatprep.mubr.msk.bf16.mxu0 %vm1850_vm0, %v2731_v55  ;;  %10242 = vmatprep.subr.msk.bf16.mxu1 %vm1850_vm0, %v16439_v11  ;;  %v16450_v55 = vld [vmem:[#allocation87_spill] sm:$0xff]  ;;  %v16451_v11 = vld [vmem:[#allocation96_spill] sm:$0xff]  ;;  %10662 = vrcp.f32 %v2539_v12 }
 0x67e   : > { %9550 = vmatmul.mubr.msk.bf16.vlgmr.msra.gmra.mrb[64].mxu0 %vm1850_vm0, %v2732_v36  ;;  %v4721_v36 = vsel %vm1850_vm0, %v16449_v54, 0 }
 0x67f   : > { %9566 = vmatpush3.bf16.msra.mxu0 %v13402_v32  ;;  %v16445_v32 = vld [vmem:[#allocation42_spill] sm:$0xff] }
 0x680   : > { %9567 = vmatprep.subr.bf16.mxu0 %v10447_v60  ;;  %v2545_v48 = vpop.xlane.xlu0 %2544 }
 0x681   : > { %10664 = vrcp.f32 %v2545_v48 }
 0x683   : > { %9568 = vmatpush3.bf16.msra.mxu0 %v10447_v60  ;;  %9774 = vmatmul.mubr.msk.bf16.gmra.mrb[132].mxu1 %vm1850_vm0, %v16440_v42  ;;  %v4724_v60 = vsel %vm1850_vm0, %v16450_v55, 0 }
 0x684   : > { %9617 = vmatprep.subr.bf16.mxu0 %v16441_v0  ;;  %9777 = vmatprep.mubr.msk.bf16.mxu1 %vm1850_vm0, %v16442_v22  ;;  %v2541_v43 = vpop.xlane.xlu0 %2540 }
 0x685   : > { %9820 = vmatpush3.bf16.xpose.msra.mxu1 %v4712_v34  ;;  %10666 = vrcp.f32 %v2541_v43 }
 0x686   : > { %10243 = vmatprep.subr.msk.bf16.mxu1 %vm1850_vm0, %v16443_v6  ;;  %v2549_v6 = vpop.xlane.xlu1 %2548 }
 0x687   : > { %10668 = vrcp.f32 %v2549_v6 }
 0x688   : > { %v2551_v34 = vpop.xlane.xlu0 %2550 }
 0x689   : > { %10670 = vrcp.f32 %v2551_v34 }
 0x68b   : > { %9778 = vmatmul.mubr.msk.bf16.gmra.mrb[136].mxu1 %vm1850_vm0, %v16444_v39 }
 0x68c   : > { %9781 = vmatprep.mubr.msk.bf16.mxu1 %vm1850_vm0, %v16445_v32 }
 0x68d   : > { %9822 = vmatpush3.bf16.xpose.msra.mxu1 %v4715_v57  ;;  %v4727_v57 = vsel %vm1850_vm0, %v16451_v11, 0 }
 0x68e   : > { %10244 = vmatprep.subr.msk.bf16.mxu1 %vm1850_vm0, %v16446_v50  ;;  %v2547_v50 = vpop.xlane.xlu0 %2546 }
 0x693   : > { %9782 = vmatmul.mubr.msk.bf16.gmra.mrb[140].mxu1 %vm1850_vm0, %v16447_v62 }
 0x694   : > { %9833 = vmatprep.mubr.msk.bf16.mxu1 %vm1850_vm0, %v16448_v16  ;;  %v2559_v16 = vpop.xlane.xlu1 %2558 }
 0x695   : > { %9824 = vmatpush3.bf16.xpose.msra.mxu1 %v4718_v38  ;;  %v16452_v38 = vld [vmem:[#allocation98_spill] sm:$0xff] }
 0x696   : > { %10245 = vmatprep.subr.msk.bf16.mxu1 %vm1850_vm0, %v16449_v54  ;;  %v10661_v54 = vpop.eup %10660  ;;  %v4730_v12 = vsel %vm1850_vm0, %v16452_v38, 0 }
 0x698   : > { %v2561_v43 = vpop.xlane.xlu1 %2560 }
 0x69c   : > { %v2557_v23 = vpop.xlane.xlu1 %2556 }
 0x69d   : > { %9826 = vmatpush3.bf16.xpose.msra.mxu1 %v4721_v36 }
 0x69e   : > { %10246 = vmatprep.subr.msk.bf16.mxu1 %vm1850_vm0, %v16450_v55  ;;  %v10663_v55 = vpop.eup %10662 }
 0x69f   : > { %v10665_v9 = vpop.eup %10664 }
 0x6a0   : > { %v10667_v48 = vpop.eup %10666 }
 0x6a5   : > { %9828 = vmatpush3.bf16.xpose.msra.mxu1 %v4724_v60  ;;  %v2553_v60 = vpop.xlane.xlu0 %2552 }
 0x6a6   : > { %10247 = vmatprep.subr.msk.bf16.mxu1 %vm1850_vm0, %v16451_v11  ;;  %10672 = vrcp.f32 %v2553_v60 }
 0x6a7   : > { %10674 = vrcp.f32 %v2547_v50 }
 0x6a8   : > { %10676 = vrcp.f32 %v2559_v16 }
 0x6a9   : > { %v2555_v34 = vpop.xlane.xlu0 %2554  ;;  %10678 = vrcp.f32 %v2561_v43  ;;  %v16455_v43 = vld [vmem:[#allocation109_spill] sm:$0xff] }
 0x6aa   : > { %10680 = vrcp.f32 %v2557_v23  ;;  %v5420_v23 = vsel %vm1850_vm0, %v13501_v3, 0 }
 0x6ab   : > { %10682 = vrcp.f32 %v2555_v34 }
 0x6ad   : > { %9830 = vmatpush3.bf16.xpose.msra.mxu1 %v4727_v57 }
 0x6ae   : > { %10248 = vmatprep.subr.msk.bf16.mxu1 %vm1850_vm0, %v16452_v38  ;;  %v16453_v38 = vld [vmem:[#allocation101_spill] sm:$0xff] }
 0x6b2   : > { %v9535_v36 = vpop.f32.mrb[84].mxu1 }
 0x6b3   : > { %v2652_v56 = vpop.f32.mrb[85].mxu1  ;;  %v2721_v11 = vmul.f32 %v10661_v54, %v9535_v36 }
 0x6b4   : > { %v9536_v19 = vpop.f32.mrb[86].mxu1  ;;  %v2719_v1 = vmul.f32 %v10663_v55, %v2652_v56  ;;  %v5417_v56 = vsel %vm1850_vm0, %v13495_v28, 0 }
 0x6b5   : > { %v2722_v57 = vmul.f32 %v10665_v9, %v9536_v19  ;;  %9832 = vmatpush3.bf16.xpose.msra.mxu1 %v4730_v12  ;;  %v2655_v41 = vpop.f32.mrb[87].mxu1  ;;  %v10669_v9 = vpop.eup %10668 }
 0x6b6   : > { %v2720_v40 = vmul.f32 %v10667_v48, %v2655_v41  ;;  %10249 = vmatprep.subr.msk.bf16.mxu1 %vm1850_vm0, %v13495_v28  ;;  %v16454_v41 = vld [vmem:[#allocation107_spill] sm:$0xff] }
 0x6b7   : > { %v2734_v8 = vpack.c.bf16 %v2722_v57, %v2721_v11 }
 0x6b8   : > { %v2733_v6 = vpack.c.bf16 %v2720_v40, %v2719_v1 }
 0x6ba   : > { %9553 = vmatprep.mubr.msk.bf16.mxu0 %vm1850_vm0, %v2733_v6 }
 0x6bb   : > { %9554 = vmatmul.mubr.msk.bf16.gmra.mrb[68].mxu0 %vm1850_vm0, %v2734_v8  ;;  %v10671_v8 = vpop.eup %10670 }
 0x6bc   : > { %9834 = vmatmul.mubr.msk.bf16.vlgmr.msra.gmra.mrb[144].mxu1 %vm1850_vm0, %v16453_v38  ;;  %v10673_v50 = vpop.eup %10672 }
 0x6bd   : > { %9837 = vmatprep.mubr.msk.bf16.mxu1 %vm1850_vm0, %v16454_v41  ;;  %9922 = vmatpush3.bf16.xpose.msra.mxu1 %v5417_v56  ;;  %v10675_v54 = vpop.eup %10674 }
 0x6be   : > { %10250 = vmatprep.subr.msk.bf16.mxu1 %vm1850_vm0, %v13501_v3  ;;  %v9539_v40 = vpop.f32.mrb[88].mxu1  ;;  %v10677_v11 = vpop.eup %10676 }
 0x6bf   : > { %v2668_v1 = vpop.f32.mrb[89].mxu1  ;;  %v2725_v36 = vmul.f32 %v10671_v8, %v9539_v40  ;;  %v10679_v6 = vpop.eup %10678 }
 0x6c0   : > { %v9540_v16 = vpop.f32.mrb[90].mxu1  ;;  %v2723_v60 = vmul.f32 %v10675_v54, %v2668_v1  ;;  %v10681_v38 = vpop.eup %10680 }
 0x6c1   : > { %v2726_v55 = vmul.f32 %v10673_v50, %v9540_v16  ;;  %v2671_v28 = vpop.f32.mrb[91].mxu1  ;;  %v10683_v41 = vpop.eup %10682 }
 0x6c2   : > { %v2724_v19 = vmul.f32 %v10669_v9, %v2671_v28 }
 0x6c3   : > { %v2736_v12 = vpack.c.bf16 %v2726_v55, %v2725_v36  ;;  %v16458_v55 = vld [vmem:[#allocation88_spill] sm:$0xff] }
 0x6c4   : > { %v2735_v48 = vpack.c.bf16 %v2724_v19, %v2723_v60  ;;  %9838 = vmatmul.mubr.msk.bf16.gmra.mrb[148].mxu1 %vm1850_vm0, %v16455_v43  ;;  %v16462_v19 = vld [vmem:[#allocation90_spill] sm:$0xff] }
 0x6c5   : > { %9841 = vmatprep.mubr.msk.bf16.mxu1 %vm1850_vm0, %v13343_v29  ;;  %9924 = vmatpush3.bf16.xpose.msra.mxu1 %v5420_v23  ;;  %v16466_v23 = vld [vmem:[#allocation92_spill] sm:$0xff] }
 0x6c6   : > { %v9543_v57 = vpop.f32.mrb[92].mxu1  ;;  %9557 = vmatprep.mubr.msk.bf16.mxu0 %vm1850_vm0, %v2735_v48  ;;  %v16465_v48 = vpack.c.bf16 %v13541_v49, %v13539_v2  ;;  %v16469_v2 = vld [vmem:[#allocation93_spill] sm:$0xff] }
 0x6c7   : > { %v2684_v34 = vpop.f32.mrb[93].mxu1  ;;  %9558 = vmatmul.mubr.msk.bf16.gmra.mrb[72].mxu0 %vm1850_vm0, %v2736_v12  ;;  %v2729_v9 = vmul.f32 %v10677_v11, %v9543_v57  ;;  %v13725_v49 = vld [vmem:[%s12159_s6 + $0x20] sm:$0xff]  }
 0x6c8   : > { %v9544_v56 = vpop.f32.mrb[94].mxu1  ;;  %v2727_v1 = vmul.f32 %v10683_v41, %v2684_v34 }
 0x6c9   : > { %v2730_v40 = vmul.f32 %v10679_v6, %v9544_v56  ;;  %v2687_v8 = vpop.f32.mrb[95].mxu1 }
 0x6ca   : > { %v2728_v3 = vmul.f32 %v10681_v38, %v2687_v8 }
 0x6cb   : > { %v2738_v50 = vpack.c.bf16 %v2730_v40, %v2729_v9 }
 0x6cc   : > { %v2737_v16 = vpack.c.bf16 %v2728_v3, %v2727_v1  ;;  %9842 = vmatmul.mubr.msk.bf16.gmra.mrb[152].mxu1 %vm1850_vm0, %v13349_v27 }
 0x6cd   : > { %9845 = vmatprep.mubr.msk.bf16.mxu1 %vm1850_vm0, %v13449_v4 }
 0x6ce   : > { %9561 = vmatprep.mubr.msk.bf16.mxu0 %vm1850_vm0, %v2737_v16  ;;  %v13627_v29 = vpop.f32.mrb[96].mxu1 }
 0x6cf   : > { %3191 = vmax.xlane.f32.xlu1 %v13627_v29  ;;  %9562 = vmatmul.mubr.msk.bf16.gmra.mrb[76].mxu0 %vm1850_vm0, %v2738_v50  ;;  %v13631_v54 = vpop.f32.mrb[97].mxu1 }
 0x6d0   : > { %3187 = vmax.xlane.f32.xlu0 %v13631_v54  ;;  %9569 = vmatprep.mubr.msk.bf16.mxu0 %vm1850_vm0, %v2245_v15  ;;  %v13638_v27 = vpop.f32.mrb[98].mxu1 }
 0x6d1   : > { %v13640_v4 = vpop.f32.mrb[99].mxu1 }
 0x6d3   : > { %3189 = vmax.xlane.f32.xlu1 %v13640_v4 }
 0x6d4   : > { %9846 = vmatmul.mubr.msk.bf16.gmra.mrb[156].mxu1 %vm1850_vm0, %v13435_v61  ;;  %3193 = vmax.xlane.f32.xlu0 %v13638_v27  ;;  %v16457_v61 = vpack.c.bf16 %v13509_v26, %v13507_v37  ;;  %v16460_v37 = vpack.c.bf16 %v13505_v14, %v13503_v51  ;;  %v16463_v51 = vld [vmem:[#allocation85_spill] sm:$0xff] }
 0x6d6   : > { %v13646_v36 = vpop.f32.mrb[100].mxu1 }
 0x6d7   : > { %3199 = vmax.xlane.f32.xlu1 %v13646_v36  ;;  %9570 = vmatmul.mubr.msk.bf16.vlgmr.msra.gmra.mrb[64].mxu0 %vm1850_vm0, %v16456_v44  ;;  %v13653_v17 = vpop.f32.mrb[101].mxu1 }
 0x6d8   : > { %9618 = vmatpush3.bf16.msra.mxu0 %v16441_v0  ;;  %3195 = vmax.xlane.f32.xlu0 %v13653_v17  ;;  %v13657_v15 = vpop.f32.mrb[102].mxu1  ;;  %v16461_v0 = vpack.c.bf16 %v13525_v59, %v13523_v21  ;;  %v16464_v21 = vpack.c.bf16 %v13521_v31, %v13519_v33  ;;  %v16467_v33 = vld [vmem:[#allocation97_spill] sm:$0xff]  ;;  %v16468_v31 = vpack.c.bf16 %v13537_v20, %v13535_v10 }
 0x6d9   : > { %9573 = vmatprep.mubr.msk.bf16.mxu0 %vm1850_vm0, %v16457_v61  ;;  %9619 = vmatprep.subr.bf16.mxu0 %v16458_v55  ;;  %v13664_v28 = vpop.f32.mrb[103].mxu1 }
 0x6db   : > { %3197 = vmax.xlane.f32.xlu1 %v13664_v28 }
 0x6dc   : > { %9620 = vmatpush3.bf16.msra.mxu0 %v16458_v55  ;;  %3201 = vmax.xlane.f32.xlu0 %v13657_v15 }
 0x6dd   : > { %9621 = vmatprep.subr.bf16.mxu0 %v16459_v7 }
 0x6de   : > { %v13670_v45 = vpop.f32.mrb[104].mxu1 }
 0x6df   : > { %3207 = vmax.xlane.f32.xlu1 %v13670_v45  ;;  %9574 = vmatmul.mubr.msk.bf16.gmra.mrb[68].mxu0 %vm1850_vm0, %v16460_v37  ;;  %v13677_v26 = vpop.f32.mrb[105].mxu1 }
 0x6e0   : > { %9622 = vmatpush3.bf16.msra.mxu0 %v16459_v7  ;;  %9577 = vmatprep.mubr.msk.bf16.mxu0 %vm1850_vm0, %v16461_v0  ;;  %v13684_v60 = vpop.f32.mrb[106].mxu1 }
 0x6e1   : > { %9623 = vmatprep.subr.bf16.mxu0 %v16462_v19  ;;  %3209 = vmax.xlane.f32.xlu0 %v13684_v60  ;;  %v13688_v12 = vpop.f32.mrb[107].mxu1 }
 0x6e3   : > { %3203 = vmax.xlane.f32.xlu1 %v13677_v26 }
 0x6e4   : > { %9624 = vmatpush3.bf16.msra.mxu0 %v16462_v19 }
 0x6e5   : > { %9625 = vmatprep.subr.bf16.mxu0 %v16463_v51  ;;  %3205 = vmax.xlane.f32.xlu0 %v13688_v12 }
 0x6e6   : > { %v13694_v14 = vpop.f32.mrb[108].mxu1 }
 0x6e7   : > { %3215 = vmax.xlane.f32.xlu1 %v13694_v14  ;;  %9578 = vmatmul.mubr.msk.bf16.gmra.mrb[72].mxu0 %vm1850_vm0, %v16464_v21  ;;  %v13701_v59 = vpop.f32.mrb[109].mxu1 }
 0x6e8   : > { %9626 = vmatpush3.bf16.msra.mxu0 %v16463_v51  ;;  %9581 = vmatprep.mubr.msk.bf16.mxu0 %vm1850_vm0, %v16465_v48  ;;  %v13708_v43 = vpop.f32.mrb[110].mxu1 }
 0x6e9   : > { %9627 = vmatprep.subr.bf16.mxu0 %v16466_v23  ;;  %3217 = vmax.xlane.f32.xlu0 %v13708_v43  ;;  %v13712_v11 = vpop.f32.mrb[111].mxu1 }
 0x6eb   : > { %3211 = vmax.xlane.f32.xlu1 %v13701_v59 }
 0x6ec   : > { %9628 = vmatpush3.bf16.msra.mxu0 %v16466_v23 }
 0x6ed   : > { %9629 = vmatprep.subr.bf16.mxu0 %v16467_v33  ;;  %3213 = vmax.xlane.f32.xlu0 %v13712_v11 }
 0x6ef   : > { %9582 = vmatmul.mubr.msk.bf16.gmra.mrb[76].mxu0 %vm1850_vm0, %v16468_v31 }
 0x6f0   : > { %9630 = vmatpush3.bf16.msra.mxu0 %v16467_v33 }
 0x6f1   : > { %9631 = vmatprep.subr.bf16.mxu0 %v16469_v2 }
 0x6f4   : > { %9632 = vmatpush3.bf16.msra.mxu0 %v16469_v2 }
 0x6f5   : > { %9649 = vmatprep.subr.bf16.mxu0 %v13725_v49 }
 0x70e   : > { %v13729_v57 = vpop.f32.mrb[112].mxu1 }
 0x70f   : > { %3803 = vmax.xlane.f32.xlu0 %v13729_v57  ;;  %v13732_v6 = vpop.f32.mrb[113].mxu1 }
 0x710   : > { %v13734_v34 = vpop.f32.mrb[114].mxu1 }
 0x711   : > { %3805 = vmax.xlane.f32.xlu1 %v13734_v34  ;;  %v13737_v10 = vpop.f32.mrb[115].mxu1 }
 0x713   : > { %3799 = vmax.xlane.f32.xlu0 %v13732_v6 }
 0x715   : > { %3801 = vmax.xlane.f32.xlu1 %v13737_v10 }
 0x716   : > { %v13741_v20 = vpop.f32.mrb[116].mxu1 }
 0x717   : > { %3811 = vmax.xlane.f32.xlu0 %v13741_v20  ;;  %v13744_v38 = vpop.f32.mrb[117].mxu1 }
 0x718   : > { %v13746_v56 = vpop.f32.mrb[118].mxu1 }
 0x719   : > { %3807 = vmax.xlane.f32.xlu1 %v13744_v38  ;;  %v13749_v41 = vpop.f32.mrb[119].mxu1 }
 0x71b   : > { %3809 = vmax.xlane.f32.xlu0 %v13749_v41 }
 0x71d   : > { %3813 = vmax.xlane.f32.xlu1 %v13746_v56 }
 0x71e   : > { %v13753_v9 = vpop.f32.mrb[120].mxu1 }
 0x71f   : > { %v13755_v40 = vpop.f32.mrb[121].mxu1 }
 0x720   : > { %3815 = vmax.xlane.f32.xlu0 %v13755_v40  ;;  %v13758_v8 = vpop.f32.mrb[122].mxu1 }
 0x721   : > { %3819 = vmax.xlane.f32.xlu1 %v13753_v9  ;;  %v13761_v1 = vpop.f32.mrb[123].mxu1 }
 0x724   : > { %3821 = vmax.xlane.f32.xlu0 %v13758_v8 }
 0x725   : > { %3817 = vmax.xlane.f32.xlu1 %v13761_v1 }
 0x726   : > { %v13765_v3 = vpop.f32.mrb[124].mxu1 }
 0x727   : > { %v13767_v50 = vpop.f32.mrb[125].mxu1 }
 0x728   : > { %3823 = vmax.xlane.f32.xlu0 %v13767_v50  ;;  %v13770_v16 = vpop.f32.mrb[126].mxu1 }
 0x729   : > { %3827 = vmax.xlane.f32.xlu1 %v13765_v3  ;;  %v13773_v44 = vpop.f32.mrb[127].mxu1 }
 0x72c   : > { %3829 = vmax.xlane.f32.xlu0 %v13770_v16 }
 0x72d   : > { %3825 = vmax.xlane.f32.xlu1 %v13773_v44 }
 0x74e   : > { %v13777_v61 = vpop.f32.mrb[128].mxu1 }
 0x74f   : > { %16470 = vst [vmem:[#allocation78_spill] sm:$0xff] %v13777_v61  ;;  %v13779_v55 = vpop.f32.mrb[129].mxu1 }
 0x750   : > { %16471 = vst [vmem:[#allocation61_spill] sm:$0xff] %v13779_v55  ;;  %v13781_v7 = vpop.f32.mrb[130].mxu1 }
 0x751   : > { %16472 = vst [vmem:[#allocation64_spill] sm:$0xff] %v13781_v7  ;;  %v13783_v37 = vpop.f32.mrb[131].mxu1 }
 0x752   : > { %16473 = vst [vmem:[#allocation62_spill] sm:$0xff] %v13783_v37 }
 0x756   : > { %v13785_v0 = vpop.f32.mrb[132].mxu1 }
 0x757   : > { %16474 = vst [vmem:[#allocation71_spill] sm:$0xff] %v13785_v0  ;;  %v13787_v19 = vpop.f32.mrb[133].mxu1 }
 0x758   : > { %16475 = vst [vmem:[#allocation66_spill] sm:$0xff] %v13787_v19  ;;  %v13789_v51 = vpop.f32.mrb[134].mxu1 }
 0x759   : > { %16476 = vst [vmem:[#allocation63_spill] sm:$0xff] %v13789_v51  ;;  %v13791_v21 = vpop.f32.mrb[135].mxu1 }
 0x75a   : > { %16477 = vst [vmem:[#allocation68_spill] sm:$0xff] %v13791_v21 }
 0x75c   : > { %v3192_v48 = vpop.xlane.xlu1 %3191 }
 0x75d   : > { %v3221_v23 = vsub.f32 %v13627_v29, %v3192_v48  ;;  %v3188_v33 = vpop.xlane.xlu0 %3187 }
 0x75e   : > { %v13794_v31 = vpop.f32.mrb[136].mxu1  ;;  %v3219_v2 = vsub.f32 %v13631_v54, %v3188_v33 }
 0x75f   : > { %16478 = vst [vmem:[#allocation67_spill] sm:$0xff] %v13794_v31  ;;  %v3239_v39 = vmul.f32 1.442695, %v3221_v23  ;;  %v13797_v5 = vpop.f32.mrb[137].mxu1 }
 0x760   : > { %16479 = vst [vmem:[#allocation65_spill] sm:$0xff] %v13797_v5  ;;  %v3235_v24 = vmul.f32 1.442695, %v3219_v2  ;;  %v13799_v62 = vpop.f32.mrb[138].mxu1  ;;  %v3190_v32 = vpop.xlane.xlu1 %3189 }
 0x761   : > { %16480 = vst [vmem:[#allocation73_spill] sm:$0xff] %v13799_v62  ;;  %10684 = vpow2.f32 %v3239_v39  ;;  %v3220_v22 = vsub.f32 %v13640_v4, %v3190_v32  ;;  %v13802_v42 = vpop.f32.mrb[139].mxu1  ;;  %v3194_v30 = vpop.xlane.xlu0 %3193 }
 0x762   : > { %16481 = vst [vmem:[#allocation69_spill] sm:$0xff] %v13802_v42  ;;  %v3222_v29 = vsub.f32 %v13638_v27, %v3194_v30  ;;  %10686 = vpow2.f32 %v3235_v24 }
 0x763   : > { %v3237_v48 = vmul.f32 1.442695, %v3220_v22 }
 0x764   : > { %v3241_v46 = vmul.f32 1.442695, %v3222_v29  ;;  %v3200_v13 = vpop.xlane.xlu1 %3199 }
 0x765   : > { %10688 = vpow2.f32 %v3237_v48  ;;  %v3225_v54 = vsub.f32 %v13646_v36, %v3200_v13  ;;  %v3196_v23 = vpop.xlane.xlu0 %3195 }
 0x766   : > { %10690 = vpow2.f32 %v3241_v46  ;;  %v13806_v33 = vpop.f32.mrb[140].mxu1  ;;  %v3223_v39 = vsub.f32 %v13653_v17, %v3196_v23 }
 0x767   : > { %16482 = vst [vmem:[#allocation80_spill] sm:$0xff] %v13806_v33  ;;  %v3247_v2 = vmul.f32 1.442695, %v3225_v54  ;;  %v13809_v32 = vpop.f32.mrb[141].mxu1 }
 0x768   : > { %16483 = vst [vmem:[#allocation75_spill] sm:$0xff] %v13809_v32  ;;  %v3243_v4 = vmul.f32 1.442695, %v3223_v39  ;;  %v13811_v58 = vpop.f32.mrb[142].mxu1  ;;  %v3198_v30 = vpop.xlane.xlu1 %3197 }
 0x769   : > { %16484 = vst [vmem:[#allocation70_spill] sm:$0xff] %v13811_v58  ;;  %10692 = vpow2.f32 %v3247_v2  ;;  %v3224_v24 = vsub.f32 %v13664_v28, %v3198_v30  ;;  %v13814_v22 = vpop.f32.mrb[143].mxu1  ;;  %v3202_v27 = vpop.xlane.xlu0 %3201 }
 0x76a   : > { %16485 = vst [vmem:[#allocation77_spill] sm:$0xff] %v13814_v22  ;;  %v3226_v13 = vsub.f32 %v13657_v15, %v3202_v27  ;;  %10694 = vpow2.f32 %v3243_v4 }
 0x76b   : > { %v10685_v46 = vpop.eup %10684  ;;  %v3245_v36 = vmul.f32 1.442695, %v3224_v24 }
 0x76c   : > { %v3249_v29 = vmul.f32 1.442695, %v3226_v13  ;;  %v3208_v17 = vpop.xlane.xlu1 %3207  ;;  %3271 = vadd.xlane.f32.xlu0 %v10685_v46  ;;  %v10687_v54 = vpop.eup %10686  ;;  %v10449_v13 = vld [vmem:[%s12159_s6 + $0x28] sm:$0xff]  }
 0x76d   : > { %10696 = vpow2.f32 %v3245_v36  ;;  %v3229_v48 = vsub.f32 %v13670_v45, %v3208_v17 }
 0x76e   : > { %10698 = vpow2.f32 %v3249_v29  ;;  %v3210_v23 = vpop.xlane.xlu0 %3209 }
 0x76f   : > { %v10689_v39 = vpop.eup %10688  ;;  %v3255_v28 = vmul.f32 1.442695, %v3229_v48  ;;  %v3230_v2 = vsub.f32 %v13684_v60, %v3210_v23 }
 0x770   : > { %v10691_v30 = vpop.eup %10690  ;;  %v3204_v47 = vpop.xlane.xlu1 %3203  ;;  %3269 = vadd.xlane.f32.xlu1 %v10689_v39  ;;  %3267 = vadd.xlane.f32.xlu0 %v10687_v54  ;;  %v3299_v15 = vpack.c.bf16 %v10689_v39, %v10687_v54 }
 0x771   : > { %10700 = vpow2.f32 %v3255_v28  ;;  %v3257_v4 = vmul.f32 1.442695, %v3230_v2  ;;  %v3227_v24 = vsub.f32 %v13677_v26, %v3204_v47  ;;  %v3300_v27 = vpack.c.bf16 %v10691_v30, %v10685_v46 }
 0x772   : > { %9633 = vmatprep.mubr.bf16.mxu0 %v3299_v15  ;;  %v3206_v45 = vpop.xlane.xlu0 %3205 }
 0x773   : > { %v10693_v36 = vpop.eup %10692  ;;  %10702 = vpow2.f32 %v3257_v4  ;;  %v3251_v29 = vmul.f32 1.442695, %v3227_v24  ;;  %v3228_v17 = vsub.f32 %v13688_v12, %v3206_v45  ;;  %9634 = vmatmul.mubr.bf16.vlgmr.msra.gmra.mrb[80].mxu0 %v3300_v27  ;;  %v16486_v4 = vld [vmem:[#allocation89_spill] sm:$0xff] }
 0x774   : > { %9650 = vmatpush3.bf16.msra.mxu0 %v13725_v49  ;;  %v3216_v60 = vpop.xlane.xlu1 %3215  ;;  %3279 = vadd.xlane.f32.xlu1 %v10693_v36  ;;  %v10695_v47 = vpop.eup %10694 }
 0x775   : > { %10704 = vpow2.f32 %v3251_v29  ;;  %v3253_v48 = vmul.f32 1.442695, %v3228_v17  ;;  %v3233_v54 = vsub.f32 %v13694_v14, %v3216_v60  ;;  %3273 = vadd.xlane.f32.xlu0 %v10691_v30  ;;  %9651 = vmatprep.subr.bf16.mxu0 %v10449_v13 }
 0x776   : > { %v3218_v26 = vpop.xlane.xlu0 %3217 }
 0x777   : > { %v10697_v46 = vpop.eup %10696  ;;  %10706 = vpow2.f32 %v3253_v48  ;;  %v3263_v23 = vmul.f32 1.442695, %v3233_v54  ;;  %v3234_v39 = vsub.f32 %v13708_v43, %v3218_v26 }
 0x778   : > { %v10699_v28 = vpop.eup %10698  ;;  %9652 = vmatpush3.bf16.msra.mxu0 %v10449_v13  ;;  %v3212_v12 = vpop.xlane.xlu1 %3211  ;;  %v3301_v2 = vpack.c.bf16 %v10697_v46, %v10695_v47 }
 0x779   : > { %v3265_v49 = vmul.f32 1.442695, %v3234_v39  ;;  %v3231_v15 = vsub.f32 %v13701_v59, %v3212_v12  ;;  %9701 = vmatprep.subr.bf16.mxu0 %v16486_v4  ;;  %3275 = vadd.xlane.f32.xlu0 %v10695_v47  ;;  %v3302_v14 = vpack.c.bf16 %v10699_v28, %v10693_v36  ;;  %10708 = vpow2.f32 %v3263_v23 }
 0x77a   : > { %3281 = vadd.xlane.f32.xlu1 %v10699_v28  ;;  %9637 = vmatprep.mubr.bf16.mxu0 %v3301_v2  ;;  %v3214_v30 = vpop.xlane.xlu0 %3213 }
 0x77b   : > { %v10701_v24 = vpop.eup %10700  ;;  %10710 = vpow2.f32 %v3265_v49  ;;  %v3259_v27 = vmul.f32 1.442695, %v3231_v15  ;;  %v3232_v43 = vsub.f32 %v13712_v11, %v3214_v30  ;;  %9638 = vmatmul.mubr.bf16.gmra.mrb[84].mxu0 %v3302_v14 }
 0x77d   : > { %v10703_v13 = vpop.eup %10702  ;;  %10712 = vpow2.f32 %v3259_v27  ;;  %v3261_v45 = vmul.f32 1.442695, %v3232_v43  ;;  %3287 = vadd.xlane.f32.xlu0 %v10701_v24 }
 0x77e   : > { %3277 = vadd.xlane.f32.xlu1 %v10697_v46  ;;  %v3304_v59 = vpack.c.bf16 %v10703_v13, %v10701_v24 }
 0x77f   : > { %v10705_v29 = vpop.eup %10704  ;;  %10714 = vpow2.f32 %v3261_v45 }
 0x781   : > { %v10707_v17 = vpop.eup %10706  ;;  %3283 = vadd.xlane.f32.xlu0 %v10705_v29 }
 0x782   : > { %3285 = vadd.xlane.f32.xlu1 %v10707_v17  ;;  %v3303_v36 = vpack.c.bf16 %v10707_v17, %v10705_v29 }
 0x783   : > { %v10709_v60 = vpop.eup %10708 }
 0x784   : > { %9641 = vmatprep.mubr.bf16.mxu0 %v3303_v36 }
 0x785   : > { %v10711_v48 = vpop.eup %10710  ;;  %3289 = vadd.xlane.f32.xlu0 %v10703_v13  ;;  %9642 = vmatmul.mubr.bf16.gmra.mrb[88].mxu0 %v3304_v59 }
 0x786   : > { %3295 = vadd.xlane.f32.xlu1 %v10709_v60  ;;  %v3306_v11 = vpack.c.bf16 %v10711_v48, %v10709_v60 }
 0x787   : > { %v10713_v54 = vpop.eup %10712 }
 0x789   : > { %v10715_v47 = vpop.eup %10714  ;;  %3291 = vadd.xlane.f32.xlu0 %v10713_v54 }
 0x78a   : > { %3297 = vadd.xlane.f32.xlu1 %v10711_v48  ;;  %v3305_v26 = vpack.c.bf16 %v10715_v47, %v10713_v54 }
 0x78c   : > { %9645 = vmatprep.mubr.bf16.mxu0 %v3305_v26 }
 0x78d   : > { %9646 = vmatmul.mubr.bf16.gmra.mrb[92].mxu0 %v3306_v11 }
 0x78e   : > { %3293 = vadd.xlane.f32.xlu1 %v10715_v47 }
 0x78f   : > { %v13828_v46 = vpop.f32.mrb[144].mxu1 }
 0x790   : > { %v13830_v23 = vpop.f32.mrb[145].mxu1 }
 0x791   : > { %v13832_v39 = vpop.f32.mrb[146].mxu1 }
 0x792   : > { %v13834_v28 = vpop.f32.mrb[147].mxu1 }
 0x797   : > { %v13836_v12 = vpop.f32.mrb[148].mxu1 }
 0x798   : > { %v13838_v2 = vpop.f32.mrb[149].mxu1 }
 0x799   : > { %v13840_v49 = vpop.f32.mrb[150].mxu1 }
 0x79a   : > { %v13842_v15 = vpop.f32.mrb[151].mxu1 }
 0x79c   : > { %v3804_v14 = vpop.xlane.xlu0 %3803 }
 0x79d   : > { %v3833_v30 = vsub.f32 %v13729_v57, %v3804_v14 }
 0x79e   : > { %v3806_v24 = vpop.xlane.xlu1 %3805 }
 0x79f   : > { %v3851_v27 = vmul.f32 1.442695, %v3833_v30  ;;  %v3834_v43 = vsub.f32 %v13734_v34, %v3806_v24  ;;  %v13846_v13 = vpop.f32.mrb[152].mxu1 }
 0x7a0   : > { %16487 = vst [vmem:[#allocation95_spill] sm:$0xff] %v13846_v13  ;;  %v13848_v45 = vpop.f32.mrb[153].mxu1  ;;  %v3800_v59 = vpop.xlane.xlu0 %3799 }
 0x7a1   : > { %10716 = vpow2.f32 %v3851_v27  ;;  %v3853_v29 = vmul.f32 1.442695, %v3834_v43  ;;  %v13850_v17 = vpop.f32.mrb[154].mxu1  ;;  %v3831_v36 = vsub.f32 %v13732_v6, %v3800_v59 }
 0x7a2   : > { %16488 = vst [vmem:[#allocation72_spill] sm:$0xff] %v13850_v17  ;;  %v13853_v60 = vpop.f32.mrb[155].mxu1  ;;  %v3802_v48 = vpop.xlane.xlu1 %3801 }
 0x7a3   : > { %10718 = vpow2.f32 %v3853_v29  ;;  %v3847_v57 = vmul.f32 1.442695, %v3831_v36  ;;  %v3832_v11 = vsub.f32 %v13737_v10, %v3802_v48 }
 0x7a4   : > { %v3812_v54 = vpop.xlane.xlu0 %3811 }
 0x7a5   : > { %10720 = vpow2.f32 %v3847_v57  ;;  %v3849_v34 = vmul.f32 1.442695, %v3832_v11  ;;  %v3837_v47 = vsub.f32 %v13741_v20, %v3812_v54 }
 0x7a6   : > { %v3808_v26 = vpop.xlane.xlu1 %3807 }
 0x7a7   : > { %10722 = vpow2.f32 %v3849_v34  ;;  %v3859_v14 = vmul.f32 1.442695, %v3837_v47  ;;  %v3835_v30 = vsub.f32 %v13744_v38, %v3808_v26  ;;  %v13858_v24 = vpop.f32.mrb[156].mxu1 }
 0x7a8   : > { %16489 = vst [vmem:[#allocation82_spill] sm:$0xff] %v13858_v24  ;;  %v13860_v6 = vpop.f32.mrb[157].mxu1  ;;  %v3810_v27 = vpop.xlane.xlu0 %3809 }
 0x7a9   : > { %16490 = vst [vmem:[#allocation74_spill] sm:$0xff] %v13860_v6  ;;  %v3855_v43 = vmul.f32 1.442695, %v3835_v30  ;;  %v13862_v59 = vpop.f32.mrb[158].mxu1  ;;  %v3836_v10 = vsub.f32 %v13749_v41, %v3810_v27  ;;  %10724 = vpow2.f32 %v3859_v14 }
 0x7aa   : > { %16491 = vst [vmem:[#allocation84_spill] sm:$0xff] %v13862_v59  ;;  %v13865_v29 = vpop.f32.mrb[159].mxu1  ;;  %v3814_v36 = vpop.xlane.xlu1 %3813 }
 0x7ab   : > { %16492 = vst [vmem:[#allocation76_spill] sm:$0xff] %v13865_v29  ;;  %v13867_v48 = vpop.eup %10716  ;;  %v3857_v20 = vmul.f32 1.442695, %v3836_v10  ;;  %v3838_v57 = vsub.f32 %v13746_v56, %v3814_v36  ;;  %10726 = vpow2.f32 %v3855_v43 }
 0x7ac   : > { %3883 = vadd.xlane.f32.xlu1 %v13867_v48 }
 0x7ad   : > { %v13871_v38 = vpop.eup %10718  ;;  %10728 = vpow2.f32 %v3857_v20  ;;  %v3861_v11 = vmul.f32 1.442695, %v3838_v57  ;;  %v3816_v54 = vpop.xlane.xlu0 %3815 }
 0x7ae   : > { %v3839_v34 = vsub.f32 %v13755_v40, %v3816_v54  ;;  %v3820_v41 = vpop.xlane.xlu1 %3819 }
 0x7af   : > { %v13876_v26 = vpop.eup %10720  ;;  %10730 = vpow2.f32 %v3861_v11  ;;  %v3841_v14 = vsub.f32 %v13753_v9, %v3820_v41 }
 0x7b0   : > { %v3863_v56 = vmul.f32 1.442695, %v3839_v34  ;;  %3879 = vadd.xlane.f32.xlu1 %v13876_v26 }
 0x7b1   : > { %v13880_v30 = vpop.eup %10722  ;;  %v3867_v27 = vmul.f32 1.442695, %v3841_v14  ;;  %v3822_v43 = vpop.xlane.xlu0 %3821 }
 0x7b2   : > { %v3842_v10 = vsub.f32 %v13758_v8, %v3822_v43  ;;  %v3818_v36 = vpop.xlane.xlu1 %3817  ;;  %3881 = vadd.xlane.f32.xlu0 %v13880_v30  ;;  %10732 = vpow2.f32 %v3863_v56 }
 0x7b3   : > { %v3840_v20 = vsub.f32 %v13761_v1, %v3818_v36  ;;  %v13888_v9 = vpop.eup %10724  ;;  %10734 = vpow2.f32 %v3867_v27 }
 0x7b4   : > { %v3869_v57 = vmul.f32 1.442695, %v3842_v10  ;;  %3885 = vadd.xlane.f32.xlu1 %v13871_v38 }
 0x7b5   : > { %v3865_v11 = vmul.f32 1.442695, %v3840_v20  ;;  %v3824_v54 = vpop.xlane.xlu0 %3823  ;;  %v13890_v34 = vpop.eup %10726 }
 0x7b6   : > { %10736 = vpow2.f32 %v3869_v57  ;;  %v3843_v8 = vsub.f32 %v13767_v50, %v3824_v54  ;;  %v3828_v41 = vpop.xlane.xlu1 %3827  ;;  %3891 = vadd.xlane.f32.xlu0 %v13888_v9 }
 0x7b7   : > { %v13894_v14 = vpop.eup %10728  ;;  %10738 = vpow2.f32 %v3865_v11  ;;  %v3845_v1 = vsub.f32 %v13765_v3, %v3828_v41 }
 0x7b8   : > { %3887 = vadd.xlane.f32.xlu1 %v13890_v34  ;;  %v3871_v43 = vmul.f32 1.442695, %v3843_v8 }
 0x7b9   : > { %v13900_v27 = vpop.eup %10730  ;;  %v3875_v10 = vmul.f32 1.442695, %v3845_v1  ;;  %v3830_v36 = vpop.xlane.xlu0 %3829 }
 0x7ba   : > { %v3846_v50 = vsub.f32 %v13770_v16, %v3830_v36  ;;  %v3826_v20 = vpop.xlane.xlu1 %3825 }
 0x7bb   : > { %10740 = vpow2.f32 %v3875_v10  ;;  %v3844_v11 = vsub.f32 %v13773_v44, %v3826_v20 }
 0x7bc   : > { %v3877_v3 = vmul.f32 1.442695, %v3846_v50  ;;  %3893 = vadd.xlane.f32.xlu1 %v13900_v27  ;;  %10742 = vpow2.f32 %v3871_v43  ;;  %v13907_v41 = vpop.eup %10732 }
 0x7bd   : > { %v3873_v54 = vmul.f32 1.442695, %v3844_v11  ;;  %v13909_v8 = vpop.eup %10734 }
 0x7be   : > { %10744 = vpow2.f32 %v3877_v3 }
 0x7bf   : > { %10746 = vpow2.f32 %v3873_v54 }
 0x7c0   : > { %v13911_v1 = vpop.eup %10736  ;;  %3889 = vadd.xlane.f32.xlu1 %v13894_v14 }
 0x7c1   : > { %v13914_v16 = vpop.eup %10738 }
 0x7c4   : > { %3899 = vadd.xlane.f32.xlu1 %v13909_v8 }
 0x7c5   : > { %v13921_v43 = vpop.eup %10740 }
 0x7c6   : > { %3907 = vadd.xlane.f32.xlu0 %v13921_v43  ;;  %v13924_v36 = vpop.eup %10742 }
 0x7c8   : > { %v13926_v50 = vpop.eup %10744  ;;  %3895 = vadd.xlane.f32.xlu1 %v13907_v41 }
 0x7c9   : > { %v13929_v20 = vpop.eup %10746 }
 0x7ca   : > { %3903 = vadd.xlane.f32.xlu0 %v13924_v36 }
 0x7cc   : > { %3901 = vadd.xlane.f32.xlu1 %v13911_v1 }
 0x7ce   : > { %3909 = vadd.xlane.f32.xlu0 %v13926_v50 }
 0x7d0   : > { %3897 = vadd.xlane.f32.xlu1 %v13914_v16 }
 0x7d4   : > { %4379 = vmax.xlane.f32.xlu1 %v13779_v55 }
 0x7d8   : > { %4381 = vmax.xlane.f32.xlu1 %v13783_v37 }
 0x7dc   : > { %3905 = vadd.xlane.f32.xlu1 %v13929_v20 }
 0x7e0   : > { %4383 = vmax.xlane.f32.xlu1 %v13777_v61 }
 0x7e4   : > { %4385 = vmax.xlane.f32.xlu1 %v13781_v7  ;;  %5380 = vrot.lane.b32.xlu0 %v16426_v25, %s11663_s12 }
 0x7e8   : > { %4387 = vmax.xlane.f32.xlu1 %v13787_v19  ;;  %5382 = vrot.lane.b32.xlu0 %v16429_v53, %s11663_s12 }
 0x7ec   : > { %4391 = vmax.xlane.f32.xlu1 %v13785_v0 }
 0x7f0   : > { %4393 = vmax.xlane.f32.xlu1 %v13789_v51 }
 0x7f9   : > { %v3272_v44 = vpop.xlane.xlu0 %3271 }
 0x7fa   : > { %10748 = vrcp.f32 %v3272_v44 }
 0x7fd   : > { %v3270_v54 = vpop.xlane.xlu1 %3269  ;;  %v3268_v57 = vpop.xlane.xlu0 %3267 }
 0x7fe   : > { %10750 = vrcp.f32 %v3270_v54 }
 0x801   : > { %5384 = vrot.lane.b32.xlu1 %v16432_v35, %s11663_s12  ;;  %v3280_v11 = vpop.xlane.xlu1 %3279 }
 0x802   : > { %v3274_v47 = vpop.xlane.xlu0 %3273 }
 0x803   : > { %10752 = vrcp.f32 %v3274_v47 }
 0x804   : > { %10754 = vrcp.f32 %v3268_v57  ;;  %v10749_v0 = vpop.eup %10748 }
 0x805   : > { %10756 = vrcp.f32 %v3280_v11 }
 0x806   : > { %v3276_v35 = vpop.xlane.xlu0 %3275 }
 0x807   : > { %4389 = vmax.xlane.f32.xlu0 %v13791_v21  ;;  %v3282_v3 = vpop.xlane.xlu1 %3281  ;;  %10758 = vrcp.f32 %v3276_v35 }
 0x808   : > { %10760 = vrcp.f32 %v3282_v3  ;;  %v10751_v44 = vpop.eup %10750 }
 0x80b   : > { %4397 = vmax.xlane.f32.xlu0 %v13802_v42  ;;  %v3278_v10 = vpop.xlane.xlu1 %3277 }
 0x80c   : > { %10762 = vrcp.f32 %v3278_v10 }
 0x80d   : > { %v10753_v21 = vpop.eup %10752 }
 0x80e   : > { %v10755_v7 = vpop.eup %10754 }
 0x80f   : > { %4399 = vmax.xlane.f32.xlu0 %v13794_v31  ;;  %v3286_v56 = vpop.xlane.xlu1 %3285  ;;  %v3288_v31 = vpop.xlane.xlu0 %3287 }
 0x810   : > { %10764 = vrcp.f32 %v3288_v31  ;;  %v16495_v31 = vld [vmem:[#allocation91_spill] sm:$0xff] }
 0x813   : > { %4401 = vmax.xlane.f32.xlu0 %v13799_v62  ;;  %v13958_v40 = vpop.xlane.xlu1 %3295  ;;  %v3284_v42 = vpop.xlane.xlu0 %3283 }
 0x814   : > { %10766 = vrcp.f32 %v3284_v42 }
 0x817   : > { %v13964_v53 = vpop.xlane.xlu1 %3297 }
 0x81b   : > { %v13967_v62 = vpop.xlane.xlu1 %3293 }
 0x825   : > { %4395 = vmax.xlane.f32.xlu1 %v13797_v5 }
 0x829   : > { %4403 = vmax.xlane.f32.xlu1 %v13809_v32  ;;  %5386 = vrot.lane.b32.xlu0 %v16433_v63, %s11663_s12  ;;  %v3290_v32 = vpop.xlane.xlu0 %3289 }
 0x82a   : > { %10768 = vrcp.f32 %v3290_v32 }
 0x82b   : > { %10770 = vrcp.f32 %v3286_v56 }
 0x82c   : > { %10772 = vrcp.f32 %v13958_v40 }
 0x82d   : > { %4407 = vmax.xlane.f32.xlu1 %v13806_v33  ;;  %v3292_v33 = vpop.xlane.xlu0 %3291 }
 0x82e   : > { %10774 = vrcp.f32 %v3292_v33 }
 0x82f   : > { %10776 = vrcp.f32 %v13964_v53 }
 0x830   : > { %10778 = vrcp.f32 %v13967_v62  ;;  %v16500_v62 = vld [vmem:[#allocation108_spill] sm:$0xff] }
 0x831   : > { %4409 = vmax.xlane.f32.xlu1 %v13811_v58 }
 0x839   : > { %v13969_v5 = vpop.xlane.xlu1 %3883 }
 0x83d   : > { %v13971_v51 = vpop.xlane.xlu1 %3879 }
 0x83f   : > { %v13979_v47 = vpop.xlane.xlu0 %3881 }
 0x840   : > { %16494 = vst [vmem:[#allocation81_spill] sm:$0xff] %v13979_v47 }
 0x841   : > { %v13973_v63 = vpop.xlane.xlu1 %3885 }
 0x842   : > { %5388 = vrot.lane.b32.xlu1 %v16434_v52, %s11663_s12 }
 0x845   : > { %v13977_v58 = vpop.xlane.xlu1 %3887 }
 0x846   : > { %16493 = vst [vmem:[#allocation79_spill] sm:$0xff] %v13977_v58  ;;  %v9635_v19 = vpop.f32.mrb[80].mxu0  ;;  %v10757_v58 = vpop.eup %10756 }
 0x847   : > { %v3365_v54 = vpop.f32.mrb[81].mxu0  ;;  %v3446_v61 = vmul.f32 %v10749_v0, %v9635_v19  ;;  %v13988_v0 = vpop.xlane.xlu0 %3891 }
 0x848   : > { %4405 = vmax.xlane.f32.xlu0 %v13814_v22  ;;  %v9636_v57 = vpop.f32.mrb[82].mxu0  ;;  %v3444_v55 = vmul.f32 %v10755_v7, %v3365_v54  ;;  %v10759_v22 = vpop.eup %10758 }
 0x849   : > { %v3447_v52 = vmul.f32 %v10753_v21, %v9636_v57  ;;  %v13982_v11 = vpop.xlane.xlu1 %3893  ;;  %v3368_v35 = vpop.f32.mrb[83].mxu0 }
 0x84a   : > { %v3445_v37 = vmul.f32 %v10751_v44, %v3368_v35  ;;  %v10761_v7 = vpop.eup %10760 }
 0x84b   : > { %v3461_v25 = vpack.c.bf16 %v3447_v52, %v3446_v61  ;;  %v10763_v61 = vpop.eup %10762 }
 0x84c   : > { %v3460_v3 = vpack.c.bf16 %v3445_v37, %v3444_v55  ;;  %4831 = vmax.xlane.f32.xlu0 %v13834_v28 }
 0x84d   : > { %v13985_v10 = vpop.xlane.xlu1 %3889 }
 0x84e   : > { %v9639_v47 = vpop.f32.mrb[84].mxu0  ;;  %9653 = vmatprep.mubr.msk.bf16.mxu0 %vm1850_vm0, %v3460_v3 }
 0x84f   : > { %v3381_v19 = vpop.f32.mrb[85].mxu0  ;;  %9654 = vmatmul.mubr.msk.bf16.vlgmr.msra.gmra.mrb[64].mxu0 %vm1850_vm0, %v3461_v25  ;;  %v3450_v55 = vmul.f32 %v10757_v58, %v9639_v47 }
 0x850   : > { %9702 = vmatpush3.bf16.msra.mxu0 %v16486_v4  ;;  %v9640_v52 = vpop.f32.mrb[86].mxu0  ;;  %v3448_v42 = vmul.f32 %v10759_v22, %v3381_v19  ;;  %v16496_v4 = vld [vmem:[#allocation100_spill] sm:$0xff]  ;;  %v10765_v22 = vpop.eup %10764  ;;  %v16498_v19 = vld [vmem:[#allocation105_spill] sm:$0xff] }
 0x851   : > { %v3451_v37 = vmul.f32 %v10761_v7, %v9640_v52  ;;  %v13992_v21 = vpop.xlane.xlu1 %3899  ;;  %9703 = vmatprep.subr.bf16.mxu0 %v16495_v31  ;;  %v3384_v44 = vpop.f32.mrb[87].mxu0 }
 0x852   : > { %v3449_v54 = vmul.f32 %v10763_v61, %v3384_v44  ;;  %v10767_v47 = vpop.eup %10766 }
 0x853   : > { %v3463_v57 = vpack.c.bf16 %v3451_v37, %v3450_v55  ;;  %v13995_v35 = vpop.xlane.xlu0 %3907  ;;  %v10769_v7 = vpop.eup %10768 }
 0x854   : > { %v3462_v25 = vpack.c.bf16 %v3449_v54, %v3448_v42  ;;  %9704 = vmatpush3.bf16.msra.mxu0 %v16495_v31  ;;  %v10771_v52 = vpop.eup %10770 }
 0x855   : > { %v13998_v32 = vpop.xlane.xlu1 %3895  ;;  %9705 = vmatprep.subr.bf16.mxu0 %v16496_v4 }
 0x856   : > { %9657 = vmatprep.mubr.msk.bf16.mxu0 %vm1850_vm0, %v3462_v25 }
 0x857   : > { %v14003_v58 = vpop.xlane.xlu0 %3903  ;;  %9658 = vmatmul.mubr.msk.bf16.gmra.mrb[68].mxu0 %vm1850_vm0, %v3463_v57 }
 0x858   : > { %16497 = vst [vmem:[#allocation102_spill] sm:$0xff] %v14003_v58  ;;  %9706 = vmatpush3.bf16.msra.mxu0 %v16496_v4  ;;  %v9643_v56 = vpop.f32.mrb[88].mxu0  ;;  %v10773_v4 = vpop.eup %10772 }
 0x859   : > { %v14009_v3 = vpop.xlane.xlu1 %3901  ;;  %9707 = vmatprep.subr.bf16.mxu0 %v16498_v19  ;;  %v3397_v40 = vpop.f32.mrb[89].mxu0  ;;  %v3454_v61 = vmul.f32 %v10765_v22, %v9643_v56 }
 0x85a   : > { %v9644_v33 = vpop.f32.mrb[90].mxu0  ;;  %v3452_v53 = vmul.f32 %v10767_v47, %v3397_v40 }
 0x85b   : > { %v3455_v55 = vmul.f32 %v10769_v7, %v9644_v33  ;;  %v14012_v37 = vpop.xlane.xlu0 %3909  ;;  %v3400_v31 = vpop.f32.mrb[91].mxu0 }
 0x85c   : > { %16499 = vst [vmem:[#allocation104_spill] sm:$0xff] %v14012_v37  ;;  %v3453_v44 = vmul.f32 %v10771_v52, %v3400_v31  ;;  %9708 = vmatpush3.bf16.msra.mxu0 %v16498_v19  ;;  %v10775_v7 = vpop.eup %10774  ;;  %v16501_v19 = vld [vmem:[#allocation110_spill] sm:$0xff] }
 0x85d   : > { %v3465_v42 = vpack.c.bf16 %v3455_v55, %v3454_v61  ;;  %v14015_v54 = vpop.xlane.xlu1 %3897  ;;  %9709 = vmatprep.subr.bf16.mxu0 %v16500_v62  ;;  %v10777_v33 = vpop.eup %10776  ;;  %v16502_v52 = vld [vmem:[#allocation54_spill] sm:$0xff] }
 0x85e   : > { %v3464_v57 = vpack.c.bf16 %v3453_v44, %v3452_v53  ;;  %v10779_v55 = vpop.eup %10778 }
 0x85f   : > { %v5381_v25 = vpop.permute.xlu0 %5380 }
 0x860   : > { %9710 = vmatpush3.bf16.msra.mxu0 %v16500_v62  ;;  %10251 = vmatprep.subr.msk.bf16.mxu1 %vm1850_vm0, %v5381_v25  ;;  %v9647_v22 = vpop.f32.mrb[92].mxu0  ;;  %v5423_v56 = vsel %vm1850_vm0, %v5381_v25, 0 }
 0x861   : > { %v14021_v47 = vpop.xlane.xlu1 %4379  ;;  %9661 = vmatprep.mubr.msk.bf16.mxu0 %vm1850_vm0, %v3464_v57  ;;  %9711 = vmatprep.subr.bf16.mxu0 %v16501_v19  ;;  %v3413_v40 = vpop.f32.mrb[93].mxu0  ;;  %v3458_v31 = vmul.f32 %v10773_v4, %v9647_v22  ;;  %v16503_v4 = vld [vmem:[#allocation111_spill] sm:$0xff] }
 0x862   : > { %9926 = vmatpush3.bf16.xpose.msra.mxu1 %v5423_v56  ;;  %4957 = vrot.lane.b32.xlu0 %v16502_v52, %s11662_s3  ;;  %v9648_v61 = vpop.f32.mrb[94].mxu0  ;;  %v3456_v25 = vmul.f32 %v10775_v7, %v3413_v40  ;;  %v10450_v7 = vld [vmem:[%s12159_s6 + $0x30] sm:$0xff]   ;;  %v16505_v40 = vpack.c.bf16 %v13871_v38, %v13867_v48  ;;  %v16508_v48 = vld [vmem:[#allocation48_spill] sm:$0xff]  ;;  %v16509_v38 = vpack.c.bf16 %v13914_v16, %v13907_v41 }
 0x863   : > { %9662 = vmatmul.mubr.msk.bf16.gmra.mrb[72].mxu0 %vm1850_vm0, %v3465_v42  ;;  %v3459_v53 = vmul.f32 %v10777_v33, %v9648_v61  ;;  %v5383_v44 = vpop.permute.xlu0 %5382  ;;  %v3416_v62 = vpop.f32.mrb[95].mxu0  ;;  %v16506_v33 = vpack.c.bf16 %v13894_v14, %v13890_v34  ;;  %v16510_v14 = vld [vmem:[#allocation53_spill] sm:$0xff]  ;;  %v16512_v41 = vpack.c.bf16 %v13929_v20, %v13924_v36  ;;  %v16513_v16 = vpack.c.bf16 %v13926_v50, %v13921_v43 }
 0x864   : > { %v3457_v37 = vmul.f32 %v10779_v55, %v3416_v62  ;;  %9712 = vmatpush3.bf16.msra.mxu0 %v16501_v19  ;;  %10252 = vmatprep.subr.msk.bf16.mxu1 %vm1850_vm0, %v5383_v44  ;;  %v5426_v22 = vsel %vm1850_vm0, %v5383_v44, 0  ;;  %v10451_v19 = vld [vmem:[%s12159_s6 + $0x38] sm:$0xff]   ;;  %v16515_v62 = vld [vmem:[#allocation41_spill] sm:$0xff] }
 0x865   : > { %v3467_v57 = vpack.c.bf16 %v3459_v53, %v3458_v31  ;;  %v14030_v56 = vpop.xlane.xlu1 %4381  ;;  %9713 = vmatprep.subr.bf16.mxu0 %v13353_v18  ;;  %v16514_v44 = vld [vmem:[#allocation56_spill] sm:$0xff] }
 0x866   : > { %v3466_v58 = vpack.c.bf16 %v3457_v37, %v3456_v25  ;;  %4829 = vmax.xlane.f32.xlu1 %v13830_v23  ;;  %v16504_v37 = vpack.c.bf16 %v13880_v30, %v13876_v26  ;;  %v16507_v30 = vpack.c.bf16 %v13900_v27, %v13888_v9  ;;  %v16511_v27 = vpack.c.bf16 %v13911_v1, %v13909_v8 }
 0x868   : > { %9714 = vmatpush3.bf16.msra.mxu0 %v13353_v18  ;;  %9665 = vmatprep.mubr.msk.bf16.mxu0 %vm1850_vm0, %v3466_v58 }
 0x869   : > { %v14036_v42 = vpop.xlane.xlu1 %3905  ;;  %9715 = vmatprep.subr.bf16.mxu0 %v16503_v4 }
 0x86a   : > { %9928 = vmatpush3.bf16.xpose.msra.mxu1 %v5426_v22  ;;  %4835 = vmax.xlane.f32.xlu1 %v13832_v39 }
 0x86b   : > { %9666 = vmatmul.mubr.msk.bf16.gmra.mrb[76].mxu0 %vm1850_vm0, %v3467_v57  ;;  %v16516_v57 = vld [vmem:[#allocation55_spill] sm:$0xff] }
 0x86c   : > { %9717 = vmatprep.mubr.bf16.mxu0 %v16504_v37  ;;  %9716 = vmatpush3.bf16.msra.mxu0 %v16503_v4  ;;  %v16517_v37 = vld [vmem:[#allocation45_spill] sm:$0xff] }
 0x86d   : > { %v14047_v18 = vpop.xlane.xlu1 %4383  ;;  %9733 = vmatprep.subr.bf16.mxu0 %v10450_v7 }
 0x871   : > { %v14049_v58 = vpop.xlane.xlu1 %4385 }
 0x873   : > { %9718 = vmatmul.mubr.bf16.vlgmr.msra.gmra.mrb[96].mxu0 %v16505_v40 }
 0x874   : > { %9734 = vmatpush3.bf16.msra.mxu0 %v10450_v7  ;;  %9721 = vmatprep.mubr.bf16.mxu0 %v16506_v33 }
 0x875   : > { %v14058_v61 = vpop.xlane.xlu1 %4387  ;;  %9735 = vmatprep.subr.bf16.mxu0 %v10451_v19 }
 0x878   : > { %9736 = vmatpush3.bf16.msra.mxu0 %v10451_v19 }
 0x879   : > { %9785 = vmatprep.subr.bf16.mxu0 %v16502_v52  ;;  %v14061_v26 = vpop.xlane.xlu1 %4391 }
 0x87b   : > { %9722 = vmatmul.mubr.bf16.gmra.mrb[100].mxu0 %v16507_v30  ;;  %5390 = vrot.lane.b32.xlu1 %v16508_v48, %s11663_s12  ;;  %v16518_v30 = vld [vmem:[#allocation58_spill] sm:$0xff] }
 0x87c   : > { %9725 = vmatprep.mubr.bf16.mxu0 %v16509_v38 }
 0x87d   : > { %v14071_v34 = vpop.xlane.xlu1 %4393 }
 0x87f   : > { %4959 = vrot.lane.b32.xlu1 %v16510_v14, %s11662_s3 }
 0x881   : > { %v5385_v55 = vpop.permute.xlu1 %5384  ;;  %4833 = vmax.xlane.f32.xlu0 %v13828_v46 }
 0x882   : > { %10253 = vmatprep.subr.msk.bf16.mxu1 %vm1850_vm0, %v5385_v55  ;;  %v5429_v9 = vsel %vm1850_vm0, %v5385_v55, 0 }
 0x883   : > { %9726 = vmatmul.mubr.bf16.gmra.mrb[104].mxu0 %v16511_v27  ;;  %9930 = vmatpush3.bf16.xpose.msra.mxu1 %v5429_v9  ;;  %v16519_v27 = vld [vmem:[#allocation49_spill] sm:$0xff] }
 0x884   : > { %9729 = vmatprep.mubr.bf16.mxu0 %v16512_v41 }
 0x885   : > { %4837 = vmax.xlane.f32.xlu0 %v13838_v2 }
 0x88b   : > { %9730 = vmatmul.mubr.bf16.gmra.mrb[108].mxu0 %v16513_v16 }
 0x894   : > { %v14088_v31 = vpop.xlane.xlu0 %4389 }
 0x898   : > { %v14090_v53 = vpop.xlane.xlu0 %4397 }
 0x89b   : > { %4961 = vrot.lane.b32.xlu0 %v16514_v44, %s11662_s3 }
 0x89c   : > { %v14094_v8 = vpop.xlane.xlu0 %4399 }
 0x8a0   : > { %v14096_v1 = vpop.xlane.xlu0 %4401 }
 0x8a3   : > { %4839 = vmax.xlane.f32.xlu1 %v13842_v15 }
 0x8a4   : > { %v5387_v36 = vpop.permute.xlu0 %5386 }
 0x8a5   : > { %10254 = vmatprep.subr.msk.bf16.mxu1 %vm1850_vm0, %v5387_v36  ;;  %v5432_v20 = vsel %vm1850_vm0, %v5387_v36, 0 }
 0x8a6   : > { %9932 = vmatpush3.bf16.xpose.msra.mxu1 %v5432_v20 }
 0x8a7   : > { %4843 = vmax.xlane.f32.xlu1 %v13840_v49 }
 0x8b2   : > { %v14102_v43 = vpop.xlane.xlu1 %4395 }
 0x8b6   : > { %v14104_v50 = vpop.xlane.xlu1 %4403 }
 0x8b8   : > { %5360 = vrot.lane.b32.xlu1 %v16515_v62, %s11663_s12 }
 0x8ba   : > { %v14108_v25 = vpop.xlane.xlu1 %4407  ;;  %4841 = vmax.xlane.f32.xlu0 %v13836_v12 }
 0x8bc   : > { %4963 = vrot.lane.b32.xlu1 %v16516_v57, %s11662_s3 }
 0x8be   : > { %v14113_v4 = vpop.xlane.xlu1 %4409 }
 0x8c2   : > { %v5389_v22 = vpop.permute.xlu1 %5388 }
 0x8c3   : > { %10255 = vmatprep.subr.msk.bf16.mxu1 %vm1850_vm0, %v5389_v22  ;;  %v5435_v7 = vsel %vm1850_vm0, %v5389_v22, 0 }
 0x8c4   : > { %9934 = vmatpush3.bf16.xpose.msra.mxu1 %v5435_v7 }
 0x8d0   : > { %5362 = vrot.lane.b32.xlu0 %v16517_v37, %s11663_s12 }
 0x8d5   : > { %v14120_v19 = vpop.xlane.xlu0 %4405 }
 0x8d9   : > { %v4832_v40 = vpop.xlane.xlu0 %4831 }
 0x8da   : > { %v4862_v33 = vsub.f32 %v13834_v28, %v4832_v40  ;;  %v16520_v28 = vld [vmem:[#allocation57_spill] sm:$0xff]  ;;  %v16521_v40 = vld [vmem:[#allocation51_spill] sm:$0xff] }
 0x8dc   : > { %v4879_v38 = vmul.f32 1.442695, %v4862_v33 }
 0x8dd   : > { %v14146_v33 = vpop.permute.xlu0 %4957 }
 0x8de   : > { %10780 = vpow2.f32 %v4879_v38 }
 0x8e0   : > { %4845 = vmax.xlane.f32.xlu1 %v13848_v45 }
 0x8ef   : > { %4847 = vmax.xlane.f32.xlu0 %v13853_v60 }
 0x8f1   : > { %4965 = vrot.lane.b32.xlu1 %v16518_v30, %s11662_s3 }
 0x8f3   : > { %v4830_v55 = vpop.xlane.xlu1 %4829  ;;  %4849 = vmax.xlane.f32.xlu0 %v13846_v13 }
 0x8f4   : > { %v4861_v9 = vsub.f32 %v13830_v23, %v4830_v55  ;;  %v14137_v23 = vpop.eup %10780 }
 0x8f5   : > { %5364 = vrot.lane.b32.xlu1 %v16519_v27, %s11663_s12  ;;  %v16523_v27 = vld [vmem:[#allocation37_spill] sm:$0xff] }
 0x8f6   : > { %v4877_v41 = vmul.f32 1.442695, %v4861_v9 }
 0x8f7   : > { %v14130_v16 = vpop.xlane.xlu1 %4835  ;;  %4851 = vmax.xlane.f32.xlu0 %v13850_v17 }
 0x8f8   : > { %10782 = vpow2.f32 %v4877_v41 }
 0x8f9   : > { %4967 = vrot.lane.b32.xlu1 %v16520_v28, %s11662_s3 }
 0x8fb   : > { %v5391_v36 = vpop.permute.xlu1 %5390 }
 0x8fc   : > { %10256 = vmatprep.subr.msk.bf16.mxu1 %vm1850_vm0, %v5391_v36  ;;  %v5438_v20 = vsel %vm1850_vm0, %v5391_v36, 0  ;;  %v16522_v36 = vld [vmem:[#allocation60_spill] sm:$0xff] }
 0x8fd   : > { %9936 = vmatpush3.bf16.xpose.msra.mxu1 %v5438_v20 }
 0x8ff   : > { %v14150_v9 = vpop.permute.xlu1 %4959 }
 0x902   : > { %v14139_v22 = vpop.eup %10782 }
 0x90d   : > { %5366 = vrot.lane.b32.xlu0 %v16521_v40, %s11663_s12 }
 0x90e   : > { %v14148_v38 = vpop.xlane.xlu0 %4833 }
 0x912   : > { %v4838_v55 = vpop.xlane.xlu0 %4837 }
 0x913   : > { %v4865_v41 = vsub.f32 %v13838_v2, %v4838_v55  ;;  %v16524_v2 = vld [vmem:[#allocation59_spill] sm:$0xff] }
 0x915   : > { %v4885_v20 = vmul.f32 1.442695, %v4865_v41  ;;  %v16525_v41 = vld [vmem:[#allocation42_spill] sm:$0xff] }
 0x917   : > { %10784 = vpow2.f32 %v4885_v20 }
 0x91d   : > { %4853 = vmax.xlane.f32.xlu1 %v13860_v6 }
 0x92c   : > { %4855 = vmax.xlane.f32.xlu0 %v13865_v29 }
 0x92e   : > { %4969 = vrot.lane.b32.xlu1 %v16522_v36, %s11662_s3 }
 0x930   : > { %v4840_v7 = vpop.xlane.xlu1 %4839  ;;  %4857 = vmax.xlane.f32.xlu0 %v13858_v24 }
 0x931   : > { %v4866_v40 = vsub.f32 %v13842_v15, %v4840_v7  ;;  %v14168_v15 = vpop.eup %10784  ;;  %v16526_v7 = vld [vmem:[#allocation46_spill] sm:$0xff] }
 0x932   : > { %5368 = vrot.lane.b32.xlu1 %v16523_v27, %s11663_s12 }
 0x933   : > { %v4887_v37 = vmul.f32 1.442695, %v4866_v40  ;;  %v16527_v40 = vld [vmem:[#allocation81_spill] sm:$0xff] }
 0x934   : > { %v4844_v62 = vpop.xlane.xlu1 %4843  ;;  %4859 = vmax.xlane.f32.xlu0 %v13862_v59 }
 0x935   : > { %10786 = vpow2.f32 %v4887_v37 }
 0x936   : > { %4971 = vrot.lane.b32.xlu1 %v16524_v2, %s11662_s3  ;;  %10788 = vrcp.f32 %v13969_v5  ;;  %v14180_v5 = vpop.permute.xlu0 %4961 }
 0x937   : > { %10790 = vrcp.f32 %v13971_v51  ;;  %v4868_v51 = vsub.f32 %v13840_v49, %v4844_v62 }
 0x938   : > { %v5361_v55 = vpop.permute.xlu1 %5360  ;;  %10792 = vrcp.f32 %v13973_v63  ;;  %v16529_v63 = vld [vmem:[#allocation79_spill] sm:$0xff] }
 0x939   : > { %9937 = vmatprep.mubr.msk.bf16.mxu1 %vm1850_vm0, %v5361_v55  ;;  %10794 = vrcp.f32 %v16527_v40  ;;  %v16528_v55 = vld [vmem:[#allocation43_spill] sm:$0xff]  ;;  %v4891_v20 = vmul.f32 1.442695, %v4868_v51 }
 0x93a   : > { %5372 = vrot.lane.b32.xlu1 %v16525_v41, %s11663_s12  ;;  %10796 = vrcp.f32 %v13988_v0  ;;  %v16530_v40 = vld [vmem:[#allocation47_spill] sm:$0xff] }
 0x93b   : > { %10798 = vrcp.f32 %v16529_v63 }
 0x93c   : > { %10800 = vrcp.f32 %v13982_v11 }
 0x93d   : > { %10802 = vrcp.f32 %v13985_v10  ;;  %v16532_v10 = vld [vmem:[#allocation39_spill] sm:$0xff] }
 0x93e   : > { %5374 = vrot.lane.b32.xlu1 %v16526_v7, %s11663_s12  ;;  %10804 = vrcp.f32 %v13992_v21 }
 0x93f   : > { %v14173_v37 = vpop.eup %10786  ;;  %10806 = vpow2.f32 %v4891_v20 }
 0x940   : > { %v10789_v41 = vpop.eup %10788 }
 0x941   : > { %v10791_v27 = vpop.eup %10790 }
 0x942   : > { %5971 = vrot.lane.b32.xlu1 %v16528_v55, %s11664_s18  ;;  %v10793_v59 = vpop.eup %10792 }
 0x943   : > { %v10795_v0 = vpop.eup %10794 }
 0x946   : > { %v9719_v7 = vpop.f32.mrb[96].mxu0  ;;  %5973 = vrot.lane.b32.xlu1 %v16530_v40, %s11664_s18  ;;  %v16531_v40 = vld [vmem:[#allocation50_spill] sm:$0xff] }
 0x947   : > { %v3977_v55 = vpop.f32.mrb[97].mxu0  ;;  %v4842_v48 = vpop.xlane.xlu0 %4841  ;;  %v4058_v62 = vmul.f32 %v10789_v41, %v9719_v7 }
 0x948   : > { %v9720_v24 = vpop.f32.mrb[98].mxu0  ;;  %v4867_v49 = vsub.f32 %v13836_v12, %v4842_v48  ;;  %v4056_v11 = vmul.f32 %v10791_v27, %v3977_v55 }
 0x949   : > { %v4059_v63 = vmul.f32 %v10793_v59, %v9720_v24  ;;  %v3980_v29 = vpop.f32.mrb[99].mxu0  ;;  %v10797_v24 = vpop.eup %10796 }
 0x94a   : > { %v4889_v6 = vmul.f32 1.442695, %v4867_v49  ;;  %v4057_v17 = vmul.f32 %v10795_v0, %v3980_v29  ;;  %5975 = vrot.lane.b32.xlu1 %v16531_v40, %s11664_s18  ;;  %5370 = vrot.lane.b32.xlu0 %v16532_v10, %s11663_s12  ;;  %v10799_v29 = vpop.eup %10798 }
 0x94b   : > { %v4073_v51 = vpack.c.bf16 %v4059_v63, %v4058_v62  ;;  %v5363_v13 = vpop.permute.xlu0 %5362  ;;  %v10801_v48 = vpop.eup %10800 }
 0x94c   : > { %10808 = vpow2.f32 %v4889_v6  ;;  %v4072_v12 = vpack.c.bf16 %v4057_v17, %v4056_v11  ;;  %9938 = vmatmul.mubr.msk.bf16.vlgmr.msra.gmra.mrb[160].mxu1 %vm1850_vm0, %v5363_v13  ;;  %v10803_v6 = vpop.eup %10802  ;;  %v16533_v13 = vld [vmem:[#allocation62_spill] sm:$0xff] }
 0x94d   : > { %10810 = vrcp.f32 %v13998_v32  ;;  %v4412_v32 = vsub.f32 %v16533_v13, %v14030_v56  ;;  %v10805_v0 = vpop.eup %10804  ;;  %v16535_v56 = vld [vmem:[#allocation102_spill] sm:$0xff] }
 0x94e   : > { %10812 = vrcp.f32 %v14009_v3  ;;  %v9723_v59 = vpop.f32.mrb[100].mxu0  ;;  %9737 = vmatprep.mubr.msk.bf16.mxu0 %vm1850_vm0, %v4072_v12  ;;  %v14209_v63 = vpop.eup %10806 }
 0x94f   : > { %10814 = vrcp.f32 %v14015_v54  ;;  %v3993_v21 = vpop.f32.mrb[101].mxu0  ;;  %9738 = vmatmul.mubr.msk.bf16.vlgmr.msra.gmra.mrb[64].mxu0 %vm1850_vm0, %v4073_v51  ;;  %v4062_v27 = vmul.f32 %v10797_v24, %v9723_v59  ;;  %v16534_v54 = vld [vmem:[#allocation61_spill] sm:$0xff]  ;;  %v4429_v11 = vmul.f32 1.442695, %v4412_v32  ;;  %v16536_v51 = vld [vmem:[#allocation104_spill] sm:$0xff] }
 0x950   : > { %9786 = vmatpush3.bf16.msra.mxu0 %v16502_v52  ;;  %v9724_v17 = vpop.f32.mrb[102].mxu0  ;;  %v4060_v7 = vmul.f32 %v10799_v29, %v3993_v21  ;;  %v4411_v55 = vsub.f32 %v16534_v54, %v14021_v47  ;;  %10816 = vrcp.f32 %v13995_v35  ;;  %v16537_v35 = vld [vmem:[#allocation78_spill] sm:$0xff] }
 0x951   : > { %v4063_v41 = vmul.f32 %v10801_v48, %v9724_v17  ;;  %9787 = vmatprep.subr.bf16.mxu0 %v16510_v14  ;;  %v3996_v3 = vpop.f32.mrb[103].mxu0  ;;  %10818 = vrcp.f32 %v16535_v56  ;;  %v4413_v59 = vsub.f32 %v16537_v35, %v14047_v18  ;;  %v16538_v17 = vld [vmem:[#allocation64_spill] sm:$0xff]  ;;  %v16541_v35 = vld [vmem:[#allocation71_spill] sm:$0xff] }
 0x952   : > { %v4061_v20 = vmul.f32 %v10803_v6, %v3996_v3  ;;  %10820 = vrcp.f32 %v16536_v51  ;;  %v4427_v24 = vmul.f32 1.442695, %v4411_v55  ;;  %v4414_v6 = vsub.f32 %v16538_v17, %v14049_v58  ;;  %v16540_v55 = vld [vmem:[#allocation66_spill] sm:$0xff]  ;;  %v16543_v17 = vld [vmem:[#allocation65_spill] sm:$0xff] }
 0x953   : > { %v4075_v49 = vpack.c.bf16 %v4063_v41, %v4062_v27  ;;  %10822 = vrcp.f32 %v14036_v42  ;;  %v16539_v42 = vld [vmem:[#allocation68_spill] sm:$0xff]  ;;  %v4431_v58 = vmul.f32 1.442695, %v4413_v59  ;;  %v4864_v51 = vsub.f32 %v13832_v39, %v14130_v16 }
 0x954   : > { %v4074_v62 = vpack.c.bf16 %v4061_v20, %v4060_v7  ;;  %9788 = vmatpush3.bf16.msra.mxu0 %v16510_v14  ;;  %10824 = vpow2.f32 %v4429_v11  ;;  %v4416_v27 = vsub.f32 %v16539_v42, %v14088_v31  ;;  %v4863_v7 = vsub.f32 %v13828_v46, %v14148_v38 }
 0x955   : > { %9789 = vmatprep.subr.bf16.mxu0 %v16514_v44  ;;  %10826 = vpow2.f32 %v4427_v24  ;;  %v4433_v56 = vmul.f32 1.442695, %v4414_v6  ;;  %v4417_v59 = vsub.f32 %v16541_v35, %v14061_v26  ;;  %v4419_v6 = vsub.f32 %v16543_v17, %v14102_v43  ;;  %v16549_v17 = vld [vmem:[#allocation70_spill] sm:$0xff] }
 0x956   : > { %v14213_v40 = vpop.eup %10808  ;;  %v9727_v12 = vpop.f32.mrb[104].mxu0  ;;  %9741 = vmatprep.mubr.msk.bf16.mxu0 %vm1850_vm0, %v4074_v62  ;;  %v4437_v31 = vmul.f32 1.442695, %v4416_v27  ;;  %v4881_v46 = vmul.f32 1.442695, %v4863_v7  ;;  %10828 = vpow2.f32 %v4431_v58 }
 0x957   : > { %v10811_v47 = vpop.eup %10810  ;;  %v4009_v29 = vpop.f32.mrb[105].mxu0  ;;  %9742 = vmatmul.mubr.msk.bf16.gmra.mrb[68].mxu0 %vm1850_vm0, %v4075_v49  ;;  %v4944_v21 = vpack.c.bf16 %v14209_v63, %v14213_v40  ;;  %v4066_v41 = vmul.f32 %v10805_v0, %v9727_v12  ;;  %v4415_v49 = vsub.f32 %v16540_v55, %v14058_v61  ;;  %10830 = vpow2.f32 %v4433_v56 }
 0x958   : > { %v10813_v48 = vpop.eup %10812  ;;  %9790 = vmatpush3.bf16.msra.mxu0 %v16514_v44  ;;  %v9728_v13 = vpop.f32.mrb[106].mxu0  ;;  %v4064_v20 = vmul.f32 %v10811_v47, %v4009_v29  ;;  %v16542_v29 = vld [vmem:[#allocation63_spill] sm:$0xff]  ;;  %10832 = vpow2.f32 %v4437_v31  ;;  %v4883_v27 = vmul.f32 1.442695, %v4864_v51  ;;  %v4443_v58 = vmul.f32 1.442695, %v4419_v6 }
 0x959   : > { %v10815_v32 = vpop.eup %10814  ;;  %v4067_v18 = vmul.f32 %v10813_v48, %v9728_v13  ;;  %9791 = vmatprep.subr.bf16.mxu0 %v16516_v57  ;;  %v4012_v3 = vpop.f32.mrb[107].mxu0  ;;  %v4435_v47 = vmul.f32 1.442695, %v4415_v49  ;;  %v4418_v48 = vsub.f32 %v16542_v29, %v14071_v34  ;;  %10834 = vpow2.f32 %v4881_v46  ;;  %v16544_v34 = vld [vmem:[#allocation69_spill] sm:$0xff] }
 0x95a   : > { %v4065_v54 = vmul.f32 %v10815_v32, %v4012_v3  ;;  %v10817_v0 = vpop.eup %10816  ;;  %v4420_v3 = vsub.f32 %v16544_v34, %v14090_v53  ;;  %v4439_v55 = vmul.f32 1.442695, %v4417_v59  ;;  %v16545_v53 = vld [vmem:[#allocation73_spill] sm:$0xff]  ;;  %v4964_v51 = vpop.permute.xlu1 %4963  ;;  %v4426_v6 = vsub.f32 %v16549_v17, %v14113_v4 }
 0x95b   : > { %v4077_v62 = vpack.c.bf16 %v4067_v18, %v4066_v41  ;;  %v10819_v12 = vpop.eup %10818  ;;  %10836 = vpow2.f32 %v4435_v47  ;;  %v4422_v56 = vsub.f32 %v16545_v53, %v14096_v1  ;;  %v16546_v31 = vld [vmem:[#allocation77_spill] sm:$0xff]  ;;  %v16548_v47 = vld [vmem:[#allocation75_spill] sm:$0xff] }
 0x95c   : > { %v4076_v11 = vpack.c.bf16 %v4065_v54, %v4064_v20  ;;  %9792 = vmatpush3.bf16.msra.mxu0 %v16516_v57  ;;  %v10821_v24 = vpop.eup %10820  ;;  %v4441_v20 = vmul.f32 1.442695, %v4418_v48  ;;  %10838 = vpow2.f32 %v4883_v27  ;;  %v4457_v4 = vmul.f32 1.442695, %v4426_v6 }
 0x95d   : > { %9793 = vmatprep.subr.bf16.mxu0 %v16518_v30  ;;  %v10823_v16 = vpop.eup %10822 }
 0x95e   : > { %v9731_v38 = vpop.f32.mrb[108].mxu0  ;;  %9745 = vmatprep.mubr.msk.bf16.mxu0 %vm1850_vm0, %v4076_v11  ;;  %v14247_v18 = vpop.eup %10824  ;;  %10840 = vpow2.f32 %v4441_v20 }
 0x95f   : > { %v4025_v61 = vpop.f32.mrb[109].mxu0  ;;  %9746 = vmatmul.mubr.msk.bf16.gmra.mrb[72].mxu0 %vm1850_vm0, %v4077_v62  ;;  %v4070_v13 = vmul.f32 %v10817_v0, %v9731_v38  ;;  %v14252_v43 = vpop.eup %10826  ;;  %v4445_v62 = vmul.f32 1.442695, %v4420_v3  ;;  %10842 = vpow2.f32 %v4443_v58  ;;  %v4424_v0 = vsub.f32 %v16546_v31, %v14120_v19  ;;  %v16547_v38 = vld [vmem:[#allocation67_spill] sm:$0xff]  ;;  %v16551_v31 = vld [vmem:[#allocation52_spill] sm:$0xff] }
 0x960   : > { %9794 = vmatpush3.bf16.msra.mxu0 %v16518_v30  ;;  %v9732_v39 = vpop.f32.mrb[110].mxu0  ;;  %v4068_v41 = vmul.f32 %v10819_v12, %v4025_v61  ;;  %v4491_v49 = vpack.c.bf16 %v14247_v18, %v14252_v43  ;;  %v14262_v11 = vpop.eup %10828  ;;  %10844 = vpow2.f32 %v4439_v55  ;;  %v4421_v1 = vsub.f32 %v16547_v38, %v14094_v8 }
 0x961   : > { %v4071_v32 = vmul.f32 %v10821_v24, %v9732_v39  ;;  %9795 = vmatprep.subr.bf16.mxu0 %v16520_v28  ;;  %v4028_v42 = vpop.f32.mrb[111].mxu0  ;;  %v14268_v46 = vpop.eup %10830  ;;  %10846 = vpow2.f32 %v4445_v62  ;;  %v4423_v61 = vsub.f32 %v16548_v47, %v14104_v50  ;;  %v4449_v19 = vmul.f32 1.442695, %v4422_v56 }
 0x962   : > { %v4069_v26 = vmul.f32 %v10823_v16, %v4028_v42  ;;  %v14272_v12 = vpop.eup %10832  ;;  %v4453_v59 = vmul.f32 1.442695, %v4424_v0  ;;  %v4492_v8 = vpack.c.bf16 %v14268_v46, %v14262_v11  ;;  %v4447_v48 = vmul.f32 1.442695, %v4421_v1  ;;  %v16550_v42 = vld [vmem:[#allocation80_spill] sm:$0xff] }
 0x963   : > { %v4079_v7 = vpack.c.bf16 %v4071_v32, %v4070_v13  ;;  %v14276_v24 = vpop.eup %10834  ;;  %v4451_v39 = vmul.f32 1.442695, %v4423_v61  ;;  %10848 = vpow2.f32 %v4449_v19  ;;  %v4425_v27 = vsub.f32 %v16550_v42, %v14108_v25 }
 0x964   : > { %v4078_v54 = vpack.c.bf16 %v4069_v26, %v4068_v41  ;;  %9796 = vmatpush3.bf16.msra.mxu0 %v16520_v28  ;;  %10850 = vpow2.f32 %v4453_v59  ;;  %v16553_v59 = vld [vmem:[#allocation72_spill] sm:$0xff] }
 0x965   : > { %9797 = vmatprep.subr.bf16.mxu0 %v16522_v36  ;;  %v14279_v35 = vpop.eup %10836  ;;  %10852 = vpow2.f32 %v4447_v48 }
 0x966   : > { %9749 = vmatprep.mubr.msk.bf16.mxu0 %vm1850_vm0, %v4078_v54  ;;  %v4493_v50 = vpack.c.bf16 %v14272_v12, %v14279_v35  ;;  %v14288_v16 = vpop.eup %10838  ;;  %10854 = vpow2.f32 %v4451_v39 }
 0x967   : > { %9750 = vmatmul.mubr.msk.bf16.gmra.mrb[76].mxu0 %vm1850_vm0, %v4079_v7  ;;  %v4455_v7 = vmul.f32 1.442695, %v4425_v27  ;;  %10856 = vpow2.f32 %v4457_v4 }
 0x968   : > { %9798 = vmatpush3.bf16.msra.mxu0 %v16522_v36  ;;  %9801 = vmatprep.mubr.bf16.mxu0 %v4491_v49  ;;  %v14295_v32 = vpop.eup %10840 }
 0x969   : > { %9799 = vmatprep.subr.bf16.mxu0 %v16524_v2  ;;  %4909 = vadd.xlane.f32.xlu0 %v14139_v22  ;;  %v14299_v41 = vpop.eup %10842  ;;  %10858 = vpow2.f32 %v4455_v7  ;;  %v16556_v7 = vld [vmem:[#allocation74_spill] sm:$0xff] }
 0x96a   : > { %v14301_v26 = vpop.eup %10844 }
 0x96b   : > { %v4494_v3 = vpack.c.bf16 %v14295_v32, %v14301_v26 }
 0x96c   : > { %9800 = vmatpush3.bf16.msra.mxu0 %v16524_v2 }
 0x96d   : > { %9849 = vmatprep.subr.bf16.mxu0 %v14146_v33  ;;  %v4846_v29 = vpop.xlane.xlu1 %4845  ;;  %4913 = vadd.xlane.f32.xlu0 %v14276_v24 }
 0x96e   : > { %4911 = vadd.xlane.f32.xlu1 %v14137_v23 }
 0x96f   : > { %9802 = vmatmul.mubr.bf16.vlgmr.msra.gmra.mrb[112].mxu0 %v4492_v8 }
 0x970   : > { %9850 = vmatpush3.bf16.msra.mxu0 %v14146_v33  ;;  %9805 = vmatprep.mubr.bf16.mxu0 %v4493_v50  ;;  %v14304_v33 = vpop.eup %10846  ;;  %v16554_v50 = vpack.c.bf16 %v14137_v23, %v14139_v22 }
 0x971   : > { %9851 = vmatprep.subr.bf16.mxu0 %v14150_v9  ;;  %v4966_v13 = vpop.permute.xlu1 %4965  ;;  %4915 = vadd.xlane.f32.xlu0 %v14288_v16  ;;  %v4495_v25 = vpack.c.bf16 %v14304_v33, %v14299_v41  ;;  %v14316_v20 = vpop.eup %10848 }
 0x972   : > { %v14318_v54 = vpop.eup %10850 }
 0x973   : > { %v14320_v58 = vpop.eup %10852 }
 0x974   : > { %9852 = vmatpush3.bf16.msra.mxu0 %v14150_v9  ;;  %v4869_v9 = vsub.f32 %v13848_v45, %v4846_v29  ;;  %v14322_v62 = vpop.eup %10854 }
 0x975   : > { %9853 = vmatprep.subr.bf16.mxu0 %v14180_v5  ;;  %v5365_v34 = vpop.permute.xlu1 %5364  ;;  %4917 = vadd.xlane.f32.xlu0 %v14168_v15  ;;  %v4497_v53 = vpack.c.bf16 %v14318_v54, %v14322_v62  ;;  %v14334_v1 = vpop.eup %10856 }
 0x976   : > { %9941 = vmatprep.mubr.msk.bf16.mxu1 %vm1850_vm0, %v5365_v34  ;;  %v4893_v55 = vmul.f32 1.442695, %v4869_v9  ;;  %v14336_v47 = vpop.eup %10858  ;;  %v16555_v34 = vld [vmem:[#allocation38_spill] sm:$0xff] }
 0x977   : > { %9806 = vmatmul.mubr.bf16.gmra.mrb[116].mxu0 %v4494_v3  ;;  %v4498_v8 = vpack.c.bf16 %v14334_v1, %v14336_v47 }
 0x978   : > { %9854 = vmatpush3.bf16.msra.mxu0 %v14180_v5  ;;  %9809 = vmatprep.mubr.bf16.mxu0 %v4495_v25  ;;  %v4496_v5 = vpack.c.bf16 %v14316_v20, %v14320_v58  ;;  %10860 = vpow2.f32 %v4893_v55 }
 0x979   : > { %9855 = vmatprep.subr.bf16.mxu0 %v4964_v51  ;;  %4919 = vadd.xlane.f32.xlu0 %v14173_v37  ;;  %v4968_v0 = vpop.permute.xlu1 %4967 }
 0x97c   : > { %9856 = vmatpush3.bf16.msra.mxu0 %v4964_v51  ;;  %v4848_v49 = vpop.xlane.xlu0 %4847 }
 0x97d   : > { %9857 = vmatprep.subr.bf16.mxu0 %v4966_v13  ;;  %v4870_v45 = vsub.f32 %v13853_v60, %v4848_v49  ;;  %4921 = vadd.xlane.f32.xlu0 %v14213_v40  ;;  %v16552_v60 = vld [vmem:[#allocation95_spill] sm:$0xff] }
 0x97f   : > { %v4895_v56 = vmul.f32 1.442695, %v4870_v45  ;;  %9810 = vmatmul.mubr.bf16.gmra.mrb[120].mxu0 %v4496_v5  ;;  %5977 = vrot.lane.b32.xlu1 %v16551_v31, %s11664_s18  ;;  %v4942_v5 = vpack.c.bf16 %v14288_v16, %v14276_v24  ;;  %v16560_v24 = vld [vmem:[#allocation82_spill] sm:$0xff] }
 0x980   : > { %9858 = vmatpush3.bf16.msra.mxu0 %v4966_v13  ;;  %9813 = vmatprep.mubr.bf16.mxu0 %v4497_v53  ;;  %v4850_v51 = vpop.xlane.xlu0 %4849  ;;  %v11260_v53 = vld [vmem:[%s12159_s6 + $0x10] sm:$0xff]  }
 0x981   : > { %10862 = vpow2.f32 %v4895_v56  ;;  %9859 = vmatprep.subr.bf16.mxu0 %v4968_v0  ;;  %v4871_v38 = vsub.f32 %v16552_v60, %v4850_v51  ;;  %4923 = vadd.xlane.f32.xlu0 %v14209_v63  ;;  %v16557_v56 = vld [vmem:[#allocation76_spill] sm:$0xff]  ;;  %v16558_v60 = vpack.c.bf16 %v14173_v37, %v14168_v15 }
 0x982   : > { %v10861_v17 = vpop.eup %10860  ;;  %v14362_v37 = vld [vmem:[%s12159_s6] sm:$0xff]  }
 0x983   : > { %v4897_v61 = vmul.f32 1.442695, %v4871_v38  ;;  %v16559_v38 = vld [vmem:[#allocation40_spill] sm:$0xff] }
 0x984   : > { %9860 = vmatpush3.bf16.msra.mxu0 %v4968_v0  ;;  %v4852_v19 = vpop.xlane.xlu0 %4851 }
 0x985   : > { %v4872_v29 = vsub.f32 %v16553_v59, %v4852_v19  ;;  %10864 = vpow2.f32 %v4897_v61  ;;  %v11261_v59 = vld [vmem:[%s12159_s6 + $0x18] sm:$0xff]  }
 0x987   : > { %v4899_v48 = vmul.f32 1.442695, %v4872_v29  ;;  %9814 = vmatmul.mubr.bf16.gmra.mrb[124].mxu0 %v4498_v8 }
 0x988   : > { %9865 = vmatprep.mubr.bf16.mxu0 %v16554_v50  ;;  %v5367_v39 = vpop.permute.xlu0 %5366 }
 0x989   : > { %10866 = vpow2.f32 %v4899_v48  ;;  %9942 = vmatmul.mubr.msk.bf16.gmra.mrb[164].mxu1 %vm1850_vm0, %v5367_v39  ;;  %v16561_v48 = vld [vmem:[#allocation84_spill] sm:$0xff] }
 0x98b   : > { %v10863_v6 = vpop.eup %10862 }
 0x98c   : > { %v4945_v13 = vpack.c.bf16 %v10863_v6, %v10861_v17 }
 0x98f   : > { %v10865_v42 = vpop.eup %10864 }
 0x993   : > { %v10867_v27 = vpop.eup %10866 }
 0x994   : > { %v4946_v4 = vpack.c.bf16 %v10867_v27, %v10865_v42 }
 0x997   : > { %5979 = vrot.lane.b32.xlu0 %v16555_v34, %s11664_s18 }
 0x9a3   : > { %4925 = vadd.xlane.f32.xlu1 %v10861_v17 }
 0x9a7   : > { %4929 = vadd.xlane.f32.xlu1 %v10865_v42 }
 0x9aa   : > { %v4854_v3 = vpop.xlane.xlu1 %4853 }
 0x9ab   : > { %v4873_v25 = vsub.f32 %v16556_v7, %v4854_v3  ;;  %4931 = vadd.xlane.f32.xlu1 %v10867_v27 }
 0x9ad   : > { %v4901_v23 = vmul.f32 1.442695, %v4873_v25 }
 0x9ae   : > { %v4970_v22 = vpop.permute.xlu1 %4969 }
 0x9af   : > { %10868 = vpow2.f32 %v4901_v23  ;;  %9861 = vmatprep.subr.bf16.mxu0 %v4970_v22 }
 0x9b0   : > { %9862 = vmatpush3.bf16.msra.mxu0 %v4970_v22 }
 0x9b2   : > { %v5369_v9 = vpop.permute.xlu1 %5368 }
 0x9b3   : > { %9945 = vmatprep.mubr.msk.bf16.mxu1 %vm1850_vm0, %v5369_v9  ;;  %v16563_v9 = vld [vmem:[#allocation48_spill] sm:$0xff] }
 0x9b6   : > { %v4972_v55 = vpop.permute.xlu1 %4971  ;;  %4927 = vadd.xlane.f32.xlu0 %v10863_v6 }
 0x9b7   : > { %9863 = vmatprep.subr.bf16.mxu0 %v4972_v55 }
 0x9b8   : > { %9864 = vmatpush3.bf16.msra.mxu0 %v4972_v55 }
 0x9b9   : > { %v10869_v49 = vpop.eup %10868  ;;  %v4856_v45 = vpop.xlane.xlu0 %4855  ;;  %9881 = vmatprep.subr.bf16.mxu0 %v11260_v53 }
 0x9ba   : > { %v4874_v31 = vsub.f32 %v16557_v56, %v4856_v45  ;;  %v5373_v0 = vpop.permute.xlu1 %5372  ;;  %4933 = vadd.xlane.f32.xlu0 %v10869_v49 }
 0x9bb   : > { %9866 = vmatmul.mubr.bf16.vlgmr.msra.gmra.mrb[128].mxu0 %v4942_v5 }
 0x9bc   : > { %v4903_v51 = vmul.f32 1.442695, %v4874_v31  ;;  %9869 = vmatprep.mubr.bf16.mxu0 %v16558_v60  ;;  %5981 = vrot.lane.b32.xlu1 %v16559_v38, %s11664_s18 }
 0x9bd   : > { %v4858_v61 = vpop.xlane.xlu0 %4857  ;;  %9882 = vmatpush3.bf16.msra.mxu0 %v11260_v53 }
 0x9be   : > { %10870 = vpow2.f32 %v4903_v51  ;;  %v4875_v16 = vsub.f32 %v16560_v24, %v4858_v61  ;;  %v5375_v19 = vpop.permute.xlu1 %5374  ;;  %9883 = vmatprep.subr.bf16.mxu0 %v11261_v59 }
 0x9c0   : > { %v4905_v29 = vmul.f32 1.442695, %v4875_v16 }
 0x9c1   : > { %v4860_v8 = vpop.xlane.xlu0 %4859  ;;  %9884 = vmatpush3.bf16.msra.mxu0 %v11261_v59 }
 0x9c2   : > { %10872 = vpow2.f32 %v4905_v29  ;;  %v4876_v50 = vsub.f32 %v16561_v48, %v4860_v8  ;;  %v5972_v15 = vpop.permute.xlu1 %5971  ;;  %9901 = vmatprep.subr.bf16.mxu0 %v14362_v37  ;;  %v16570_v8 = vld [vmem:[#allocation45_spill] sm:$0xff] }
 0x9c3   : > { %9870 = vmatmul.mubr.bf16.gmra.mrb[132].mxu0 %v4944_v21  ;;  %10257 = vmatprep.subr.msk.bf16.mxu1 %vm1850_vm0, %v5972_v15  ;;  %v6012_v39 = vsel %vm1850_vm0, %v5972_v15, 0 }
 0x9c4   : > { %v4907_v17 = vmul.f32 1.442695, %v4876_v50  ;;  %9873 = vmatprep.mubr.bf16.mxu0 %v4945_v13  ;;  %10006 = vmatpush3.bf16.xpose.msra.mxu1 %v6012_v39 }
 0x9c5   : > { %v5371_v6 = vpop.permute.xlu0 %5370 }
 0x9c6   : > { %10874 = vpow2.f32 %v4907_v17  ;;  %v5974_v42 = vpop.permute.xlu1 %5973  ;;  %9946 = vmatmul.mubr.msk.bf16.gmra.mrb[168].mxu1 %vm1850_vm0, %v5371_v6 }
 0x9c7   : > { %9949 = vmatprep.mubr.msk.bf16.mxu1 %vm1850_vm0, %v5373_v0  ;;  %10258 = vmatprep.subr.msk.bf16.mxu1 %vm1850_vm0, %v5974_v42  ;;  %v6015_v40 = vsel %vm1850_vm0, %v5974_v42, 0 }
 0x9c8   : > { %v10871_v27 = vpop.eup %10870 }
 0x9c9   : > { %4935 = vadd.xlane.f32.xlu0 %v10871_v27  ;;  %v4947_v63 = vpack.c.bf16 %v10871_v27, %v10869_v49 }
 0x9ca   : > { %v5976_v34 = vpop.permute.xlu1 %5975 }
 0x9cb   : > { %9874 = vmatmul.mubr.bf16.gmra.mrb[136].mxu0 %v4946_v4  ;;  %v6018_v7 = vsel %vm1850_vm0, %v5976_v34, 0  ;;  %v16562_v4 = vld [vmem:[#allocation44_spill] sm:$0xff] }
 0x9cc   : > { %v10873_v21 = vpop.eup %10872  ;;  %9877 = vmatprep.mubr.bf16.mxu0 %v4947_v63  ;;  %10008 = vmatpush3.bf16.xpose.msra.mxu1 %v6015_v40 }
 0x9cd   : > { %10259 = vmatprep.subr.msk.bf16.mxu1 %vm1850_vm0, %v5976_v34  ;;  %4937 = vadd.xlane.f32.xlu0 %v10873_v21 }
 0x9ce   : > { %9950 = vmatmul.mubr.msk.bf16.gmra.mrb[172].mxu1 %vm1850_vm0, %v5375_v19 }
 0x9d0   : > { %v10875_v13 = vpop.eup %10874 }
 0x9d1   : > { %v4948_v3 = vpack.c.bf16 %v10875_v13, %v10873_v21 }
 0x9d3   : > { %9878 = vmatmul.mubr.bf16.gmra.mrb[140].mxu0 %v4948_v3 }
 0x9d4   : > { %10010 = vmatpush3.bf16.xpose.msra.mxu1 %v6018_v7 }
 0x9e0   : > { %4939 = vadd.xlane.f32.xlu1 %v10875_v13 }
 0x9e3   : > { %5983 = vrot.lane.b32.xlu0 %v16562_v4, %s11664_s18 }
 0x9e4   : > { %4461 = vadd.xlane.f32.xlu1 %v14247_v18 }
 0x9e8   : > { %4463 = vadd.xlane.f32.xlu1 %v14262_v11 }
 0x9ec   : > { %4465 = vadd.xlane.f32.xlu1 %v14268_v46 }
 0x9f6   : > { %v14382_v25 = vpop.xlane.xlu0 %4909 }
 0x9fa   : > { %v14384_v23 = vpop.xlane.xlu0 %4913 }
 0x9fb   : > { %v14386_v22 = vpop.xlane.xlu1 %4911 }
 0x9fd   : > { %5985 = vrot.lane.b32.xlu1 %v16563_v9, %s11664_s18 }
 0x9fe   : > { %v14390_v55 = vpop.xlane.xlu0 %4915 }
 0x9ff   : > { %v5978_v49 = vpop.permute.xlu1 %5977 }
 0xa00   : > { %10260 = vmatprep.subr.msk.bf16.mxu1 %vm1850_vm0, %v5978_v49  ;;  %v6021_v18 = vsel %vm1850_vm0, %v5978_v49, 0 }
 0xa01   : > { %10012 = vmatpush3.bf16.xpose.msra.mxu1 %v6021_v18 }
 0xa02   : > { %4459 = vadd.xlane.f32.xlu0 %v14252_v43  ;;  %v14395_v11 = vpop.xlane.xlu0 %4917 }
 0xa06   : > { %4467 = vadd.xlane.f32.xlu0 %v14279_v35  ;;  %v14398_v46 = vpop.xlane.xlu0 %4919  ;;  %v16564_v35 = vld [vmem:[#allocation41_spill] sm:$0xff] }
 0xa0a   : > { %4469 = vadd.xlane.f32.xlu0 %v14272_v12  ;;  %v14401_v45 = vpop.xlane.xlu0 %4921 }
 0xa0e   : > { %v14403_v5 = vpop.xlane.xlu0 %4923 }
 0xa12   : > { %v5980_v53 = vpop.permute.xlu0 %5979 }
 0xa13   : > { %10261 = vmatprep.subr.msk.bf16.mxu1 %vm1850_vm0, %v5980_v53  ;;  %v6024_v56 = vsel %vm1850_vm0, %v5980_v53, 0 }
 0xa14   : > { %10014 = vmatpush3.bf16.xpose.msra.mxu1 %v6024_v56 }
 0xa1f   : > { %v14407_v31 = vpop.f32.mrb[160].mxu1 }
 0xa20   : > { %v14409_v43 = vpop.f32.mrb[161].mxu1  ;;  %5955 = vrot.lane.b32.xlu0 %v16564_v35, %s11664_s18 }
 0xa21   : > { %v14413_v0 = vpop.f32.mrb[162].mxu1  ;;  %4471 = vadd.xlane.f32.xlu1 %v14301_v26 }
 0xa22   : > { %v14416_v12 = vpop.f32.mrb[64].mxu0  ;;  %v14418_v51 = vpop.f32.mrb[163].mxu1 }
 0xa23   : > { %v14420_v60 = vpop.f32.mrb[65].mxu0 }
 0xa24   : > { %v14422_v38 = vpop.f32.mrb[66].mxu0 }
 0xa25   : > { %v14424_v61 = vpop.f32.mrb[67].mxu0 }
 0xa2a   : > { %v14426_v24 = vpop.f32.mrb[68].mxu0 }
 0xa2b   : > { %16565 = vst [vmem:[#allocation86_spill] sm:$0xff] %v14426_v24  ;;  %v14428_v16 = vpop.f32.mrb[69].mxu0 }
 0xa2c   : > { %16566 = vst [vmem:[#allocation106_spill] sm:$0xff] %v14428_v16  ;;  %v14430_v19 = vpop.f32.mrb[70].mxu0 }
 0xa2d   : > { %16567 = vst [vmem:[#allocation103_spill] sm:$0xff] %v14430_v19  ;;  %v14432_v59 = vpop.f32.mrb[71].mxu0 }
 0xa2e   : > { %16568 = vst [vmem:[#allocation99_spill] sm:$0xff] %v14432_v59 }
 0xa30   : > { %v14434_v29 = vpop.xlane.xlu1 %4925 }
 0xa32   : > { %v14436_v26 = vpop.f32.mrb[72].mxu0  ;;  %5957 = vrot.lane.b32.xlu1 %v16570_v8, %s11664_s18 }
 0xa33   : > { %16569 = vst [vmem:[#allocation94_spill] sm:$0xff] %v14436_v26  ;;  %v14440_v48 = vpop.f32.mrb[73].mxu0  ;;  %v16579_v26 = vld [vmem:[#allocation51_spill] sm:$0xff] }
 0xa34   : > { %16571 = vst [vmem:[#allocation87_spill] sm:$0xff] %v14440_v48  ;;  %v14442_v50 = vpop.f32.mrb[74].mxu0  ;;  %v14444_v15 = vpop.xlane.xlu1 %4929 }
 0xa35   : > { %16572 = vst [vmem:[#allocation96_spill] sm:$0xff] %v14442_v50  ;;  %v14446_v39 = vpop.f32.mrb[75].mxu0  ;;  %v16578_v50 = vld [vmem:[#allocation49_spill] sm:$0xff] }
 0xa36   : > { %16573 = vst [vmem:[#allocation98_spill] sm:$0xff] %v14446_v39 }
 0xa38   : > { %v14448_v17 = vpop.xlane.xlu1 %4931 }
 0xa3a   : > { %v14450_v6 = vpop.f32.mrb[76].mxu0 }
 0xa3b   : > { %16574 = vst [vmem:[#allocation101_spill] sm:$0xff] %v14450_v6  ;;  %v14452_v42 = vpop.f32.mrb[77].mxu0 }
 0xa3c   : > { %16575 = vst [vmem:[#allocation107_spill] sm:$0xff] %v14452_v42  ;;  %v14454_v27 = vpop.f32.mrb[78].mxu0  ;;  %v5982_v63 = vpop.permute.xlu1 %5981 }
 0xa3d   : > { %16576 = vst [vmem:[#allocation109_spill] sm:$0xff] %v14454_v27  ;;  %v14456_v40 = vpop.f32.mrb[79].mxu0  ;;  %10262 = vmatprep.subr.msk.bf16.mxu1 %vm1850_vm0, %v5982_v63  ;;  %v6027_v21 = vsel %vm1850_vm0, %v5982_v63, 0 }
 0xa3e   : > { %16577 = vst [vmem:[#allocation88_spill] sm:$0xff] %v14456_v40  ;;  %10016 = vmatpush3.bf16.xpose.msra.mxu1 %v6027_v21 }
 0xa3f   : > { %4473 = vadd.xlane.f32.xlu0 %v14295_v32 }
 0xa42   : > { %v9803_v34 = vpop.f32.mrb[112].mxu0 }
 0xa43   : > { %v14461_v13 = vpop.f32.mrb[113].mxu0  ;;  %4475 = vadd.xlane.f32.xlu0 %v14299_v41  ;;  %v14472_v49 = vpop.xlane.xlu0 %4927 }
 0xa44   : > { %v9804_v3 = vpop.f32.mrb[114].mxu0 }
 0xa45   : > { %v14464_v7 = vpop.f32.mrb[115].mxu0 }
 0xa47   : > { %4479 = vadd.xlane.f32.xlu0 %v14320_v58  ;;  %v14479_v41 = vpop.xlane.xlu0 %4933 }
 0xa4a   : > { %v14467_v4 = vpop.f32.mrb[116].mxu0 }
 0xa4b   : > { %v14469_v9 = vpop.f32.mrb[117].mxu0  ;;  %4481 = vadd.xlane.f32.xlu0 %v14316_v20 }
 0xa4c   : > { %v14474_v18 = vpop.f32.mrb[118].mxu0 }
 0xa4d   : > { %v14476_v32 = vpop.f32.mrb[119].mxu0 }
 0xa4f   : > { %4483 = vadd.xlane.f32.xlu0 %v14322_v62 }
 0xa52   : > { %v14481_v53 = vpop.f32.mrb[120].mxu0 }
 0xa53   : > { %v14483_v56 = vpop.f32.mrb[121].mxu0  ;;  %4485 = vadd.xlane.f32.xlu0 %v14318_v54 }
 0xa54   : > { %v14486_v58 = vpop.f32.mrb[122].mxu0 }
 0xa55   : > { %v14488_v35 = vpop.f32.mrb[123].mxu0 }
 0xa56   : > { %4477 = vadd.xlane.f32.xlu1 %v14304_v33  ;;  %v14491_v20 = vpop.xlane.xlu0 %4935 }
 0xa5a   : > { %v14493_v8 = vpop.f32.mrb[124].mxu0  ;;  %4487 = vadd.xlane.f32.xlu1 %v14336_v47  ;;  %v14496_v62 = vpop.xlane.xlu0 %4937 }
 0xa5b   : > { %v14498_v63 = vpop.f32.mrb[125].mxu0 }
 0xa5c   : > { %v14500_v21 = vpop.f32.mrb[126].mxu0  ;;  %v14502_v27 = vpop.f32.mrb[164].mxu1 }
 0xa5d   : > { %v14504_v54 = vpop.f32.mrb[127].mxu0  ;;  %v14506_v6 = vpop.f32.mrb[165].mxu1 }
 0xa5e   : > { %v14508_v40 = vpop.f32.mrb[166].mxu1  ;;  %4489 = vadd.xlane.f32.xlu1 %v14334_v1  ;;  %v5984_v33 = vpop.permute.xlu0 %5983 }
 0xa5f   : > { %v14511_v42 = vpop.f32.mrb[167].mxu1  ;;  %10263 = vmatprep.subr.msk.bf16.mxu1 %vm1850_vm0, %v5984_v33  ;;  %v6030_v47 = vsel %vm1850_vm0, %v5984_v33, 0 }
 0xa60   : > { %10018 = vmatpush3.bf16.xpose.msra.mxu1 %v6030_v47 }
 0xa62   : > { %5537 = vmax.xlane.f32.xlu1 %v14409_v43 }
 0xa69   : > { %5959 = vrot.lane.b32.xlu0 %v16578_v50, %s11664_s18 }
 0xa6d   : > { %5961 = vrot.lane.b32.xlu0 %v16579_v26, %s11664_s18  ;;  %v14520_v39 = vpop.xlane.xlu1 %4939 }
 0xa71   : > { %v4462_v48 = vpop.xlane.xlu1 %4461 }
 0xa73   : > { %5657 = vrot.lane.b32.xlu1 %v16502_v52, %s11663_s12 }
 0xa75   : > { %v4464_v1 = vpop.xlane.xlu1 %4463 }
 0xa76   : > { %10876 = vrcp.f32 %v4464_v1 }
 0xa79   : > { %v4466_v19 = vpop.xlane.xlu1 %4465 }
 0xa7a   : > { %10878 = vrcp.f32 %v4466_v19 }
 0xa7b   : > { %10880 = vrcp.f32 %v14382_v25 }
 0xa7c   : > { %10882 = vrcp.f32 %v14384_v23 }
 0xa7d   : > { %v5986_v33 = vpop.permute.xlu1 %5985  ;;  %10884 = vrcp.f32 %v14390_v55 }
 0xa7e   : > { %10264 = vmatprep.subr.msk.bf16.mxu1 %vm1850_vm0, %v5986_v33  ;;  %v6033_v47 = vsel %vm1850_vm0, %v5986_v33, 0  ;;  %10886 = vrcp.f32 %v14386_v22 }
 0xa7f   : > { %10020 = vmatpush3.bf16.xpose.msra.mxu1 %v6033_v47  ;;  %10888 = vrcp.f32 %v14395_v11 }
 0xa80   : > { %v10877_v50 = vpop.eup %10876  ;;  %10890 = vrcp.f32 %v14401_v45 }
 0xa81   : > { %v14528_v26 = vmul.f32 %v10877_v50, %v9803_v34  ;;  %10892 = vrcp.f32 %v14403_v5 }
 0xa82   : > { %10894 = vrcp.f32 %v4462_v48 }
 0xa83   : > { %10896 = vrcp.f32 %v14398_v46 }
 0xa84   : > { %v10879_v24 = vpop.eup %10878 }
 0xa85   : > { %v14530_v59 = vmul.f32 %v10879_v24, %v9804_v3  ;;  %v10881_v25 = vpop.eup %10880 }
 0xa86   : > { %v10883_v24 = vpop.eup %10882 }
 0xa87   : > { %v10885_v22 = vpop.eup %10884 }
 0xa88   : > { %v10887_v11 = vpop.eup %10886 }
 0xa89   : > { %v10889_v19 = vpop.eup %10888 }
 0xa8c   : > { %5539 = vmax.xlane.f32.xlu0 %v14418_v51 }
 0xa8e   : > { %v9867_v23 = vpop.f32.mrb[128].mxu0 }
 0xa8f   : > { %v5015_v55 = vpop.f32.mrb[129].mxu0  ;;  %v4460_v34 = vpop.xlane.xlu0 %4459  ;;  %v5096_v1 = vmul.f32 %v10883_v24, %v9867_v23 }
 0xa90   : > { %10898 = vrcp.f32 %v4460_v34  ;;  %v9868_v3 = vpop.f32.mrb[130].mxu0  ;;  %5543 = vmax.xlane.f32.xlu0 %v14413_v0  ;;  %v5094_v47 = vmul.f32 %v10881_v25, %v5015_v55  ;;  %v10891_v34 = vpop.eup %10890 }
 0xa91   : > { %v5097_v45 = vmul.f32 %v10885_v22, %v9868_v3  ;;  %v5018_v33 = vpop.f32.mrb[131].mxu0  ;;  %10900 = vrcp.f32 %v14434_v29  ;;  %v10893_v23 = vpop.eup %10892 }
 0xa92   : > { %v5095_v50 = vmul.f32 %v10887_v11, %v5018_v33  ;;  %10902 = vrcp.f32 %v14444_v15  ;;  %v10895_v15 = vpop.eup %10894 }
 0xa93   : > { %v5111_v5 = vpack.c.bf16 %v5097_v45, %v5096_v1  ;;  %v4468_v48 = vpop.xlane.xlu0 %4467  ;;  %10904 = vrcp.f32 %v14448_v17  ;;  %v10897_v17 = vpop.eup %10896  ;;  %v11263_v1 = vld [vmem:[%s12159_s6 + $0x8] sm:$0xff]  }
 0xa94   : > { %v5110_v46 = vpack.c.bf16 %v5095_v50, %v5094_v47  ;;  %10906 = vrcp.f32 %v4468_v48 }
 0xa95   : > { %10908 = vrcp.f32 %v14472_v49 }
 0xa96   : > { %v9871_v16 = vpop.f32.mrb[132].mxu0  ;;  %9885 = vmatprep.mubr.msk.bf16.mxu0 %vm1850_vm0, %v5110_v46 }
 0xa97   : > { %v5031_v25 = vpop.f32.mrb[133].mxu0  ;;  %5541 = vmax.xlane.f32.xlu1 %v14407_v31  ;;  %9886 = vmatmul.mubr.msk.bf16.vlgmr.msra.gmra.mrb[144].mxu0 %vm1850_vm0, %v5111_v5  ;;  %v4470_v29 = vpop.xlane.xlu0 %4469  ;;  %v5100_v55 = vmul.f32 %v10891_v34, %v9871_v16  ;;  %v4613_v16 = vmul.f32 %v10895_v15, %v14464_v7 }
 0xa98   : > { %10910 = vrcp.f32 %v4470_v29  ;;  %v9872_v24 = vpop.f32.mrb[134].mxu0  ;;  %9902 = vmatpush3.bf16.msra.mxu0 %v14362_v37  ;;  %v5098_v45 = vmul.f32 %v10889_v19, %v5031_v25 }
 0xa99   : > { %v5101_v22 = vmul.f32 %v10893_v23, %v9872_v24  ;;  %v5034_v3 = vpop.f32.mrb[135].mxu0  ;;  %v14550_v11 = vpop.f32.mrb[168].mxu1  ;;  %9903 = vmatprep.subr.bf16.mxu0 %v11263_v1  ;;  %10912 = vrcp.f32 %v14479_v41 }
 0xa9a   : > { %v10899_v49 = vpop.eup %10898  ;;  %v5099_v33 = vmul.f32 %v10897_v17, %v5034_v3  ;;  %v14553_v47 = vpop.f32.mrb[169].mxu1  ;;  %10914 = vrcp.f32 %v14496_v62 }
 0xa9b   : > { %v5113_v50 = vpack.c.bf16 %v5101_v22, %v5100_v55  ;;  %5545 = vmax.xlane.f32.xlu1 %v14506_v6  ;;  %v14556_v5 = vpop.f32.mrb[170].mxu1  ;;  %v5956_v48 = vpop.permute.xlu0 %5955  ;;  %v4612_v37 = vmul.f32 %v10899_v49, %v14461_v13  ;;  %10916 = vrcp.f32 %v14520_v39 }
 0xa9c   : > { %v5112_v46 = vpack.c.bf16 %v5099_v33, %v5098_v45  ;;  %v14561_v34 = vpop.f32.mrb[171].mxu1  ;;  %10021 = vmatprep.mubr.msk.bf16.mxu1 %vm1850_vm0, %v5956_v48  ;;  %9904 = vmatpush3.bf16.msra.mxu0 %v11263_v1  ;;  %v10901_v19 = vpop.eup %10900  ;;  %10918 = vrcp.f32 %v14491_v20 }
 0xa9d   : > { %v4628_v23 = vpack.c.bf16 %v4613_v16, %v4612_v37  ;;  %v10903_v25 = vpop.eup %10902 }
 0xa9e   : > { %v9875_v29 = vpop.f32.mrb[136].mxu0  ;;  %9889 = vmatprep.mubr.msk.bf16.mxu0 %vm1850_vm0, %v5112_v46  ;;  %v10905_v13 = vpop.eup %10904 }
 0xa9f   : > { %v5047_v7 = vpop.f32.mrb[137].mxu0  ;;  %9890 = vmatmul.mubr.msk.bf16.gmra.mrb[148].mxu0 %vm1850_vm0, %v5113_v50  ;;  %v10907_v41 = vpop.eup %10906  ;;  %v5104_v17 = vmul.f32 %v10903_v25, %v9875_v29 }
 0xaa0   : > { %v9876_v15 = vpop.f32.mrb[138].mxu0  ;;  %v10909_v24 = vpop.eup %10908  ;;  %v5102_v1 = vmul.f32 %v10901_v19, %v5047_v7  ;;  %v4616_v20 = vmul.f32 %v10907_v41, %v14469_v9 }
 0xaa1   : > { %v5105_v55 = vmul.f32 %v10905_v13, %v9876_v15  ;;  %v5050_v22 = vpop.f32.mrb[139].mxu0  ;;  %v14569_v62 = vpop.f32.mrb[172].mxu1 }
 0xaa2   : > { %v10911_v3 = vpop.eup %10910  ;;  %v5103_v39 = vmul.f32 %v10909_v24, %v5050_v22  ;;  %v14571_v49 = vpop.f32.mrb[173].mxu1 }
 0xaa3   : > { %v5115_v45 = vpack.c.bf16 %v5105_v55, %v5104_v17  ;;  %v14573_v33 = vpop.f32.mrb[174].mxu1  ;;  %v4617_v50 = vmul.f32 %v10911_v3, %v14476_v32  ;;  %v10913_v46 = vpop.eup %10912 }
 0xaa4   : > { %v5114_v48 = vpack.c.bf16 %v5103_v39, %v5102_v1  ;;  %v14577_v37 = vpop.f32.mrb[175].mxu1  ;;  %v10915_v19 = vpop.eup %10914  ;;  %v16580_v39 = vpack.c.bf16 %v14530_v59, %v14528_v26 }
 0xaa5   : > { %v4630_v16 = vpack.c.bf16 %v4617_v50, %v4616_v20  ;;  %v10917_v13 = vpop.eup %10916 }
 0xaa6   : > { %5659 = vrot.lane.b32.xlu0 %v16510_v14, %s11663_s12  ;;  %v9879_v25 = vpop.f32.mrb[140].mxu0  ;;  %9893 = vmatprep.mubr.msk.bf16.mxu0 %vm1850_vm0, %v5114_v48  ;;  %v10919_v9 = vpop.eup %10918 }
 0xaa7   : > { %v5063_v29 = vpop.f32.mrb[141].mxu0  ;;  %9894 = vmatmul.mubr.msk.bf16.gmra.mrb[152].mxu0 %vm1850_vm0, %v5115_v45  ;;  %v5108_v41 = vmul.f32 %v10915_v19, %v9879_v25  ;;  %v16581_v19 = vld [vmem:[#allocation37_spill] sm:$0xff] }
 0xaa8   : > { %v9880_v7 = vpop.f32.mrb[142].mxu0  ;;  %v5106_v24 = vmul.f32 %v10913_v46, %v5063_v29 }
 0xaa9   : > { %v5109_v32 = vmul.f32 %v10917_v13, %v9880_v7  ;;  %v5066_v15 = vpop.f32.mrb[143].mxu0 }
 0xaaa   : > { %v5107_v17 = vmul.f32 %v10919_v9, %v5066_v15 }
 0xaab   : > { %v5117_v55 = vpack.c.bf16 %v5109_v32, %v5108_v41 }
 0xaac   : > { %v5116_v22 = vpack.c.bf16 %v5107_v17, %v5106_v24  ;;  %5661 = vrot.lane.b32.xlu1 %v16514_v44, %s11663_s12 }
 0xaae   : > { %v4472_v3 = vpop.xlane.xlu1 %4471  ;;  %9897 = vmatprep.mubr.msk.bf16.mxu0 %vm1850_vm0, %v5116_v22 }
 0xaaf   : > { %9898 = vmatmul.mubr.msk.bf16.gmra.mrb[156].mxu0 %vm1850_vm0, %v5117_v55  ;;  %10920 = vrcp.f32 %v4472_v3 }
 0xab0   : > { %9905 = vmatprep.mubr.msk.bf16.mxu0 %vm1850_vm0, %v4628_v23 }
 0xab2   : > { %v5958_v1 = vpop.permute.xlu1 %5957 }
 0xab3   : > { %10022 = vmatmul.mubr.msk.bf16.vlgmr.msra.gmra.mrb[176].mxu1 %vm1850_vm0, %v5958_v1 }
 0xab7   : > { %9906 = vmatmul.mubr.msk.bf16.vlgmr.msra.gmra.mrb[144].mxu0 %vm1850_vm0, %v16580_v39 }
 0xab8   : > { %9909 = vmatprep.mubr.msk.bf16.mxu0 %vm1850_vm0, %v4630_v16 }
 0xab9   : > { %v10921_v50 = vpop.eup %10920 }
 0xaba   : > { %v4618_v59 = vmul.f32 %v10921_v50, %v14467_v4 }
 0xac5   : > { %5547 = vmax.xlane.f32.xlu0 %v14511_v42 }
 0xac9   : > { %5551 = vmax.xlane.f32.xlu0 %v14508_v40 }
 0xacc   : > { %v4474_v45 = vpop.xlane.xlu0 %4473 }
 0xacd   : > { %10922 = vrcp.f32 %v4474_v45 }
 0xad0   : > { %5549 = vmax.xlane.f32.xlu1 %v14502_v27  ;;  %v4476_v23 = vpop.xlane.xlu0 %4475 }
 0xad4   : > { %v4480_v20 = vpop.xlane.xlu0 %4479 }
 0xad5   : > { %10924 = vrcp.f32 %v4480_v20 }
 0xad7   : > { %v10923_v48 = vpop.eup %10922 }
 0xad8   : > { %v4482_v46 = vpop.xlane.xlu0 %4481  ;;  %v4619_v26 = vmul.f32 %v10923_v48, %v14474_v18 }
 0xad9   : > { %10926 = vrcp.f32 %v4482_v46 }
 0xada   : > { %v4631_v16 = vpack.c.bf16 %v4619_v26, %v4618_v59 }
 0xadc   : > { %9910 = vmatmul.mubr.msk.bf16.gmra.mrb[148].mxu0 %vm1850_vm0, %v4631_v16  ;;  %v4484_v25 = vpop.xlane.xlu0 %4483 }
 0xadd   : > { %10928 = vrcp.f32 %v4484_v25 }
 0xadf   : > { %5963 = vrot.lane.b32.xlu0 %v16581_v19, %s11664_s18  ;;  %v10925_v13 = vpop.eup %10924 }
 0xae0   : > { %v4486_v29 = vpop.xlane.xlu0 %4485  ;;  %v4622_v9 = vmul.f32 %v10925_v13, %v14481_v53 }
 0xae1   : > { %10930 = vrcp.f32 %v4486_v29  ;;  %5965 = vrot.lane.b32.xlu1 %v16532_v10, %s11664_s18 }
 0xae2   : > { %10932 = vrcp.f32 %v4476_v23 }
 0xae3   : > { %v10927_v7 = vpop.eup %10926  ;;  %5663 = vrot.lane.b32.xlu0 %v16516_v57, %s11663_s12  ;;  %v4478_v4 = vpop.xlane.xlu1 %4477 }
 0xae4   : > { %10934 = vrcp.f32 %v4478_v4  ;;  %v5960_v18 = vpop.permute.xlu0 %5959  ;;  %v4623_v41 = vmul.f32 %v10927_v7, %v14486_v58 }
 0xae5   : > { %10025 = vmatprep.mubr.msk.bf16.mxu1 %vm1850_vm0, %v5960_v18 }
 0xae6   : > { %v4633_v32 = vpack.c.bf16 %v4623_v41, %v4622_v9 }
 0xae7   : > { %v4488_v15 = vpop.xlane.xlu1 %4487  ;;  %v10929_v17 = vpop.eup %10928 }
 0xae8   : > { %v5962_v24 = vpop.permute.xlu0 %5961  ;;  %10936 = vrcp.f32 %v4488_v15  ;;  %v4624_v3 = vmul.f32 %v10929_v17, %v14498_v63  ;;  %v16582_v15 = vld [vmem:[#allocation42_spill] sm:$0xff] }
 0xae9   : > { %10026 = vmatmul.mubr.msk.bf16.gmra.mrb[180].mxu1 %vm1850_vm0, %v5962_v24  ;;  %v16583_v17 = vld [vmem:[#allocation46_spill] sm:$0xff] }
 0xaeb   : > { %v10931_v10 = vpop.eup %10930  ;;  %v4490_v55 = vpop.xlane.xlu1 %4489 }
 0xaec   : > { %v10933_v22 = vpop.eup %10932  ;;  %10938 = vrcp.f32 %v4490_v55  ;;  %v4625_v1 = vmul.f32 %v10931_v10, %v14504_v54 }
 0xaed   : > { %v4620_v45 = vmul.f32 %v10933_v22, %v14483_v56 }
 0xaee   : > { %v10935_v53 = vpop.eup %10934  ;;  %v4634_v39 = vpack.c.bf16 %v4625_v1, %v4624_v3 }
 0xaef   : > { %v5538_v58 = vpop.xlane.xlu1 %5537  ;;  %v4621_v23 = vmul.f32 %v10935_v53, %v14488_v35 }
 0xaf0   : > { %v5569_v56 = vsub.f32 %v14409_v43, %v5538_v58 }
 0xaf1   : > { %v4632_v20 = vpack.c.bf16 %v4621_v23, %v4620_v45 }
 0xaf2   : > { %v10937_v48 = vpop.eup %10936  ;;  %v5585_v35 = vmul.f32 1.442695, %v5569_v56 }
 0xaf3   : > { %v5658_v50 = vpop.permute.xlu1 %5657  ;;  %9913 = vmatprep.mubr.msk.bf16.mxu0 %vm1850_vm0, %v4632_v20  ;;  %v4626_v54 = vmul.f32 %v10937_v48, %v14493_v8 }
 0xaf4   : > { %9914 = vmatmul.mubr.msk.bf16.gmra.mrb[152].mxu0 %vm1850_vm0, %v4633_v32  ;;  %9953 = vmatprep.subr.bf16.mxu0 %v5658_v50  ;;  %10940 = vpow2.f32 %v5585_v35 }
 0xaf5   : > { %9917 = vmatprep.mubr.msk.bf16.mxu0 %vm1850_vm0, %v4634_v39  ;;  %9954 = vmatpush3.bf16.msra.mxu0 %v5658_v50 }
 0xaf6   : > { %v10939_v63 = vpop.eup %10938 }
 0xaf7   : > { %v4627_v46 = vmul.f32 %v10939_v63, %v14500_v21 }
 0xaf9   : > { %v4635_v59 = vpack.c.bf16 %v4627_v46, %v4626_v54 }
 0xafc   : > { %9918 = vmatmul.mubr.msk.bf16.gmra.mrb[156].mxu0 %vm1850_vm0, %v4635_v59 }
 0xafe   : > { %v10941_v19 = vpop.eup %10940 }
 0xb02   : > { %5553 = vmax.xlane.f32.xlu0 %v14553_v47 }
 0xb05   : > { %5555 = vmax.xlane.f32.xlu1 %v14561_v34 }
 0xb09   : > { %5557 = vmax.xlane.f32.xlu1 %v14550_v11 }
 0xb0d   : > { %5559 = vmax.xlane.f32.xlu1 %v14556_v5 }
 0xb11   : > { %5561 = vmax.xlane.f32.xlu1 %v14571_v49 }
 0xb18   : > { %5665 = vrot.lane.b32.xlu0 %v16518_v30, %s11663_s12 }
 0xb19   : > { %v5540_v8 = vpop.xlane.xlu0 %5539 }
 0xb1a   : > { %v5570_v21 = vsub.f32 %v14418_v51, %v5540_v8 }
 0xb1c   : > { %v5587_v26 = vmul.f32 1.442695, %v5570_v21  ;;  %5667 = vrot.lane.b32.xlu0 %v16520_v28, %s11663_s12 }
 0xb1d   : > { %v5544_v16 = vpop.xlane.xlu0 %5543 }
 0xb1e   : > { %10942 = vpow2.f32 %v5587_v26  ;;  %v5572_v20 = vsub.f32 %v14413_v0, %v5544_v16 }
 0xb20   : > { %v5591_v63 = vmul.f32 1.442695, %v5572_v20 }
 0xb21   : > { %v5660_v25 = vpop.permute.xlu0 %5659 }
 0xb22   : > { %5669 = vrot.lane.b32.xlu1 %v16522_v36, %s11663_s12  ;;  %9955 = vmatprep.subr.bf16.mxu0 %v5660_v25 }
 0xb23   : > { %9956 = vmatpush3.bf16.msra.mxu0 %v5660_v25 }
 0xb24   : > { %v5542_v43 = vpop.xlane.xlu1 %5541 }
 0xb25   : > { %v5571_v45 = vsub.f32 %v14407_v31, %v5542_v43 }
 0xb27   : > { %v5589_v50 = vmul.f32 1.442695, %v5571_v45 }
 0xb28   : > { %v10943_v29 = vpop.eup %10942  ;;  %v5546_v13 = vpop.xlane.xlu1 %5545 }
 0xb29   : > { %v5649_v7 = vpack.c.bf16 %v10943_v29, %v10941_v19  ;;  %v5573_v4 = vsub.f32 %v14506_v6, %v5546_v13 }
 0xb2b   : > { %9969 = vmatprep.mubr.bf16.mxu0 %v5649_v7  ;;  %v5593_v18 = vmul.f32 1.442695, %v5573_v4 }
 0xb2c   : > { %v5662_v51 = vpop.permute.xlu1 %5661 }
 0xb2d   : > { %9957 = vmatprep.subr.bf16.mxu0 %v5662_v51  ;;  %10944 = vpow2.f32 %v5593_v18 }
 0xb2e   : > { %9958 = vmatpush3.bf16.msra.mxu0 %v5662_v51 }
 0xb37   : > { %v14647_v1 = vpop.eup %10944 }
 0xb3b   : > { %5563 = vmax.xlane.f32.xlu0 %v14577_v37 }
 0xb3f   : > { %5567 = vmax.xlane.f32.xlu0 %v14573_v33 }
 0xb46   : > { %5565 = vmax.xlane.f32.xlu1 %v14569_v62 }
 0xb52   : > { %v5548_v9 = vpop.xlane.xlu0 %5547 }
 0xb53   : > { %v5574_v41 = vsub.f32 %v14511_v42, %v5548_v9 }
 0xb55   : > { %v5595_v32 = vmul.f32 1.442695, %v5574_v41  ;;  %5967 = vrot.lane.b32.xlu0 %v16582_v15, %s11664_s18 }
 0xb56   : > { %v5552_v24 = vpop.xlane.xlu0 %5551 }
 0xb57   : > { %10946 = vpow2.f32 %v5595_v32  ;;  %5969 = vrot.lane.b32.xlu1 %v16583_v17, %s11664_s18  ;;  %v5576_v10 = vsub.f32 %v14508_v40, %v5552_v24 }
 0xb59   : > { %5671 = vrot.lane.b32.xlu0 %v16524_v2, %s11663_s12  ;;  %v5599_v55 = vmul.f32 1.442695, %v5576_v10 }
 0xb5a   : > { %v5964_v6 = vpop.permute.xlu0 %5963 }
 0xb5b   : > { %10029 = vmatprep.mubr.msk.bf16.mxu1 %vm1850_vm0, %v5964_v6  ;;  %10948 = vpow2.f32 %v5599_v55 }
 0xb5d   : > { %v5550_v42 = vpop.xlane.xlu1 %5549 }
 0xb5e   : > { %v5575_v22 = vsub.f32 %v14502_v27, %v5550_v42  ;;  %v5664_v3 = vpop.permute.xlu0 %5663 }
 0xb5f   : > { %9959 = vmatprep.subr.bf16.mxu0 %v5664_v3 }
 0xb60   : > { %v5597_v53 = vmul.f32 1.442695, %v5575_v22  ;;  %9960 = vmatpush3.bf16.msra.mxu0 %v5664_v3 }
 0xb61   : > { %v14649_v39 = vpop.eup %10946  ;;  %v5966_v40 = vpop.permute.xlu1 %5965 }
 0xb62   : > { %10950 = vpow2.f32 %v5597_v53  ;;  %10030 = vmatmul.mubr.msk.bf16.gmra.mrb[184].mxu1 %vm1850_vm0, %v5966_v40  ;;  %v5651_v58 = vpack.c.bf16 %v14649_v39, %v14647_v1 }
 0xb63   : > { %10952 = vpow2.f32 %v5589_v50 }
 0xb64   : > { %10954 = vpow2.f32 %v5591_v63 }
 0xb65   : > { %v14655_v23 = vpop.eup %10948 }
 0xb6c   : > { %v14657_v27 = vpop.eup %10950 }
 0xb6d   : > { %v5652_v48 = vpack.c.bf16 %v14655_v23, %v14657_v27  ;;  %v14662_v54 = vpop.eup %10952 }
 0xb6e   : > { %v14665_v31 = vpop.eup %10954 }
 0xb78   : > { %5617 = vadd.xlane.f32.xlu0 %v10941_v19 }
 0xb7b   : > { %5619 = vadd.xlane.f32.xlu1 %v10943_v29 }
 0xb7c   : > { %5621 = vadd.xlane.f32.xlu0 %v14662_v54 }
 0xb7f   : > { %5631 = vadd.xlane.f32.xlu1 %v14655_v23 }
 0xb80   : > { %5623 = vadd.xlane.f32.xlu0 %v14665_v31 }
 0xb84   : > { %5625 = vadd.xlane.f32.xlu0 %v14647_v1 }
 0xb86   : > { %v14670_v0 = vpop.f32.mrb[176].mxu1 }
 0xb87   : > { %v14672_v46 = vpop.f32.mrb[177].mxu1 }
 0xb88   : > { %v14674_v59 = vpop.f32.mrb[178].mxu1  ;;  %5627 = vadd.xlane.f32.xlu0 %v14649_v39 }
 0xb89   : > { %v14677_v56 = vpop.f32.mrb[179].mxu1 }
 0xb8c   : > { %5629 = vadd.xlane.f32.xlu0 %v14657_v27 }
 0xb8f   : > { %v5554_v35 = vpop.xlane.xlu0 %5553 }
 0xb90   : > { %v5577_v8 = vsub.f32 %v14553_v47, %v5554_v35 }
 0xb92   : > { %v5601_v21 = vmul.f32 1.442695, %v5577_v8  ;;  %v5556_v26 = vpop.xlane.xlu1 %5555 }
 0xb93   : > { %v5578_v16 = vsub.f32 %v14561_v34, %v5556_v26  ;;  %v5666_v25 = vpop.permute.xlu0 %5665 }
 0xb94   : > { %10956 = vpow2.f32 %v5601_v21  ;;  %9961 = vmatprep.subr.bf16.mxu0 %v5666_v25 }
 0xb95   : > { %v5603_v43 = vmul.f32 1.442695, %v5578_v16  ;;  %9962 = vmatpush3.bf16.msra.mxu0 %v5666_v25  ;;  %v5650_v16 = vpack.c.bf16 %v14665_v31, %v14662_v54  ;;  %v11264_v25 = vld [vmem:[%s12159_s6 + $0x20] sm:$0xff]  }
 0xb96   : > { %v5558_v19 = vpop.xlane.xlu1 %5557 }
 0xb97   : > { %10958 = vpow2.f32 %v5603_v43  ;;  %v5579_v29 = vsub.f32 %v14550_v11, %v5558_v19  ;;  %v5668_v13 = vpop.permute.xlu0 %5667  ;;  %v16584_v43 = vmov 0   ;;  %v11265_v19 = vld [vmem:[%s12159_s6 + $0x28] sm:$0xff]  }
 0xb98   : > { %9963 = vmatprep.subr.bf16.mxu0 %v5668_v13 }
 0xb99   : > { %v5605_v7 = vmul.f32 1.442695, %v5579_v29  ;;  %9964 = vmatpush3.bf16.msra.mxu0 %v5668_v13 }
 0xb9a   : > { %v5560_v51 = vpop.xlane.xlu1 %5559 }
 0xb9b   : > { %10960 = vpow2.f32 %v5605_v7  ;;  %v5580_v47 = vsub.f32 %v14556_v5, %v5560_v51 }
 0xb9d   : > { %v5607_v4 = vmul.f32 1.442695, %v5580_v47 }
 0xb9e   : > { %v10957_v18 = vpop.eup %10956  ;;  %v5562_v34 = vpop.xlane.xlu1 %5561 }
 0xb9f   : > { %10962 = vpow2.f32 %v5607_v4  ;;  %v5581_v9 = vsub.f32 %v14571_v49, %v5562_v34  ;;  %5633 = vadd.xlane.f32.xlu0 %v10957_v18 }
 0xba1   : > { %v10959_v41 = vpop.eup %10958  ;;  %v5609_v32 = vmul.f32 1.442695, %v5581_v9 }
 0xba2   : > { %v5670_v15 = vpop.permute.xlu1 %5669  ;;  %5635 = vadd.xlane.f32.xlu1 %v10959_v41  ;;  %v5653_v11 = vpack.c.bf16 %v10959_v41, %v10957_v18 }
 0xba3   : > { %10964 = vpow2.f32 %v5609_v32  ;;  %9965 = vmatprep.subr.bf16.mxu0 %v5670_v15 }
 0xba4   : > { %9966 = vmatpush3.bf16.msra.mxu0 %v5670_v15 }
 0xba5   : > { %v10961_v24 = vpop.eup %10960 }
 0xba6   : > { %5637 = vadd.xlane.f32.xlu0 %v10961_v24 }
 0xba9   : > { %v10963_v17 = vpop.eup %10962 }
 0xbaa   : > { %5639 = vadd.xlane.f32.xlu1 %v10963_v17  ;;  %v5654_v5 = vpack.c.bf16 %v10963_v17, %v10961_v24 }
 0xbad   : > { %v10965_v10 = vpop.eup %10964 }
 0xbae   : > { %5641 = vadd.xlane.f32.xlu0 %v10965_v10 }
 0xbbc   : > { %v14685_v6 = vpop.f32.mrb[180].mxu1 }
 0xbbd   : > { %v14687_v55 = vpop.f32.mrb[181].mxu1 }
 0xbbe   : > { %v14689_v49 = vpop.f32.mrb[182].mxu1 }
 0xbbf   : > { %v14691_v42 = vpop.f32.mrb[183].mxu1 }
 0xbc8   : > { %v5564_v22 = vpop.xlane.xlu0 %5563 }
 0xbc9   : > { %v5582_v3 = vsub.f32 %v14577_v37, %v5564_v22 }
 0xbcb   : > { %v5611_v53 = vmul.f32 1.442695, %v5582_v3 }
 0xbcc   : > { %v5568_v40 = vpop.xlane.xlu0 %5567 }
 0xbcd   : > { %10966 = vpow2.f32 %v5611_v53  ;;  %v5584_v45 = vsub.f32 %v14573_v33, %v5568_v40 }
 0xbcf   : > { %v5615_v20 = vmul.f32 1.442695, %v5584_v45 }
 0xbd0   : > { %v5968_v50 = vpop.permute.xlu0 %5967 }
 0xbd1   : > { %10968 = vpow2.f32 %v5615_v20  ;;  %10033 = vmatprep.mubr.msk.bf16.mxu1 %vm1850_vm0, %v5968_v50 }
 0xbd3   : > { %v5566_v63 = vpop.xlane.xlu1 %5565 }
 0xbd4   : > { %v5583_v35 = vsub.f32 %v14569_v62, %v5566_v63  ;;  %v5672_v8 = vpop.permute.xlu0 %5671 }
 0xbd5   : > { %9967 = vmatprep.subr.bf16.mxu0 %v5672_v8 }
 0xbd6   : > { %v5613_v21 = vmul.f32 1.442695, %v5583_v35  ;;  %9968 = vmatpush3.bf16.msra.mxu0 %v5672_v8 }
 0xbd7   : > { %v10967_v37 = vpop.eup %10966  ;;  %v5970_v26 = vpop.permute.xlu1 %5969  ;;  %9985 = vmatprep.subr.bf16.mxu0 %v11264_v25 }
 0xbd8   : > { %10970 = vpow2.f32 %v5613_v21  ;;  %5643 = vadd.xlane.f32.xlu1 %v10967_v37  ;;  %10034 = vmatmul.mubr.msk.bf16.gmra.mrb[188].mxu1 %vm1850_vm0, %v5970_v26  ;;  %v5655_v33 = vpack.c.bf16 %v10967_v37, %v10965_v10 }
 0xbd9   : > { %9970 = vmatmul.mubr.bf16.vlgmr.msra.gmra.mrb[160].mxu0 %v5650_v16  ;;  %7207 = vmatprep.mubr.bf16.mxu1 %v16584_v43 }
 0xbda   : > { %9973 = vmatprep.mubr.bf16.mxu0 %v5651_v58  ;;  %9986 = vmatpush3.bf16.msra.mxu0 %v11264_v25 }
 0xbdb   : > { %v10969_v62 = vpop.eup %10968  ;;  %9987 = vmatprep.subr.bf16.mxu0 %v11265_v19 }
 0xbdc   : > { %5647 = vadd.xlane.f32.xlu1 %v10969_v62 }
 0xbde   : > { %9988 = vmatpush3.bf16.msra.mxu0 %v11265_v19 }
 0xbe0   : > { %6134 = vmax.xlane.f32.xlu1 %v14677_v56 }
 0xbe1   : > { %9974 = vmatmul.mubr.bf16.gmra.mrb[164].mxu0 %v5652_v48 }
 0xbe2   : > { %v10971_v54 = vpop.eup %10970  ;;  %9977 = vmatprep.mubr.bf16.mxu0 %v5653_v11 }
 0xbe3   : > { %5645 = vadd.xlane.f32.xlu0 %v10971_v54  ;;  %v5656_v31 = vpack.c.bf16 %v10969_v62, %v10971_v54 }
 0xbe4   : > { %6136 = vmax.xlane.f32.xlu1 %v14670_v0 }
 0xbe7   : > { %6132 = vmax.xlane.f32.xlu0 %v14672_v46 }
 0xbe8   : > { %6138 = vmax.xlane.f32.xlu1 %v14674_v59 }
 0xbe9   : > { %9978 = vmatmul.mubr.bf16.gmra.mrb[168].mxu0 %v5654_v5 }
 0xbea   : > { %9981 = vmatprep.mubr.bf16.mxu0 %v5655_v33 }
 0xbf1   : > { %9982 = vmatmul.mubr.bf16.gmra.mrb[172].mxu0 %v5656_v31 }
 0xbf9   : > { %6254 = vrot.lane.b32.xlu1 %v16510_v14, %s11664_s18 }
 0xbfd   : > { %6252 = vrot.lane.b32.xlu0 %v16502_v52, %s11664_s18  ;;  %6258 = vrot.lane.b32.xlu1 %v16516_v57, %s11664_s18 }
 0xc01   : > { %6256 = vrot.lane.b32.xlu0 %v16514_v44, %s11664_s18 }
 0xc05   : > { %v5618_v44 = vpop.xlane.xlu0 %5617 }
 0xc08   : > { %v5620_v23 = vpop.xlane.xlu1 %5619 }
 0xc09   : > { %v5622_v39 = vpop.xlane.xlu0 %5621 }
 0xc0c   : > { %v5632_v48 = vpop.xlane.xlu1 %5631 }
 0xc0d   : > { %v5624_v58 = vpop.xlane.xlu0 %5623 }
 0xc11   : > { %v5626_v27 = vpop.xlane.xlu0 %5625 }
 0xc20   : > { %6140 = vmax.xlane.f32.xlu0 %v14687_v55 }
 0xc21   : > { %6142 = vmax.xlane.f32.xlu1 %v14691_v42 }
 0xc25   : > { %6144 = vmax.xlane.f32.xlu1 %v14685_v6 }
 0xc29   : > { %6146 = vmax.xlane.f32.xlu1 %v14689_v49 }
 0xc2f   : > { %v14741_v29 = vpop.xlane.xlu1 %5635 }
 0xc35   : > { %v14725_v1 = vpop.f32.mrb[184].mxu1 }
 0xc36   : > { %v14727_v14 = vpop.f32.mrb[185].mxu1  ;;  %6260 = vrot.lane.b32.xlu0 %v16518_v30, %s11664_s18  ;;  %v5628_v30 = vpop.xlane.xlu0 %5627 }
 0xc37   : > { %v14731_v52 = vpop.f32.mrb[186].mxu1  ;;  %v14745_v13 = vpop.xlane.xlu1 %5639 }
 0xc38   : > { %v14733_v57 = vpop.f32.mrb[187].mxu1 }
 0xc3a   : > { %6264 = vrot.lane.b32.xlu0 %v16522_v36, %s11664_s18  ;;  %6262 = vrot.lane.b32.xlu1 %v16520_v28, %s11664_s18  ;;  %v5630_v36 = vpop.xlane.xlu0 %5629 }
 0xc3e   : > { %6266 = vrot.lane.b32.xlu0 %v16524_v2, %s11664_s18  ;;  %v5634_v28 = vpop.xlane.xlu0 %5633 }
 0xc42   : > { %v5638_v7 = vpop.xlane.xlu0 %5637 }
 0xc46   : > { %v14753_v47 = vpop.xlane.xlu0 %5641 }
 0xc5d   : > { %6148 = vmax.xlane.f32.xlu0 %v14727_v14 }
 0xc5e   : > { %6150 = vmax.xlane.f32.xlu1 %v14733_v57 }
 0xc61   : > { %6152 = vmax.xlane.f32.xlu0 %v14725_v1 }
 0xc65   : > { %6154 = vmax.xlane.f32.xlu0 %v14731_v52  ;;  %v14749_v2 = vpop.xlane.xlu1 %5643 }
 0xc69   : > { %v14751_v51 = vpop.xlane.xlu1 %5647 }
 0xc6d   : > { %v6135_v4 = vpop.xlane.xlu1 %6134 }
 0xc6e   : > { %v6165_v18 = vsub.f32 %v14677_v56, %v6135_v4 }
 0xc70   : > { %v14756_v34 = vpop.xlane.xlu0 %5645  ;;  %v6182_v32 = vmul.f32 1.442695, %v6165_v18 }
 0xc71   : > { %v6137_v9 = vpop.xlane.xlu1 %6136 }
 0xc72   : > { %v6166_v41 = vsub.f32 %v14670_v0, %v6137_v9  ;;  %10972 = vpow2.f32 %v6182_v32 }
 0xc74   : > { %v6184_v15 = vmul.f32 1.442695, %v6166_v41  ;;  %v6133_v11 = vpop.xlane.xlu0 %6132 }
 0xc75   : > { %v6164_v24 = vsub.f32 %v14672_v46, %v6133_v11  ;;  %v6139_v17 = vpop.xlane.xlu1 %6138 }
 0xc76   : > { %v6167_v5 = vsub.f32 %v14674_v59, %v6139_v17  ;;  %10974 = vpow2.f32 %v6184_v15 }
 0xc77   : > { %v6180_v10 = vmul.f32 1.442695, %v6164_v24 }
 0xc78   : > { %v6186_v22 = vmul.f32 1.442695, %v6167_v5  ;;  %v14761_v3 = vpop.permute.xlu0 %6252 }
 0xc79   : > { %10976 = vpow2.f32 %v6180_v10  ;;  %10037 = vmatprep.subr.bf16.mxu0 %v14761_v3  ;;  %v14776_v45 = vpop.permute.xlu1 %6254 }
 0xc7a   : > { %10978 = vpow2.f32 %v6186_v22 }
 0xc7b   : > { %10980 = vrcp.f32 %v5618_v44 }
 0xc7c   : > { %v14764_v56 = vpop.eup %10972  ;;  %10982 = vrcp.f32 %v5622_v39  ;;  %v14778_v20 = vpop.permute.xlu0 %6256 }
 0xc7d   : > { %10984 = vrcp.f32 %v5624_v58  ;;  %v14780_v50 = vpop.permute.xlu1 %6258 }
 0xc7e   : > { %10986 = vrcp.f32 %v5620_v23 }
 0xc7f   : > { %10988 = vrcp.f32 %v5632_v48 }
 0xc80   : > { %v14766_v0 = vpop.eup %10974  ;;  %10990 = vrcp.f32 %v5626_v27 }
 0xc81   : > { %10992 = vrcp.f32 %v5630_v36 }
 0xc82   : > { %10994 = vrcp.f32 %v5628_v30 }
 0xc83   : > { %v14768_v53 = vpop.eup %10976  ;;  %10996 = vrcp.f32 %v5634_v28 }
 0xc84   : > { %v14770_v46 = vpop.eup %10978  ;;  %v6244_v59 = vpack.c.bf16 %v14764_v56, %v14768_v53  ;;  %10998 = vrcp.f32 %v5638_v7 }
 0xc85   : > { %v6245_v40 = vpack.c.bf16 %v14770_v46, %v14766_v0  ;;  %v10981_v21 = vpop.eup %10980  ;;  %11000 = vrcp.f32 %v14745_v13 }
 0xc86   : > { %v10983_v16 = vpop.eup %10982 }
 0xc87   : > { %v10985_v62 = vpop.eup %10984 }
 0xc88   : > { %v10987_v39 = vpop.eup %10986 }
 0xc89   : > { %v10989_v9 = vpop.eup %10988 }
 0xc8a   : > { %v10991_v13 = vpop.eup %10990 }
 0xc8b   : > { %v10993_v11 = vpop.eup %10992 }
 0xc8c   : > { %v10995_v17 = vpop.eup %10994 }
 0xc8d   : > { %v10997_v22 = vpop.eup %10996 }
 0xcab   : > { %v14782_v63 = vpop.f32.mrb[188].mxu1 }
 0xcac   : > { %v9971_v35 = vpop.f32.mrb[160].mxu0  ;;  %v14784_v8 = vpop.f32.mrb[189].mxu1 }
 0xcad   : > { %6156 = vmax.xlane.f32.xlu0 %v14784_v8  ;;  %v5715_v37 = vpop.f32.mrb[161].mxu0  ;;  %v14787_v26 = vpop.f32.mrb[190].mxu1  ;;  %v5796_v58 = vmul.f32 %v10983_v16, %v9971_v35 }
 0xcae   : > { %v6141_v25 = vpop.xlane.xlu0 %6140  ;;  %v6143_v33 = vpop.xlane.xlu1 %6142  ;;  %v5794_v48 = vmul.f32 %v10981_v21, %v5715_v37 }
 0xcaf   : > { %v6168_v19 = vsub.f32 %v14687_v55, %v6141_v25  ;;  %v6169_v54 = vsub.f32 %v14691_v42, %v6143_v33  ;;  %v9972_v31 = vpop.f32.mrb[162].mxu0  ;;  %v14791_v44 = vpop.f32.mrb[191].mxu1 }
 0xcb0   : > { %v5797_v23 = vmul.f32 %v10985_v62, %v9972_v31  ;;  %6158 = vmax.xlane.f32.xlu1 %v14791_v44  ;;  %v5718_v27 = vpop.f32.mrb[163].mxu0 }
 0xcb1   : > { %v6188_v30 = vmul.f32 1.442695, %v6168_v19  ;;  %v6190_v36 = vmul.f32 1.442695, %v6169_v54  ;;  %v5795_v4 = vmul.f32 %v10987_v39, %v5718_v27  ;;  %6160 = vmax.xlane.f32.xlu0 %v14782_v63 }
 0xcb2   : > { %v5811_v55 = vpack.c.bf16 %v5797_v23, %v5796_v58  ;;  %v6145_v42 = vpop.xlane.xlu1 %6144 }
 0xcb3   : > { %11002 = vpow2.f32 %v6188_v30  ;;  %v5810_v28 = vpack.c.bf16 %v5795_v4, %v5794_v48  ;;  %v6170_v18 = vsub.f32 %v14685_v6, %v6145_v42 }
 0xcb4   : > { %11004 = vpow2.f32 %v6190_v36  ;;  %6162 = vmax.xlane.f32.xlu1 %v14787_v26  ;;  %v9975_v7 = vpop.f32.mrb[164].mxu0  ;;  %v6261_v36 = vpop.permute.xlu0 %6260 }
 0xcb5   : > { %11006 = vrcp.f32 %v14741_v29  ;;  %v6192_v41 = vmul.f32 1.442695, %v6170_v18  ;;  %9989 = vmatprep.mubr.msk.bf16.mxu0 %vm1850_vm0, %v5810_v28  ;;  %v5731_v32 = vpop.f32.mrb[165].mxu0  ;;  %6212 = vadd.xlane.f32.xlu0 %v14768_v53  ;;  %v5800_v5 = vmul.f32 %v10993_v11, %v9975_v7 }
 0xcb6   : > { %9990 = vmatmul.mubr.msk.bf16.vlgmr.msra.gmra.mrb[144].mxu0 %vm1850_vm0, %v5811_v55  ;;  %v6147_v15 = vpop.xlane.xlu1 %6146  ;;  %v9976_v24 = vpop.f32.mrb[166].mxu0  ;;  %v5798_v35 = vmul.f32 %v10991_v13, %v5731_v32 }
 0xcb7   : > { %11008 = vpow2.f32 %v6192_v41  ;;  %10038 = vmatpush3.bf16.msra.mxu0 %v14761_v3  ;;  %v6171_v6 = vsub.f32 %v14689_v49, %v6147_v15  ;;  %v5801_v29 = vmul.f32 %v10989_v9, %v9976_v24  ;;  %v5734_v10 = vpop.f32.mrb[167].mxu0  ;;  %v10999_v3 = vpop.eup %10998 }
 0xcb8   : > { %10039 = vmatprep.subr.bf16.mxu0 %v14776_v45  ;;  %6214 = vadd.xlane.f32.xlu1 %v14764_v56  ;;  %11010 = vrcp.f32 %v14753_v47  ;;  %v5799_v37 = vmul.f32 %v10995_v17, %v5734_v10  ;;  %v11001_v25 = vpop.eup %11000  ;;  %v11267_v10 = vld [vmem:[%s12159_s6 + $0x38] sm:$0xff]  }
 0xcb9   : > { %v6194_v21 = vmul.f32 1.442695, %v6171_v6  ;;  %6216 = vadd.xlane.f32.xlu0 %v14766_v0  ;;  %11012 = vrcp.f32 %v14751_v51  ;;  %v5813_v49 = vpack.c.bf16 %v5801_v29, %v5800_v5  ;;  %v6265_v6 = vpop.permute.xlu0 %6264  ;;  %v11266_v29 = vld [vmem:[%s12159_s6 + $0x30] sm:$0xff]  }
 0xcba   : > { %v5812_v16 = vpack.c.bf16 %v5799_v37, %v5798_v35  ;;  %v6263_v41 = vpop.permute.xlu1 %6262 }
 0xcbb   : > { %11014 = vpow2.f32 %v6194_v21  ;;  %10040 = vmatpush3.bf16.msra.mxu0 %v14776_v45 }
 0xcbc   : > { %11016 = vrcp.f32 %v14756_v34  ;;  %10041 = vmatprep.subr.bf16.mxu0 %v14778_v20  ;;  %6218 = vadd.xlane.f32.xlu1 %v14770_v46  ;;  %v9979_v47 = vpop.f32.mrb[168].mxu0 }
 0xcbd   : > { %v11003_v33 = vpop.eup %11002  ;;  %11018 = vrcp.f32 %v14749_v2  ;;  %9993 = vmatprep.mubr.msk.bf16.mxu0 %vm1850_vm0, %v5812_v16  ;;  %v5747_v62 = vpop.f32.mrb[169].mxu0  ;;  %v5804_v54 = vmul.f32 %v10999_v3, %v9979_v47 }
 0xcbe   : > { %v11005_v51 = vpop.eup %11004  ;;  %9994 = vmatmul.mubr.msk.bf16.gmra.mrb[148].mxu0 %vm1850_vm0, %v5813_v49  ;;  %6220 = vadd.xlane.f32.xlu0 %v11003_v33  ;;  %v9980_v19 = vpop.f32.mrb[170].mxu0  ;;  %v5802_v58 = vmul.f32 %v10997_v22, %v5747_v62 }
 0xcbf   : > { %v11007_v45 = vpop.eup %11006  ;;  %10042 = vmatpush3.bf16.msra.mxu0 %v14778_v20  ;;  %v5805_v34 = vmul.f32 %v11001_v25, %v9980_v19  ;;  %v5750_v31 = vpop.f32.mrb[171].mxu0  ;;  %v6246_v39 = vpack.c.bf16 %v11005_v51, %v11003_v33 }
 0xcc0   : > { %10043 = vmatprep.subr.bf16.mxu0 %v14780_v50  ;;  %6222 = vadd.xlane.f32.xlu1 %v11005_v51  ;;  %v5803_v2 = vmul.f32 %v11007_v45, %v5750_v31  ;;  %v6267_v5 = vpop.permute.xlu0 %6266 }
 0xcc1   : > { %v11009_v23 = vpop.eup %11008  ;;  %v5815_v27 = vpack.c.bf16 %v5805_v34, %v5804_v54 }
 0xcc2   : > { %v5814_v48 = vpack.c.bf16 %v5803_v2, %v5802_v58  ;;  %6224 = vadd.xlane.f32.xlu0 %v11009_v23  ;;  %v11011_v30 = vpop.eup %11010 }
 0xcc3   : > { %10044 = vmatpush3.bf16.msra.mxu0 %v14780_v50  ;;  %v11013_v4 = vpop.eup %11012 }
 0xcc4   : > { %10045 = vmatprep.subr.bf16.mxu0 %v6261_v36  ;;  %v9983_v55 = vpop.f32.mrb[172].mxu0  ;;  %9997 = vmatprep.mubr.msk.bf16.mxu0 %vm1850_vm0, %v5814_v48 }
 0xcc5   : > { %v11015_v20 = vpop.eup %11014  ;;  %v5763_v42 = vpop.f32.mrb[173].mxu0 }
 0xcc6   : > { %v11017_v28 = vpop.eup %11016  ;;  %9998 = vmatmul.mubr.msk.bf16.gmra.mrb[152].mxu0 %vm1850_vm0, %v5815_v27  ;;  %6226 = vadd.xlane.f32.xlu1 %v11015_v20  ;;  %v9984_v18 = vpop.f32.mrb[174].mxu0  ;;  %v6247_v7 = vpack.c.bf16 %v11015_v20, %v11009_v23  ;;  %v5806_v50 = vmul.f32 %v11011_v30, %v5763_v42  ;;  %v11268_v27 = vld [vmem:[#allocation2] sm:$0xff] }
 0xcc7   : > { %v11019_v9 = vpop.eup %11018  ;;  %v5808_v32 = vmul.f32 %v11017_v28, %v9983_v55  ;;  %10046 = vmatpush3.bf16.msra.mxu0 %v6261_v36  ;;  %v5809_v13 = vmul.f32 %v11013_v4, %v9984_v18  ;;  %v5766_v15 = vpop.f32.mrb[175].mxu0  ;;  %v11270_v55 = vld [vmem:[#allocation2 + $0x10] sm:$0xff]  ;;  %v11271_v28 = vld [vmem:[#allocation2 + $0x18] sm:$0xff] }
 0xcc8   : > { %10047 = vmatprep.subr.bf16.mxu0 %v6263_v41  ;;  %v5807_v11 = vmul.f32 %v11019_v9, %v5766_v15  ;;  %v6552_v20 = vadd.f32 %v11270_v55, %v14416_v12  ;;  %v6553_v18 = vadd.f32 %v11271_v28, %v14422_v38  ;;  %v11272_v9 = vld [vmem:[#allocation2 + $0x20] sm:$0xff]  ;;  %v16587_v15 = vld [vmem:[#allocation99_spill] sm:$0xff] }
 0xcc9   : > { %v5817_v24 = vpack.c.bf16 %v5809_v13, %v5808_v32  ;;  %v11273_v13 = vld [vmem:[#allocation2 + $0x28] sm:$0xff] }
 0xcca   : > { %v5816_v17 = vpack.c.bf16 %v5807_v11, %v5806_v50  ;;  %v6555_v38 = vadd.f32 %v11273_v13, %v16587_v15  ;;  %v11274_v50 = vld [vmem:[#allocation2 + $0x30] sm:$0xff] }
 0xccb   : > { %10048 = vmatpush3.bf16.msra.mxu0 %v6263_v41  ;;  %v16586_v41 = vld [vmem:[#allocation106_spill] sm:$0xff] }
 0xccc   : > { %10049 = vmatprep.subr.bf16.mxu0 %v6265_v6  ;;  %10001 = vmatprep.mubr.msk.bf16.mxu0 %vm1850_vm0, %v5816_v17  ;;  %v6554_v12 = vadd.f32 %v11272_v9, %v16586_v41  ;;  %v16588_v11 = vld [vmem:[#allocation86_spill] sm:$0xff]  ;;  %v11275_v17 = vld [vmem:[#allocation2 + $0x38] sm:$0xff] }
 0xcce   : > { %10002 = vmatmul.mubr.msk.bf16.gmra.mrb[156].mxu0 %vm1850_vm0, %v5817_v24 }
 0xccf   : > { %10050 = vmatpush3.bf16.msra.mxu0 %v6265_v6  ;;  %10053 = vmatprep.mubr.bf16.mxu0 %v6244_v59  ;;  %v6556_v6 = vadd.f32 %v11274_v50, %v16588_v11 }
 0xcd0   : > { %10051 = vmatprep.subr.bf16.mxu0 %v6267_v5 }
 0xcd3   : > { %10052 = vmatpush3.bf16.msra.mxu0 %v6267_v5  ;;  %v16589_v5 = vld [vmem:[#allocation103_spill] sm:$0xff] }
 0xcd4   : > { %10069 = vmatprep.subr.bf16.mxu0 %v11266_v29 }
 0xcd6   : > { %10054 = vmatmul.mubr.bf16.vlgmr.msra.gmra.mrb[176].mxu0 %v6245_v40 }
 0xcd7   : > { %10057 = vmatprep.mubr.bf16.mxu0 %v6246_v39  ;;  %10070 = vmatpush3.bf16.msra.mxu0 %v11266_v29  ;;  %v6557_v29 = vadd.f32 %v11275_v17, %v16589_v5 }
 0xcd8   : > { %10071 = vmatprep.subr.bf16.mxu0 %v11267_v10 }
 0xcdb   : > { %10072 = vmatpush3.bf16.msra.mxu0 %v11267_v10 }
 0xcde   : > { %10058 = vmatmul.mubr.bf16.gmra.mrb[180].mxu0 %v6247_v7 }
 0xcea   : > { %v6149_v22 = vpop.xlane.xlu0 %6148 }
 0xceb   : > { %v6172_v35 = vsub.f32 %v14727_v14, %v6149_v22  ;;  %v6151_v21 = vpop.xlane.xlu1 %6150 }
 0xcec   : > { %v6173_v56 = vsub.f32 %v14733_v57, %v6151_v21  ;;  %v16590_v21 = vld [vmem:[#allocation87_spill] sm:$0xff] }
 0xced   : > { %v6196_v53 = vmul.f32 1.442695, %v6172_v35  ;;  %v11276_v35 = vld [vmem:[#allocation2 + $0x40] sm:$0xff] }
 0xcee   : > { %v6198_v59 = vmul.f32 1.442695, %v6173_v56  ;;  %v6153_v37 = vpop.xlane.xlu0 %6152  ;;  %v6558_v56 = vadd.f32 %v11276_v35, %v16590_v21 }
 0xcef   : > { %11020 = vpow2.f32 %v6196_v53  ;;  %v6174_v3 = vsub.f32 %v14725_v1, %v6153_v37  ;;  %v16591_v37 = vld [vmem:[#allocation98_spill] sm:$0xff] }
 0xcf0   : > { %11022 = vpow2.f32 %v6198_v59  ;;  %v11277_v59 = vld [vmem:[#allocation2 + $0x48] sm:$0xff] }
 0xcf1   : > { %v6200_v0 = vmul.f32 1.442695, %v6174_v3  ;;  %v6559_v3 = vadd.f32 %v11277_v59, %v16591_v37 }
 0xcf2   : > { %v6155_v46 = vpop.xlane.xlu0 %6154 }
 0xcf3   : > { %11024 = vpow2.f32 %v6200_v0  ;;  %v6175_v40 = vsub.f32 %v14731_v52, %v6155_v46  ;;  %v11278_v0 = vld [vmem:[#allocation2 + $0x50] sm:$0xff] }
 0xcf4   : > { %v16592_v46 = vld [vmem:[#allocation94_spill] sm:$0xff] }
 0xcf5   : > { %v6202_v49 = vmul.f32 1.442695, %v6175_v40  ;;  %v6560_v40 = vadd.f32 %v11278_v0, %v16592_v46 }
 0xcf7   : > { %11026 = vpow2.f32 %v6202_v49 }
 0xcf9   : > { %v11021_v16 = vpop.eup %11020 }
 0xcfa   : > { %v11023_v25 = vpop.eup %11022  ;;  %6228 = vadd.xlane.f32.xlu0 %v11021_v16 }
 0xcfb   : > { %6230 = vadd.xlane.f32.xlu1 %v11023_v25  ;;  %v6248_v14 = vpack.c.bf16 %v11023_v25, %v11021_v16  ;;  %v11279_v16 = vld [vmem:[#allocation2 + $0x58] sm:$0xff] }
 0xcfc   : > { %v16593_v25 = vld [vmem:[#allocation96_spill] sm:$0xff] }
 0xcfd   : > { %v11025_v57 = vpop.eup %11024  ;;  %10061 = vmatprep.mubr.bf16.mxu0 %v6248_v14  ;;  %v6561_v14 = vadd.f32 %v11279_v16, %v16593_v25 }
 0xcfe   : > { %6232 = vadd.xlane.f32.xlu0 %v11025_v57 }
 0xd01   : > { %v11027_v47 = vpop.eup %11026 }
 0xd02   : > { %6234 = vadd.xlane.f32.xlu1 %v11027_v47  ;;  %v6249_v33 = vpack.c.bf16 %v11027_v47, %v11025_v57 }
 0xd04   : > { %10062 = vmatmul.mubr.bf16.gmra.mrb[184].mxu0 %v6249_v33  ;;  %v11280_v33 = vld [vmem:[#allocation2 + $0x60] sm:$0xff] }
 0xd3a   : > { %v6157_v1 = vpop.xlane.xlu0 %6156 }
 0xd3b   : > { %v6176_v62 = vsub.f32 %v14784_v8, %v6157_v1  ;;  %v16594_v1 = vld [vmem:[#allocation107_spill] sm:$0xff] }
 0xd3d   : > { %v6204_v51 = vmul.f32 1.442695, %v6176_v62  ;;  %v6159_v19 = vpop.xlane.xlu1 %6158  ;;  %v6562_v62 = vadd.f32 %v11280_v33, %v16594_v1 }
 0xd3e   : > { %v6177_v52 = vsub.f32 %v14791_v44, %v6159_v19  ;;  %v6161_v45 = vpop.xlane.xlu0 %6160  ;;  %v6550_v44 = vadd.f32 %v11268_v27, %v14420_v60  ;;  %v11281_v19 = vld [vmem:[#allocation2 + $0x68] sm:$0xff] }
 0xd3f   : > { %11028 = vpow2.f32 %v6204_v51  ;;  %v6178_v54 = vsub.f32 %v14782_v63, %v6161_v45  ;;  %v14845_v63 = vld [vmem:[%s732_s17] ss:$0 sm:$0xff] }
 0xd40   : > { %v6206_v34 = vmul.f32 1.442695, %v6177_v52  ;;  %v14850_v60 = vadd.f32 %v14845_v63, %v6550_v44  ;;  %v14864_v32 = vadd.f32 %v14845_v63, %v6553_v18  ;;  %v14869_v24 = vadd.f32 %v14845_v63, %v6554_v12  ;;  %v16595_v52 = vld [vmem:[#allocation88_spill] sm:$0xff] }
 0xd41   : > { %v6208_v31 = vmul.f32 1.442695, %v6178_v54  ;;  %v6163_v39 = vpop.xlane.xlu1 %6162  ;;  %v14875_v10 = vadd.f32 %v14845_v63, %v6555_v38  ;;  %v14878_v22 = vadd.f32 %v14845_v63, %v6556_v6  ;;  %v14884_v53 = vadd.f32 %v14845_v63, %v6557_v29  ;;  %v11282_v54 = vld [vmem:[#allocation2 + $0x70] sm:$0xff] }
 0xd42   : > { %11030 = vpow2.f32 %v6206_v34  ;;  %v6179_v58 = vsub.f32 %v14787_v26, %v6163_v39  ;;  %v11269_v26 = vld [vmem:[#allocation2 + $0x8] sm:$0xff]  ;;  %v14889_v49 = vadd.f32 %v14845_v63, %v6558_v56  ;;  %v14895_v57 = vadd.f32 %v14845_v63, %v6559_v3 }
 0xd43   : > { %11032 = vpow2.f32 %v6208_v31  ;;  %v6551_v36 = vadd.f32 %v11269_v26, %v14424_v61  ;;  %v14858_v61 = vadd.f32 %v14845_v63, %v6552_v20  ;;  %v14898_v47 = vadd.f32 %v14845_v63, %v6560_v40  ;;  %v16596_v34 = vld [vmem:[#allocation101_spill] sm:$0xff] }
 0xd44   : > { %v6210_v2 = vmul.f32 1.442695, %v6179_v58  ;;  %v14904_v51 = vadd.f32 %v14845_v63, %v6561_v14  ;;  %v6563_v45 = vadd.f32 %v11281_v19, %v16595_v52  ;;  %v6564_v31 = vadd.f32 %v11282_v54, %v16596_v34  ;;  %v11283_v58 = vld [vmem:[#allocation2 + $0x78] sm:$0xff] }
 0xd45   : > { %v14855_v7 = vadd.f32 %v14845_v63, %v6551_v36  ;;  %v14909_v39 = vadd.f32 %v14845_v63, %v6562_v62 }
 0xd46   : > { %11034 = vpow2.f32 %v6210_v2  ;;  %v16597_v2 = vld [vmem:[#allocation109_spill] sm:$0xff]  ;;  %v14918_v27 = vadd.f32 %v14845_v63, %v6564_v31 }
 0xd49   : > { %v11029_v23 = vpop.eup %11028 }
 0xd4a   : > { %6236 = vadd.xlane.f32.xlu0 %v11029_v23 }
 0xd4c   : > { %v11031_v8 = vpop.eup %11030 }
 0xd4d   : > { %v11033_v48 = vpop.eup %11032  ;;  %6238 = vadd.xlane.f32.xlu1 %v11031_v8  ;;  %v6250_v30 = vpack.c.bf16 %v11031_v8, %v11029_v23  ;;  %v6565_v23 = vadd.f32 %v11283_v58, %v16597_v2  ;;  %v14915_v8 = vadd.f32 %v14845_v63, %v6563_v45 }
 0xd4e   : > { %6240 = vadd.xlane.f32.xlu0 %v11033_v48 }
 0xd4f   : > { %10065 = vmatprep.mubr.bf16.mxu0 %v6250_v30  ;;  %v14923_v44 = vadd.f32 %v14845_v63, %v6565_v23  ;;  %v6215_v30 = vpop.xlane.xlu1 %6214 }
 0xd50   : > { %v11035_v4 = vpop.eup %11034 }
 0xd51   : > { %6242 = vadd.xlane.f32.xlu1 %v11035_v4  ;;  %v6251_v42 = vpack.c.bf16 %v11035_v4, %v11033_v48  ;;  %16598 = vst [vmem:[#allocation83_spill] sm:$0xff] %v14923_v44  ;;  %v6213_v48 = vpop.xlane.xlu0 %6212 }
 0xd52   : > { %6623 = vadd.xlane.f32.xlu0 %v14850_v60  ;;  %11036 = vrcp.f32 %v6213_v48 }
 0xd53   : > { %10066 = vmatmul.mubr.bf16.gmra.mrb[188].mxu0 %v6251_v42  ;;  %v6219_v36 = vpop.xlane.xlu1 %6218 }
 0xd55   : > { %6625 = vadd.xlane.f32.xlu1 %v14855_v7  ;;  %v6217_v26 = vpop.xlane.xlu0 %6216 }
 0xd56   : > { %6627 = vadd.xlane.f32.xlu0 %v14858_v61  ;;  %11038 = vrcp.f32 %v6217_v26 }
 0xd57   : > { %11040 = vrcp.f32 %v6219_v36  ;;  %v6223_v55 = vpop.xlane.xlu1 %6222 }
 0xd58   : > { %11042 = vrcp.f32 %v6215_v30 }
 0xd59   : > { %6629 = vadd.xlane.f32.xlu1 %v14864_v32  ;;  %v6221_v4 = vpop.xlane.xlu0 %6220 }
 0xd5a   : > { %6631 = vadd.xlane.f32.xlu0 %v14869_v24  ;;  %11044 = vrcp.f32 %v6221_v4 }
 0xd5b   : > { %v6227_v42 = vpop.xlane.xlu1 %6226 }
 0xd5c   : > { %v11037_v28 = vpop.eup %11036 }
 0xd5d   : > { %6633 = vadd.xlane.f32.xlu1 %v14875_v10  ;;  %v6225_v20 = vpop.xlane.xlu0 %6224 }
 0xd5e   : > { %6635 = vadd.xlane.f32.xlu0 %v14878_v22  ;;  %11046 = vrcp.f32 %v6225_v20 }
 0xd5f   : > { %11048 = vrcp.f32 %v6227_v42 }
 0xd60   : > { %v11039_v9 = vpop.eup %11038  ;;  %11050 = vrcp.f32 %v6223_v55 }
 0xd61   : > { %6637 = vadd.xlane.f32.xlu1 %v14884_v53  ;;  %v11041_v12 = vpop.eup %11040 }
 0xd62   : > { %6639 = vadd.xlane.f32.xlu0 %v14889_v49  ;;  %v11043_v15 = vpop.eup %11042 }
 0xd64   : > { %v11045_v35 = vpop.eup %11044 }
 0xd65   : > { %6641 = vadd.xlane.f32.xlu1 %v14895_v57 }
 0xd66   : > { %6643 = vadd.xlane.f32.xlu0 %v14898_v47 }
 0xd68   : > { %v11047_v56 = vpop.eup %11046 }
 0xd69   : > { %6645 = vadd.xlane.f32.xlu1 %v14904_v51  ;;  %v11049_v37 = vpop.eup %11048 }
 0xd6a   : > { %6647 = vadd.xlane.f32.xlu0 %v14909_v39  ;;  %v11051_v0 = vpop.eup %11050 }
 0xd6d   : > { %6649 = vadd.xlane.f32.xlu1 %v14915_v8 }
 0xd6e   : > { %6651 = vadd.xlane.f32.xlu0 %v14918_v27 }
 0xd71   : > { %6653 = vadd.xlane.f32.xlu1 %v14923_v44 }
 0xd87   : > { %v6229_v62 = vpop.xlane.xlu0 %6228 }
 0xd88   : > { %v6231_v19 = vpop.xlane.xlu1 %6230  ;;  %11052 = vrcp.f32 %v6229_v62 }
 0xd8b   : > { %v6233_v52 = vpop.xlane.xlu0 %6232 }
 0xd8c   : > { %11054 = vrcp.f32 %v6233_v52  ;;  %v11286_v52 = vld [vmem:[#allocation2 + $0x88] sm:$0xff] }
 0xd8f   : > { %v6235_v45 = vpop.xlane.xlu1 %6234 }
 0xd90   : > { %11056 = vrcp.f32 %v6235_v45 }
 0xd91   : > { %11058 = vrcp.f32 %v6231_v19 }
 0xd92   : > { %v11053_v54 = vpop.eup %11052 }
 0xd96   : > { %v11055_v31 = vpop.eup %11054 }
 0xd9a   : > { %v11057_v2 = vpop.eup %11056 }
 0xd9b   : > { %v11059_v48 = vpop.eup %11058 }
 0xda9   : > { %v10055_v18 = vpop.f32.mrb[176].mxu0 }
 0xdaa   : > { %v6310_v41 = vpop.f32.mrb[177].mxu0  ;;  %v6391_v38 = vmul.f32 %v11039_v9, %v10055_v18 }
 0xdab   : > { %v10056_v13 = vpop.f32.mrb[178].mxu0  ;;  %v6389_v6 = vmul.f32 %v11037_v28, %v6310_v41 }
 0xdac   : > { %v6392_v50 = vmul.f32 %v11041_v12, %v10056_v13  ;;  %v6313_v11 = vpop.f32.mrb[179].mxu0 }
 0xdad   : > { %v6390_v17 = vmul.f32 %v11043_v15, %v6313_v11 }
 0xdae   : > { %v6406_v5 = vpack.c.bf16 %v6392_v50, %v6391_v38 }
 0xdaf   : > { %v6405_v29 = vpack.c.bf16 %v6390_v17, %v6389_v6 }
 0xdb1   : > { %v10059_v21 = vpop.f32.mrb[180].mxu0  ;;  %10073 = vmatprep.mubr.msk.bf16.mxu0 %vm1850_vm0, %v6405_v29 }
 0xdb2   : > { %v6326_v59 = vpop.f32.mrb[181].mxu0  ;;  %10074 = vmatmul.mubr.msk.bf16.vlgmr.msra.gmra.mrb[144].mxu0 %vm1850_vm0, %v6406_v5  ;;  %v6395_v46 = vmul.f32 %v11047_v56, %v10059_v21 }
 0xdb3   : > { %v10060_v3 = vpop.f32.mrb[182].mxu0  ;;  %v6393_v25 = vmul.f32 %v11045_v35, %v6326_v59 }
 0xdb4   : > { %v6396_v40 = vmul.f32 %v11049_v37, %v10060_v3  ;;  %v6329_v16 = vpop.f32.mrb[183].mxu0 }
 0xdb5   : > { %v6394_v14 = vmul.f32 %v11051_v0, %v6329_v16 }
 0xdb6   : > { %v6408_v33 = vpack.c.bf16 %v6396_v40, %v6395_v46  ;;  %v11284_v46 = vld [vmem:[#allocation2 + $0x80] sm:$0xff] }
 0xdb7   : > { %v6407_v1 = vpack.c.bf16 %v6394_v14, %v6393_v25 }
 0xdb9   : > { %10077 = vmatprep.mubr.msk.bf16.mxu0 %vm1850_vm0, %v6407_v1  ;;  %v11285_v1 = vld [vmem:[#allocation2 + $0x90] sm:$0xff] }
 0xdba   : > { %10078 = vmatmul.mubr.msk.bf16.gmra.mrb[148].mxu0 %vm1850_vm0, %v6408_v33 }
 0xdd7   : > { %v10063_v34 = vpop.f32.mrb[184].mxu0  ;;  %v6237_v28 = vpop.xlane.xlu0 %6236 }
 0xdd8   : > { %v6342_v58 = vpop.f32.mrb[185].mxu0  ;;  %v6399_v30 = vmul.f32 %v11055_v31, %v10063_v34  ;;  %11060 = vrcp.f32 %v6237_v28  ;;  %v11287_v34 = vld [vmem:[#allocation2 + $0x98] sm:$0xff] }
 0xdd9   : > { %v10064_v23 = vpop.f32.mrb[186].mxu0  ;;  %v6397_v4 = vmul.f32 %v11053_v54, %v6342_v58 }
 0xdda   : > { %v6400_v26 = vmul.f32 %v11057_v2, %v10064_v23  ;;  %v6345_v36 = vpop.f32.mrb[187].mxu0  ;;  %v6239_v18 = vpop.xlane.xlu1 %6238 }
 0xddb   : > { %v6398_v55 = vmul.f32 %v11059_v48, %v6345_v36  ;;  %v6241_v9 = vpop.xlane.xlu0 %6240 }
 0xddc   : > { %v6410_v20 = vpack.c.bf16 %v6400_v26, %v6399_v30  ;;  %11062 = vrcp.f32 %v6241_v9 }
 0xddd   : > { %v6409_v42 = vpack.c.bf16 %v6398_v55, %v6397_v4 }
 0xdde   : > { %v6243_v41 = vpop.xlane.xlu1 %6242 }
 0xddf   : > { %10081 = vmatprep.mubr.msk.bf16.mxu0 %vm1850_vm0, %v6409_v42  ;;  %11064 = vrcp.f32 %v6243_v41  ;;  %v6624_v3 = vpop.xlane.xlu0 %6623 }
 0xde0   : > { %10082 = vmatmul.mubr.msk.bf16.gmra.mrb[152].mxu0 %vm1850_vm0, %v6410_v20  ;;  %11066 = vrcp.f32 %v6239_v18  ;;  %v6687_v33 = vmul.f32 0.0078125, %v6624_v3  ;;  %v11288_v18 = vld [vmem:[#allocation2 + $0xa0] sm:$0xff] }
 0xde1   : > { %v10452_v3 = vld [vmem:[%s12161_s8] ss:$8 sps:$4 sm:$0xff]  }
 0xde2   : > { %v11061_v12 = vpop.eup %11060  ;;  %v6626_v25 = vpop.xlane.xlu1 %6625  ;;  %v14942_v2 = vsub.f32 %v14850_v60, %v6687_v33  ;;  %v10457_v33 = vld [vmem:[%s12161_s8 + $0x14] ss:$8 sps:$4 sm:$0xff]  }
 0xde3   : > { %v6688_v54 = vmul.f32 0.0078125, %v6626_v25  ;;  %v6628_v30 = vpop.xlane.xlu0 %6627 }
 0xde4   : > { %v6689_v28 = vmul.f32 0.0078125, %v6628_v30  ;;  %v6751_v41 = vmul.f32 %v14942_v2, %v14942_v2  ;;  %v10461_v30 = vld [vmem:[%s12161_s8 + $0x30] ss:$8 sps:$4 sm:$0xff]  }
 0xde5   : > { %v14949_v36 = vsub.f32 %v14855_v7, %v6688_v54  ;;  %v10460_v54 = vld [vmem:[%s12161_s8 + $0x24] ss:$8 sps:$4 sm:$0xff]  }
 0xde6   : > { %v11063_v15 = vpop.eup %11062  ;;  %v6630_v20 = vpop.xlane.xlu1 %6629 }
 0xde9   : > { %v11065_v50 = vpop.eup %11064 }
 0xdea   : > { %v11067_v6 = vpop.eup %11066 }
 0xe26   : > { %v10067_v13 = vpop.f32.mrb[188].mxu0 }
 0xe27   : > { %v6358_v38 = vpop.f32.mrb[189].mxu0  ;;  %v6403_v17 = vmul.f32 %v11063_v15, %v10067_v13  ;;  %v11289_v13 = vld [vmem:[#allocation2 + $0xa8] sm:$0xff] }
 0xe28   : > { %v10068_v11 = vpop.f32.mrb[190].mxu0  ;;  %v6401_v35 = vmul.f32 %v11061_v12, %v6358_v38  ;;  %v6690_v12 = vmul.f32 0.0078125, %v6630_v20  ;;  %v6752_v38 = vmul.f32 %v14949_v36, %v14949_v36  ;;  %v10469_v20 = vld [vmem:[%s12161_s8 + $0x54] ss:$8 sps:$4 sm:$0xff]  }
 0xe29   : > { %v6404_v5 = vmul.f32 %v11065_v50, %v10068_v11  ;;  %v6361_v29 = vpop.f32.mrb[191].mxu0  ;;  %v14961_v50 = vsub.f32 %v14858_v61, %v6689_v28 }
 0xe2a   : > { %v6402_v21 = vmul.f32 %v11067_v6, %v6361_v29  ;;  %v6632_v6 = vpop.xlane.xlu0 %6631  ;;  %v6634_v29 = vpop.xlane.xlu1 %6633 }
 0xe2b   : > { %v6412_v56 = vpack.c.bf16 %v6404_v5, %v6403_v17  ;;  %v14967_v17 = vsub.f32 %v14864_v32, %v6690_v12 }
 0xe2c   : > { %v6411_v59 = vpack.c.bf16 %v6402_v21, %v6401_v35  ;;  %v6691_v35 = vmul.f32 0.0078125, %v6632_v6  ;;  %v11290_v21 = vld [vmem:[#allocation2 + $0xb0] sm:$0xff]  ;;  %v11292_v6 = vld [vmem:[#allocation2 + $0xc0] sm:$0xff] }
 0xe2e   : > { %10085 = vmatprep.mubr.msk.bf16.mxu0 %vm1850_vm0, %v6411_v59  ;;  %v6753_v59 = vmul.f32 %v14961_v50, %v14961_v50  ;;  %v14981_v25 = vsub.f32 %v14869_v24, %v6691_v35  ;;  %v6636_v28 = vpop.xlane.xlu0 %6635 }
 0xe2f   : > { %10086 = vmatmul.mubr.msk.bf16.gmra.mrb[156].mxu0 %vm1850_vm0, %v6412_v56  ;;  %v6693_v12 = vmul.f32 0.0078125, %v6636_v28 }
 0xe85   : > { %v10075_v37 = vpop.f32.mrb[144].mxu0 }
 0xe86   : > { %v6471_v0 = vpop.f32.mrb[145].mxu0  ;;  %v6568_v62 = vadd.f32 %v11285_v1, %v10075_v37  ;;  %v10454_v37 = vld [vmem:[%s12161_s8 + $0x4] ss:$8 sps:$4 sm:$0xff]   ;;  %v10455_v1 = vld [vmem:[%s12161_s8 + $0x10] ss:$8 sps:$4 sm:$0xff]  }
 0xe87   : > { %v6566_v40 = vadd.f32 %v11284_v46, %v6471_v0  ;;  %v10076_v16 = vpop.f32.mrb[146].mxu0  ;;  %v6692_v0 = vmul.f32 0.0078125, %v6634_v29  ;;  %v11291_v46 = vld [vmem:[#allocation2 + $0xb8] sm:$0xff]  ;;  %7175 = vmatprep.subr.bf16.mxu1 %v10454_v37  ;;  %v15013_v37 = vsub.f32 %v14878_v22, %v6693_v12 }
 0xe88   : > { %v6474_v14 = vpop.f32.mrb[147].mxu0  ;;  %v6569_v31 = vadd.f32 %v11287_v34, %v10076_v16  ;;  %v14945_v23 = vadd.f32 %v14845_v63, %v6568_v62  ;;  %v6754_v16 = vmul.f32 %v14967_v17, %v14967_v17  ;;  %7176 = vmatpush1.bf16.msra.mxu1 %v10452_v3  ;;  %v10458_v34 = vld [vmem:[%s12161_s8 + $0x20] ss:$8 sps:$4 sm:$0xff]  }
 0xe89   : > { %v14935_v19 = vadd.f32 %v14845_v63, %v6566_v40  ;;  %v6567_v45 = vadd.f32 %v11286_v52, %v6474_v14  ;;  %v14989_v62 = vsub.f32 %v14875_v10, %v6692_v0  ;;  %7177 = vmatprep.subr.bf16.mxu1 %v10457_v33  ;;  %v11293_v0 = vld [vmem:[#allocation2 + $0xc8] sm:$0xff] }
 0xe8a   : > { %16601 = vst [vmem:[#allocation92_spill] sm:$0xff] %v14945_v23  ;;  %v14952_v4 = vadd.f32 %v14845_v63, %v6569_v31 }
 0xe8b   : > { %16599 = vst [vmem:[#allocation90_spill] sm:$0xff] %v14935_v19  ;;  %v14938_v58 = vadd.f32 %v14845_v63, %v6567_v45  ;;  %6655 = vadd.xlane.f32.xlu0 %v14935_v19  ;;  %v6755_v45 = vmul.f32 %v14981_v25, %v14981_v25  ;;  %v6756_v31 = vmul.f32 %v14989_v62, %v14989_v62 }
 0xe8c   : > { %16602 = vst [vmem:[#allocation97_spill] sm:$0xff] %v14952_v4  ;;  %7178 = vmatpush1.bf16.msra.mxu1 %v10455_v1 }
 0xe8d   : > { %16600 = vst [vmem:[#allocation85_spill] sm:$0xff] %v14938_v58  ;;  %6657 = vadd.xlane.f32.xlu1 %v14938_v58  ;;  %v10079_v48 = vpop.f32.mrb[148].mxu0  ;;  %7179 = vmatprep.subr.bf16.mxu1 %v10460_v54  ;;  %v11294_v54 = vld [vmem:[#allocation2 + $0xd0] sm:$0xff] }
 0xe8e   : > { %v6487_v26 = vpop.f32.mrb[149].mxu0  ;;  %v6572_v56 = vadd.f32 %v11290_v21, %v10079_v48  ;;  %v10463_v48 = vld [vmem:[%s12161_s8 + $0x34] ss:$8 sps:$4 sm:$0xff]  }
 0xe8f   : > { %6659 = vadd.xlane.f32.xlu0 %v14945_v23  ;;  %v10080_v55 = vpop.f32.mrb[150].mxu0  ;;  %v6570_v9 = vadd.f32 %v11288_v18, %v6487_v26  ;;  %v10466_v26 = vld [vmem:[%s12161_s8 + $0x44] ss:$8 sps:$4 sm:$0xff]   ;;  %v10475_v21 = vld [vmem:[%s12161_s8 + $0x74] ss:$8 sps:$4 sm:$0xff]  }
 0xe90   : > { %v6490_v42 = vpop.f32.mrb[151].mxu0  ;;  %v6573_v40 = vadd.f32 %v11291_v46, %v10080_v55  ;;  %v14984_v14 = vadd.f32 %v14845_v63, %v6572_v56  ;;  %7180 = vmatpush1.bf16.msra.mxu1 %v10458_v34  ;;  %v10464_v55 = vld [vmem:[%s12161_s8 + $0x40] ss:$8 sps:$4 sm:$0xff]   ;;  %v10472_v18 = vld [vmem:[%s12161_s8 + $0x64] ss:$8 sps:$4 sm:$0xff]  }
 0xe91   : > { %6661 = vadd.xlane.f32.xlu1 %v14952_v4  ;;  %v6571_v15 = vadd.f32 %v11289_v13, %v6490_v42  ;;  %v14964_v11 = vadd.f32 %v14845_v63, %v6570_v9  ;;  %7181 = vmatprep.subr.bf16.mxu1 %v10463_v48  ;;  %v10467_v42 = vld [vmem:[%s12161_s8 + $0x50] ss:$8 sps:$4 sm:$0xff]   ;;  %v6638_v9 = vpop.xlane.xlu1 %6637 }
 0xe92   : > { %v14992_v52 = vadd.f32 %v14845_v63, %v6573_v40  ;;  %v6640_v40 = vpop.xlane.xlu0 %6639 }
 0xe93   : > { %6783 = vadd.xlane.f32.xlu0 %v6751_v41  ;;  %16603 = vst [vmem:[#allocation93_spill] sm:$0xff] %v14964_v11  ;;  %v14970_v5 = vadd.f32 %v14845_v63, %v6571_v15  ;;  %v10470_v41 = vld [vmem:[%s12161_s8 + $0x60] ss:$8 sps:$4 sm:$0xff]  }
 0xe94   : > { %16605 = vst [vmem:[#allocation91_spill] sm:$0xff] %v14992_v52  ;;  %7182 = vmatpush1.bf16.msra.mxu1 %v10461_v30  ;;  %v11295_v30 = vld [vmem:[#allocation2 + $0xd8] sm:$0xff] }
 0xe95   : > { %6785 = vadd.xlane.f32.xlu1 %v6752_v38  ;;  %16604 = vst [vmem:[#allocation89_spill] sm:$0xff] %v14970_v5  ;;  %7183 = vmatprep.subr.bf16.mxu1 %v10466_v26  ;;  %v6694_v38 = vmul.f32 0.0078125, %v6638_v9  ;;  %v6642_v1 = vpop.xlane.xlu1 %6641 }
 0xe96   : > { %v6696_v48 = vmul.f32 0.0078125, %v6642_v1  ;;  %v6644_v12 = vpop.xlane.xlu0 %6643  ;;  %v11297_v1 = vld [vmem:[#allocation2 + $0xe8] sm:$0xff] }
 0xe97   : > { %6663 = vadd.xlane.f32.xlu0 %v14964_v11 }
 0xe98   : > { %7184 = vmatpush1.bf16.msra.mxu1 %v10464_v55  ;;  %v15037_v28 = vsub.f32 %v14895_v57, %v6696_v48 }
 0xe99   : > { %6665 = vadd.xlane.f32.xlu1 %v14970_v5  ;;  %7185 = vmatprep.subr.bf16.mxu1 %v10469_v20 }
 0xe9b   : > { %6787 = vadd.xlane.f32.xlu0 %v6753_v59  ;;  %v10473_v59 = vld [vmem:[%s12161_s8 + $0x70] ss:$8 sps:$4 sm:$0xff]  }
 0xe9c   : > { %7186 = vmatpush1.bf16.msra.mxu1 %v10467_v42 }
 0xe9d   : > { %6789 = vadd.xlane.f32.xlu1 %v6754_v16  ;;  %7187 = vmatprep.subr.bf16.mxu1 %v10472_v18  ;;  %v15019_v16 = vsub.f32 %v14884_v53, %v6694_v38 }
 0xe9f   : > { %6667 = vadd.xlane.f32.xlu0 %v14984_v14  ;;  %v6758_v55 = vmul.f32 %v15019_v16, %v15019_v16 }
 0xea0   : > { %7188 = vmatpush1.bf16.msra.mxu1 %v10470_v41  ;;  %v6760_v41 = vmul.f32 %v15037_v28, %v15037_v28 }
 0xea1   : > { %6669 = vadd.xlane.f32.xlu1 %v14992_v52  ;;  %7189 = vmatprep.subr.bf16.mxu1 %v10475_v21 }
 0xea3   : > { %6791 = vadd.xlane.f32.xlu0 %v6755_v45  ;;  %v6695_v45 = vmul.f32 0.0078125, %v6640_v40 }
 0xea4   : > { %7190 = vmatpush1.bf16.msra.mxu1 %v10473_v59  ;;  %v6648_v59 = vpop.xlane.xlu0 %6647 }
 0xea5   : > { %6793 = vadd.xlane.f32.xlu1 %v6756_v31  ;;  %v6757_v31 = vmul.f32 %v15013_v37, %v15013_v37  ;;  %v15031_v20 = vsub.f32 %v14889_v49, %v6695_v45  ;;  %v6699_v48 = vmul.f32 0.0078125, %v6648_v59 }
 0xea7   : > { %v6759_v9 = vmul.f32 %v15031_v20, %v15031_v20 }
 0xeb3   : > { %v10083_v13 = vpop.f32.mrb[152].mxu0 }
 0xeb4   : > { %v6503_v15 = vpop.f32.mrb[153].mxu0  ;;  %v6576_v34 = vadd.f32 %v11294_v54, %v10083_v13  ;;  %v6646_v13 = vpop.xlane.xlu1 %6645 }
 0xeb5   : > { %v6574_v29 = vadd.f32 %v11292_v6, %v6503_v15  ;;  %v10084_v35 = vpop.f32.mrb[154].mxu0  ;;  %v6697_v15 = vmul.f32 0.0078125, %v6644_v12  ;;  %v11299_v12 = vld [vmem:[#allocation2 + $0xf8] sm:$0xff] }
 0xeb6   : > { %v6506_v56 = vpop.f32.mrb[155].mxu0  ;;  %v6577_v26 = vadd.f32 %v11295_v30, %v10084_v35  ;;  %v15034_v42 = vadd.f32 %v14845_v63, %v6576_v34  ;;  %v11296_v35 = vld [vmem:[#allocation2 + $0xe0] sm:$0xff]  ;;  %v11298_v30 = vld [vmem:[#allocation2 + $0xf0] sm:$0xff] }
 0xeb7   : > { %v15016_v3 = vadd.f32 %v14845_v63, %v6574_v29  ;;  %v6575_v46 = vadd.f32 %v11293_v0, %v6506_v56  ;;  %v6698_v29 = vmul.f32 0.0078125, %v6646_v13 }
 0xeb8   : > { %16606 = vst [vmem:[#allocation100_spill] sm:$0xff] %v15034_v42  ;;  %v15040_v18 = vadd.f32 %v14845_v63, %v6577_v26  ;;  %v6650_v54 = vpop.xlane.xlu1 %6649 }
 0xeb9   : > { %v15022_v33 = vadd.f32 %v14845_v63, %v6575_v46  ;;  %6671 = vadd.xlane.f32.xlu0 %v15016_v3  ;;  %v15049_v46 = vsub.f32 %v14898_v47, %v6697_v15  ;;  %v15055_v34 = vsub.f32 %v14904_v51, %v6698_v29  ;;  %v15067_v29 = vsub.f32 %v14909_v39, %v6699_v48 }
 0xeba   : > { %16607 = vst [vmem:[#allocation105_spill] sm:$0xff] %v15040_v18 }
 0xebb   : > { %6673 = vadd.xlane.f32.xlu1 %v15022_v33  ;;  %v6762_v15 = vmul.f32 %v15055_v34, %v15055_v34 }
 0xebd   : > { %6795 = vadd.xlane.f32.xlu0 %v6757_v31 }
 0xebf   : > { %6797 = vadd.xlane.f32.xlu1 %v6758_v55  ;;  %v6761_v55 = vmul.f32 %v15049_v46, %v15049_v46 }
 0xec1   : > { %6675 = vadd.xlane.f32.xlu0 %v15034_v42 }
 0xec3   : > { %6677 = vadd.xlane.f32.xlu1 %v15040_v18 }
 0xec5   : > { %6799 = vadd.xlane.f32.xlu0 %v6759_v9  ;;  %v6652_v9 = vpop.xlane.xlu0 %6651 }
 0xec7   : > { %6801 = vadd.xlane.f32.xlu1 %v6760_v41  ;;  %v6700_v41 = vmul.f32 0.0078125, %v6650_v54 }
 0xf02   : > { %v10087_v38 = vpop.f32.mrb[156].mxu0 }
 0xf03   : > { %v6519_v6 = vpop.f32.mrb[157].mxu0  ;;  %v6580_v26 = vadd.f32 %v11298_v30, %v10087_v38 }
 0xf04   : > { %v6578_v21 = vadd.f32 %v11296_v35, %v6519_v6  ;;  %v10088_v56 = vpop.f32.mrb[158].mxu0  ;;  %v6654_v6 = vpop.xlane.xlu1 %6653  ;;  %v6701_v35 = vmul.f32 0.0078125, %v6652_v9 }
 0xf05   : > { %v6522_v0 = vpop.f32.mrb[159].mxu0  ;;  %v6581_v13 = vadd.f32 %v11299_v12, %v10088_v56  ;;  %v15070_v38 = vadd.f32 %v14845_v63, %v6580_v26  ;;  %v6702_v59 = vmul.f32 0.0078125, %v6654_v6 }
 0xf06   : > { %v15052_v40 = vadd.f32 %v14845_v63, %v6578_v21  ;;  %v6579_v45 = vadd.f32 %v11297_v1, %v6522_v0  ;;  %v15073_v21 = vsub.f32 %v14915_v8, %v6700_v41  ;;  %v15080_v56 = vsub.f32 %v14918_v27, %v6701_v35 }
 0xf07   : > { %16610 = vst [vmem:[#allocation54_spill] sm:$0xff] %v15070_v38  ;;  %v15076_v0 = vadd.f32 %v14845_v63, %v6581_v13  ;;  %v6763_v1 = vmul.f32 %v15067_v29, %v15067_v29 }
 0xf08   : > { %16608 = vst [vmem:[#allocation108_spill] sm:$0xff] %v15052_v40  ;;  %v15058_v31 = vadd.f32 %v14845_v63, %v6579_v45  ;;  %6679 = vadd.xlane.f32.xlu0 %v15052_v40  ;;  %v15086_v45 = vsub.f32 %v14923_v44, %v6702_v59  ;;  %v6764_v54 = vmul.f32 %v15073_v21, %v15073_v21 }
 0xf09   : > { %16611 = vst [vmem:[#allocation111_spill] sm:$0xff] %v15076_v0  ;;  %v6765_v63 = vmul.f32 %v15080_v56, %v15080_v56 }
 0xf0a   : > { %16609 = vst [vmem:[#allocation110_spill] sm:$0xff] %v15058_v31  ;;  %6681 = vadd.xlane.f32.xlu1 %v15058_v31  ;;  %v6766_v30 = vmul.f32 %v15086_v45, %v15086_v45 }
 0xf0c   : > { %6803 = vadd.xlane.f32.xlu0 %v6761_v55 }
 0xf0e   : > { %6805 = vadd.xlane.f32.xlu1 %v6762_v15 }
 0xf10   : > { %6683 = vadd.xlane.f32.xlu0 %v15070_v38 }
 0xf12   : > { %6685 = vadd.xlane.f32.xlu1 %v15076_v0 }
 0xf14   : > { %6807 = vadd.xlane.f32.xlu0 %v6763_v1 }
 0xf16   : > { %6809 = vadd.xlane.f32.xlu1 %v6764_v54 }
 0xf18   : > { %6811 = vadd.xlane.f32.xlu0 %v6765_v63  ;;  %v6656_v48 = vpop.xlane.xlu0 %6655 }
 0xf19   : > { %v6703_v26 = vmul.f32 0.0078125, %v6656_v48 }
 0xf1a   : > { %v6658_v55 = vpop.xlane.xlu1 %6657  ;;  %6813 = vadd.xlane.f32.xlu1 %v6766_v30 }
 0xf1b   : > { %v15095_v9 = vsub.f32 %v14935_v19, %v6703_v26  ;;  %v6704_v41 = vmul.f32 0.0078125, %v6658_v55 }
 0xf1c   : > { %v6660_v12 = vpop.xlane.xlu0 %6659 }
 0xf1d   : > { %v15098_v13 = vsub.f32 %v14938_v58, %v6704_v41  ;;  %v6705_v15 = vmul.f32 0.0078125, %v6660_v12  ;;  %v6767_v6 = vmul.f32 %v15095_v9, %v15095_v9 }
 0xf1e   : > { %v6662_v35 = vpop.xlane.xlu1 %6661 }
 0xf1f   : > { %v15103_v59 = vsub.f32 %v14945_v23, %v6705_v15  ;;  %v6706_v1 = vmul.f32 0.0078125, %v6662_v35  ;;  %6815 = vadd.xlane.f32.xlu0 %v6767_v6  ;;  %v6768_v54 = vmul.f32 %v15098_v13, %v15098_v13 }
 0xf20   : > { %v6784_v63 = vpop.xlane.xlu0 %6783 }
 0xf21   : > { %v15108_v48 = vsub.f32 %v14952_v4, %v6706_v1  ;;  %v6847_v30 = vmul.f32 0.0078125, %v6784_v63  ;;  %6817 = vadd.xlane.f32.xlu1 %v6768_v54  ;;  %v6769_v26 = vmul.f32 %v15103_v59, %v15103_v59 }
 0xf22   : > { %v6786_v55 = vpop.xlane.xlu1 %6785 }
 0xf23   : > { %v6879_v41 = vadd.f32 1e-05, %v6847_v30  ;;  %v6848_v12 = vmul.f32 0.0078125, %v6786_v55  ;;  %6819 = vadd.xlane.f32.xlu0 %v6769_v26  ;;  %v6770_v15 = vmul.f32 %v15108_v48, %v15108_v48 }
 0xf24   : > { %v6664_v6 = vpop.xlane.xlu0 %6663 }
 0xf25   : > { %11068 = vrsqrt.f32 %v6879_v41  ;;  %v6880_v35 = vadd.f32 1e-05, %v6848_v12  ;;  %v6707_v23 = vmul.f32 0.0078125, %v6664_v6  ;;  %6821 = vadd.xlane.f32.xlu1 %v6770_v15 }
 0xf26   : > { %v6666_v58 = vpop.xlane.xlu1 %6665 }
 0xf27   : > { %11070 = vrsqrt.f32 %v6880_v35  ;;  %v15115_v1 = vsub.f32 %v14964_v11, %v6707_v23  ;;  %v6708_v54 = vmul.f32 0.0078125, %v6666_v58 }
 0xf28   : > { %v6788_v63 = vpop.xlane.xlu0 %6787 }
 0xf29   : > { %v15118_v30 = vsub.f32 %v14970_v5, %v6708_v54  ;;  %v6849_v26 = vmul.f32 0.0078125, %v6788_v63  ;;  %v6771_v55 = vmul.f32 %v15115_v1, %v15115_v1  ;;  %v15125_v54 = vld [vmem:[%s12196_s25] ss:$0 sm:$0xff] }
 0xf2a   : > { %v6790_v4 = vpop.xlane.xlu1 %6789 }
 0xf2b   : > { %v6881_v41 = vadd.f32 1e-05, %v6849_v26  ;;  %v6850_v12 = vmul.f32 0.0078125, %v6790_v4  ;;  %6823 = vadd.xlane.f32.xlu0 %v6771_v55  ;;  %v6772_v15 = vmul.f32 %v15118_v30, %v15118_v30 }
 0xf2c   : > { %v6668_v6 = vpop.xlane.xlu0 %6667 }
 0xf2d   : > { %11072 = vrsqrt.f32 %v6881_v41  ;;  %v6882_v23 = vadd.f32 1e-05, %v6850_v12  ;;  %v6709_v58 = vmul.f32 0.0078125, %v6668_v6  ;;  %6825 = vadd.xlane.f32.xlu1 %v6772_v15 }
 0xf2e   : > { %v6670_v35 = vpop.xlane.xlu1 %6669 }
 0xf2f   : > { %v11069_v11 = vpop.eup %11068  ;;  %11074 = vrsqrt.f32 %v6882_v23  ;;  %v15128_v63 = vsub.f32 %v14984_v14, %v6709_v58  ;;  %v6710_v26 = vmul.f32 0.0078125, %v6670_v35 }
 0xf30   : > { %v6943_v4 = vmul.f32 %v11069_v11, %v14942_v2  ;;  %v6792_v55 = vpop.xlane.xlu0 %6791  ;;  %v15141_v11 = vld [vmem:[%s12202_s23] ss:$0 sm:$0xff] }
 0xf31   : > { %v11071_v5 = vpop.eup %11070  ;;  %v15132_v19 = vsub.f32 %v14992_v52, %v6710_v26  ;;  %v6851_v41 = vmul.f32 0.0078125, %v6792_v55  ;;  %v6773_v12 = vmul.f32 %v15128_v63, %v15128_v63 }
 0xf32   : > { %v6981_v15 = vmul.f32 %v15125_v54, %v6943_v4  ;;  %v6944_v6 = vmul.f32 %v11071_v5, %v14949_v36  ;;  %v6794_v23 = vpop.xlane.xlu1 %6793 }
 0xf33   : > { %v6883_v44 = vadd.f32 1e-05, %v6851_v41  ;;  %v6852_v58 = vmul.f32 0.0078125, %v6794_v23  ;;  %6827 = vadd.xlane.f32.xlu0 %v6773_v12  ;;  %v6774_v2 = vmul.f32 %v15132_v19, %v15132_v19 }
 0xf34   : > { %v6982_v35 = vmul.f32 %v15125_v54, %v6944_v6  ;;  %v7019_v55 = vadd.f32 %v15141_v11, %v6981_v15 }
 0xf35   : > { %11076 = vrsqrt.f32 %v6883_v44  ;;  %v6884_v26 = vadd.f32 1e-05, %v6852_v58  ;;  %6829 = vadd.xlane.f32.xlu1 %v6774_v2 }
 0xf36   : > { %v7020_v4 = vadd.f32 %v15141_v11, %v6982_v35 }
 0xf37   : > { %v11073_v52 = vpop.eup %11072  ;;  %11078 = vrsqrt.f32 %v6884_v26 }
 0xf38   : > { %v7051_v36 = vpack.c.bf16 %v7020_v4, %v7019_v55  ;;  %v6945_v5 = vmul.f32 %v11073_v52, %v14961_v50 }
 0xf39   : > { %v11075_v41 = vpop.eup %11074 }
 0xf3a   : > { %7208 = vmatmul.mubr.bf16.vlgmr.msra.gmra.mrb[192].mxu1 %v7051_v36  ;;  %v6946_v12 = vmul.f32 %v11075_v41, %v14967_v17  ;;  %v6983_v23 = vmul.f32 %v15125_v54, %v6945_v5 }
 0xf3b   : > { %7217 = vmatprep.mubr.bf16.mxu1 %v16584_v43 }
 0xf3c   : > { %v6984_v44 = vmul.f32 %v15125_v54, %v6946_v12  ;;  %v7021_v6 = vadd.f32 %v15141_v11, %v6983_v23 }
 0xf3e   : > { %v7022_v15 = vadd.f32 %v15141_v11, %v6984_v44 }
 0xf3f   : > { %v11077_v58 = vpop.eup %11076 }
 0xf40   : > { %v7052_v2 = vpack.c.bf16 %v7022_v15, %v7021_v6  ;;  %v6947_v35 = vmul.f32 %v11077_v58, %v14981_v25 }
 0xf41   : > { %v11079_v26 = vpop.eup %11078 }
 0xf42   : > { %7218 = vmatmul.mubr.bf16.gmra.mrb[196].mxu1 %v7052_v2  ;;  %v6948_v50 = vmul.f32 %v11079_v26, %v14989_v62  ;;  %v6985_v17 = vmul.f32 %v15125_v54, %v6947_v35 }
 0xf43   : > { %7227 = vmatprep.mubr.bf16.mxu1 %v16584_v43 }
 0xf44   : > { %v6986_v52 = vmul.f32 %v15125_v54, %v6948_v50  ;;  %v7023_v4 = vadd.f32 %v15141_v11, %v6985_v17 }
 0xf46   : > { %v6672_v55 = vpop.xlane.xlu0 %6671  ;;  %v7024_v36 = vadd.f32 %v15141_v11, %v6986_v52 }
 0xf47   : > { %v6711_v5 = vmul.f32 0.0078125, %v6672_v55 }
 0xf48   : > { %v6674_v41 = vpop.xlane.xlu1 %6673  ;;  %v7053_v12 = vpack.c.bf16 %v7024_v36, %v7023_v4 }
 0xf49   : > { %v15161_v25 = vsub.f32 %v15016_v3, %v6711_v5  ;;  %v6712_v23 = vmul.f32 0.0078125, %v6674_v41 }
 0xf4a   : > { %7228 = vmatmul.mubr.bf16.gmra.mrb[200].mxu1 %v7053_v12  ;;  %v6796_v62 = vpop.xlane.xlu0 %6795 }
 0xf4b   : > { %v15164_v44 = vsub.f32 %v15022_v33, %v6712_v23  ;;  %v6853_v6 = vmul.f32 0.0078125, %v6796_v62  ;;  %v6775_v15 = vmul.f32 %v15161_v25, %v15161_v25  ;;  %7237 = vmatprep.mubr.bf16.mxu1 %v16584_v43 }
 0xf4c   : > { %v6798_v58 = vpop.xlane.xlu1 %6797 }
 0xf4d   : > { %v6885_v2 = vadd.f32 1e-05, %v6853_v6  ;;  %v6854_v35 = vmul.f32 0.0078125, %v6798_v58  ;;  %6831 = vadd.xlane.f32.xlu0 %v6775_v15  ;;  %v6776_v26 = vmul.f32 %v15164_v44, %v15164_v44 }
 0xf4e   : > { %v6676_v50 = vpop.xlane.xlu0 %6675 }
 0xf4f   : > { %11080 = vrsqrt.f32 %v6885_v2  ;;  %v6886_v17 = vadd.f32 1e-05, %v6854_v35  ;;  %v6713_v52 = vmul.f32 0.0078125, %v6676_v50  ;;  %6833 = vadd.xlane.f32.xlu1 %v6776_v26 }
 0xf50   : > { %v6678_v55 = vpop.xlane.xlu1 %6677 }
 0xf51   : > { %11082 = vrsqrt.f32 %v6886_v17  ;;  %v15172_v4 = vsub.f32 %v15034_v42, %v6713_v52  ;;  %v6714_v36 = vmul.f32 0.0078125, %v6678_v55 }
 0xf52   : > { %v6800_v5 = vpop.xlane.xlu0 %6799 }
 0xf53   : > { %v15175_v41 = vsub.f32 %v15040_v18, %v6714_v36  ;;  %v6855_v12 = vmul.f32 0.0078125, %v6800_v5  ;;  %v6777_v23 = vmul.f32 %v15172_v4, %v15172_v4 }
 0xf54   : > { %v6802_v62 = vpop.xlane.xlu1 %6801 }
 0xf55   : > { %v6887_v6 = vadd.f32 1e-05, %v6855_v12  ;;  %v6856_v15 = vmul.f32 0.0078125, %v6802_v62  ;;  %6835 = vadd.xlane.f32.xlu0 %v6777_v23  ;;  %v6778_v58 = vmul.f32 %v15175_v41, %v15175_v41 }
 0xf57   : > { %11084 = vrsqrt.f32 %v6887_v6  ;;  %v6888_v2 = vadd.f32 1e-05, %v6856_v15  ;;  %6837 = vadd.xlane.f32.xlu1 %v6778_v58 }
 0xf59   : > { %v11081_v35 = vpop.eup %11080  ;;  %11086 = vrsqrt.f32 %v6888_v2 }
 0xf5a   : > { %v6949_v26 = vmul.f32 %v11081_v35, %v15013_v37 }
 0xf5b   : > { %v11083_v50 = vpop.eup %11082 }
 0xf5c   : > { %v6950_v17 = vmul.f32 %v11083_v50, %v15019_v16  ;;  %v6987_v52 = vmul.f32 %v15125_v54, %v6949_v26  ;;  %v10477_v26 = vld [vmem:[%s12170_s4] sm:$0xff]   ;;  %v10479_v50 = vld [vmem:[%s12170_s4 + $0x8] sm:$0xff]  }
 0xf5e   : > { %v6988_v55 = vmul.f32 %v15125_v54, %v6950_v17  ;;  %v7025_v36 = vadd.f32 %v15141_v11, %v6987_v52 }
 0xf60   : > { %v7026_v5 = vadd.f32 %v15141_v11, %v6988_v55  ;;  %v10480_v55 = vld [vmem:[%s12170_s4 + $0x50] sm:$0xff]  }
 0xf61   : > { %v11085_v12 = vpop.eup %11084 }
 0xf62   : > { %v7054_v23 = vpack.c.bf16 %v7026_v5, %v7025_v36  ;;  %v6951_v62 = vmul.f32 %v11085_v12, %v15031_v20  ;;  %v10476_v20 = vld [vmem:[%s12170_s4 + $0x40] sm:$0xff]   ;;  %v10481_v5 = vld [vmem:[%s12170_s4 + $0x10] sm:$0xff]  }
 0xf63   : > { %v11087_v6 = vpop.eup %11086  ;;  %9257 = vmatprep.subr.bf16.mxu0 %v10476_v20 }
 0xf64   : > { %7238 = vmatmul.mubr.bf16.gmra.mrb[204].mxu1 %v7054_v23  ;;  %v6952_v37 = vmul.f32 %v11087_v6, %v15037_v28  ;;  %v6989_v16 = vmul.f32 %v15125_v54, %v6951_v62  ;;  %9258 = vmatpush3.bf16.msra.mxu0 %v10477_v26  ;;  %v10478_v28 = vld [vmem:[%s12170_s4 + $0x48] sm:$0xff]  }
 0xf65   : > { %7247 = vmatprep.mubr.bf16.mxu1 %v16584_v43  ;;  %9259 = vmatprep.subr.bf16.mxu0 %v10478_v28 }
 0xf66   : > { %v6990_v15 = vmul.f32 %v15125_v54, %v6952_v37  ;;  %v7027_v58 = vadd.f32 %v15141_v11, %v6989_v16 }
 0xf68   : > { %v7028_v2 = vadd.f32 %v15141_v11, %v6990_v15  ;;  %9260 = vmatpush3.bf16.msra.mxu0 %v10479_v50  ;;  %v10482_v15 = vld [vmem:[%s12170_s4 + $0x58] sm:$0xff]  }
 0xf69   : > { %9261 = vmatprep.subr.bf16.mxu0 %v10480_v55 }
 0xf6a   : > { %v7055_v35 = vpack.c.bf16 %v7028_v2, %v7027_v58  ;;  %v10483_v2 = vld [vmem:[%s12170_s4 + $0x18] sm:$0xff]  }
 0xf6c   : > { %7248 = vmatmul.mubr.bf16.gmra.mrb[208].mxu1 %v7055_v35  ;;  %9262 = vmatpush3.bf16.msra.mxu0 %v10481_v5 }
 0xf6d   : > { %7257 = vmatprep.mubr.bf16.mxu1 %v16584_v43  ;;  %9263 = vmatprep.subr.bf16.mxu0 %v10482_v15 }
 0xf70   : > { %9264 = vmatpush3.bf16.msra.mxu0 %v10483_v2 }
 0xf95   : > { %v6680_v17 = vpop.xlane.xlu0 %6679 }
 0xf96   : > { %v6715_v52 = vmul.f32 0.0078125, %v6680_v17 }
 0xf97   : > { %v6682_v36 = vpop.xlane.xlu1 %6681 }
 0xf98   : > { %v15202_v12 = vsub.f32 %v15052_v40, %v6715_v52  ;;  %v6716_v23 = vmul.f32 0.0078125, %v6682_v36  ;;  %v10484_v52 = vld [vmem:[%s12170_s4 + $0x60] sm:$0xff]  }
 0xf99   : > { %v6804_v62 = vpop.xlane.xlu0 %6803  ;;  %v10485_v36 = vld [vmem:[%s12170_s4 + $0x20] sm:$0xff]   ;;  %9265 = vmatprep.subr.bf16.mxu0 %v10484_v52 }
 0xf9a   : > { %v15205_v6 = vsub.f32 %v15058_v31, %v6716_v23  ;;  %v6857_v37 = vmul.f32 0.0078125, %v6804_v62  ;;  %v6779_v16 = vmul.f32 %v15202_v12, %v15202_v12  ;;  %9266 = vmatpush3.bf16.msra.mxu0 %v10485_v36 }
 0xf9b   : > { %v6806_v58 = vpop.xlane.xlu1 %6805 }
 0xf9c   : > { %v6889_v35 = vadd.f32 1e-05, %v6857_v37  ;;  %v6858_v20 = vmul.f32 0.0078125, %v6806_v58  ;;  %6839 = vadd.xlane.f32.xlu0 %v6779_v16  ;;  %v6780_v26 = vmul.f32 %v15205_v6, %v15205_v6  ;;  %v10486_v58 = vld [vmem:[%s12170_s4 + $0x68] sm:$0xff]  }
 0xf9d   : > { %v6684_v28 = vpop.xlane.xlu0 %6683  ;;  %9267 = vmatprep.subr.bf16.mxu0 %v10486_v58 }
 0xf9e   : > { %11088 = vrsqrt.f32 %v6889_v35  ;;  %v6890_v50 = vadd.f32 1e-05, %v6858_v20  ;;  %v6717_v17 = vmul.f32 0.0078125, %v6684_v28  ;;  %6841 = vadd.xlane.f32.xlu1 %v6780_v26  ;;  %v10487_v35 = vld [vmem:[%s12170_s4 + $0x28] sm:$0xff]  }
 0xf9f   : > { %v6686_v55 = vpop.xlane.xlu1 %6685  ;;  %9268 = vmatpush3.bf16.msra.mxu0 %v10487_v35 }
 0xfa0   : > { %11090 = vrsqrt.f32 %v6890_v50  ;;  %v15216_v5 = vsub.f32 %v15070_v38, %v6717_v17  ;;  %v6718_v23 = vmul.f32 0.0078125, %v6686_v55  ;;  %v10488_v55 = vld [vmem:[%s12170_s4 + $0x70] sm:$0xff]  }
 0xfa1   : > { %v6808_v62 = vpop.xlane.xlu0 %6807  ;;  %9269 = vmatprep.subr.bf16.mxu0 %v10488_v55 }
 0xfa2   : > { %v15219_v37 = vsub.f32 %v15076_v0, %v6718_v23  ;;  %v6859_v16 = vmul.f32 0.0078125, %v6808_v62  ;;  %v6781_v15 = vmul.f32 %v15216_v5, %v15216_v5  ;;  %v10489_v23 = vld [vmem:[%s12170_s4 + $0x30] sm:$0xff]  }
 0xfa3   : > { %v6810_v2 = vpop.xlane.xlu1 %6809  ;;  %9270 = vmatpush3.bf16.msra.mxu0 %v10489_v23 }
 0xfa4   : > { %v6891_v20 = vadd.f32 1e-05, %v6859_v16  ;;  %v6860_v26 = vmul.f32 0.0078125, %v6810_v2  ;;  %6843 = vadd.xlane.f32.xlu0 %v6781_v15  ;;  %v6782_v28 = vmul.f32 %v15219_v37, %v15219_v37 }
 0xfa5   : > { %v6812_v50 = vpop.xlane.xlu0 %6811 }
 0xfa6   : > { %11092 = vrsqrt.f32 %v6891_v20  ;;  %v6892_v17 = vadd.f32 1e-05, %v6860_v26  ;;  %v6861_v52 = vmul.f32 0.0078125, %v6812_v50  ;;  %6845 = vadd.xlane.f32.xlu1 %v6782_v28  ;;  %v10490_v20 = vld [vmem:[%s12170_s4 + $0x78] sm:$0xff]  }
 0xfa7   : > { %v6814_v36 = vpop.xlane.xlu1 %6813  ;;  %v10491_v50 = vld [vmem:[%s12170_s4 + $0x38] sm:$0xff]   ;;  %9271 = vmatprep.subr.bf16.mxu0 %v10490_v20 }
 0xfa8   : > { %v11089_v62 = vpop.eup %11088  ;;  %11094 = vrsqrt.f32 %v6892_v17  ;;  %v6893_v16 = vadd.f32 1e-05, %v6861_v52  ;;  %v6862_v2 = vmul.f32 0.0078125, %v6814_v36  ;;  %9272 = vmatpush3.bf16.msra.mxu0 %v10491_v50 }
 0xfa9   : > { %v6953_v15 = vmul.f32 %v11089_v62, %v15049_v46 }
 0xfaa   : > { %v11091_v58 = vpop.eup %11090  ;;  %11096 = vrsqrt.f32 %v6893_v16  ;;  %v6894_v35 = vadd.f32 1e-05, %v6862_v2 }
 0xfab   : > { %v6954_v26 = vmul.f32 %v11091_v58, %v15055_v34  ;;  %v6991_v28 = vmul.f32 %v15125_v54, %v6953_v15 }
 0xfac   : > { %11098 = vrsqrt.f32 %v6894_v35  ;;  %v6816_v0 = vpop.xlane.xlu0 %6815 }
 0xfad   : > { %v6863_v38 = vmul.f32 0.0078125, %v6816_v0  ;;  %v6992_v17 = vmul.f32 %v15125_v54, %v6954_v26  ;;  %v7029_v36 = vadd.f32 %v15141_v11, %v6991_v28 }
 0xfae   : > { %v6818_v52 = vpop.xlane.xlu1 %6817 }
 0xfaf   : > { %v6895_v55 = vadd.f32 1e-05, %v6863_v38  ;;  %v6864_v46 = vmul.f32 0.0078125, %v6818_v52  ;;  %v7030_v23 = vadd.f32 %v15141_v11, %v6992_v17 }
 0xfb0   : > { %v11093_v62 = vpop.eup %11092  ;;  %v6820_v16 = vpop.xlane.xlu0 %6819 }
 0xfb1   : > { %v6896_v34 = vadd.f32 1e-05, %v6864_v46  ;;  %v7056_v2 = vpack.c.bf16 %v7030_v23, %v7029_v36  ;;  %11100 = vrsqrt.f32 %v6895_v55  ;;  %v6865_v58 = vmul.f32 0.0078125, %v6820_v16 }
 0xfb2   : > { %v11095_v15 = vpop.eup %11094  ;;  %v6822_v35 = vpop.xlane.xlu1 %6821  ;;  %v6955_v0 = vmul.f32 %v11093_v62, %v15067_v29 }
 0xfb3   : > { %11102 = vrsqrt.f32 %v6896_v34  ;;  %v6866_v20 = vmul.f32 0.0078125, %v6822_v35  ;;  %7258 = vmatmul.mubr.bf16.gmra.mrb[212].mxu1 %v7056_v2  ;;  %v6956_v38 = vmul.f32 %v11095_v15, %v15073_v21  ;;  %v6897_v46 = vadd.f32 1e-05, %v6865_v58 }
 0xfb4   : > { %v11097_v26 = vpop.eup %11096  ;;  %7267 = vmatprep.mubr.bf16.mxu1 %v16584_v43  ;;  %v6993_v28 = vmul.f32 %v15125_v54, %v6955_v0 }
 0xfb5   : > { %v6898_v50 = vadd.f32 1e-05, %v6866_v20  ;;  %v6994_v17 = vmul.f32 %v15125_v54, %v6956_v38  ;;  %v6957_v29 = vmul.f32 %v11097_v26, %v15080_v56 }
 0xfb6   : > { %v11099_v52 = vpop.eup %11098  ;;  %v7031_v55 = vadd.f32 %v15141_v11, %v6993_v28 }
 0xfb7   : > { %v7032_v36 = vadd.f32 %v15141_v11, %v6994_v17  ;;  %v6958_v23 = vmul.f32 %v11099_v52, %v15086_v45  ;;  %11104 = vrsqrt.f32 %v6898_v50  ;;  %v6995_v58 = vmul.f32 %v15125_v54, %v6957_v29 }
 0xfb8   : > { %v6824_v21 = vpop.xlane.xlu0 %6823  ;;  %11106 = vrsqrt.f32 %v6897_v46 }
 0xfb9   : > { %v7057_v62 = vpack.c.bf16 %v7032_v36, %v7031_v55  ;;  %v6996_v16 = vmul.f32 %v15125_v54, %v6958_v23  ;;  %v6867_v34 = vmul.f32 0.0078125, %v6824_v21  ;;  %v7033_v26 = vadd.f32 %v15141_v11, %v6995_v58 }
 0xfba   : > { %v6826_v2 = vpop.xlane.xlu1 %6825 }
 0xfbb   : > { %v6868_v15 = vmul.f32 0.0078125, %v6826_v2  ;;  %7268 = vmatmul.mubr.bf16.gmra.mrb[216].mxu1 %v7057_v62  ;;  %v11101_v35 = vpop.eup %11100  ;;  %v7034_v56 = vadd.f32 %v15141_v11, %v6996_v16  ;;  %v6899_v45 = vadd.f32 1e-05, %v6867_v34 }
 0xfbc   : > { %7277 = vmatprep.mubr.bf16.mxu1 %v16584_v43  ;;  %v6959_v28 = vmul.f32 %v11101_v35, %v15095_v9 }
 0xfbd   : > { %v11103_v0 = vpop.eup %11102  ;;  %v6900_v20 = vadd.f32 1e-05, %v6868_v15  ;;  %v7058_v17 = vpack.c.bf16 %v7034_v56, %v7033_v26 }
 0xfbe   : > { %v6960_v38 = vmul.f32 %v11103_v0, %v15098_v13  ;;  %v6997_v23 = vmul.f32 %v15125_v54, %v6959_v28 }
 0xfbf   : > { %11108 = vrsqrt.f32 %v6900_v20 }
 0xfc0   : > { %v6828_v50 = vpop.xlane.xlu0 %6827  ;;  %v6998_v52 = vmul.f32 %v15125_v54, %v6960_v38  ;;  %11110 = vrsqrt.f32 %v6899_v45  ;;  %v7035_v34 = vadd.f32 %v15141_v11, %v6997_v23 }
 0xfc1   : > { %v11105_v46 = vpop.eup %11104  ;;  %v6869_v55 = vmul.f32 0.0078125, %v6828_v50 }
 0xfc2   : > { %v6830_v36 = vpop.xlane.xlu1 %6829  ;;  %v11107_v21 = vpop.eup %11106  ;;  %v7036_v62 = vadd.f32 %v15141_v11, %v6998_v52  ;;  %v6962_v9 = vmul.f32 %v11105_v46, %v15108_v48 }
 0xfc3   : > { %v6870_v29 = vmul.f32 0.0078125, %v6830_v36  ;;  %7278 = vmatmul.mubr.bf16.gmra.mrb[220].mxu1 %v7058_v17  ;;  %v6901_v16 = vadd.f32 1e-05, %v6869_v55  ;;  %v6961_v2 = vmul.f32 %v11107_v21, %v15103_v59 }
 0xfc4   : > { %7287 = vmatprep.mubr.bf16.mxu1 %v16584_v43  ;;  %v7059_v15 = vpack.c.bf16 %v7036_v62, %v7035_v34  ;;  %v7000_v58 = vmul.f32 %v15125_v54, %v6962_v9 }
 0xfc5   : > { %v6902_v13 = vadd.f32 1e-05, %v6870_v29  ;;  %v6999_v0 = vmul.f32 %v15125_v54, %v6961_v2 }
 0xfc6   : > { %v7038_v56 = vadd.f32 %v15141_v11, %v7000_v58 }
 0xfc7   : > { %11112 = vrsqrt.f32 %v6902_v13  ;;  %v7037_v45 = vadd.f32 %v15141_v11, %v6999_v0 }
 0xfc8   : > { %11114 = vrsqrt.f32 %v6901_v16 }
 0xfc9   : > { %v11109_v35 = vpop.eup %11108  ;;  %v7060_v38 = vpack.c.bf16 %v7038_v56, %v7037_v45 }
 0xfca   : > { %v11111_v20 = vpop.eup %11110  ;;  %v6964_v48 = vmul.f32 %v11109_v35, %v15118_v30 }
 0xfcb   : > { %7288 = vmatmul.mubr.bf16.gmra.mrb[224].mxu1 %v7059_v15  ;;  %v6963_v59 = vmul.f32 %v11111_v20, %v15115_v1 }
 0xfcc   : > { %7297 = vmatprep.mubr.bf16.mxu1 %v16584_v43  ;;  %v7002_v26 = vmul.f32 %v15125_v54, %v6964_v48 }
 0xfcd   : > { %v7001_v50 = vmul.f32 %v15125_v54, %v6963_v59 }
 0xfce   : > { %v7040_v52 = vadd.f32 %v15141_v11, %v7002_v26 }
 0xfcf   : > { %v7039_v30 = vadd.f32 %v15141_v11, %v7001_v50 }
 0xfd1   : > { %v11113_v28 = vpop.eup %11112  ;;  %v7061_v36 = vpack.c.bf16 %v7040_v52, %v7039_v30 }
 0xfd2   : > { %v11115_v17 = vpop.eup %11114  ;;  %v6966_v46 = vmul.f32 %v11113_v28, %v15132_v19 }
 0xfd3   : > { %7298 = vmatmul.mubr.bf16.gmra.mrb[228].mxu1 %v7060_v38  ;;  %v6965_v55 = vmul.f32 %v11115_v17, %v15128_v63 }
 0xfd4   : > { %7307 = vmatprep.mubr.bf16.mxu1 %v16584_v43  ;;  %v7004_v1 = vmul.f32 %v15125_v54, %v6966_v46 }
 0xfd5   : > { %v7003_v21 = vmul.f32 %v15125_v54, %v6965_v55 }
 0xfd6   : > { %v7042_v16 = vadd.f32 %v15141_v11, %v7004_v1 }
 0xfd7   : > { %v7041_v34 = vadd.f32 %v15141_v11, %v7003_v21 }
 0xfd9   : > { %v7062_v63 = vpack.c.bf16 %v7042_v16, %v7041_v34 }
 0xfda   : > { %v6832_v29 = vpop.xlane.xlu0 %6831 }
 0xfdb   : > { %7308 = vmatmul.mubr.bf16.gmra.mrb[232].mxu1 %v7061_v36  ;;  %v6871_v23 = vmul.f32 0.0078125, %v6832_v29 }
 0xfdc   : > { %v6834_v13 = vpop.xlane.xlu1 %6833  ;;  %7317 = vmatprep.mubr.bf16.mxu1 %v16584_v43 }
 0xfdd   : > { %v6903_v62 = vadd.f32 1e-05, %v6871_v23  ;;  %v6872_v9 = vmul.f32 0.0078125, %v6834_v13  ;;  %v7085_v23 = vlaneseq  ;;  %v7083_v13 = vld [vmem:[%s12168_s28] sm:$0x3] }
 0xfdf   : > { %11116 = vrsqrt.f32 %v6903_v62  ;;  %v6904_v19 = vadd.f32 1e-05, %v6872_v9 }
 0xfe1   : > { %11118 = vrsqrt.f32 %v6904_v19 }
 0xfe2   : > { %v6836_v2 = vpop.xlane.xlu0 %6835 }
 0xfe3   : > { %7318 = vmatmul.mubr.bf16.gmra.mrb[236].mxu1 %v7062_v63  ;;  %v6873_v15 = vmul.f32 0.0078125, %v6836_v2 }
 0xfe4   : > { %v6838_v58 = vpop.xlane.xlu1 %6837  ;;  %7327 = vmatprep.mubr.bf16.mxu1 %v16584_v43 }
 0xfe5   : > { %v6905_v35 = vadd.f32 1e-05, %v6873_v15  ;;  %v6874_v0 = vmul.f32 0.0078125, %v6838_v58 }
 0xfe7   : > { %11120 = vrsqrt.f32 %v6905_v35  ;;  %v6906_v20 = vadd.f32 1e-05, %v6874_v0 }
 0xfe9   : > { %v11117_v56 = vpop.eup %11116  ;;  %11122 = vrsqrt.f32 %v6906_v20 }
 0xfea   : > { %v6967_v48 = vmul.f32 %v11117_v56, %v15161_v25 }
 0xfeb   : > { %v11119_v45 = vpop.eup %11118 }
 0xfec   : > { %v6968_v59 = vmul.f32 %v11119_v45, %v15164_v44  ;;  %v7005_v38 = vmul.f32 %v15125_v54, %v6967_v48 }
 0xfee   : > { %v7006_v26 = vmul.f32 %v15125_v54, %v6968_v59  ;;  %v7043_v28 = vadd.f32 %v15141_v11, %v7005_v38 }
 0xff0   : > { %v7044_v50 = vadd.f32 %v15141_v11, %v7006_v26 }
 0xff1   : > { %v11121_v17 = vpop.eup %11120 }
 0xff2   : > { %v7063_v52 = vpack.c.bf16 %v7044_v50, %v7043_v28  ;;  %v6969_v46 = vmul.f32 %v11121_v17, %v15172_v4  ;;  %v7086_v4 = vshrl.u32 %v7085_v23, 7 }
 0xff3   : > { %v11123_v30 = vpop.eup %11122 }
 0xff4   : > { %7328 = vmatmul.mubr.bf16.gmra.mrb[240].mxu1 %v7063_v52  ;;  %v6970_v25 = vmul.f32 %v11123_v30, %v15175_v41  ;;  %v7007_v55 = vmul.f32 %v15125_v54, %v6969_v46  ;;  %v7087_v21 = vsub.s32 0, %v7086_v4  ;;  %v7091_v62 = vsub.s32 1, %v7086_v4 }
 0xff5   : > { %7337 = vmatprep.mubr.bf16.mxu1 %v16584_v43 }
 0xff6   : > { %v7008_v44 = vmul.f32 %v15125_v54, %v6970_v25  ;;  %v7045_v36 = vadd.f32 %v15141_v11, %v7007_v55  ;;  %v15295_v41 = vrot.slane %v7083_v13, %v7087_v21  ;;  %v15297_v9 = vrot.slane %v7083_v13, %v7091_v62 }
 0xff8   : > { %v7046_v1 = vadd.f32 %v15141_v11, %v7008_v44 }
 0xffa   : > { %v7064_v29 = vpack.c.bf16 %v7046_v1, %v7045_v36 }
 0xffc   : > { %7338 = vmatmul.mubr.bf16.gmra.mrb[244].mxu1 %v7064_v29 }
 0xffd   : > { %7347 = vmatprep.mubr.bf16.mxu1 %v16584_v43 }
0x100d   : > { %v7209_v16 = vpop.f32.mrb[192].mxu1 }
0x100e   : > { %v15300_v54 = vadd.f32 %v7209_v16, %v15295_v41  ;;  %v7211_v19 = vpop.f32.mrb[193].mxu1 }
0x100f   : > { %v15303_v11 = vadd.f32 %v7211_v19, %v15297_v9  ;;  %v7213_v34 = vpop.f32.mrb[194].mxu1 }
0x1010   : > { %v7432_v63 = vmul.f32 0.044715, %v15300_v54  ;;  %v15307_v2 = vadd.f32 %v7213_v34, %v15295_v41  ;;  %v7215_v15 = vpop.f32.mrb[195].mxu1 }
0x1011   : > { %v7433_v58 = vmul.f32 0.044715, %v15303_v11  ;;  %v15311_v35 = vadd.f32 %v7215_v15, %v15297_v9 }
0x1012   : > { %v7496_v0 = vmul.f32 %v7432_v63, %v15300_v54  ;;  %v7434_v20 = vmul.f32 0.044715, %v15307_v2 }
0x1013   : > { %v7497_v56 = vmul.f32 %v7433_v58, %v15303_v11  ;;  %v7435_v48 = vmul.f32 0.044715, %v15311_v35 }
0x1014   : > { %v7560_v45 = vmul.f32 %v7496_v0, %v15300_v54  ;;  %v7498_v59 = vmul.f32 %v7434_v20, %v15307_v2 }
0x1015   : > { %v7561_v38 = vmul.f32 %v7497_v56, %v15303_v11  ;;  %v7499_v26 = vmul.f32 %v7435_v48, %v15311_v35  ;;  %v7219_v28 = vpop.f32.mrb[196].mxu1 }
0x1016   : > { %v7624_v50 = vadd.f32 %v7560_v45, %v15300_v54  ;;  %v7562_v17 = vmul.f32 %v7498_v59, %v15307_v2  ;;  %v15324_v52 = vadd.f32 %v7219_v28, %v15295_v41  ;;  %v7221_v46 = vpop.f32.mrb[197].mxu1 }
0x1017   : > { %v7563_v30 = vmul.f32 %v7499_v26, %v15311_v35  ;;  %v15328_v25 = vadd.f32 %v7221_v46, %v15297_v9  ;;  %v7223_v55 = vpop.f32.mrb[198].mxu1  ;;  %v7625_v44 = vadd.f32 %v7561_v38, %v15303_v11 }
0x1018   : > { %v7688_v36 = vmul.f32 0.7978846, %v7624_v50  ;;  %v7626_v1 = vadd.f32 %v7562_v17, %v15307_v2  ;;  %v7436_v29 = vmul.f32 0.044715, %v15324_v52  ;;  %v15334_v23 = vadd.f32 %v7223_v55, %v15295_v41  ;;  %v7225_v4 = vpop.f32.mrb[199].mxu1 }
0x1019   : > { %v7437_v21 = vmul.f32 0.044715, %v15328_v25  ;;  %v15338_v13 = vadd.f32 %v7225_v4, %v15297_v9  ;;  %v7627_v62 = vadd.f32 %v7563_v30, %v15311_v35  ;;  %v7689_v16 = vmul.f32 0.7978846, %v7625_v44 }
0x101a   : > { %11124 = vtanh.f32 %v7688_v36  ;;  %v7690_v19 = vmul.f32 0.7978846, %v7626_v1  ;;  %v7500_v34 = vmul.f32 %v7436_v29, %v15324_v52  ;;  %v7438_v63 = vmul.f32 0.044715, %v15334_v23 }
0x101b   : > { %v7501_v15 = vmul.f32 %v7437_v21, %v15328_v25  ;;  %v7439_v58 = vmul.f32 0.044715, %v15338_v13  ;;  %v7691_v0 = vmul.f32 0.7978846, %v7627_v62  ;;  %11126 = vtanh.f32 %v7689_v16 }
0x101c   : > { %11128 = vtanh.f32 %v7690_v19  ;;  %v7564_v20 = vmul.f32 %v7500_v34, %v15324_v52  ;;  %v7502_v56 = vmul.f32 %v7438_v63, %v15334_v23 }
0x101d   : > { %v7565_v48 = vmul.f32 %v7501_v15, %v15328_v25  ;;  %v7503_v45 = vmul.f32 %v7439_v58, %v15338_v13  ;;  %v7229_v59 = vpop.f32.mrb[200].mxu1  ;;  %11130 = vtanh.f32 %v7691_v0 }
0x101e   : > { %v7566_v38 = vmul.f32 %v7502_v56, %v15334_v23  ;;  %v15351_v26 = vadd.f32 %v7229_v59, %v15295_v41  ;;  %v7231_v28 = vpop.f32.mrb[201].mxu1  ;;  %v7628_v55 = vadd.f32 %v7564_v20, %v15324_v52 }
0x101f   : > { %v7567_v50 = vmul.f32 %v7503_v45, %v15338_v13  ;;  %v15355_v17 = vadd.f32 %v7231_v28, %v15297_v9  ;;  %v7233_v46 = vpop.f32.mrb[202].mxu1  ;;  %v7629_v30 = vadd.f32 %v7565_v48, %v15328_v25  ;;  %v7368_v48 = vmul.f32 0.5, %v15300_v54 }
0x1020   : > { %v7440_v44 = vmul.f32 0.044715, %v15351_v26  ;;  %v15361_v36 = vadd.f32 %v7233_v46, %v15295_v41  ;;  %v7235_v1 = vpop.f32.mrb[203].mxu1  ;;  %v7630_v29 = vadd.f32 %v7566_v38, %v15334_v23  ;;  %v7692_v63 = vmul.f32 0.7978846, %v7628_v55 }
0x1021   : > { %v7441_v4 = vmul.f32 0.044715, %v15355_v17  ;;  %v15366_v21 = vadd.f32 %v7235_v1, %v15297_v9  ;;  %v7631_v62 = vadd.f32 %v7567_v50, %v15338_v13  ;;  %v7693_v16 = vmul.f32 0.7978846, %v7629_v30 }
0x1022   : > { %v7504_v19 = vmul.f32 %v7440_v44, %v15351_v26  ;;  %v7442_v34 = vmul.f32 0.044715, %v15361_v36  ;;  %v7694_v15 = vmul.f32 0.7978846, %v7630_v29  ;;  %v7369_v44 = vmul.f32 0.5, %v15303_v11 }
0x1023   : > { %v7505_v58 = vmul.f32 %v7441_v4, %v15355_v17  ;;  %v7443_v0 = vmul.f32 0.044715, %v15366_v21  ;;  %v7695_v20 = vmul.f32 0.7978846, %v7631_v62  ;;  %11132 = vtanh.f32 %v7693_v16 }
0x1024   : > { %v11125_v56 = vpop.eup %11124  ;;  %v7568_v45 = vmul.f32 %v7504_v19, %v15351_v26  ;;  %v7506_v59 = vmul.f32 %v7442_v34, %v15361_v36  ;;  %11134 = vtanh.f32 %v7692_v63  ;;  %v7370_v29 = vmul.f32 0.5, %v15307_v2 }
0x1025   : > { %v11127_v38 = vpop.eup %11126  ;;  %v7569_v28 = vmul.f32 %v7505_v58, %v15355_v17  ;;  %v7507_v50 = vmul.f32 %v7443_v0, %v15366_v21  ;;  %v7816_v46 = vadd.f32 1.0, %v11125_v56  ;;  %11136 = vtanh.f32 %v7695_v20 }
0x1026   : > { %v11129_v30 = vpop.eup %11128  ;;  %v7570_v55 = vmul.f32 %v7506_v59, %v15361_v36  ;;  %v7817_v1 = vadd.f32 1.0, %v11127_v38  ;;  %11138 = vtanh.f32 %v7694_v15  ;;  %v7371_v19 = vmul.f32 0.5, %v15311_v35 }
0x1027   : > { %v11131_v54 = vpop.eup %11130  ;;  %v7571_v4 = vmul.f32 %v7507_v50, %v15366_v21  ;;  %v7818_v62 = vadd.f32 1.0, %v11129_v30  ;;  %v7633_v16 = vadd.f32 %v7569_v28, %v15355_v17  ;;  %v7880_v63 = vmul.f32 %v7816_v46, %v7368_v48 }
0x1028   : > { %v7819_v34 = vadd.f32 1.0, %v11131_v54  ;;  %v7632_v58 = vadd.f32 %v7568_v45, %v15351_v26  ;;  %v7634_v15 = vadd.f32 %v7570_v55, %v15361_v36  ;;  %v7881_v2 = vmul.f32 %v7817_v1, %v7369_v44 }
0x1029   : > { %v6840_v0 = vpop.xlane.xlu0 %6839  ;;  %v7882_v20 = vmul.f32 %v7818_v62, %v7370_v29  ;;  %v7635_v11 = vadd.f32 %v7571_v4, %v15366_v21  ;;  %v7697_v56 = vmul.f32 0.7978846, %v7633_v16  ;;  %v7373_v16 = vmul.f32 0.5, %v15328_v25 }
0x102a   : > { %v6875_v59 = vmul.f32 0.0078125, %v6840_v0  ;;  %v7883_v38 = vmul.f32 %v7819_v34, %v7371_v19  ;;  %v7696_v50 = vmul.f32 0.7978846, %v7632_v58  ;;  %v7698_v35 = vmul.f32 0.7978846, %v7634_v15 }
0x102b   : > { %v6842_v30 = vpop.xlane.xlu1 %6841  ;;  %v7944_v31 = vpack.c.bf16 %v7882_v20, %v7880_v63  ;;  %v7699_v28 = vmul.f32 0.7978846, %v7635_v11  ;;  %11140 = vtanh.f32 %v7697_v56  ;;  %v7375_v19 = vmul.f32 0.5, %v15338_v13 }
0x102c   : > { %v6907_v54 = vadd.f32 1e-05, %v6875_v59  ;;  %v6876_v48 = vmul.f32 0.0078125, %v6842_v30  ;;  %v7945_v46 = vpack.c.bf16 %v7883_v38, %v7881_v2  ;;  %11142 = vtanh.f32 %v7696_v50 }
0x102d   : > { %v11133_v45 = vpop.eup %11132  ;;  %11144 = vtanh.f32 %v7699_v28  ;;  %v7372_v58 = vmul.f32 0.5, %v15324_v52  ;;  %v7374_v0 = vmul.f32 0.5, %v15334_v23 }
0x102e   : > { %v11135_v29 = vpop.eup %11134  ;;  %11146 = vrsqrt.f32 %v6907_v54  ;;  %v6908_v4 = vadd.f32 1e-05, %v6876_v48  ;;  %8143 = vmatprep.mubr.bf16.mxu0 %v7945_v46  ;;  %v7821_v55 = vadd.f32 1.0, %v11133_v45  ;;  %v7377_v48 = vmul.f32 0.5, %v15355_v17 }
0x102f   : > { %v11137_v62 = vpop.eup %11136  ;;  %8144 = vmatmul.mubr.bf16.vlgmr.msra.gmra.mrb[192].mxu0 %v7944_v31  ;;  %v7820_v44 = vadd.f32 1.0, %v11135_v29  ;;  %11148 = vtanh.f32 %v7698_v35  ;;  %v7379_v46 = vmul.f32 0.5, %v15366_v21  ;;  %v7376_v45 = vmul.f32 0.5, %v15351_v26 }
0x1030   : > { %v11139_v1 = vpop.eup %11138  ;;  %11150 = vrsqrt.f32 %v6908_v4  ;;  %v7823_v34 = vadd.f32 1.0, %v11137_v62  ;;  %v7885_v56 = vmul.f32 %v7821_v55, %v7373_v16 }
0x1031   : > { %v6844_v63 = vpop.xlane.xlu0 %6843  ;;  %v7822_v20 = vadd.f32 1.0, %v11139_v1  ;;  %v7884_v31 = vmul.f32 %v7820_v44, %v7372_v58  ;;  %v7378_v1 = vmul.f32 0.5, %v15361_v36 }
0x1032   : > { %v6877_v11 = vmul.f32 0.0078125, %v6844_v63  ;;  %v7887_v15 = vmul.f32 %v7823_v34, %v7375_v19 }
0x1033   : > { %v6846_v59 = vpop.xlane.xlu1 %6845  ;;  %v7886_v2 = vmul.f32 %v7822_v20, %v7374_v0 }
0x1034   : > { %v6909_v38 = vadd.f32 1e-05, %v6877_v11  ;;  %v6878_v50 = vmul.f32 0.0078125, %v6846_v59  ;;  %v7947_v30 = vpack.c.bf16 %v7887_v15, %v7885_v56 }
0x1035   : > { %v11141_v28 = vpop.eup %11140  ;;  %v7946_v25 = vpack.c.bf16 %v7886_v2, %v7884_v31  ;;  %v11300_v31 = vld [vmem:[%s12196_s25] ss:$0 sm:$0xff] }
0x1036   : > { %v11143_v35 = vpop.eup %11142  ;;  %11152 = vrsqrt.f32 %v6909_v38  ;;  %v6910_v13 = vadd.f32 1e-05, %v6878_v50  ;;  %8151 = vmatprep.mubr.bf16.mxu0 %v7947_v30  ;;  %v7825_v54 = vadd.f32 1.0, %v11141_v28 }
0x1037   : > { %v11145_v52 = vpop.eup %11144  ;;  %8152 = vmatmul.mubr.bf16.gmra.mrb[196].mxu0 %v7946_v25  ;;  %v7239_v23 = vpop.f32.mrb[204].mxu1  ;;  %v7824_v29 = vadd.f32 1.0, %v11143_v35 }
0x1038   : > { %v11147_v4 = vpop.eup %11146  ;;  %11154 = vrsqrt.f32 %v6910_v13  ;;  %v15395_v55 = vadd.f32 %v7239_v23, %v15295_v41  ;;  %v7241_v62 = vpop.f32.mrb[205].mxu1  ;;  %v7827_v44 = vadd.f32 1.0, %v11145_v52  ;;  %v7889_v34 = vmul.f32 %v7825_v54, %v7377_v48 }
0x1039   : > { %v11149_v16 = vpop.eup %11148  ;;  %v15399_v19 = vadd.f32 %v7241_v62, %v15297_v9  ;;  %v7243_v17 = vpop.f32.mrb[206].mxu1  ;;  %v7888_v21 = vmul.f32 %v7824_v29, %v7376_v45  ;;  %v6971_v26 = vmul.f32 %v11147_v4, %v15202_v12 }
0x103a   : > { %v11151_v63 = vpop.eup %11150  ;;  %v7444_v58 = vmul.f32 0.044715, %v15395_v55  ;;  %v15404_v0 = vadd.f32 %v7243_v17, %v15295_v41  ;;  %v7245_v20 = vpop.f32.mrb[207].mxu1  ;;  %v7891_v11 = vmul.f32 %v7827_v44, %v7379_v46  ;;  %v7826_v56 = vadd.f32 1.0, %v11149_v16  ;;  %v11301_v46 = vld [vmem:[%s12202_s23] ss:$0 sm:$0xff] }
0x103b   : > { %v7445_v36 = vmul.f32 0.044715, %v15399_v19  ;;  %v15408_v15 = vadd.f32 %v7245_v20, %v15297_v9  ;;  %v6972_v59 = vmul.f32 %v11151_v63, %v15205_v6  ;;  %v7009_v2 = vmul.f32 %v11300_v31, %v6971_v26 }
0x103c   : > { %v7508_v12 = vmul.f32 %v7444_v58, %v15395_v55  ;;  %v7446_v38 = vmul.f32 0.044715, %v15404_v0  ;;  %v7949_v50 = vpack.c.bf16 %v7891_v11, %v7889_v34  ;;  %v7890_v30 = vmul.f32 %v7826_v56, %v7378_v1 }
0x103d   : > { %v7509_v28 = vmul.f32 %v7445_v36, %v15399_v19  ;;  %v7447_v25 = vmul.f32 0.044715, %v15408_v15  ;;  %v7010_v35 = vmul.f32 %v11300_v31, %v6972_v59  ;;  %v7047_v45 = vadd.f32 %v11301_v46, %v7009_v2 }
0x103e   : > { %v7572_v13 = vmul.f32 %v7508_v12, %v15395_v55  ;;  %v7510_v54 = vmul.f32 %v7446_v38, %v15404_v0  ;;  %8159 = vmatprep.mubr.bf16.mxu0 %v7949_v50  ;;  %v7948_v6 = vpack.c.bf16 %v7890_v30, %v7888_v21 }
0x103f   : > { %v7573_v52 = vmul.f32 %v7509_v28, %v15399_v19  ;;  %v7511_v23 = vmul.f32 %v7447_v25, %v15408_v15  ;;  %v7249_v48 = vpop.f32.mrb[208].mxu1  ;;  %v7048_v29 = vadd.f32 %v11301_v46, %v7010_v35 }
0x1040   : > { %v11153_v4 = vpop.eup %11152  ;;  %v7574_v62 = vmul.f32 %v7510_v54, %v15404_v0  ;;  %8160 = vmatmul.mubr.bf16.gmra.mrb[200].mxu0 %v7948_v6  ;;  %v15423_v44 = vadd.f32 %v7249_v48, %v15295_v41  ;;  %v7251_v1 = vpop.f32.mrb[209].mxu1  ;;  %v7636_v36 = vadd.f32 %v7572_v13, %v15395_v55 }
0x1041   : > { %v7575_v16 = vmul.f32 %v7511_v23, %v15408_v15  ;;  %v15427_v17 = vadd.f32 %v7251_v1, %v15297_v9  ;;  %v7253_v34 = vpop.f32.mrb[210].mxu1  ;;  %v7065_v21 = vpack.c.bf16 %v7048_v29, %v7047_v45  ;;  %v6973_v26 = vmul.f32 %v11153_v4, %v15216_v5 }
0x1042   : > { %v11155_v63 = vpop.eup %11154  ;;  %v7448_v58 = vmul.f32 0.044715, %v15423_v44  ;;  %v15432_v20 = vadd.f32 %v7253_v34, %v15295_v41  ;;  %v7255_v11 = vpop.f32.mrb[211].mxu1  ;;  %v7637_v56 = vadd.f32 %v7573_v52, %v15399_v19  ;;  %v7638_v45 = vadd.f32 %v7574_v62, %v15404_v0 }
0x1043   : > { %v7449_v59 = vmul.f32 0.044715, %v15427_v17  ;;  %v15438_v2 = vadd.f32 %v7255_v11, %v15297_v9  ;;  %7348 = vmatmul.mubr.bf16.gmra.mrb[248].mxu1 %v7065_v21  ;;  %v6974_v12 = vmul.f32 %v11155_v63, %v15219_v37  ;;  %v7011_v5 = vmul.f32 %v11300_v31, %v6973_v26 }
0x1044   : > { %v7512_v38 = vmul.f32 %v7448_v58, %v15423_v44  ;;  %v7450_v50 = vmul.f32 0.044715, %v15432_v20  ;;  %7357 = vmatprep.mubr.bf16.mxu1 %v16584_v43  ;;  %v7639_v30 = vadd.f32 %v7575_v16, %v15408_v15  ;;  %v7701_v28 = vmul.f32 0.7978846, %v7637_v56 }
0x1045   : > { %v7513_v25 = vmul.f32 %v7449_v59, %v15427_v17  ;;  %v7451_v35 = vmul.f32 0.044715, %v15438_v2  ;;  %v7012_v13 = vmul.f32 %v11300_v31, %v6974_v12  ;;  %v7049_v54 = vadd.f32 %v11301_v46, %v7011_v5 }
0x1046   : > { %v7576_v6 = vmul.f32 %v7512_v38, %v15423_v44  ;;  %v7514_v37 = vmul.f32 %v7450_v50, %v15432_v20  ;;  %v7703_v52 = vmul.f32 0.7978846, %v7639_v30  ;;  %11156 = vtanh.f32 %v7701_v28 }
0x1047   : > { %v7577_v23 = vmul.f32 %v7513_v25, %v15427_v17  ;;  %v7515_v48 = vmul.f32 %v7451_v35, %v15438_v2  ;;  %v7050_v43 = vadd.f32 %v11301_v46, %v7012_v13  ;;  %v7700_v4 = vmul.f32 0.7978846, %v7636_v36 }
0x1048   : > { %v7578_v29 = vmul.f32 %v7514_v37, %v15432_v20  ;;  %11158 = vtanh.f32 %v7703_v52  ;;  %v7702_v16 = vmul.f32 0.7978846, %v7638_v45  ;;  %v7640_v26 = vadd.f32 %v7576_v6, %v15423_v44 }
0x1049   : > { %v7579_v31 = vmul.f32 %v7515_v48, %v15438_v2  ;;  %v7066_v1 = vpack.c.bf16 %v7050_v43, %v7049_v54  ;;  %11160 = vtanh.f32 %v7700_v4  ;;  %v7641_v34 = vadd.f32 %v7577_v23, %v15427_v17 }
0x104a   : > { %11162 = vtanh.f32 %v7702_v16  ;;  %v7642_v46 = vadd.f32 %v7578_v29, %v15432_v20  ;;  %v7704_v58 = vmul.f32 0.7978846, %v7640_v26  ;;  %v7381_v12 = vmul.f32 0.5, %v15399_v19 }
0x104b   : > { %7358 = vmatmul.mubr.bf16.gmra.mrb[252].mxu1 %v7066_v1  ;;  %v7643_v21 = vadd.f32 %v7579_v31, %v15438_v2  ;;  %v7705_v62 = vmul.f32 0.7978846, %v7641_v34  ;;  %v7383_v5 = vmul.f32 0.5, %v15408_v15  ;;  %v7380_v13 = vmul.f32 0.5, %v15395_v55 }
0x104c   : > { %v7706_v11 = vmul.f32 0.7978846, %v7642_v46  ;;  %v7382_v54 = vmul.f32 0.5, %v15404_v0  ;;  %v7385_v29 = vmul.f32 0.5, %v15427_v17  ;;  %v7387_v4 = vmul.f32 0.5, %v15438_v2 }
0x104d   : > { %v7707_v63 = vmul.f32 0.7978846, %v7643_v21  ;;  %11164 = vtanh.f32 %v7705_v62  ;;  %v7384_v55 = vmul.f32 0.5, %v15423_v44  ;;  %v7386_v21 = vmul.f32 0.5, %v15432_v20 }
0x104f   : > { %11166 = vtanh.f32 %v7707_v63 }
0x1050   : > { %v11157_v56 = vpop.eup %11156  ;;  %11168 = vtanh.f32 %v7704_v58 }
0x1051   : > { %v7829_v36 = vadd.f32 1.0, %v11157_v56  ;;  %11170 = vtanh.f32 %v7706_v11 }
0x1052   : > { %v11159_v59 = vpop.eup %11158 }
0x1053   : > { %v7831_v38 = vadd.f32 1.0, %v11159_v59  ;;  %v11161_v50 = vpop.eup %11160  ;;  %v7893_v28 = vmul.f32 %v7829_v36, %v7381_v12 }
0x1054   : > { %v11163_v30 = vpop.eup %11162  ;;  %v7828_v35 = vadd.f32 1.0, %v11161_v50 }
0x1055   : > { %v7895_v25 = vmul.f32 %v7831_v38, %v7383_v5  ;;  %v7830_v6 = vadd.f32 1.0, %v11163_v30 }
0x1056   : > { %v7892_v23 = vmul.f32 %v7828_v35, %v7380_v13 }
0x1057   : > { %v7951_v37 = vpack.c.bf16 %v7895_v25, %v7893_v28  ;;  %v11165_v52 = vpop.eup %11164  ;;  %v7894_v48 = vmul.f32 %v7830_v6, %v7382_v54 }
0x1058   : > { %v7833_v19 = vadd.f32 1.0, %v11165_v52 }
0x1059   : > { %v11167_v43 = vpop.eup %11166  ;;  %8167 = vmatprep.mubr.bf16.mxu0 %v7951_v37  ;;  %v7950_v15 = vpack.c.bf16 %v7894_v48, %v7892_v23 }
0x105a   : > { %v11169_v45 = vpop.eup %11168  ;;  %v7835_v31 = vadd.f32 1.0, %v11167_v43  ;;  %v7897_v0 = vmul.f32 %v7833_v19, %v7385_v29 }
0x105b   : > { %v11171_v1 = vpop.eup %11170  ;;  %v7832_v16 = vadd.f32 1.0, %v11169_v45  ;;  %8168 = vmatmul.mubr.bf16.gmra.mrb[204].mxu0 %v7950_v15 }
0x105c   : > { %v7899_v34 = vmul.f32 %v7835_v31, %v7387_v4  ;;  %v7834_v26 = vadd.f32 1.0, %v11171_v1 }
0x105d   : > { %v7896_v62 = vmul.f32 %v7832_v16, %v7384_v55 }
0x105e   : > { %v7953_v46 = vpack.c.bf16 %v7899_v34, %v7897_v0  ;;  %v7898_v63 = vmul.f32 %v7834_v26, %v7386_v21 }
0x1060   : > { %8175 = vmatprep.mubr.bf16.mxu0 %v7953_v46  ;;  %v7952_v58 = vpack.c.bf16 %v7898_v63, %v7896_v62 }
0x1063   : > { %8176 = vmatmul.mubr.bf16.gmra.mrb[208].mxu0 %v7952_v58 }
0x1086   : > { %v7259_v17 = vpop.f32.mrb[212].mxu1 }
0x1087   : > { %v7260_v2 = vadd.f32 %v7259_v17, %v15295_v41  ;;  %v7261_v11 = vpop.f32.mrb[213].mxu1 }
0x1088   : > { %v7262_v56 = vadd.f32 %v7261_v11, %v15297_v9  ;;  %v7263_v44 = vpop.f32.mrb[214].mxu1 }
0x1089   : > { %v7452_v36 = vmul.f32 0.044715, %v7260_v2  ;;  %v7264_v59 = vadd.f32 %v7263_v44, %v15295_v41  ;;  %v7265_v12 = vpop.f32.mrb[215].mxu1 }
0x108a   : > { %v7453_v5 = vmul.f32 0.044715, %v7262_v56  ;;  %v7266_v20 = vadd.f32 %v7265_v12, %v15297_v9 }
0x108b   : > { %v7516_v38 = vmul.f32 %v7452_v36, %v7260_v2  ;;  %v7454_v50 = vmul.f32 0.044715, %v7264_v59  ;;  %v15474_v36 = vmul.f32 0.5, %v7260_v2 }
0x108c   : > { %v7517_v30 = vmul.f32 %v7453_v5, %v7262_v56  ;;  %v7455_v28 = vmul.f32 0.044715, %v7266_v20 }
0x108d   : > { %v7580_v25 = vmul.f32 %v7516_v38, %v7260_v2  ;;  %v7518_v35 = vmul.f32 %v7454_v50, %v7264_v59  ;;  %v7389_v50 = vmul.f32 0.5, %v7262_v56 }
0x108e   : > { %v7581_v13 = vmul.f32 %v7517_v30, %v7262_v56  ;;  %v7519_v54 = vmul.f32 %v7455_v28, %v7266_v20  ;;  %v7269_v6 = vpop.f32.mrb[216].mxu1 }
0x108f   : > { %v7582_v37 = vmul.f32 %v7518_v35, %v7264_v59  ;;  %v7270_v52 = vadd.f32 %v7269_v6, %v15295_v41  ;;  %v7271_v23 = vpop.f32.mrb[217].mxu1  ;;  %v7644_v48 = vadd.f32 %v7580_v25, %v7260_v2  ;;  %v7391_v35 = vmul.f32 0.5, %v7266_v20 }
0x1090   : > { %v7583_v43 = vmul.f32 %v7519_v54, %v7266_v20  ;;  %v7272_v19 = vadd.f32 %v7271_v23, %v15297_v9  ;;  %v7273_v45 = vpop.f32.mrb[218].mxu1  ;;  %v7645_v15 = vadd.f32 %v7581_v13, %v7262_v56  ;;  %v7390_v13 = vmul.f32 0.5, %v7264_v59 }
0x1091   : > { %v7456_v29 = vmul.f32 0.044715, %v7270_v52  ;;  %v7274_v4 = vadd.f32 %v7273_v45, %v15295_v41  ;;  %v7275_v31 = vpop.f32.mrb[219].mxu1  ;;  %v7646_v1 = vadd.f32 %v7582_v37, %v7264_v59  ;;  %v7708_v55 = vmul.f32 0.7978846, %v7644_v48 }
0x1092   : > { %v7457_v16 = vmul.f32 0.044715, %v7272_v19  ;;  %v7276_v0 = vadd.f32 %v7275_v31, %v15297_v9  ;;  %v7647_v34 = vadd.f32 %v7583_v43, %v7266_v20  ;;  %v7709_v21 = vmul.f32 0.7978846, %v7645_v15 }
0x1093   : > { %v7520_v26 = vmul.f32 %v7456_v29, %v7270_v52  ;;  %v7458_v46 = vmul.f32 0.044715, %v7274_v4  ;;  %v7710_v62 = vmul.f32 0.7978846, %v7646_v1  ;;  %11172 = vtanh.f32 %v7708_v55 }
0x1094   : > { %v7521_v63 = vmul.f32 %v7457_v16, %v7272_v19  ;;  %v7459_v58 = vmul.f32 0.044715, %v7276_v0  ;;  %v7711_v17 = vmul.f32 0.7978846, %v7647_v34  ;;  %11174 = vtanh.f32 %v7709_v21 }
0x1095   : > { %v7584_v11 = vmul.f32 %v7520_v26, %v7270_v52  ;;  %v7522_v44 = vmul.f32 %v7458_v46, %v7274_v4  ;;  %11176 = vtanh.f32 %v7710_v62  ;;  %v15483_v45 = vmul.f32 0.5, %v7272_v19 }
0x1096   : > { %v7585_v12 = vmul.f32 %v7521_v63, %v7272_v19  ;;  %v7523_v5 = vmul.f32 %v7459_v58, %v7276_v0  ;;  %v7279_v38 = vpop.f32.mrb[220].mxu1  ;;  %11178 = vtanh.f32 %v7711_v17  ;;  %v15485_v56 = vmul.f32 0.5, %v7276_v0 }
0x1097   : > { %v7586_v30 = vmul.f32 %v7522_v44, %v7274_v4  ;;  %v15477_v28 = vadd.f32 %v7279_v38, %v15295_v41  ;;  %v7281_v25 = vpop.f32.mrb[221].mxu1  ;;  %v7648_v2 = vadd.f32 %v7584_v11, %v7270_v52  ;;  %v15490_v62 = vmul.f32 0.5, %v7270_v52 }
0x1098   : > { %v7587_v54 = vmul.f32 %v7523_v5, %v7276_v0  ;;  %v7282_v6 = vadd.f32 %v7281_v25, %v15297_v9  ;;  %v7283_v37 = vpop.f32.mrb[222].mxu1  ;;  %v7649_v23 = vadd.f32 %v7585_v12, %v7272_v19  ;;  %v15492_v63 = vmul.f32 0.5, %v7274_v4 }
0x1099   : > { %v15481_v48 = vadd.f32 %v7283_v37, %v15295_v41  ;;  %v7285_v43 = vpop.f32.mrb[223].mxu1  ;;  %v7650_v15 = vadd.f32 %v7586_v30, %v7274_v4  ;;  %v7460_v1 = vmul.f32 0.044715, %v15477_v28  ;;  %v7712_v55 = vmul.f32 0.7978846, %v7648_v2 }
0x109a   : > { %v7461_v29 = vmul.f32 0.044715, %v7282_v6  ;;  %v7286_v31 = vadd.f32 %v7285_v43, %v15297_v9  ;;  %v7651_v20 = vadd.f32 %v7587_v54, %v7276_v0  ;;  %v7713_v59 = vmul.f32 0.7978846, %v7649_v23 }
0x109b   : > { %v7714_v16 = vmul.f32 0.7978846, %v7650_v15  ;;  %v7462_v19 = vmul.f32 0.044715, %v15481_v48  ;;  %v15495_v44 = vmul.f32 0.5, %v15477_v28  ;;  %v7524_v4 = vmul.f32 %v7460_v1, %v15477_v28 }
0x109c   : > { %v7525_v34 = vmul.f32 %v7461_v29, %v7282_v6  ;;  %v7463_v21 = vmul.f32 0.044715, %v7286_v31  ;;  %v7715_v26 = vmul.f32 0.7978846, %v7651_v20  ;;  %11180 = vtanh.f32 %v7713_v59 }
0x109d   : > { %v11173_v46 = vpop.eup %11172  ;;  %11182 = vtanh.f32 %v7712_v55  ;;  %v7526_v43 = vmul.f32 %v7462_v19, %v15481_v48 }
0x109e   : > { %v11175_v58 = vpop.eup %11174  ;;  %v7527_v17 = vmul.f32 %v7463_v21, %v7286_v31  ;;  %v7289_v0 = vpop.f32.mrb[224].mxu1  ;;  %v7836_v11 = vadd.f32 1.0, %v11173_v46  ;;  %11184 = vtanh.f32 %v7715_v26  ;;  %v7589_v5 = vmul.f32 %v7525_v34, %v7282_v6 }
0x109f   : > { %v11177_v12 = vpop.eup %11176  ;;  %v15498_v38 = vadd.f32 %v7289_v0, %v15295_v41  ;;  %v7291_v30 = vpop.f32.mrb[225].mxu1  ;;  %v7837_v25 = vadd.f32 1.0, %v11175_v58  ;;  %11186 = vtanh.f32 %v7714_v16  ;;  %v7588_v58 = vmul.f32 %v7524_v4, %v15477_v28 }
0x10a0   : > { %v11179_v52 = vpop.eup %11178  ;;  %v7591_v54 = vmul.f32 %v7527_v17, %v7286_v31  ;;  %v15502_v37 = vadd.f32 %v7291_v30, %v15297_v9  ;;  %v7293_v23 = vpop.f32.mrb[226].mxu1  ;;  %v7838_v2 = vadd.f32 1.0, %v11177_v12  ;;  %v7900_v1 = vmul.f32 %v7836_v11, %v15474_v36 }
0x10a1   : > { %v7464_v15 = vmul.f32 0.044715, %v15498_v38  ;;  %v15507_v29 = vadd.f32 %v7293_v23, %v15295_v41  ;;  %v7295_v20 = vpop.f32.mrb[227].mxu1  ;;  %v7839_v59 = vadd.f32 1.0, %v11179_v52  ;;  %v7901_v26 = vmul.f32 %v7837_v25, %v7389_v50 }
0x10a2   : > { %v7465_v55 = vmul.f32 0.044715, %v15502_v37  ;;  %v15511_v16 = vadd.f32 %v7295_v20, %v15297_v9  ;;  %v7902_v34 = vmul.f32 %v7838_v2, %v7390_v13  ;;  %v7653_v19 = vadd.f32 %v7589_v5, %v7282_v6 }
0x10a3   : > { %v7528_v21 = vmul.f32 %v7464_v15, %v15498_v38  ;;  %v7903_v46 = vmul.f32 %v7839_v59, %v7391_v35  ;;  %v7466_v17 = vmul.f32 0.044715, %v15507_v29  ;;  %v7655_v12 = vadd.f32 %v7591_v54, %v7286_v31 }
0x10a4   : > { %v7954_v0 = vpack.c.bf16 %v7902_v34, %v7900_v1  ;;  %v7467_v30 = vmul.f32 0.044715, %v15511_v16  ;;  %v15518_v23 = vmul.f32 0.5, %v7282_v6  ;;  %v7717_v20 = vmul.f32 0.7978846, %v7653_v19 }
0x10a5   : > { %v7955_v52 = vpack.c.bf16 %v7903_v46, %v7901_v26  ;;  %v7590_v36 = vmul.f32 %v7526_v43, %v15481_v48  ;;  %v7529_v13 = vmul.f32 %v7465_v55, %v15502_v37  ;;  %v15522_v35 = vmul.f32 0.5, %v7286_v31 }
0x10a6   : > { %v11181_v40 = vpop.eup %11180  ;;  %v7299_v50 = vpop.f32.mrb[228].mxu1  ;;  %v7719_v11 = vmul.f32 0.7978846, %v7655_v12  ;;  %v15525_v25 = vmul.f32 %v7528_v21, %v15498_v38  ;;  %11188 = vtanh.f32 %v7717_v20  ;;  %v7530_v43 = vmul.f32 %v7466_v17, %v15507_v29 }
0x10a7   : > { %v11183_v5 = vpop.eup %11182  ;;  %v15528_v4 = vadd.f32 %v7299_v50, %v15295_v41  ;;  %v7301_v54 = vpop.f32.mrb[229].mxu1  ;;  %8183 = vmatprep.mubr.bf16.mxu0 %v7955_v52  ;;  %v7841_v6 = vadd.f32 1.0, %v11181_v40  ;;  %v7531_v1 = vmul.f32 %v7467_v30, %v15511_v16  ;;  %v7652_v20 = vadd.f32 %v7588_v58, %v15477_v28 }
0x10a8   : > { %v11185_v2 = vpop.eup %11184  ;;  %v15532_v15 = vadd.f32 %v7301_v54, %v15297_v9  ;;  %v7303_v31 = vpop.f32.mrb[230].mxu1  ;;  %8184 = vmatmul.mubr.bf16.gmra.mrb[212].mxu0 %v7954_v0  ;;  %v7840_v59 = vadd.f32 1.0, %v11183_v5  ;;  %11190 = vtanh.f32 %v7719_v11  ;;  %v7654_v54 = vadd.f32 %v7590_v36, %v15481_v48 }
0x10a9   : > { %v11187_v55 = vpop.eup %11186  ;;  %v7468_v34 = vmul.f32 0.044715, %v15528_v4  ;;  %v15537_v21 = vadd.f32 %v7303_v31, %v15295_v41  ;;  %v7305_v40 = vpop.f32.mrb[231].mxu1  ;;  %v7843_v26 = vadd.f32 1.0, %v11185_v2  ;;  %v7905_v17 = vmul.f32 %v7841_v6, %v15483_v45 }
0x10aa   : > { %v7469_v46 = vmul.f32 0.044715, %v15532_v15  ;;  %v15541_v19 = vadd.f32 %v7305_v40, %v15297_v9  ;;  %v7842_v0 = vadd.f32 1.0, %v11187_v55  ;;  %v7904_v30 = vmul.f32 %v7840_v59, %v15490_v62 }
0x10ab   : > { %v7470_v12 = vmul.f32 0.044715, %v15537_v21  ;;  %v7907_v52 = vmul.f32 %v7843_v26, %v15485_v56  ;;  %v7532_v50 = vmul.f32 %v7468_v34, %v15528_v4  ;;  %v7593_v2 = vmul.f32 %v7529_v13, %v15502_v37 }
0x10ac   : > { %v7533_v11 = vmul.f32 %v7469_v46, %v15532_v15  ;;  %v7906_v5 = vmul.f32 %v7842_v0, %v15492_v63  ;;  %v7595_v45 = vmul.f32 %v7531_v1, %v15511_v16  ;;  %v7716_v31 = vmul.f32 0.7978846, %v7652_v20 }
0x10ad   : > { %v7957_v6 = vpack.c.bf16 %v7907_v52, %v7905_v17  ;;  %v7471_v56 = vmul.f32 0.044715, %v15541_v19  ;;  %v15556_v28 = vmul.f32 0.5, %v15481_v48  ;;  %v7718_v58 = vmul.f32 0.7978846, %v7654_v54 }
0x10ae   : > { %v7309_v55 = vpop.f32.mrb[232].mxu1  ;;  %v7956_v62 = vpack.c.bf16 %v7906_v5, %v7904_v30  ;;  %v7594_v59 = vmul.f32 %v7530_v43, %v15507_v29  ;;  %v7534_v63 = vmul.f32 %v7470_v12, %v15537_v21  ;;  %11192 = vtanh.f32 %v7716_v31 }
0x10af   : > { %v15561_v36 = vadd.f32 %v7309_v55, %v15295_v41  ;;  %v7311_v13 = vpop.f32.mrb[233].mxu1  ;;  %8191 = vmatprep.mubr.bf16.mxu0 %v7957_v6  ;;  %v15564_v1 = vmul.f32 %v7532_v50, %v15528_v4  ;;  %v15567_v34 = vmul.f32 %v7533_v11, %v15532_v15  ;;  %11194 = vtanh.f32 %v7718_v58 }
0x10b0   : > { %v15570_v48 = vadd.f32 %v7311_v13, %v15297_v9  ;;  %v7313_v40 = vpop.f32.mrb[234].mxu1  ;;  %8192 = vmatmul.mubr.bf16.gmra.mrb[216].mxu0 %v7956_v62  ;;  %v11189_v43 = vpop.eup %11188  ;;  %v7657_v0 = vadd.f32 %v7593_v2, %v15502_v37  ;;  %v7659_v12 = vadd.f32 %v7595_v45, %v15511_v16  ;;  %v7535_v30 = vmul.f32 %v7471_v56, %v15541_v19 }
0x10b1   : > { %v7472_v26 = vmul.f32 0.044715, %v15561_v36  ;;  %v15574_v46 = vadd.f32 %v7313_v40, %v15295_v41  ;;  %v7315_v17 = vpop.f32.mrb[235].mxu1  ;;  %v7845_v11 = vadd.f32 1.0, %v11189_v43  ;;  %v15584_v5 = vmul.f32 %v7534_v63, %v15537_v21 }
0x10b2   : > { %v11191_v52 = vpop.eup %11190  ;;  %v7473_v20 = vmul.f32 0.044715, %v15570_v48  ;;  %v15581_v50 = vadd.f32 %v7315_v17, %v15297_v9  ;;  %v7721_v31 = vmul.f32 0.7978846, %v7657_v0  ;;  %v15590_v55 = vmul.f32 0.5, %v15502_v37 }
0x10b3   : > { %v7536_v54 = vmul.f32 %v7472_v26, %v15561_v36  ;;  %v7847_v6 = vadd.f32 1.0, %v11191_v52  ;;  %v7474_v45 = vmul.f32 0.044715, %v15574_v46  ;;  %v7723_v56 = vmul.f32 0.7978846, %v7659_v12 }
0x10b4   : > { %v7537_v2 = vmul.f32 %v7473_v20, %v15570_v48  ;;  %v7475_v62 = vmul.f32 0.044715, %v15581_v50  ;;  %v7909_v58 = vmul.f32 %v7845_v11, %v15518_v23  ;;  %11196 = vtanh.f32 %v7721_v31 }
0x10b5   : > { %v7911_v13 = vmul.f32 %v7847_v6, %v15522_v35  ;;  %v7599_v63 = vmul.f32 %v7535_v30, %v15541_v19  ;;  %v7403_v43 = vmul.f32 0.5, %v15511_v16  ;;  %11198 = vtanh.f32 %v7723_v56 }
0x10b6   : > { %v7319_v40 = vpop.f32.mrb[236].mxu1  ;;  %v15598_v26 = vmul.f32 0.5, %v15498_v38  ;;  %v15601_v37 = vmul.f32 %v7536_v54, %v15561_v36  ;;  %v7656_v35 = vadd.f32 %v15525_v25, %v15498_v38  ;;  %v7601_v12 = vmul.f32 %v7537_v2, %v15570_v48 }
0x10b7   : > { %v15604_v17 = vadd.f32 %v7319_v40, %v15295_v41  ;;  %v7321_v0 = vpop.f32.mrb[237].mxu1  ;;  %v7959_v23 = vpack.c.bf16 %v7911_v13, %v7909_v58  ;;  %v7538_v52 = vmul.f32 %v7474_v45, %v15574_v46  ;;  %v7658_v20 = vadd.f32 %v7594_v59, %v15507_v29 }
0x10b8   : > { %v15611_v16 = vadd.f32 %v7321_v0, %v15297_v9  ;;  %v7323_v30 = vpop.f32.mrb[238].mxu1  ;;  %v11193_v11 = vpop.eup %11192  ;;  %v7539_v54 = vmul.f32 %v7475_v62, %v15581_v50  ;;  %v7720_v25 = vmul.f32 0.7978846, %v7656_v35  ;;  %v7402_v35 = vmul.f32 0.5, %v15507_v29 }
0x10b9   : > { %v7476_v6 = vmul.f32 0.044715, %v15604_v17  ;;  %8199 = vmatprep.mubr.bf16.mxu0 %v7959_v23  ;;  %v15617_v31 = vadd.f32 %v7323_v30, %v15295_v41  ;;  %v7325_v38 = vpop.f32.mrb[239].mxu1  ;;  %v11195_v2 = vpop.eup %11194  ;;  %v7844_v56 = vadd.f32 1.0, %v11193_v11  ;;  %v7722_v13 = vmul.f32 0.7978846, %v7658_v20 }
0x10ba   : > { %v7477_v45 = vmul.f32 0.044715, %v15611_v16  ;;  %v15621_v58 = vadd.f32 %v7325_v38, %v15297_v9  ;;  %v7846_v40 = vadd.f32 1.0, %v11195_v2  ;;  %11200 = vtanh.f32 %v7720_v25 }
0x10bb   : > { %v7540_v59 = vmul.f32 %v7476_v6, %v15604_v17  ;;  %v7478_v62 = vmul.f32 0.044715, %v15617_v31  ;;  %v7602_v0 = vmul.f32 %v7538_v52, %v15574_v46  ;;  %11202 = vtanh.f32 %v7722_v13 }
0x10bc   : > { %v7479_v23 = vmul.f32 0.044715, %v15621_v58  ;;  %v7541_v30 = vmul.f32 %v7477_v45, %v15611_v16  ;;  %v7908_v11 = vmul.f32 %v7844_v56, %v15495_v44  ;;  %v7910_v38 = vmul.f32 %v7846_v40, %v15556_v28 }
0x10bd   : > { %v7661_v20 = vadd.f32 %v15567_v34, %v15532_v15  ;;  %v7603_v6 = vmul.f32 %v7539_v54, %v15581_v50  ;;  %v15635_v25 = vmul.f32 0.5, %v15532_v15  ;;  %v15638_v52 = vmul.f32 0.5, %v15541_v19 }
0x10be   : > { %v7663_v29 = vadd.f32 %v7599_v63, %v15541_v19  ;;  %v11197_v2 = vpop.eup %11196  ;;  %v15642_v45 = vmul.f32 %v7540_v59, %v15604_v17  ;;  %v7542_v44 = vmul.f32 %v7478_v62, %v15617_v31  ;;  %v7958_v28 = vpack.c.bf16 %v7910_v38, %v7908_v11 }
0x10bf   : > { %v7725_v56 = vmul.f32 0.7978846, %v7661_v20  ;;  %v11199_v13 = vpop.eup %11198  ;;  %v7543_v34 = vmul.f32 %v7479_v23, %v15621_v58  ;;  %v7849_v54 = vadd.f32 1.0, %v11197_v2  ;;  %v7660_v15 = vadd.f32 %v15564_v1, %v15528_v4 }
0x10c0   : > { %v7727_v40 = vmul.f32 0.7978846, %v7663_v29  ;;  %v7605_v18 = vmul.f32 %v7541_v30, %v15611_v16  ;;  %8200 = vmatmul.mubr.bf16.gmra.mrb[220].mxu0 %v7958_v28  ;;  %v7851_v19 = vadd.f32 1.0, %v11199_v13  ;;  %v7662_v63 = vadd.f32 %v15584_v5, %v15537_v21 }
0x10c1   : > { %11204 = vtanh.f32 %v7725_v56  ;;  %v7913_v59 = vmul.f32 %v7849_v54, %v15590_v55  ;;  %v15653_v62 = vmul.f32 0.5, %v15528_v4  ;;  %v7724_v23 = vmul.f32 0.7978846, %v7660_v15 }
0x10c2   : > { %11206 = vtanh.f32 %v7727_v40  ;;  %v7915_v11 = vmul.f32 %v7851_v19, %v7403_v43  ;;  %v7726_v38 = vmul.f32 0.7978846, %v7662_v63  ;;  %v7665_v20 = vadd.f32 %v7601_v12, %v15570_v48 }
0x10c3   : > { %v7667_v1 = vadd.f32 %v7603_v6, %v15581_v50  ;;  %v15658_v30 = vmul.f32 %v7542_v44, %v15617_v31  ;;  %v7607_v29 = vmul.f32 %v7543_v34, %v15621_v58  ;;  %11208 = vtanh.f32 %v7724_v23 }
0x10c4   : > { %v7664_v5 = vadd.f32 %v15601_v37, %v15561_v36  ;;  %v11201_v55 = vpop.eup %11200  ;;  %v7961_v2 = vpack.c.bf16 %v7915_v11, %v7913_v59  ;;  %11210 = vtanh.f32 %v7726_v38  ;;  %v7729_v4 = vmul.f32 0.7978846, %v7665_v20 }
0x10c5   : > { %v7731_v28 = vmul.f32 0.7978846, %v7667_v1  ;;  %v11203_v43 = vpop.eup %11202  ;;  %v7848_v56 = vadd.f32 1.0, %v11201_v55  ;;  %v15664_v12 = vmul.f32 0.5, %v15537_v21  ;;  %v7666_v6 = vadd.f32 %v7602_v0, %v15574_v46 }
0x10c6   : > { %v7728_v44 = vmul.f32 0.7978846, %v7664_v5  ;;  %8207 = vmatprep.mubr.bf16.mxu0 %v7961_v2  ;;  %v7850_v13 = vadd.f32 1.0, %v11203_v43  ;;  %v15668_v54 = vmul.f32 0.5, %v15570_v48  ;;  %11212 = vtanh.f32 %v7729_v4 }
0x10c7   : > { %v7329_v34 = vpop.f32.mrb[240].mxu1  ;;  %v7669_v37 = vadd.f32 %v7605_v18, %v15611_v16  ;;  %v7912_v40 = vmul.f32 %v7848_v56, %v15598_v26  ;;  %11214 = vtanh.f32 %v7731_v28  ;;  %v7730_v21 = vmul.f32 0.7978846, %v7666_v6 }
0x10c8   : > { %v15673_v15 = vadd.f32 %v7329_v34, %v15295_v41  ;;  %v7331_v19 = vpop.f32.mrb[241].mxu1  ;;  %v7914_v63 = vmul.f32 %v7850_v13, %v7402_v35  ;;  %11216 = vtanh.f32 %v7728_v44  ;;  %v7671_v48 = vadd.f32 %v7607_v29, %v15621_v58 }
0x10c9   : > { %v15676_v0 = vadd.f32 %v7331_v19, %v15297_v9  ;;  %v7333_v59 = vpop.f32.mrb[242].mxu1  ;;  %11218 = vtanh.f32 %v7730_v21  ;;  %v7733_v11 = vmul.f32 0.7978846, %v7669_v37  ;;  %v7411_v44 = vmul.f32 0.5, %v15581_v50 }
0x10ca   : > { %v7480_v23 = vmul.f32 0.044715, %v15673_v15  ;;  %v15681_v18 = vadd.f32 %v7333_v59, %v15295_v41  ;;  %v7335_v26 = vpop.f32.mrb[243].mxu1  ;;  %v7960_v20 = vpack.c.bf16 %v7914_v63, %v7912_v40  ;;  %v7735_v5 = vmul.f32 0.7978846, %v7671_v48 }
0x10cb   : > { %v11205_v38 = vpop.eup %11204  ;;  %v7481_v1 = vmul.f32 0.044715, %v15676_v0  ;;  %v15685_v35 = vadd.f32 %v7335_v26, %v15297_v9  ;;  %11220 = vtanh.f32 %v7733_v11  ;;  %v7408_v13 = vmul.f32 0.5, %v15561_v36 }
0x10cc   : > { %v11207_v55 = vpop.eup %11206  ;;  %v7853_v2 = vadd.f32 1.0, %v11205_v38  ;;  %v7544_v29 = vmul.f32 %v7480_v23, %v15673_v15  ;;  %v7482_v4 = vmul.f32 0.044715, %v15681_v18  ;;  %8208 = vmatmul.mubr.bf16.gmra.mrb[224].mxu0 %v7960_v20  ;;  %11222 = vtanh.f32 %v7735_v5 }
0x10cd   : > { %v7855_v28 = vadd.f32 1.0, %v11207_v55  ;;  %v7545_v43 = vmul.f32 %v7481_v1, %v15676_v0  ;;  %v7483_v56 = vmul.f32 0.044715, %v15685_v35  ;;  %v11209_v6 = vpop.eup %11208  ;;  %v7410_v34 = vmul.f32 0.5, %v15574_v46 }
0x10ce   : > { %v7413_v37 = vmul.f32 0.5, %v15611_v16  ;;  %v11211_v40 = vpop.eup %11210  ;;  %v7917_v19 = vmul.f32 %v7853_v2, %v15635_v25  ;;  %v7852_v63 = vadd.f32 1.0, %v11209_v6  ;;  %v7415_v48 = vmul.f32 0.5, %v15621_v58 }
0x10cf   : > { %v7919_v21 = vmul.f32 %v7855_v28, %v15638_v52  ;;  %v7339_v59 = vpop.f32.mrb[244].mxu1  ;;  %v7608_v23 = vmul.f32 %v7544_v29, %v15673_v15  ;;  %v7854_v26 = vadd.f32 1.0, %v11211_v40  ;;  %v7546_v50 = vmul.f32 %v7482_v4, %v15681_v18 }
0x10d0   : > { %v15701_v36 = vadd.f32 %v7339_v59, %v15295_v41  ;;  %v7341_v46 = vpop.f32.mrb[245].mxu1  ;;  %v11213_v11 = vpop.eup %11212  ;;  %v7609_v38 = vmul.f32 %v7545_v43, %v15676_v0  ;;  %v7547_v25 = vmul.f32 %v7483_v56, %v15685_v35  ;;  %v7916_v1 = vmul.f32 %v7852_v63, %v15653_v62 }
0x10d1   : > { %v7963_v16 = vpack.c.bf16 %v7919_v21, %v7917_v19  ;;  %v15706_v52 = vadd.f32 %v7341_v46, %v15297_v9  ;;  %v7343_v20 = vpop.f32.mrb[246].mxu1  ;;  %v11215_v58 = vpop.eup %11214  ;;  %v7918_v5 = vmul.f32 %v7854_v26, %v15664_v12  ;;  %v7857_v55 = vadd.f32 1.0, %v11213_v11 }
0x10d2   : > { %v15711_v2 = vadd.f32 %v7343_v20, %v15295_v41  ;;  %v7345_v29 = vpop.f32.mrb[247].mxu1  ;;  %v11217_v4 = vpop.eup %11216  ;;  %v7859_v28 = vadd.f32 1.0, %v11215_v58  ;;  %v7484_v43 = vmul.f32 0.044715, %v15701_v36  ;;  %v7668_v21 = vadd.f32 %v15642_v45, %v15604_v17 }
0x10d3   : > { %8215 = vmatprep.mubr.bf16.mxu0 %v7963_v16  ;;  %v7485_v56 = vmul.f32 0.044715, %v15706_v52  ;;  %v15716_v6 = vadd.f32 %v7345_v29, %v15297_v9  ;;  %v11219_v40 = vpop.eup %11218  ;;  %v7962_v19 = vpack.c.bf16 %v7918_v5, %v7916_v1  ;;  %v7921_v62 = vmul.f32 %v7857_v55, %v15668_v54 }
0x10d4   : > { %v7856_v12 = vadd.f32 1.0, %v11217_v4  ;;  %v7923_v63 = vmul.f32 %v7859_v28, %v7411_v44  ;;  %v7858_v59 = vadd.f32 1.0, %v11219_v40  ;;  %v7486_v46 = vmul.f32 0.044715, %v15711_v2 }
0x10d5   : > { %v7549_v26 = vmul.f32 %v7485_v56, %v15706_v52  ;;  %v11221_v11 = vpop.eup %11220  ;;  %8216 = vmatmul.mubr.bf16.gmra.mrb[228].mxu0 %v7962_v19  ;;  %v7610_v16 = vmul.f32 %v7546_v50, %v15681_v18  ;;  %v7611_v20 = vmul.f32 %v7547_v25, %v15685_v35  ;;  %v7487_v58 = vmul.f32 0.044715, %v15716_v6 }
0x10d6   : > { %v7670_v54 = vadd.f32 %v15658_v30, %v15617_v31  ;;  %v11223_v1 = vpop.eup %11222  ;;  %v7965_v5 = vpack.c.bf16 %v7923_v63, %v7921_v62  ;;  %v7548_v45 = vmul.f32 %v7484_v43, %v15701_v36  ;;  %v7920_v44 = vmul.f32 %v7856_v12, %v7408_v13 }
0x10d7   : > { %v7922_v55 = vmul.f32 %v7858_v59, %v7410_v34  ;;  %v7551_v29 = vmul.f32 %v7487_v58, %v15716_v6  ;;  %v7861_v4 = vadd.f32 1.0, %v11221_v11  ;;  %v7863_v28 = vadd.f32 1.0, %v11223_v1 }
0x10d8   : > { %v7732_v56 = vmul.f32 0.7978846, %v7668_v21  ;;  %8223 = vmatprep.mubr.bf16.mxu0 %v7965_v5  ;;  %v7613_v25 = vmul.f32 %v7549_v26, %v15706_v52  ;;  %v7550_v40 = vmul.f32 %v7486_v46, %v15711_v2  ;;  %v7734_v19 = vmul.f32 0.7978846, %v7670_v54 }
0x10d9   : > { %v7964_v50 = vpack.c.bf16 %v7922_v55, %v7920_v44  ;;  %v7615_v30 = vmul.f32 %v7551_v29, %v15716_v6  ;;  %v7925_v42 = vmul.f32 %v7861_v4, %v7413_v37  ;;  %v7927_v62 = vmul.f32 %v7863_v28, %v7415_v48 }
0x10da   : > { %11224 = vtanh.f32 %v7732_v56  ;;  %v7673_v13 = vadd.f32 %v7609_v38, %v15676_v0  ;;  %v7675_v34 = vadd.f32 %v7611_v20, %v15685_v35  ;;  %v7612_v43 = vmul.f32 %v7548_v45, %v15701_v36 }
0x10db   : > { %11226 = vtanh.f32 %v7734_v19  ;;  %v7967_v12 = vpack.c.bf16 %v7927_v62, %v7925_v42  ;;  %v7672_v21 = vadd.f32 %v7608_v23, %v15673_v15  ;;  %v7614_v63 = vmul.f32 %v7550_v40, %v15711_v2 }
0x10dc   : > { %v7737_v59 = vmul.f32 0.7978846, %v7673_v13  ;;  %v7739_v26 = vmul.f32 0.7978846, %v7675_v34  ;;  %v7674_v46 = vadd.f32 %v7610_v16, %v15681_v18  ;;  %v7677_v48 = vadd.f32 %v7613_v25, %v15706_v52 }
0x10dd   : > { %8224 = vmatmul.mubr.bf16.gmra.mrb[232].mxu0 %v7964_v50  ;;  %v7736_v37 = vmul.f32 0.7978846, %v7672_v21  ;;  %v7679_v11 = vadd.f32 %v7615_v30, %v15716_v6  ;;  %v7676_v23 = vadd.f32 %v7612_v43, %v15701_v36  ;;  %v7678_v58 = vadd.f32 %v7614_v63, %v15711_v2 }
0x10de   : > { %8231 = vmatprep.mubr.bf16.mxu0 %v7967_v12  ;;  %11228 = vtanh.f32 %v7737_v59  ;;  %v7738_v38 = vmul.f32 0.7978846, %v7674_v46  ;;  %v7741_v20 = vmul.f32 0.7978846, %v7677_v48  ;;  %v7412_v44 = vmul.f32 0.5, %v15604_v17 }
0x10df   : > { %11230 = vtanh.f32 %v7739_v26  ;;  %v7743_v42 = vmul.f32 0.7978846, %v7679_v11  ;;  %v7740_v54 = vmul.f32 0.7978846, %v7676_v23  ;;  %v7742_v16 = vmul.f32 0.7978846, %v7678_v58 }
0x10e0   : > { %11232 = vtanh.f32 %v7736_v37  ;;  %v7414_v55 = vmul.f32 0.5, %v15617_v31  ;;  %v7417_v30 = vmul.f32 0.5, %v15676_v0  ;;  %v7419_v62 = vmul.f32 0.5, %v15685_v35 }
0x10e1   : > { %11234 = vtanh.f32 %v7738_v38  ;;  %v7416_v17 = vmul.f32 0.5, %v15673_v15  ;;  %v7418_v63 = vmul.f32 0.5, %v15681_v18  ;;  %v7421_v46 = vmul.f32 0.5, %v15706_v52 }
0x10e2   : > { %11236 = vtanh.f32 %v7741_v20  ;;  %v7423_v37 = vmul.f32 0.5, %v15716_v6  ;;  %v7420_v15 = vmul.f32 0.5, %v15701_v36  ;;  %v7422_v23 = vmul.f32 0.5, %v15711_v2 }
0x10e3   : > { %11238 = vtanh.f32 %v7743_v42 }
0x10e4   : > { %v11225_v1 = vpop.eup %11224  ;;  %11240 = vtanh.f32 %v7740_v54 }
0x10e5   : > { %v11227_v5 = vpop.eup %11226  ;;  %v7860_v45 = vadd.f32 1.0, %v11225_v1  ;;  %11242 = vtanh.f32 %v7742_v16 }
0x10e6   : > { %v7862_v29 = vadd.f32 1.0, %v11227_v5 }
0x10e7   : > { %v7924_v4 = vmul.f32 %v7860_v45, %v7412_v44 }
0x10e8   : > { %v7926_v28 = vmul.f32 %v7862_v29, %v7414_v55  ;;  %v11229_v56 = vpop.eup %11228  ;;  %v15755_v55 = vld [vmem:[%s638_s10] ss:$0 sm:$0xff]  ;;  %s16626_s10 = sld [smem:[#allocation25_spill]] }
0x10e9   : > { %v11231_v50 = vpop.eup %11230  ;;  %v7865_v40 = vadd.f32 1.0, %v11229_v56 }
0x10ea   : > { %v7966_v25 = vpack.c.bf16 %v7926_v28, %v7924_v4  ;;  %v11233_v19 = vpop.eup %11232  ;;  %v7867_v13 = vadd.f32 1.0, %v11231_v50 }
0x10eb   : > { %v11235_v34 = vpop.eup %11234  ;;  %v7864_v43 = vadd.f32 1.0, %v11233_v19  ;;  %v7929_v12 = vmul.f32 %v7865_v40, %v7417_v30 }
0x10ec   : > { %8232 = vmatmul.mubr.bf16.gmra.mrb[236].mxu0 %v7966_v25  ;;  %v11237_v31 = vpop.eup %11236  ;;  %v7931_v21 = vmul.f32 %v7867_v13, %v7419_v62  ;;  %v7866_v59 = vadd.f32 1.0, %v11235_v34 }
0x10ed   : > { %v11239_v26 = vpop.eup %11238  ;;  %v7869_v0 = vadd.f32 1.0, %v11237_v31  ;;  %v7928_v11 = vmul.f32 %v7864_v43, %v7416_v17 }
0x10ee   : > { %v11241_v48 = vpop.eup %11240  ;;  %v7969_v35 = vpack.c.bf16 %v7931_v21, %v7929_v12  ;;  %v7930_v38 = vmul.f32 %v7866_v59, %v7418_v63  ;;  %v7871_v20 = vadd.f32 1.0, %v11239_v26  ;;  %p8882_p3 = scmp.ne.s32.totalorder %s16626_s10, 1 }
0x10ef   : > { %v11243_v42 = vpop.eup %11242  ;;  %v7868_v58 = vadd.f32 1.0, %v11241_v48  ;;  %v7933_v54 = vmul.f32 %v7869_v0, %v7421_v46 }
0x10f0   : > { %8239 = vmatprep.mubr.bf16.mxu0 %v7969_v35  ;;  %v7968_v18 = vpack.c.bf16 %v7930_v38, %v7928_v11  ;;  %v7935_v16 = vmul.f32 %v7871_v20, %v7423_v37  ;;  %v7870_v52 = vadd.f32 1.0, %v11243_v42 }
0x10f1   : > { %v7932_v6 = vmul.f32 %v7868_v58, %v7420_v15 }
0x10f2   : > { %v7971_v1 = vpack.c.bf16 %v7935_v16, %v7933_v54  ;;  %v7934_v5 = vmul.f32 %v7870_v52, %v7422_v23 }
0x10f4   : > { %8240 = vmatmul.mubr.bf16.gmra.mrb[240].mxu0 %v7968_v18  ;;  %v7970_v45 = vpack.c.bf16 %v7934_v5, %v7932_v6 }
0x10f5   : > { %8247 = vmatprep.mubr.bf16.mxu0 %v7971_v1 }
0x10fc   : > { %8248 = vmatmul.mubr.bf16.gmra.mrb[244].mxu0 %v7970_v45 }
0x1102   : > { %v9273_v44 = vpop.f32.mrb[192].mxu0 }
0x1103   : > { %v9274_v36 = vpop.f32.mrb[193].mxu0 }
0x1104   : > { %v9275_v29 = vadd.f32 %v9274_v36, %v9273_v44  ;;  %v9276_v2 = vpop.f32.mrb[194].mxu0 }
0x1105   : > { %v9277_v4 = vpop.f32.mrb[195].mxu0 }
0x1106   : > { %v8146_v28 = vadd.f32 %v9275_v29, %v15755_v55  ;;  %v9278_v56 = vadd.f32 %v9277_v4, %v9276_v2 }
0x1108   : > { %v15759_v50 = vadd.f32 %v8146_v28, %v14850_v60  ;;  %v8149_v25 = vadd.f32 %v9278_v56, %v15755_v55 }
0x110a   : > { %8304 = vst [vmem:[#allocation2] sm:$0xff] %v15759_v50  ;;  %v15764_v40 = vadd.f32 %v8149_v25, %v14855_v7  ;;  %v9279_v19 = vpop.f32.mrb[196].mxu0  ;;  %8340 = vst [vmem:[%s12207_s11] sm:$0xff] (!%p8882_p3), %v15759_v50 }
0x110b   : > { %v9280_v30 = vpop.f32.mrb[197].mxu0 }
0x110c   : > { %8305 = vst [vmem:[#allocation2 + $0x8] sm:$0xff] %v15764_v40  ;;  %v9281_v62 = vadd.f32 %v9280_v30, %v9279_v19  ;;  %v9282_v13 = vpop.f32.mrb[198].mxu0  ;;  %8341 = vst [vmem:[%s12207_s11 + $0x8] sm:$0xff] (!%p8882_p3), %v15764_v40 }
0x110d   : > { %v9283_v34 = vpop.f32.mrb[199].mxu0 }
0x110e   : > { %v8154_v17 = vadd.f32 %v9281_v62, %v15755_v55  ;;  %v9284_v43 = vadd.f32 %v9283_v34, %v9282_v13 }
0x1110   : > { %v15769_v60 = vadd.f32 %v8154_v17, %v14858_v61  ;;  %v8157_v31 = vadd.f32 %v9284_v43, %v15755_v55 }
0x1112   : > { %8306 = vst [vmem:[#allocation2 + $0x10] sm:$0xff] %v15769_v60  ;;  %v15774_v7 = vadd.f32 %v8157_v31, %v14864_v32  ;;  %8342 = vst [vmem:[%s12207_s11 + $0x10] sm:$0xff] (!%p8882_p3), %v15769_v60 }
0x1113   : > { %v9285_v12 = vpop.f32.mrb[200].mxu0 }
0x1114   : > { %8307 = vst [vmem:[#allocation2 + $0x18] sm:$0xff] %v15774_v7  ;;  %v9286_v21 = vpop.f32.mrb[201].mxu0  ;;  %8343 = vst [vmem:[%s12207_s11 + $0x18] sm:$0xff] (!%p8882_p3), %v15774_v7 }
0x1115   : > { %v9287_v63 = vadd.f32 %v9286_v21, %v9285_v12  ;;  %v9288_v59 = vpop.f32.mrb[202].mxu0 }
0x1116   : > { %v9289_v26 = vpop.f32.mrb[203].mxu0  ;;  %v7349_v46 = vpop.f32.mrb[248].mxu1 }
0x1117   : > { %v8162_v37 = vadd.f32 %v9287_v63, %v15755_v55  ;;  %v9290_v0 = vadd.f32 %v9289_v26, %v9288_v59  ;;  %v15779_v61 = vadd.f32 %v7349_v46, %v15295_v41  ;;  %v7351_v48 = vpop.f32.mrb[249].mxu1 }
0x1118   : > { %v15782_v35 = vadd.f32 %v7351_v48, %v15297_v9  ;;  %v7353_v32 = vpop.f32.mrb[250].mxu1 }
0x1119   : > { %v15785_v11 = vadd.f32 %v8162_v37, %v14869_v24  ;;  %v8165_v38 = vadd.f32 %v9290_v0, %v15755_v55  ;;  %v7488_v20 = vmul.f32 0.044715, %v15779_v61  ;;  %v15790_v42 = vadd.f32 %v7353_v32, %v15295_v41  ;;  %v7355_v15 = vpop.f32.mrb[251].mxu1 }
0x111a   : > { %v7489_v23 = vmul.f32 0.044715, %v15782_v35  ;;  %v15794_v58 = vadd.f32 %v7355_v15, %v15297_v9 }
0x111b   : > { %8308 = vst [vmem:[#allocation2 + $0x20] sm:$0xff] %v15785_v11  ;;  %v15798_v18 = vadd.f32 %v8165_v38, %v14875_v10  ;;  %v7552_v24 = vmul.f32 %v7488_v20, %v15779_v61  ;;  %v7490_v54 = vmul.f32 0.044715, %v15790_v42  ;;  %8344 = vst [vmem:[%s12207_s11 + $0x20] sm:$0xff] (!%p8882_p3), %v15785_v11 }
0x111c   : > { %v7553_v16 = vmul.f32 %v7489_v23, %v15782_v35  ;;  %v7491_v52 = vmul.f32 0.044715, %v15794_v58 }
0x111d   : > { %8309 = vst [vmem:[#allocation2 + $0x28] sm:$0xff] %v15798_v18  ;;  %v7616_v1 = vmul.f32 %v7552_v24, %v15779_v61  ;;  %v7554_v6 = vmul.f32 %v7490_v54, %v15790_v42  ;;  %8345 = vst [vmem:[%s12207_s11 + $0x28] sm:$0xff] (!%p8882_p3), %v15798_v18 }
0x111e   : > { %v7617_v5 = vmul.f32 %v7553_v16, %v15782_v35  ;;  %v7555_v45 = vmul.f32 %v7491_v52, %v15794_v58  ;;  %v7359_v10 = vpop.f32.mrb[252].mxu1 }
0x111f   : > { %v7618_v44 = vmul.f32 %v7554_v6, %v15790_v42  ;;  %v15811_v36 = vadd.f32 %v7359_v10, %v15295_v41  ;;  %v7361_v29 = vpop.f32.mrb[253].mxu1  ;;  %v7680_v2 = vadd.f32 %v7616_v1, %v15779_v61 }
0x1120   : > { %v7619_v4 = vmul.f32 %v7555_v45, %v15794_v58  ;;  %v15816_v28 = vadd.f32 %v7361_v29, %v15297_v9  ;;  %v7363_v56 = vpop.f32.mrb[254].mxu1  ;;  %v7681_v25 = vadd.f32 %v7617_v5, %v15782_v35 }
0x1121   : > { %v7492_v19 = vmul.f32 0.044715, %v15811_v36  ;;  %v15821_v30 = vadd.f32 %v7363_v56, %v15295_v41  ;;  %v7365_v62 = vpop.f32.mrb[255].mxu1  ;;  %v7682_v13 = vadd.f32 %v7618_v44, %v15790_v42  ;;  %v7744_v34 = vmul.f32 0.7978846, %v7680_v2 }
0x1122   : > { %v7493_v17 = vmul.f32 0.044715, %v15816_v28  ;;  %v15826_v43 = vadd.f32 %v7365_v62, %v15297_v9  ;;  %v7683_v31 = vadd.f32 %v7619_v4, %v15794_v58  ;;  %v7745_v12 = vmul.f32 0.7978846, %v7681_v25 }
0x1123   : > { %v7556_v21 = vmul.f32 %v7492_v19, %v15811_v36  ;;  %v7494_v63 = vmul.f32 0.044715, %v15821_v30  ;;  %v7746_v59 = vmul.f32 0.7978846, %v7682_v13  ;;  %11244 = vtanh.f32 %v7744_v34 }
0x1124   : > { %v7557_v41 = vmul.f32 %v7493_v17, %v15816_v28  ;;  %v7495_v26 = vmul.f32 0.044715, %v15826_v43  ;;  %v7747_v46 = vmul.f32 0.7978846, %v7683_v31  ;;  %11246 = vtanh.f32 %v7745_v12 }
0x1125   : > { %v7620_v37 = vmul.f32 %v7556_v21, %v15811_v36  ;;  %v7558_v9 = vmul.f32 %v7494_v63, %v15821_v30  ;;  %11248 = vtanh.f32 %v7746_v59  ;;  %v7424_v56 = vmul.f32 0.5, %v15779_v61 }
0x1126   : > { %v7621_v0 = vmul.f32 %v7557_v41, %v15816_v28  ;;  %v7559_v48 = vmul.f32 %v7495_v26, %v15826_v43  ;;  %11250 = vtanh.f32 %v7747_v46  ;;  %v7426_v25 = vmul.f32 0.5, %v15790_v42 }
0x1127   : > { %v7622_v32 = vmul.f32 %v7558_v9, %v15821_v30  ;;  %v7684_v38 = vadd.f32 %v7620_v37, %v15811_v36  ;;  %v7425_v34 = vmul.f32 0.5, %v15782_v35  ;;  %v7427_v17 = vmul.f32 0.5, %v15794_v58 }
0x1128   : > { %v7623_v20 = vmul.f32 %v7559_v48, %v15826_v43  ;;  %v7685_v15 = vadd.f32 %v7621_v0, %v15816_v28 }
0x1129   : > { %v7686_v23 = vadd.f32 %v7622_v32, %v15821_v30  ;;  %v7748_v24 = vmul.f32 0.7978846, %v7684_v38 }
0x112a   : > { %v7687_v54 = vadd.f32 %v7623_v20, %v15826_v43  ;;  %v7749_v16 = vmul.f32 0.7978846, %v7685_v15 }
0x112b   : > { %v7750_v52 = vmul.f32 0.7978846, %v7686_v23  ;;  %11252 = vtanh.f32 %v7748_v24  ;;  %v7430_v24 = vmul.f32 0.5, %v15821_v30 }
0x112c   : > { %v7751_v1 = vmul.f32 0.7978846, %v7687_v54  ;;  %11254 = vtanh.f32 %v7749_v16 }
0x112d   : > { %v11245_v6 = vpop.eup %11244  ;;  %11256 = vtanh.f32 %v7750_v52 }
0x112e   : > { %v11247_v5 = vpop.eup %11246  ;;  %v7872_v45 = vadd.f32 1.0, %v11245_v6  ;;  %11258 = vtanh.f32 %v7751_v1  ;;  %v9291_v44 = vpop.f32.mrb[204].mxu0  ;;  %v7429_v1 = vmul.f32 0.5, %v15816_v28 }
0x112f   : > { %v11249_v10 = vpop.eup %11248  ;;  %v7873_v29 = vadd.f32 1.0, %v11247_v5  ;;  %v9292_v4 = vpop.f32.mrb[205].mxu0 }
0x1130   : > { %v11251_v2 = vpop.eup %11250  ;;  %v7874_v19 = vadd.f32 1.0, %v11249_v10  ;;  %v9293_v62 = vadd.f32 %v9292_v4, %v9291_v44  ;;  %v9294_v13 = vpop.f32.mrb[206].mxu0  ;;  %v7936_v21 = vmul.f32 %v7872_v45, %v7424_v56 }
0x1131   : > { %v7875_v31 = vadd.f32 1.0, %v11251_v2  ;;  %v9295_v12 = vpop.f32.mrb[207].mxu0  ;;  %v7937_v26 = vmul.f32 %v7873_v29, %v7425_v34 }
0x1132   : > { %v7938_v63 = vmul.f32 %v7874_v19, %v7426_v25  ;;  %v8170_v59 = vadd.f32 %v9293_v62, %v15755_v55  ;;  %v9296_v41 = vadd.f32 %v9295_v12, %v9294_v13 }
0x1133   : > { %v7939_v46 = vmul.f32 %v7875_v31, %v7427_v17 }
0x1134   : > { %v7972_v37 = vpack.c.bf16 %v7938_v63, %v7936_v21  ;;  %v15849_v42 = vadd.f32 %v8170_v59, %v14878_v22  ;;  %v8173_v9 = vadd.f32 %v9296_v41, %v15755_v55  ;;  %v7428_v22 = vmul.f32 0.5, %v15811_v36 }
0x1135   : > { %v11253_v61 = vpop.eup %11252  ;;  %v7973_v0 = vpack.c.bf16 %v7939_v46, %v7937_v26 }
0x1136   : > { %v11255_v35 = vpop.eup %11254  ;;  %v7876_v48 = vadd.f32 1.0, %v11253_v61  ;;  %8310 = vst [vmem:[#allocation2 + $0x30] sm:$0xff] %v15849_v42  ;;  %v15854_v32 = vadd.f32 %v8173_v9, %v14884_v53  ;;  %v9297_v38 = vpop.f32.mrb[208].mxu0  ;;  %v7431_v53 = vmul.f32 0.5, %v15826_v43  ;;  %8346 = vst [vmem:[%s12207_s11 + $0x30] sm:$0xff] (!%p8882_p3), %v15849_v42 }
0x1137   : > { %v11257_v58 = vpop.eup %11256  ;;  %8255 = vmatprep.mubr.bf16.mxu0 %v7973_v0  ;;  %v7877_v20 = vadd.f32 1.0, %v11255_v35  ;;  %v9298_v23 = vpop.f32.mrb[209].mxu0 }
0x1138   : > { %v11259_v15 = vpop.eup %11258  ;;  %8256 = vmatmul.mubr.bf16.gmra.mrb[248].mxu0 %v7972_v37  ;;  %v7878_v54 = vadd.f32 1.0, %v11257_v58  ;;  %8311 = vst [vmem:[#allocation2 + $0x38] sm:$0xff] %v15854_v32  ;;  %v9299_v16 = vadd.f32 %v9298_v23, %v9297_v38  ;;  %v9300_v52 = vpop.f32.mrb[210].mxu0  ;;  %v7940_v45 = vmul.f32 %v7876_v48, %v7428_v22  ;;  %v16612_v23 = vld [vmem:[#allocation83_spill] sm:$0xff]  ;;  %8347 = vst [vmem:[%s12207_s11 + $0x38] sm:$0xff] (!%p8882_p3), %v15854_v32 }
0x1139   : > { %v7879_v6 = vadd.f32 1.0, %v11259_v15  ;;  %v9301_v5 = vpop.f32.mrb[211].mxu0  ;;  %v7941_v2 = vmul.f32 %v7877_v20, %v7429_v1 }
0x113a   : > { %v7942_v10 = vmul.f32 %v7878_v54, %v7430_v24  ;;  %v8178_v44 = vadd.f32 %v9299_v16, %v15755_v55  ;;  %v9302_v29 = vadd.f32 %v9301_v5, %v9300_v52 }
0x113b   : > { %v7943_v36 = vmul.f32 %v7879_v6, %v7431_v53  ;;  %v16613_v6 = vld [vmem:[#allocation90_spill] sm:$0xff] }
0x113c   : > { %v7974_v4 = vpack.c.bf16 %v7942_v10, %v7940_v45  ;;  %v15863_v30 = vadd.f32 %v8178_v44, %v14889_v49  ;;  %v8181_v56 = vadd.f32 %v9302_v29, %v15755_v55  ;;  %v16614_v45 = vld [vmem:[#allocation85_spill] sm:$0xff] }
0x113d   : > { %v7975_v25 = vpack.c.bf16 %v7943_v36, %v7941_v2 }
0x113e   : > { %8312 = vst [vmem:[#allocation2 + $0x40] sm:$0xff] %v15863_v30  ;;  %v15868_v28 = vadd.f32 %v8181_v56, %v14895_v57  ;;  %8348 = vst [vmem:[%s12207_s11 + $0x40] sm:$0xff] (!%p8882_p3), %v15863_v30 }
0x113f   : > { %8263 = vmatprep.mubr.bf16.mxu0 %v7975_v25 }
0x1140   : > { %8264 = vmatmul.mubr.bf16.gmra.mrb[252].mxu0 %v7974_v4  ;;  %8313 = vst [vmem:[#allocation2 + $0x48] sm:$0xff] %v15868_v28  ;;  %8349 = vst [vmem:[%s12207_s11 + $0x48] sm:$0xff] (!%p8882_p3), %v15868_v28 }
0x117b   : > { %v9303_v43 = vpop.f32.mrb[212].mxu0 }
0x117c   : > { %v9304_v19 = vpop.f32.mrb[213].mxu0 }
0x117d   : > { %v9305_v62 = vadd.f32 %v9304_v19, %v9303_v43  ;;  %v9306_v13 = vpop.f32.mrb[214].mxu0  ;;  %v16615_v43 = vld [vmem:[#allocation92_spill] sm:$0xff] }
0x117e   : > { %v9307_v34 = vpop.f32.mrb[215].mxu0 }
0x117f   : > { %v8186_v49 = vadd.f32 %v9305_v62, %v15755_v55  ;;  %v9308_v17 = vadd.f32 %v9307_v34, %v9306_v13  ;;  %v16616_v13 = vld [vmem:[#allocation97_spill] sm:$0xff] }
0x1181   : > { %v15873_v31 = vadd.f32 %v8186_v49, %v14898_v47  ;;  %v8189_v12 = vadd.f32 %v9308_v17, %v15755_v55 }
0x1183   : > { %8314 = vst [vmem:[#allocation2 + $0x50] sm:$0xff] %v15873_v31  ;;  %v15878_v57 = vadd.f32 %v8189_v12, %v14904_v51  ;;  %v9309_v21 = vpop.f32.mrb[216].mxu0  ;;  %8350 = vst [vmem:[%s12207_s11 + $0x50] sm:$0xff] (!%p8882_p3), %v15873_v31 }
0x1184   : > { %v9310_v63 = vpop.f32.mrb[217].mxu0 }
0x1185   : > { %8315 = vst [vmem:[#allocation2 + $0x58] sm:$0xff] %v15878_v57  ;;  %v9311_v59 = vadd.f32 %v9310_v63, %v9309_v21  ;;  %v9312_v41 = vpop.f32.mrb[218].mxu0  ;;  %8351 = vst [vmem:[%s12207_s11 + $0x58] sm:$0xff] (!%p8882_p3), %v15878_v57 }
0x1186   : > { %v9313_v26 = vpop.f32.mrb[219].mxu0 }
0x1187   : > { %v8194_v46 = vadd.f32 %v9311_v59, %v15755_v55  ;;  %v9314_v37 = vadd.f32 %v9313_v26, %v9312_v41  ;;  %v16617_v26 = vld [vmem:[#allocation93_spill] sm:$0xff] }
0x1189   : > { %v15883_v47 = vadd.f32 %v8194_v46, %v14909_v39  ;;  %v8197_v61 = vadd.f32 %v9314_v37, %v15755_v55 }
0x118b   : > { %8316 = vst [vmem:[#allocation2 + $0x60] sm:$0xff] %v15883_v47  ;;  %v15888_v51 = vadd.f32 %v8197_v61, %v14915_v8  ;;  %v16618_v61 = vld [vmem:[#allocation89_spill] sm:$0xff]  ;;  %8352 = vst [vmem:[%s12207_s11 + $0x60] sm:$0xff] (!%p8882_p3), %v15883_v47 }
0x118d   : > { %8317 = vst [vmem:[#allocation2 + $0x68] sm:$0xff] %v15888_v51  ;;  %8353 = vst [vmem:[%s12207_s11 + $0x68] sm:$0xff] (!%p8882_p3), %v15888_v51 }
0x1193   : > { %v9315_v9 = vpop.f32.mrb[220].mxu0 }
0x1194   : > { %v9316_v0 = vpop.f32.mrb[221].mxu0 }
0x1195   : > { %v9317_v35 = vadd.f32 %v9316_v0, %v9315_v9  ;;  %v9318_v48 = vpop.f32.mrb[222].mxu0 }
0x1196   : > { %v9319_v58 = vpop.f32.mrb[223].mxu0 }
0x1197   : > { %v8202_v38 = vadd.f32 %v9317_v35, %v15755_v55  ;;  %v9320_v20 = vadd.f32 %v9319_v58, %v9318_v48 }
0x1199   : > { %v15893_v39 = vadd.f32 %v8202_v38, %v14918_v27  ;;  %v8205_v15 = vadd.f32 %v9320_v20, %v15755_v55 }
0x119b   : > { %8318 = vst [vmem:[#allocation2 + $0x70] sm:$0xff] %v15893_v39  ;;  %v15898_v8 = vadd.f32 %v8205_v15, %v16612_v23  ;;  %8354 = vst [vmem:[%s12207_s11 + $0x70] sm:$0xff] (!%p8882_p3), %v15893_v39 }
0x119d   : > { %8319 = vst [vmem:[#allocation2 + $0x78] sm:$0xff] %v15898_v8  ;;  %8355 = vst [vmem:[%s12207_s11 + $0x78] sm:$0xff] (!%p8882_p3), %v15898_v8 }
0x119f   : > { %v9321_v22 = vpop.f32.mrb[224].mxu0 }
0x11a0   : > { %v9322_v24 = vpop.f32.mrb[225].mxu0 }
0x11a1   : > { %v9323_v54 = vadd.f32 %v9322_v24, %v9321_v22  ;;  %v9324_v16 = vpop.f32.mrb[226].mxu0  ;;  %v16619_v24 = vld [vmem:[#allocation91_spill] sm:$0xff] }
0x11a2   : > { %v9325_v52 = vpop.f32.mrb[227].mxu0 }
0x11a3   : > { %v8210_v1 = vadd.f32 %v9323_v54, %v15755_v55  ;;  %v9326_v53 = vadd.f32 %v9325_v52, %v9324_v16 }
0x11a5   : > { %v15903_v27 = vadd.f32 %v8210_v1, %v16613_v6  ;;  %v8213_v5 = vadd.f32 %v9326_v53, %v15755_v55 }
0x11a7   : > { %8320 = vst [vmem:[#allocation2 + $0x80] sm:$0xff] %v15903_v27  ;;  %v15908_v10 = vadd.f32 %v8213_v5, %v16614_v45  ;;  %8356 = vst [vmem:[%s12207_s11 + $0x80] sm:$0xff] (!%p8882_p3), %v15903_v27 }
0x11a8   : > { %v9327_v44 = vpop.f32.mrb[228].mxu0 }
0x11a9   : > { %8321 = vst [vmem:[#allocation2 + $0x88] sm:$0xff] %v15908_v10  ;;  %v9328_v29 = vpop.f32.mrb[229].mxu0  ;;  %8357 = vst [vmem:[%s12207_s11 + $0x88] sm:$0xff] (!%p8882_p3), %v15908_v10 }
0x11aa   : > { %v9329_v2 = vadd.f32 %v9328_v29, %v9327_v44  ;;  %v9330_v36 = vpop.f32.mrb[230].mxu0 }
0x11ab   : > { %v9331_v4 = vpop.f32.mrb[231].mxu0 }
0x11ac   : > { %v8218_v56 = vadd.f32 %v9329_v2, %v15755_v55  ;;  %v9332_v25 = vadd.f32 %v9331_v4, %v9330_v36 }
0x11ae   : > { %v15913_v19 = vadd.f32 %v8218_v56, %v16615_v43  ;;  %v8221_v62 = vadd.f32 %v9332_v25, %v15755_v55 }
0x11b0   : > { %8322 = vst [vmem:[#allocation2 + $0x90] sm:$0xff] %v15913_v19  ;;  %v15918_v34 = vadd.f32 %v8221_v62, %v16616_v13  ;;  %v9333_v49 = vpop.f32.mrb[232].mxu0  ;;  %v16620_v13 = vld [vmem:[#allocation100_spill] sm:$0xff]  ;;  %8358 = vst [vmem:[%s12207_s11 + $0x90] sm:$0xff] (!%p8882_p3), %v15913_v19 }
0x11b1   : > { %v9334_v17 = vpop.f32.mrb[233].mxu0 }
0x11b2   : > { %8323 = vst [vmem:[#allocation2 + $0x98] sm:$0xff] %v15918_v34  ;;  %v9335_v12 = vadd.f32 %v9334_v17, %v9333_v49  ;;  %v9336_v21 = vpop.f32.mrb[234].mxu0  ;;  %v16621_v17 = vld [vmem:[#allocation105_spill] sm:$0xff]  ;;  %8359 = vst [vmem:[%s12207_s11 + $0x98] sm:$0xff] (!%p8882_p3), %v15918_v34 }
0x11b3   : > { %v9337_v63 = vpop.f32.mrb[235].mxu0 }
0x11b4   : > { %v8226_v59 = vadd.f32 %v9335_v12, %v15755_v55  ;;  %v9338_v41 = vadd.f32 %v9337_v63, %v9336_v21 }
0x11b6   : > { %v15923_v46 = vadd.f32 %v8226_v59, %v16617_v26  ;;  %v8229_v37 = vadd.f32 %v9338_v41, %v15755_v55 }
0x11b8   : > { %8324 = vst [vmem:[#allocation2 + $0xa0] sm:$0xff] %v15923_v46  ;;  %v15928_v9 = vadd.f32 %v8229_v37, %v16618_v61  ;;  %v16622_v61 = vld [vmem:[#allocation108_spill] sm:$0xff]  ;;  %8360 = vst [vmem:[%s12207_s11 + $0xa0] sm:$0xff] (!%p8882_p3), %v15923_v46 }
0x11ba   : > { %8325 = vst [vmem:[#allocation2 + $0xa8] sm:$0xff] %v15928_v9  ;;  %8361 = vst [vmem:[%s12207_s11 + $0xa8] sm:$0xff] (!%p8882_p3), %v15928_v9 }
0x11bf   : > { %v9339_v0 = vpop.f32.mrb[236].mxu0 }
0x11c0   : > { %v9340_v35 = vpop.f32.mrb[237].mxu0 }
0x11c1   : > { %v9341_v48 = vadd.f32 %v9340_v35, %v9339_v0  ;;  %v9342_v58 = vpop.f32.mrb[238].mxu0 }
0x11c2   : > { %v9343_v38 = vpop.f32.mrb[239].mxu0 }
0x11c3   : > { %v8234_v20 = vadd.f32 %v9341_v48, %v15755_v55  ;;  %v9344_v15 = vadd.f32 %v9343_v38, %v9342_v58  ;;  %v16623_v48 = vld [vmem:[#allocation110_spill] sm:$0xff] }
0x11c5   : > { %v15933_v23 = vadd.f32 %v8234_v20, %v14984_v14  ;;  %v8237_v22 = vadd.f32 %v9344_v15, %v15755_v55 }
0x11c7   : > { %8326 = vst [vmem:[#allocation2 + $0xb0] sm:$0xff] %v15933_v23  ;;  %v15938_v54 = vadd.f32 %v8237_v22, %v16619_v24  ;;  %v9345_v16 = vpop.f32.mrb[240].mxu0  ;;  %8362 = vst [vmem:[%s12207_s11 + $0xb0] sm:$0xff] (!%p8882_p3), %v15933_v23 }
0x11c8   : > { %v9346_v52 = vpop.f32.mrb[241].mxu0 }
0x11c9   : > { %8327 = vst [vmem:[#allocation2 + $0xb8] sm:$0xff] %v15938_v54  ;;  %v9347_v1 = vadd.f32 %v9346_v52, %v9345_v16  ;;  %v9348_v53 = vpop.f32.mrb[242].mxu0  ;;  %8363 = vst [vmem:[%s12207_s11 + $0xb8] sm:$0xff] (!%p8882_p3), %v15938_v54 }
0x11ca   : > { %v9349_v6 = vpop.f32.mrb[243].mxu0 }
0x11cb   : > { %v8242_v5 = vadd.f32 %v9347_v1, %v15755_v55  ;;  %v9350_v45 = vadd.f32 %v9349_v6, %v9348_v53  ;;  %v16624_v1 = vld [vmem:[#allocation54_spill] sm:$0xff] }
0x11cd   : > { %v15943_v14 = vadd.f32 %v8242_v5, %v15016_v3  ;;  %v8245_v44 = vadd.f32 %v9350_v45, %v15755_v55  ;;  %v16625_v5 = vld [vmem:[#allocation111_spill] sm:$0xff] }
0x11cf   : > { %8328 = vst [vmem:[#allocation2 + $0xc0] sm:$0xff] %v15943_v14  ;;  %v15948_v29 = vadd.f32 %v8245_v44, %v15022_v33  ;;  %v9351_v2 = vpop.f32.mrb[244].mxu0  ;;  %8364 = vst [vmem:[%s12207_s11 + $0xc0] sm:$0xff] (!%p8882_p3), %v15943_v14 }
0x11d0   : > { %v9352_v36 = vpop.f32.mrb[245].mxu0 }
0x11d1   : > { %8329 = vst [vmem:[#allocation2 + $0xc8] sm:$0xff] %v15948_v29  ;;  %v9353_v4 = vadd.f32 %v9352_v36, %v9351_v2  ;;  %v9354_v56 = vpop.f32.mrb[246].mxu0  ;;  %8365 = vst [vmem:[%s12207_s11 + $0xc8] sm:$0xff] (!%p8882_p3), %v15948_v29 }
0x11d2   : > { %v9355_v25 = vpop.f32.mrb[247].mxu0 }
0x11d3   : > { %v8250_v43 = vadd.f32 %v9353_v4, %v15755_v55  ;;  %v9356_v62 = vadd.f32 %v9355_v25, %v9354_v56 }
0x11d5   : > { %v8298_v3 = vadd.f32 %v8250_v43, %v16620_v13  ;;  %v8253_v49 = vadd.f32 %v9356_v62, %v15755_v55 }
0x11d7   : > { %8330 = vst [vmem:[#allocation2 + $0xd0] sm:$0xff] %v8298_v3  ;;  %v8299_v12 = vadd.f32 %v8253_v49, %v16621_v17  ;;  %8366 = vst [vmem:[%s12207_s11 + $0xd0] sm:$0xff] (!%p8882_p3), %v8298_v3 }
0x11d9   : > { %8331 = vst [vmem:[#allocation2 + $0xd8] sm:$0xff] %v8299_v12  ;;  %8367 = vst [vmem:[%s12207_s11 + $0xd8] sm:$0xff] (!%p8882_p3), %v8299_v12 }
0x120b   : > { %v9357_v33 = vpop.f32.mrb[248].mxu0 }
0x120c   : > { %v9358_v21 = vpop.f32.mrb[249].mxu0 }
0x120d   : > { %v9359_v63 = vadd.f32 %v9358_v21, %v9357_v33  ;;  %v9360_v59 = vpop.f32.mrb[250].mxu0 }
0x120e   : > { %v9361_v41 = vpop.f32.mrb[251].mxu0 }
0x120f   : > { %v8258_v26 = vadd.f32 %v9359_v63, %v15755_v55  ;;  %v9362_v37 = vadd.f32 %v9361_v41, %v9360_v59 }
0x1211   : > { %v8300_v0 = vadd.f32 %v8258_v26, %v16622_v61  ;;  %v8261_v35 = vadd.f32 %v9362_v37, %v15755_v55 }
0x1213   : > { %8332 = vst [vmem:[#allocation2 + $0xe0] sm:$0xff] %v8300_v0  ;;  %v8301_v58 = vadd.f32 %v8261_v35, %v16623_v48  ;;  %v9363_v38 = vpop.f32.mrb[252].mxu0  ;;  %8368 = vst [vmem:[%s12207_s11 + $0xe0] sm:$0xff] (!%p8882_p3), %v8300_v0 }
0x1214   : > { %v9364_v20 = vpop.f32.mrb[253].mxu0 }
0x1215   : > { %8333 = vst [vmem:[#allocation2 + $0xe8] sm:$0xff] %v8301_v58  ;;  %v9365_v15 = vadd.f32 %v9364_v20, %v9363_v38  ;;  %v9366_v22 = vpop.f32.mrb[254].mxu0  ;;  %8369 = vst [vmem:[%s12207_s11 + $0xe8] sm:$0xff] (!%p8882_p3), %v8301_v58 }
0x1216   : > { %v9367_v24 = vpop.f32.mrb[255].mxu0 }
0x1217   : > { %v8266_v16 = vadd.f32 %v9365_v15, %v15755_v55  ;;  %v9368_v52 = vadd.f32 %v9367_v24, %v9366_v22  ;;  %8339 = sbr.rel (%p8882_p3) target bundleno = 4638 (0x121e), region = 104 }
0x1219   : > { %v8302_v53 = vadd.f32 %v8266_v16, %v16624_v1  ;;  %v8269_v6 = vadd.f32 %v9368_v52, %v15755_v55 }
0x121b   : > { %8334 = vst [vmem:[#allocation2 + $0xf0] sm:$0xff] %v8302_v53  ;;  %v8303_v45 = vadd.f32 %v8269_v6, %v16625_v5  ;;  %8370 = vst [vmem:[%s12207_s11 + $0xf0] sm:$0xff] (!%p8882_p3), %v8302_v53 }
0x121d   : > { %8335 = vst [vmem:[#allocation2 + $0xf8] sm:$0xff] %v8303_v45  ;;  %8371 = vst [vmem:[%s12207_s11 + $0xf8] sm:$0xff] (!%p8882_p3), %v8303_v45 }
0x121e PF: > { %s16627_s23 = sld [smem:[#allocation26_spill]]  ;;  %s16628_s25 = sld [smem:[#allocation33_spill]] }
0x121f   : > { %s16629_s28 = sld [smem:[#allocation124_spill]]  ;;  %s8387_s16 = sshll.u32 %s12207_s11, 4  ;;  %s16029_s16 = int_to_ptr.vmem [resolvable:$true] %s8387_s16 }
0x1220   : > { %s8373_s27 = scalar_lea.sflag [#allocation5], %s12134_s2  ;;  %s11512_s30 = scalar_lea.vmem %s16029_s16, 4096 }
0x1221   : > { %p11513_p0 = scmp.ne.s32.totalorder %s16029_s16, %s11512_s30  ;;  %s11665_s15 = smov [#allocation15]  }
0x1222   : > { %s11516_s0 = sshll.u32 %s11665_s15, 4  ;;  %s11517_s0 = int_to_ptr.vmem [resolvable:$false] %s11516_s0 }
0x1223   : > { %s11518_s9 = scalar_lea.vmem %s11517_s0, 8192  ;;  %p11519_p10 = scmp.lt.s32.totalorder %s16029_s16, %s11517_s0 }
0x1224   : > { %s8896_s17 = sshll.u32 %s16627_s23, 12  ;;  %p16631_p9 = scmp.ne.s32.totalorder %s16628_s25, 0 }
0x1225   : > { %s16630_s4 = smov %s16629_s28  ;;  %s16026_s22 = scalar_lea.hbm %s16629_s28, %s8896_s17 }
0x1226   : > { %p11514_p13 = pnand %p11513_p0, %p16631_p9  ;;  %p11520_p8 = scmp.lt.s32.totalorder %s11518_s9, %s11512_s30 }
0x1228   : > { %p11515_p4 = pneg %p11514_p13  ;;  %p11521_p6 = por %p11520_p8, %p11519_p10 }
0x122a   : > { %p11522_p12 = pnand %p11521_p6, %p11515_p4 }
0x122c   : > { %11525 = shalt.err (!%p11522_p12)
}
0x122d   : > { %s11526_s11 = scalar_lea.hbm %s16026_s22, 4096  ;;  %s11530_s1 = scalar_lea.hbm %s16630_s4, 8192 }
0x122e   : > { %p11527_p2 = scmp.ne.s32.totalorder %s16026_s22, %s11526_s11  ;;  %p11531_p1 = scmp.lt.u32.totalorder %s16026_s22, %s16630_s4 }
0x122f   : > { %p11532_p5 = scmp.lt.u32.totalorder %s11530_s1, %s11526_s11  ;;  %p11534_p0 = scmp.lt.u32.totalorder %s11526_s11, %s16026_s22 }
0x1230   : > { %p11528_p7 = pnand %p11527_p2, %p16631_p9 }
0x1231   : > { %p11533_p3 = por %p11532_p5, %p11531_p1 }
0x1232   : > { %p11529_p11 = pneg %p11528_p7 }
0x1233   : > { %p11535_p13 = por %p11534_p0, %p11533_p3 }
0x1235   : > { %p11536_p4 = pnand %p11535_p13, %p11529_p11 }
0x1237   : > { %11539 = shalt.err (!%p11536_p4)
}
0x1238   : > { %s11666_s5 = smov 128   ;;  %s11667_s3 = smov 8  }
0x1239   : > { %10282 = dma.vmem_to_hbm [thread:$0]  (%p16631_p9), %s16029_s16, 4096, %s16026_s22, %s8373_s27, %s11666_s5, %s11666_s5, %s11667_s3  }
0x123a PF: > { %s16632_s12 = sld [smem:[#allocation36_spill]]  ;;  %p10311_p10 = scmp.ge.s32.totalorder %s11646_s13, 2 }
0x123b   : > { %s8402_s18 = sand.u32 1, %s11618_s24  }
0x123c   : > { %s8403_s6 = scalar_lea.sflag [#allocation5], %s8402_s18 }
0x1240   : > { %p16633_p8 = scmp.ne.s32.totalorder %s16632_s12, 0 }
0x1242   : > { %p10307_p6 = pnand %p10311_p10, %p16633_p8 }
0x1244   : > { %11601 = dma.done.wait (!%p10307_p6), %s8403_s6, 4096  }
0x1245   : > { %11603 = vsyncadd (!%p10307_p6), %s8403_s6, 4294963200  ;;  %s37_s13 = sadd.s32 1, %s11646_s13   ;;  %s16634_s21 = sld [smem:[#allocation21_spill]] }
0x1246   : > { %p34_p12 = scmp.ge.s32.totalorder %s37_s13, 6   ;;  %s16635_s22 = sld [smem:[#allocation22_spill]] }
0x1247   : > { %s16636_s23 = sld [smem:[#allocation34_spill]]  ;;  %s16637_s24 = sld [smem:[#allocation23_spill]] }
0x1248   : > { %s16638_s25 = sld [smem:[#allocation24_spill]]  ;;  %s16639_s26 = sld [smem:[#allocation35_spill]] }
0x1249   : > { %s16640_s27 = sld [smem:[#allocation27_spill]]  ;;  %s16641_s28 = sld [smem:[#allocation28_spill]] }
0x124a   : > { %s16642_s29 = sld [smem:[#allocation30_spill]]  ;;  %s16643_s30 = sld [smem:[#allocation31_spill]] }
0x124b   :  { %36 = sbr.rel (!%p34_p12) target bundleno = 29 (0x1d), region = 211 }
0x1252   :  { %8408 = vsyncpa [#allocation4], 1 }
0x1253   :  { %8410 = vsyncpa [#allocation4 + $0x1], 1 }
0x1254   :  { %8411 = vsyncpa [#allocation7], 1 }
0x1255   :  { %8413 = vsyncpa [#allocation7 + $0x1], 1 }
0x1256   :  { %8414 = vsyncpa [#allocation10], 1 }
0x1257   :  { %8416 = vsyncpa [#allocation10 + $0x1], 1 }
0x1258   :  { %8417 = vsyncpa [#allocation13], 1 }
0x1259   :  { %8419 = vsyncpa [#allocation13 + $0x1], 1 }
0x125a   :  { %8420 = vsyncpa [#allocation5], 1 }
0x125b   :  { %8422 = vsyncpa [#allocation5 + $0x1], 1 }

</bundles_post_ra>
